<compile_context>
chip_gen: v6e
topology: v6e:2x2x1
jax: 0.10.0
libtpu: 0.0.40
codegen_flags: <defaults>
</compile_context>

<pallas_src>
import jax
import jax.numpy as jnp
from jax.experimental import pallas as pl
from jax.experimental.pallas import tpu as pltpu

HIDDEN = 512
N_HEADS = 8
HEAD_DIM = HIDDEN // N_HEADS
FFN = HIDDEN * 4
LN_EPS = 1e-5


def _layernorm(x, gamma, beta):
    mu = jnp.mean(x, axis=-1, keepdims=True)
    xc = x - mu
    var = jnp.mean(xc * xc, axis=-1, keepdims=True)
    inv = jax.lax.rsqrt(var + LN_EPS)
    return xc * inv * gamma + beta


def decoder_kernel(x_ref, wqkv_ref, bqkv_ref, wo_ref, bo_ref,
                   g1_ref, be1_ref, w1_ref, bf1_ref, w2_ref, bf2_ref,
                   g2_ref, be2_ref, out_ref):
    # x_ref / out_ref: (S, E) block for the current batch element.
    x = x_ref[...]                                   # (S, E) f32 (residuals)
    xb = x.astype(jnp.bfloat16)

    # ---- fused QKV in-projection (bf16 MXU, f32 accumulation) ----
    qkv = jnp.dot(xb, wqkv_ref[...],
                  preferred_element_type=jnp.float32) + bqkv_ref[...]  # (S, 3E)

    scale = 1.0 / (HEAD_DIM ** 0.5)
    # Pre-cast once to bf16; only small per-head slices stay live in the loop.
    q = (qkv[:, :HIDDEN] * scale).astype(jnp.bfloat16)
    k = qkv[:, HIDDEN:2 * HIDDEN].astype(jnp.bfloat16)
    v = qkv[:, 2 * HIDDEN:].astype(jnp.bfloat16)

    # ---- per-head attention; contexts gathered into one (S, E) slab ----
    ctx_heads = []
    for h in range(N_HEADS):
        sl = slice(h * HEAD_DIM, (h + 1) * HEAD_DIM)
        qh, kh, vh = q[:, sl], k[:, sl], v[:, sl]

        s = jax.lax.dot_general(qh, kh, (((1,), (1,)), ((), ())),
                                preferred_element_type=jnp.float32)     # (S, S) f32
        s = s - jnp.max(s, axis=-1, keepdims=True)
        p = jnp.exp(s)
        p = p * pl.reciprocal(jnp.sum(p, axis=-1, keepdims=True), approx=True)

        ctx_heads.append(jnp.dot(p.astype(jnp.bfloat16), vh,
                                 preferred_element_type=jnp.float32))   # (S, Dh)

    # Lane "concat" -> single K=512 output projection (full MXU depth).
    ctx = jnp.concatenate(ctx_heads, axis=-1).astype(jnp.bfloat16)      # (S, E)
    attn = jnp.dot(ctx, wo_ref[...],
                   preferred_element_type=jnp.float32) + bo_ref[...]
    # TODO(synk): attention / residual dropout omitted (inference -> identity)

    # ---- residual + LayerNorm 1 (f32) ----
    out1 = _layernorm(attn + x, g1_ref[...], be1_ref[...])

    # ---- feed-forward: Linear -> ReLU -> Linear (bf16 MXU, f32 acc) ----
    h1 = jnp.dot(out1.astype(jnp.bfloat16), w1_ref[...],
                 preferred_element_type=jnp.float32) + bf1_ref[...]
    h1 = jnp.maximum(h1, 0.0)
    ff = jnp.dot(h1.astype(jnp.bfloat16), w2_ref[...],
                 preferred_element_type=jnp.float32) + bf2_ref[...]

    # ---- residual + LayerNorm 2 ----
    out_ref[...] = _layernorm(ff + out1, g2_ref[...], be2_ref[...])


def prepare_params(p):
    """Cast the large projection weights to bf16 once (biases/LN stay f32)."""
    kp = dict(p)
    for name in ("w_qkv", "w_o", "w1", "w2"):
        kp[name] = p[name].astype(jnp.bfloat16)
    return kp


def decoder_forward(x_sbe, kparams):
    """x_sbe: (S, B, E) float32 (PyTorch seq-first layout). Returns (S, B, E)."""
    S, B, E = x_sbe.shape
    assert E == HIDDEN

    # Batch-major for the per-batch grid axis.
    x_bse = jnp.transpose(x_sbe, (1, 0, 2))          # (B, S, E)

    # Weights: constant block across the grid -> DMA'd once, stay resident.
    def wspec(shape):
        return pl.BlockSpec(shape, lambda b: (0, 0))

    # Advisory cost estimate (per call).
    flops = (2 * B * S * E * (3 * E)                      # qkv projection
             + B * N_HEADS * (2 * S * S * HEAD_DIM) * 2   # scores + ctx
             + 2 * B * S * E * E                          # output projection
             + 2 * 2 * B * S * E * FFN)                   # FFN
    transcendentals = B * N_HEADS * S * S + B * N_HEADS * S + 2 * B * S
    bytes_accessed = (2 * (E * 3 * E + E * E + E * FFN + FFN * E)   # bf16 weights
                      + 2 * B * S * E * 4                           # x in + out (f32)
                      + 4 * (3 * E + E + FFN + E + 4 * E))          # biases / LN

    out = pl.pallas_call(
        decoder_kernel,
        out_shape=jax.ShapeDtypeStruct((B, S, E), jnp.float32),
        grid=(B,),
        in_specs=[
            pl.BlockSpec((None, S, E), lambda b: (b, 0, 0)),        # x (per batch)
            wspec((E, 3 * E)), wspec((1, 3 * E)),                   # W_qkv (bf16), b_qkv
            wspec((E, E)), wspec((1, E)),                           # W_o (bf16), b_o
            wspec((1, E)), wspec((1, E)),                           # ln1 gamma, beta
            wspec((E, FFN)), wspec((1, FFN)),                       # W1 (bf16), b1
            wspec((FFN, E)), wspec((1, E)),                         # W2 (bf16), b2
            wspec((1, E)), wspec((1, E)),                           # ln2 gamma, beta
        ],
        out_specs=pl.BlockSpec((None, S, E), lambda b: (b, 0, 0)),
        compiler_params=pltpu.CompilerParams(
            dimension_semantics=("parallel",),       # v7x: both TCs split the batch
            vmem_limit_bytes=32 * 1024 * 1024),      # fits v7x's 64 MiB VMEM
        cost_estimate=pl.CostEstimate(flops=flops,
                                      transcendentals=transcendentals,
                                      bytes_accessed=bytes_accessed),
    )(x_bse,
      kparams["w_qkv"], kparams["b_qkv"],
      kparams["w_o"], kparams["b_o"],
      kparams["g1"], kparams["be1"],
      kparams["w1"], kparams["bf1"],
      kparams["w2"], kparams["bf2"],
      kparams["g2"], kparams["be2"])

    return jnp.transpose(out, (1, 0, 2))             # back to (S, B, E)


def decoder_reference(x_sbe, p):
    """Pure-JAX f32 reference for correctness check."""
    x = jnp.transpose(x_sbe, (1, 0, 2))
    B, S, E = x.shape
    qkv = x @ p["w_qkv"] + p["b_qkv"][0]
    q, k, v = jnp.split(qkv, 3, axis=-1)
    qh = q.reshape(B, S, N_HEADS, HEAD_DIM).transpose(0, 2, 1, 3)
    kh = k.reshape(B, S, N_HEADS, HEAD_DIM).transpose(0, 2, 1, 3)
    vh = v.reshape(B, S, N_HEADS, HEAD_DIM).transpose(0, 2, 1, 3)
    s = jnp.einsum("bhqd,bhkd->bhqk", qh, kh) / (HEAD_DIM ** 0.5)
    a = jax.nn.softmax(s, axis=-1)
    ctx = jnp.einsum("bhqk,bhkd->bhqd", a, vh).transpose(0, 2, 1, 3).reshape(B, S, E)
    attn = ctx @ p["w_o"] + p["b_o"][0]

    def ln(z, g, b):
        mu = jnp.mean(z, axis=-1, keepdims=True)
        var = jnp.mean((z - mu) ** 2, axis=-1, keepdims=True)
        return (z - mu) * jax.lax.rsqrt(var + LN_EPS) * g + b

    out1 = ln(attn + x, p["g1"][0], p["be1"][0])
    ff = jnp.maximum(out1 @ p["w1"] + p["bf1"][0], 0.0) @ p["w2"] + p["bf2"][0]
    out2 = ln(ff + out1, p["g2"][0], p["be2"][0])
    return jnp.transpose(out2, (1, 0, 2))


def init_params(key):
    ks = jax.random.split(key, 8)
    sc = 0.02
    return {
        "w_qkv": jax.random.normal(ks[0], (HIDDEN, 3 * HIDDEN), jnp.float32) * sc,
        "b_qkv": jax.random.normal(ks[1], (1, 3 * HIDDEN), jnp.float32) * sc,
        "w_o":   jax.random.normal(ks[2], (HIDDEN, HIDDEN), jnp.float32) * sc,
        "b_o":   jax.random.normal(ks[3], (1, HIDDEN), jnp.float32) * sc,
        "g1":    jnp.ones((1, HIDDEN), jnp.float32),
        "be1":   jnp.zeros((1, HIDDEN), jnp.float32),
        "w1":    jax.random.normal(ks[4], (HIDDEN, FFN), jnp.float32) * sc,
        "bf1":   jax.random.normal(ks[5], (1, FFN), jnp.float32) * sc,
        "w2":    jax.random.normal(ks[6], (FFN, HIDDEN), jnp.float32) * sc,
        "bf2":   jax.random.normal(ks[7], (1, HIDDEN), jnp.float32) * sc,
        "g2":    jnp.ones((1, HIDDEN), jnp.float32),
        "be2":   jnp.zeros((1, HIDDEN), jnp.float32),
    }


if __name__ == "__main__":
    key = jax.random.PRNGKey(0)
    k_param, k_x = jax.random.split(key)
    params = init_params(k_param)
    kparams = prepare_params(params)          # bf16 weights for the kernel

    S, B = 8, 2
    input_tokens = jax.random.normal(k_x, (S, B, HIDDEN), jnp.float32)

    out = jax.block_until_ready(decoder_forward(input_tokens, kparams))
    ref = jax.block_until_ready(decoder_reference(input_tokens, params))

    assert out.shape == (S, B, HIDDEN)
    assert jnp.all(jnp.isfinite(out))
    # bf16 matmuls with f32 accumulation vs f32 reference -> slightly relaxed tol.
    assert jnp.allclose(out, ref, atol=2e-2, rtol=2e-2)
    print("KERNEL_OK")
</pallas_src>

<mosaic_0001>
module attributes {stable_mosaic.version = 11 : i64} {
  func.func @decoder_kernel(%arg0: i32, %arg1: memref<1x8x512xf32, #tpu.memory_space<vmem>>, %arg2: memref<512x1536xbf16, #tpu.memory_space<vmem>>, %arg3: memref<1x1536xf32, #tpu.memory_space<vmem>>, %arg4: memref<512x512xbf16, #tpu.memory_space<vmem>>, %arg5: memref<1x512xf32, #tpu.memory_space<vmem>>, %arg6: memref<1x512xf32, #tpu.memory_space<vmem>>, %arg7: memref<1x512xf32, #tpu.memory_space<vmem>>, %arg8: memref<512x2048xbf16, #tpu.memory_space<vmem>>, %arg9: memref<1x2048xf32, #tpu.memory_space<vmem>>, %arg10: memref<2048x512xbf16, #tpu.memory_space<vmem>>, %arg11: memref<1x512xf32, #tpu.memory_space<vmem>>, %arg12: memref<1x512xf32, #tpu.memory_space<vmem>>, %arg13: memref<1x512xf32, #tpu.memory_space<vmem>>, %arg14: memref<1x8x512xf32, #tpu.memory_space<vmem>>) attributes {dimension_semantics = [#tpu.dimension_semantics<parallel>], iteration_bounds = array<i64: 2>, scalar_prefetch = 0 : i64, scratch_operands = 0 : i64, tpu.core_type = #tpu.core_type<tc>, window_params = [{transform_indices = @transform_0, window_bounds = array<i64: 1, 8, 512>}, {pipeline_mode = #tpu.pipeline_mode<synchronous>, transform_indices = @transform_1, window_bounds = array<i64: 512, 1536>}, {pipeline_mode = #tpu.pipeline_mode<synchronous>, transform_indices = @transform_2, window_bounds = array<i64: 1, 1536>}, {pipeline_mode = #tpu.pipeline_mode<synchronous>, transform_indices = @transform_3, window_bounds = array<i64: 512, 512>}, {pipeline_mode = #tpu.pipeline_mode<synchronous>, transform_indices = @transform_4, window_bounds = array<i64: 1, 512>}, {pipeline_mode = #tpu.pipeline_mode<synchronous>, transform_indices = @transform_5, window_bounds = array<i64: 1, 512>}, {pipeline_mode = #tpu.pipeline_mode<synchronous>, transform_indices = @transform_6, window_bounds = array<i64: 1, 512>}, {pipeline_mode = #tpu.pipeline_mode<synchronous>, transform_indices = @transform_7, window_bounds = array<i64: 512, 2048>}, {pipeline_mode = #tpu.pipeline_mode<synchronous>, transform_indices = @transform_8, window_bounds = array<i64: 1, 2048>}, {pipeline_mode = #tpu.pipeline_mode<synchronous>, transform_indices = @transform_9, window_bounds = array<i64: 2048, 512>}, {pipeline_mode = #tpu.pipeline_mode<synchronous>, transform_indices = @transform_10, window_bounds = array<i64: 1, 512>}, {pipeline_mode = #tpu.pipeline_mode<synchronous>, transform_indices = @transform_11, window_bounds = array<i64: 1, 512>}, {pipeline_mode = #tpu.pipeline_mode<synchronous>, transform_indices = @transform_12, window_bounds = array<i64: 1, 512>}, {transform_indices = @transform_13, window_bounds = array<i64: 1, 8, 512>}]} {
    %c0 = arith.constant 0 : index
    %c0_0 = arith.constant 0 : index
    %c0_1 = arith.constant 0 : index
    %0 = vector.load %arg1[%c0, %c0_0, %c0_1] : memref<1x8x512xf32, #tpu.memory_space<vmem>>, vector<1x8x512xf32>
    %1 = vector.shape_cast %0 : vector<1x8x512xf32> to vector<8x512xf32>
    %2 = arith.truncf %1 : vector<8x512xf32> to vector<8x512xbf16>
    %c0_2 = arith.constant 0 : index
    %c0_3 = arith.constant 0 : index
    %3 = vector.load %arg2[%c0_2, %c0_3] : memref<512x1536xbf16, #tpu.memory_space<vmem>>, vector<512x1536xbf16>
    %cst = arith.constant dense<0.000000e+00> : vector<8x1536xf32>
    %4 = tpu.matmul %2, %3, %cst {dimension_numbers = #tpu.dot_dimension_numbers<[1], [0], [0], [1], [0, 0, 1, 1], [], []>} : vector<8x512xbf16>, vector<512x1536xbf16>, vector<8x1536xf32> -> vector<8x1536xf32>
    %c0_4 = arith.constant 0 : index
    %c0_5 = arith.constant 0 : index
    %5 = vector.load %arg3[%c0_4, %c0_5] : memref<1x1536xf32, #tpu.memory_space<vmem>>, vector<1x1536xf32>
    %6 = vector.broadcast %5 : vector<1x1536xf32> to vector<8x1536xf32>
    %7 = arith.addf %4, %6 : vector<8x1536xf32>
    %8 = vector.extract_strided_slice %7 {offsets = [0, 0], sizes = [8, 512], strides = [1, 1]} : vector<8x1536xf32> to vector<8x512xf32>
    %cst_6 = arith.constant 1.250000e-01 : f32
    %9 = vector.broadcast %cst_6 : f32 to vector<8x512xf32>
    %10 = arith.mulf %8, %9 : vector<8x512xf32>
    %11 = arith.truncf %10 : vector<8x512xf32> to vector<8x512xbf16>
    %12 = vector.extract_strided_slice %7 {offsets = [0, 512], sizes = [8, 512], strides = [1, 1]} : vector<8x1536xf32> to vector<8x512xf32>
    %13 = arith.truncf %12 : vector<8x512xf32> to vector<8x512xbf16>
    %14 = vector.extract_strided_slice %7 {offsets = [0, 1024], sizes = [8, 512], strides = [1, 1]} : vector<8x1536xf32> to vector<8x512xf32>
    %15 = arith.truncf %14 : vector<8x512xf32> to vector<8x512xbf16>
    %16 = vector.extract_strided_slice %11 {offsets = [0, 0], sizes = [8, 64], strides = [1, 1]} : vector<8x512xbf16> to vector<8x64xbf16>
    %17 = vector.extract_strided_slice %13 {offsets = [0, 0], sizes = [8, 64], strides = [1, 1]} : vector<8x512xbf16> to vector<8x64xbf16>
    %18 = vector.extract_strided_slice %15 {offsets = [0, 0], sizes = [8, 64], strides = [1, 1]} : vector<8x512xbf16> to vector<8x64xbf16>
    %cst_7 = arith.constant dense<0.000000e+00> : vector<8x8xf32>
    %19 = tpu.matmul %16, %17, %cst_7 {dimension_numbers = #tpu.dot_dimension_numbers<[1], [1], [0], [0], [0, 0, 1, 0], [], []>} : vector<8x64xbf16>, vector<8x64xbf16>, vector<8x8xf32> -> vector<8x8xf32>
    %cst_8 = arith.constant dense<0xFF800000> : vector<8xf32>
    %20 = vector.multi_reduction <maximumf>, %19, %cst_8 [1] : vector<8x8xf32> to vector<8xf32>
    %21 = vector.shape_cast %20 : vector<8xf32> to vector<8x1xf32>
    %22 = vector.broadcast %21 : vector<8x1xf32> to vector<8x8xf32>
    %23 = arith.subf %19, %22 : vector<8x8xf32>
    %24 = math.exp %23 : vector<8x8xf32>
    %cst_9 = arith.constant dense<0.000000e+00> : vector<8xf32>
    %25 = vector.multi_reduction <add>, %24, %cst_9 [1] : vector<8x8xf32> to vector<8xf32>
    %26 = vector.shape_cast %25 : vector<8xf32> to vector<8x1xf32>
    %27 = tpu.reciprocal %26 {approx = true} : vector<8x1xf32> -> vector<8x1xf32>
    %28 = vector.broadcast %27 : vector<8x1xf32> to vector<8x8xf32>
    %29 = arith.mulf %24, %28 : vector<8x8xf32>
    %30 = arith.truncf %29 : vector<8x8xf32> to vector<8x8xbf16>
    %cst_10 = arith.constant dense<0.000000e+00> : vector<8x64xf32>
    %31 = tpu.matmul %30, %18, %cst_10 {dimension_numbers = #tpu.dot_dimension_numbers<[1], [0], [0], [1], [0, 0, 1, 1], [], []>} : vector<8x8xbf16>, vector<8x64xbf16>, vector<8x64xf32> -> vector<8x64xf32>
    %32 = vector.extract_strided_slice %11 {offsets = [0, 64], sizes = [8, 64], strides = [1, 1]} : vector<8x512xbf16> to vector<8x64xbf16>
    %33 = vector.extract_strided_slice %13 {offsets = [0, 64], sizes = [8, 64], strides = [1, 1]} : vector<8x512xbf16> to vector<8x64xbf16>
    %34 = vector.extract_strided_slice %15 {offsets = [0, 64], sizes = [8, 64], strides = [1, 1]} : vector<8x512xbf16> to vector<8x64xbf16>
    %cst_11 = arith.constant dense<0.000000e+00> : vector<8x8xf32>
    %35 = tpu.matmul %32, %33, %cst_11 {dimension_numbers = #tpu.dot_dimension_numbers<[1], [1], [0], [0], [0, 0, 1, 0], [], []>} : vector<8x64xbf16>, vector<8x64xbf16>, vector<8x8xf32> -> vector<8x8xf32>
    %cst_12 = arith.constant dense<0xFF800000> : vector<8xf32>
    %36 = vector.multi_reduction <maximumf>, %35, %cst_12 [1] : vector<8x8xf32> to vector<8xf32>
    %37 = vector.shape_cast %36 : vector<8xf32> to vector<8x1xf32>
    %38 = vector.broadcast %37 : vector<8x1xf32> to vector<8x8xf32>
    %39 = arith.subf %35, %38 : vector<8x8xf32>
    %40 = math.exp %39 : vector<8x8xf32>
    %cst_13 = arith.constant dense<0.000000e+00> : vector<8xf32>
    %41 = vector.multi_reduction <add>, %40, %cst_13 [1] : vector<8x8xf32> to vector<8xf32>
    %42 = vector.shape_cast %41 : vector<8xf32> to vector<8x1xf32>
    %43 = tpu.reciprocal %42 {approx = true} : vector<8x1xf32> -> vector<8x1xf32>
    %44 = vector.broadcast %43 : vector<8x1xf32> to vector<8x8xf32>
    %45 = arith.mulf %40, %44 : vector<8x8xf32>
    %46 = arith.truncf %45 : vector<8x8xf32> to vector<8x8xbf16>
    %cst_14 = arith.constant dense<0.000000e+00> : vector<8x64xf32>
    %47 = tpu.matmul %46, %34, %cst_14 {dimension_numbers = #tpu.dot_dimension_numbers<[1], [0], [0], [1], [0, 0, 1, 1], [], []>} : vector<8x8xbf16>, vector<8x64xbf16>, vector<8x64xf32> -> vector<8x64xf32>
    %48 = vector.extract_strided_slice %11 {offsets = [0, 128], sizes = [8, 64], strides = [1, 1]} : vector<8x512xbf16> to vector<8x64xbf16>
    %49 = vector.extract_strided_slice %13 {offsets = [0, 128], sizes = [8, 64], strides = [1, 1]} : vector<8x512xbf16> to vector<8x64xbf16>
    %50 = vector.extract_strided_slice %15 {offsets = [0, 128], sizes = [8, 64], strides = [1, 1]} : vector<8x512xbf16> to vector<8x64xbf16>
    %cst_15 = arith.constant dense<0.000000e+00> : vector<8x8xf32>
    %51 = tpu.matmul %48, %49, %cst_15 {dimension_numbers = #tpu.dot_dimension_numbers<[1], [1], [0], [0], [0, 0, 1, 0], [], []>} : vector<8x64xbf16>, vector<8x64xbf16>, vector<8x8xf32> -> vector<8x8xf32>
    %cst_16 = arith.constant dense<0xFF800000> : vector<8xf32>
    %52 = vector.multi_reduction <maximumf>, %51, %cst_16 [1] : vector<8x8xf32> to vector<8xf32>
    %53 = vector.shape_cast %52 : vector<8xf32> to vector<8x1xf32>
    %54 = vector.broadcast %53 : vector<8x1xf32> to vector<8x8xf32>
    %55 = arith.subf %51, %54 : vector<8x8xf32>
    %56 = math.exp %55 : vector<8x8xf32>
    %cst_17 = arith.constant dense<0.000000e+00> : vector<8xf32>
    %57 = vector.multi_reduction <add>, %56, %cst_17 [1] : vector<8x8xf32> to vector<8xf32>
    %58 = vector.shape_cast %57 : vector<8xf32> to vector<8x1xf32>
    %59 = tpu.reciprocal %58 {approx = true} : vector<8x1xf32> -> vector<8x1xf32>
    %60 = vector.broadcast %59 : vector<8x1xf32> to vector<8x8xf32>
    %61 = arith.mulf %56, %60 : vector<8x8xf32>
    %62 = arith.truncf %61 : vector<8x8xf32> to vector<8x8xbf16>
    %cst_18 = arith.constant dense<0.000000e+00> : vector<8x64xf32>
    %63 = tpu.matmul %62, %50, %cst_18 {dimension_numbers = #tpu.dot_dimension_numbers<[1], [0], [0], [1], [0, 0, 1, 1], [], []>} : vector<8x8xbf16>, vector<8x64xbf16>, vector<8x64xf32> -> vector<8x64xf32>
    %64 = vector.extract_strided_slice %11 {offsets = [0, 192], sizes = [8, 64], strides = [1, 1]} : vector<8x512xbf16> to vector<8x64xbf16>
    %65 = vector.extract_strided_slice %13 {offsets = [0, 192], sizes = [8, 64], strides = [1, 1]} : vector<8x512xbf16> to vector<8x64xbf16>
    %66 = vector.extract_strided_slice %15 {offsets = [0, 192], sizes = [8, 64], strides = [1, 1]} : vector<8x512xbf16> to vector<8x64xbf16>
    %cst_19 = arith.constant dense<0.000000e+00> : vector<8x8xf32>
    %67 = tpu.matmul %64, %65, %cst_19 {dimension_numbers = #tpu.dot_dimension_numbers<[1], [1], [0], [0], [0, 0, 1, 0], [], []>} : vector<8x64xbf16>, vector<8x64xbf16>, vector<8x8xf32> -> vector<8x8xf32>
    %cst_20 = arith.constant dense<0xFF800000> : vector<8xf32>
    %68 = vector.multi_reduction <maximumf>, %67, %cst_20 [1] : vector<8x8xf32> to vector<8xf32>
    %69 = vector.shape_cast %68 : vector<8xf32> to vector<8x1xf32>
    %70 = vector.broadcast %69 : vector<8x1xf32> to vector<8x8xf32>
    %71 = arith.subf %67, %70 : vector<8x8xf32>
    %72 = math.exp %71 : vector<8x8xf32>
    %cst_21 = arith.constant dense<0.000000e+00> : vector<8xf32>
    %73 = vector.multi_reduction <add>, %72, %cst_21 [1] : vector<8x8xf32> to vector<8xf32>
    %74 = vector.shape_cast %73 : vector<8xf32> to vector<8x1xf32>
    %75 = tpu.reciprocal %74 {approx = true} : vector<8x1xf32> -> vector<8x1xf32>
    %76 = vector.broadcast %75 : vector<8x1xf32> to vector<8x8xf32>
    %77 = arith.mulf %72, %76 : vector<8x8xf32>
    %78 = arith.truncf %77 : vector<8x8xf32> to vector<8x8xbf16>
    %cst_22 = arith.constant dense<0.000000e+00> : vector<8x64xf32>
    %79 = tpu.matmul %78, %66, %cst_22 {dimension_numbers = #tpu.dot_dimension_numbers<[1], [0], [0], [1], [0, 0, 1, 1], [], []>} : vector<8x8xbf16>, vector<8x64xbf16>, vector<8x64xf32> -> vector<8x64xf32>
    %80 = vector.extract_strided_slice %11 {offsets = [0, 256], sizes = [8, 64], strides = [1, 1]} : vector<8x512xbf16> to vector<8x64xbf16>
    %81 = vector.extract_strided_slice %13 {offsets = [0, 256], sizes = [8, 64], strides = [1, 1]} : vector<8x512xbf16> to vector<8x64xbf16>
    %82 = vector.extract_strided_slice %15 {offsets = [0, 256], sizes = [8, 64], strides = [1, 1]} : vector<8x512xbf16> to vector<8x64xbf16>
    %cst_23 = arith.constant dense<0.000000e+00> : vector<8x8xf32>
    %83 = tpu.matmul %80, %81, %cst_23 {dimension_numbers = #tpu.dot_dimension_numbers<[1], [1], [0], [0], [0, 0, 1, 0], [], []>} : vector<8x64xbf16>, vector<8x64xbf16>, vector<8x8xf32> -> vector<8x8xf32>
    %cst_24 = arith.constant dense<0xFF800000> : vector<8xf32>
    %84 = vector.multi_reduction <maximumf>, %83, %cst_24 [1] : vector<8x8xf32> to vector<8xf32>
    %85 = vector.shape_cast %84 : vector<8xf32> to vector<8x1xf32>
    %86 = vector.broadcast %85 : vector<8x1xf32> to vector<8x8xf32>
    %87 = arith.subf %83, %86 : vector<8x8xf32>
    %88 = math.exp %87 : vector<8x8xf32>
    %cst_25 = arith.constant dense<0.000000e+00> : vector<8xf32>
    %89 = vector.multi_reduction <add>, %88, %cst_25 [1] : vector<8x8xf32> to vector<8xf32>
    %90 = vector.shape_cast %89 : vector<8xf32> to vector<8x1xf32>
    %91 = tpu.reciprocal %90 {approx = true} : vector<8x1xf32> -> vector<8x1xf32>
    %92 = vector.broadcast %91 : vector<8x1xf32> to vector<8x8xf32>
    %93 = arith.mulf %88, %92 : vector<8x8xf32>
    %94 = arith.truncf %93 : vector<8x8xf32> to vector<8x8xbf16>
    %cst_26 = arith.constant dense<0.000000e+00> : vector<8x64xf32>
    %95 = tpu.matmul %94, %82, %cst_26 {dimension_numbers = #tpu.dot_dimension_numbers<[1], [0], [0], [1], [0, 0, 1, 1], [], []>} : vector<8x8xbf16>, vector<8x64xbf16>, vector<8x64xf32> -> vector<8x64xf32>
    %96 = vector.extract_strided_slice %11 {offsets = [0, 320], sizes = [8, 64], strides = [1, 1]} : vector<8x512xbf16> to vector<8x64xbf16>
    %97 = vector.extract_strided_slice %13 {offsets = [0, 320], sizes = [8, 64], strides = [1, 1]} : vector<8x512xbf16> to vector<8x64xbf16>
    %98 = vector.extract_strided_slice %15 {offsets = [0, 320], sizes = [8, 64], strides = [1, 1]} : vector<8x512xbf16> to vector<8x64xbf16>
    %cst_27 = arith.constant dense<0.000000e+00> : vector<8x8xf32>
    %99 = tpu.matmul %96, %97, %cst_27 {dimension_numbers = #tpu.dot_dimension_numbers<[1], [1], [0], [0], [0, 0, 1, 0], [], []>} : vector<8x64xbf16>, vector<8x64xbf16>, vector<8x8xf32> -> vector<8x8xf32>
    %cst_28 = arith.constant dense<0xFF800000> : vector<8xf32>
    %100 = vector.multi_reduction <maximumf>, %99, %cst_28 [1] : vector<8x8xf32> to vector<8xf32>
    %101 = vector.shape_cast %100 : vector<8xf32> to vector<8x1xf32>
    %102 = vector.broadcast %101 : vector<8x1xf32> to vector<8x8xf32>
    %103 = arith.subf %99, %102 : vector<8x8xf32>
    %104 = math.exp %103 : vector<8x8xf32>
    %cst_29 = arith.constant dense<0.000000e+00> : vector<8xf32>
    %105 = vector.multi_reduction <add>, %104, %cst_29 [1] : vector<8x8xf32> to vector<8xf32>
    %106 = vector.shape_cast %105 : vector<8xf32> to vector<8x1xf32>
    %107 = tpu.reciprocal %106 {approx = true} : vector<8x1xf32> -> vector<8x1xf32>
    %108 = vector.broadcast %107 : vector<8x1xf32> to vector<8x8xf32>
    %109 = arith.mulf %104, %108 : vector<8x8xf32>
    %110 = arith.truncf %109 : vector<8x8xf32> to vector<8x8xbf16>
    %cst_30 = arith.constant dense<0.000000e+00> : vector<8x64xf32>
    %111 = tpu.matmul %110, %98, %cst_30 {dimension_numbers = #tpu.dot_dimension_numbers<[1], [0], [0], [1], [0, 0, 1, 1], [], []>} : vector<8x8xbf16>, vector<8x64xbf16>, vector<8x64xf32> -> vector<8x64xf32>
    %112 = vector.extract_strided_slice %11 {offsets = [0, 384], sizes = [8, 64], strides = [1, 1]} : vector<8x512xbf16> to vector<8x64xbf16>
    %113 = vector.extract_strided_slice %13 {offsets = [0, 384], sizes = [8, 64], strides = [1, 1]} : vector<8x512xbf16> to vector<8x64xbf16>
    %114 = vector.extract_strided_slice %15 {offsets = [0, 384], sizes = [8, 64], strides = [1, 1]} : vector<8x512xbf16> to vector<8x64xbf16>
    %cst_31 = arith.constant dense<0.000000e+00> : vector<8x8xf32>
    %115 = tpu.matmul %112, %113, %cst_31 {dimension_numbers = #tpu.dot_dimension_numbers<[1], [1], [0], [0], [0, 0, 1, 0], [], []>} : vector<8x64xbf16>, vector<8x64xbf16>, vector<8x8xf32> -> vector<8x8xf32>
    %cst_32 = arith.constant dense<0xFF800000> : vector<8xf32>
    %116 = vector.multi_reduction <maximumf>, %115, %cst_32 [1] : vector<8x8xf32> to vector<8xf32>
    %117 = vector.shape_cast %116 : vector<8xf32> to vector<8x1xf32>
    %118 = vector.broadcast %117 : vector<8x1xf32> to vector<8x8xf32>
    %119 = arith.subf %115, %118 : vector<8x8xf32>
    %120 = math.exp %119 : vector<8x8xf32>
    %cst_33 = arith.constant dense<0.000000e+00> : vector<8xf32>
    %121 = vector.multi_reduction <add>, %120, %cst_33 [1] : vector<8x8xf32> to vector<8xf32>
    %122 = vector.shape_cast %121 : vector<8xf32> to vector<8x1xf32>
    %123 = tpu.reciprocal %122 {approx = true} : vector<8x1xf32> -> vector<8x1xf32>
    %124 = vector.broadcast %123 : vector<8x1xf32> to vector<8x8xf32>
    %125 = arith.mulf %120, %124 : vector<8x8xf32>
    %126 = arith.truncf %125 : vector<8x8xf32> to vector<8x8xbf16>
    %cst_34 = arith.constant dense<0.000000e+00> : vector<8x64xf32>
    %127 = tpu.matmul %126, %114, %cst_34 {dimension_numbers = #tpu.dot_dimension_numbers<[1], [0], [0], [1], [0, 0, 1, 1], [], []>} : vector<8x8xbf16>, vector<8x64xbf16>, vector<8x64xf32> -> vector<8x64xf32>
    %128 = vector.extract_strided_slice %11 {offsets = [0, 448], sizes = [8, 64], strides = [1, 1]} : vector<8x512xbf16> to vector<8x64xbf16>
    %129 = vector.extract_strided_slice %13 {offsets = [0, 448], sizes = [8, 64], strides = [1, 1]} : vector<8x512xbf16> to vector<8x64xbf16>
    %130 = vector.extract_strided_slice %15 {offsets = [0, 448], sizes = [8, 64], strides = [1, 1]} : vector<8x512xbf16> to vector<8x64xbf16>
    %cst_35 = arith.constant dense<0.000000e+00> : vector<8x8xf32>
    %131 = tpu.matmul %128, %129, %cst_35 {dimension_numbers = #tpu.dot_dimension_numbers<[1], [1], [0], [0], [0, 0, 1, 0], [], []>} : vector<8x64xbf16>, vector<8x64xbf16>, vector<8x8xf32> -> vector<8x8xf32>
    %cst_36 = arith.constant dense<0xFF800000> : vector<8xf32>
    %132 = vector.multi_reduction <maximumf>, %131, %cst_36 [1] : vector<8x8xf32> to vector<8xf32>
    %133 = vector.shape_cast %132 : vector<8xf32> to vector<8x1xf32>
    %134 = vector.broadcast %133 : vector<8x1xf32> to vector<8x8xf32>
    %135 = arith.subf %131, %134 : vector<8x8xf32>
    %136 = math.exp %135 : vector<8x8xf32>
    %cst_37 = arith.constant dense<0.000000e+00> : vector<8xf32>
    %137 = vector.multi_reduction <add>, %136, %cst_37 [1] : vector<8x8xf32> to vector<8xf32>
    %138 = vector.shape_cast %137 : vector<8xf32> to vector<8x1xf32>
    %139 = tpu.reciprocal %138 {approx = true} : vector<8x1xf32> -> vector<8x1xf32>
    %140 = vector.broadcast %139 : vector<8x1xf32> to vector<8x8xf32>
    %141 = arith.mulf %136, %140 : vector<8x8xf32>
    %142 = arith.truncf %141 : vector<8x8xf32> to vector<8x8xbf16>
    %cst_38 = arith.constant dense<0.000000e+00> : vector<8x64xf32>
    %143 = tpu.matmul %142, %130, %cst_38 {dimension_numbers = #tpu.dot_dimension_numbers<[1], [0], [0], [1], [0, 0, 1, 1], [], []>} : vector<8x8xbf16>, vector<8x64xbf16>, vector<8x64xf32> -> vector<8x64xf32>
    %144 = tpu.concatenate %31, %47, %63, %79, %95, %111, %127, %143 in 1 : vector<8x64xf32>, vector<8x64xf32>, vector<8x64xf32>, vector<8x64xf32>, vector<8x64xf32>, vector<8x64xf32>, vector<8x64xf32>, vector<8x64xf32> -> vector<8x512xf32>
    %145 = arith.truncf %144 : vector<8x512xf32> to vector<8x512xbf16>
    %c0_39 = arith.constant 0 : index
    %c0_40 = arith.constant 0 : index
    %146 = vector.load %arg4[%c0_39, %c0_40] : memref<512x512xbf16, #tpu.memory_space<vmem>>, vector<512x512xbf16>
    %cst_41 = arith.constant dense<0.000000e+00> : vector<8x512xf32>
    %147 = tpu.matmul %145, %146, %cst_41 {dimension_numbers = #tpu.dot_dimension_numbers<[1], [0], [0], [1], [0, 0, 1, 1], [], []>} : vector<8x512xbf16>, vector<512x512xbf16>, vector<8x512xf32> -> vector<8x512xf32>
    %c0_42 = arith.constant 0 : index
    %c0_43 = arith.constant 0 : index
    %148 = vector.load %arg5[%c0_42, %c0_43] : memref<1x512xf32, #tpu.memory_space<vmem>>, vector<1x512xf32>
    %149 = vector.broadcast %148 : vector<1x512xf32> to vector<8x512xf32>
    %150 = arith.addf %147, %149 : vector<8x512xf32>
    %151 = arith.addf %150, %1 : vector<8x512xf32>
    %c0_44 = arith.constant 0 : index
    %c0_45 = arith.constant 0 : index
    %152 = vector.load %arg6[%c0_44, %c0_45] : memref<1x512xf32, #tpu.memory_space<vmem>>, vector<1x512xf32>
    %c0_46 = arith.constant 0 : index
    %c0_47 = arith.constant 0 : index
    %153 = vector.load %arg7[%c0_46, %c0_47] : memref<1x512xf32, #tpu.memory_space<vmem>>, vector<1x512xf32>
    %cst_48 = arith.constant dense<0.000000e+00> : vector<8xf32>
    %154 = vector.multi_reduction <add>, %151, %cst_48 [1] : vector<8x512xf32> to vector<8xf32>
    %155 = vector.shape_cast %154 : vector<8xf32> to vector<8x1xf32>
    %cst_49 = arith.constant 5.120000e+02 : f32
    %156 = vector.broadcast %cst_49 : f32 to vector<8x1xf32>
    %157 = arith.divf %155, %156 : vector<8x1xf32>
    %158 = vector.broadcast %157 : vector<8x1xf32> to vector<8x512xf32>
    %159 = arith.subf %151, %158 : vector<8x512xf32>
    %160 = arith.mulf %159, %159 : vector<8x512xf32>
    %cst_50 = arith.constant dense<0.000000e+00> : vector<8xf32>
    %161 = vector.multi_reduction <add>, %160, %cst_50 [1] : vector<8x512xf32> to vector<8xf32>
    %162 = vector.shape_cast %161 : vector<8xf32> to vector<8x1xf32>
    %cst_51 = arith.constant 5.120000e+02 : f32
    %163 = vector.broadcast %cst_51 : f32 to vector<8x1xf32>
    %164 = arith.divf %162, %163 : vector<8x1xf32>
    %cst_52 = arith.constant 9.99999974E-6 : f32
    %165 = vector.broadcast %cst_52 : f32 to vector<8x1xf32>
    %166 = arith.addf %164, %165 : vector<8x1xf32>
    %167 = math.rsqrt %166 : vector<8x1xf32>
    %168 = vector.broadcast %167 : vector<8x1xf32> to vector<8x512xf32>
    %169 = arith.mulf %159, %168 : vector<8x512xf32>
    %170 = vector.broadcast %152 : vector<1x512xf32> to vector<8x512xf32>
    %171 = arith.mulf %169, %170 : vector<8x512xf32>
    %172 = vector.broadcast %153 : vector<1x512xf32> to vector<8x512xf32>
    %173 = arith.addf %171, %172 : vector<8x512xf32>
    %174 = arith.truncf %173 : vector<8x512xf32> to vector<8x512xbf16>
    %c0_53 = arith.constant 0 : index
    %c0_54 = arith.constant 0 : index
    %175 = vector.load %arg8[%c0_53, %c0_54] : memref<512x2048xbf16, #tpu.memory_space<vmem>>, vector<512x2048xbf16>
    %cst_55 = arith.constant dense<0.000000e+00> : vector<8x2048xf32>
    %176 = tpu.matmul %174, %175, %cst_55 {dimension_numbers = #tpu.dot_dimension_numbers<[1], [0], [0], [1], [0, 0, 1, 1], [], []>} : vector<8x512xbf16>, vector<512x2048xbf16>, vector<8x2048xf32> -> vector<8x2048xf32>
    %c0_56 = arith.constant 0 : index
    %c0_57 = arith.constant 0 : index
    %177 = vector.load %arg9[%c0_56, %c0_57] : memref<1x2048xf32, #tpu.memory_space<vmem>>, vector<1x2048xf32>
    %178 = vector.broadcast %177 : vector<1x2048xf32> to vector<8x2048xf32>
    %179 = arith.addf %176, %178 : vector<8x2048xf32>
    %cst_58 = arith.constant 0.000000e+00 : f32
    %180 = vector.broadcast %cst_58 : f32 to vector<8x2048xf32>
    %181 = arith.maximumf %179, %180 : vector<8x2048xf32>
    %182 = arith.truncf %181 : vector<8x2048xf32> to vector<8x2048xbf16>
    %c0_59 = arith.constant 0 : index
    %c0_60 = arith.constant 0 : index
    %183 = vector.load %arg10[%c0_59, %c0_60] : memref<2048x512xbf16, #tpu.memory_space<vmem>>, vector<2048x512xbf16>
    %cst_61 = arith.constant dense<0.000000e+00> : vector<8x512xf32>
    %184 = tpu.matmul %182, %183, %cst_61 {dimension_numbers = #tpu.dot_dimension_numbers<[1], [0], [0], [1], [0, 0, 1, 1], [], []>} : vector<8x2048xbf16>, vector<2048x512xbf16>, vector<8x512xf32> -> vector<8x512xf32>
    %c0_62 = arith.constant 0 : index
    %c0_63 = arith.constant 0 : index
    %185 = vector.load %arg11[%c0_62, %c0_63] : memref<1x512xf32, #tpu.memory_space<vmem>>, vector<1x512xf32>
    %186 = vector.broadcast %185 : vector<1x512xf32> to vector<8x512xf32>
    %187 = arith.addf %184, %186 : vector<8x512xf32>
    %188 = arith.addf %187, %173 : vector<8x512xf32>
    %c0_64 = arith.constant 0 : index
    %c0_65 = arith.constant 0 : index
    %189 = vector.load %arg12[%c0_64, %c0_65] : memref<1x512xf32, #tpu.memory_space<vmem>>, vector<1x512xf32>
    %c0_66 = arith.constant 0 : index
    %c0_67 = arith.constant 0 : index
    %190 = vector.load %arg13[%c0_66, %c0_67] : memref<1x512xf32, #tpu.memory_space<vmem>>, vector<1x512xf32>
    %cst_68 = arith.constant dense<0.000000e+00> : vector<8xf32>
    %191 = vector.multi_reduction <add>, %188, %cst_68 [1] : vector<8x512xf32> to vector<8xf32>
    %192 = vector.shape_cast %191 : vector<8xf32> to vector<8x1xf32>
    %cst_69 = arith.constant 5.120000e+02 : f32
    %193 = vector.broadcast %cst_69 : f32 to vector<8x1xf32>
    %194 = arith.divf %192, %193 : vector<8x1xf32>
    %195 = vector.broadcast %194 : vector<8x1xf32> to vector<8x512xf32>
    %196 = arith.subf %188, %195 : vector<8x512xf32>
    %197 = arith.mulf %196, %196 : vector<8x512xf32>
    %cst_70 = arith.constant dense<0.000000e+00> : vector<8xf32>
    %198 = vector.multi_reduction <add>, %197, %cst_70 [1] : vector<8x512xf32> to vector<8xf32>
    %199 = vector.shape_cast %198 : vector<8xf32> to vector<8x1xf32>
    %cst_71 = arith.constant 5.120000e+02 : f32
    %200 = vector.broadcast %cst_71 : f32 to vector<8x1xf32>
    %201 = arith.divf %199, %200 : vector<8x1xf32>
    %cst_72 = arith.constant 9.99999974E-6 : f32
    %202 = vector.broadcast %cst_72 : f32 to vector<8x1xf32>
    %203 = arith.addf %201, %202 : vector<8x1xf32>
    %204 = math.rsqrt %203 : vector<8x1xf32>
    %205 = vector.broadcast %204 : vector<8x1xf32> to vector<8x512xf32>
    %206 = arith.mulf %196, %205 : vector<8x512xf32>
    %207 = vector.broadcast %189 : vector<1x512xf32> to vector<8x512xf32>
    %208 = arith.mulf %206, %207 : vector<8x512xf32>
    %209 = vector.broadcast %190 : vector<1x512xf32> to vector<8x512xf32>
    %210 = arith.addf %208, %209 : vector<8x512xf32>
    %c0_73 = arith.constant 0 : index
    %c0_74 = arith.constant 0 : index
    %c0_75 = arith.constant 0 : index
    %211 = vector.load %arg14[%c0_73, %c0_74, %c0_75] : memref<1x8x512xf32, #tpu.memory_space<vmem>>, vector<1x8x512xf32>
    %212 = vector.shape_cast %211 : vector<1x8x512xf32> to vector<8x512xf32>
    %213 = vector.shape_cast %210 : vector<8x512xf32> to vector<1x8x512xf32>
    tpu.vector_store %arg14[%c0_73, %c0_74, %c0_75], %213 {strides = array<i32>} : memref<1x8x512xf32, #tpu.memory_space<vmem>>, vector<1x8x512xf32>,
    return
  }
  func.func @transform_0(%arg0: i32) -> (i32, i32, i32) {
    %c0_i32 = arith.constant 0 : i32
    %c0_i32_0 = arith.constant 0 : i32
    %c0_i32_1 = arith.constant 0 : i32
    return %arg0, %c0_i32, %c0_i32_0 : i32, i32, i32
  }
  func.func @transform_1(%arg0: i32) -> (i32, i32) {
    %c0_i32 = arith.constant 0 : i32
    %c0_i32_0 = arith.constant 0 : i32
    %c0_i32_1 = arith.constant 0 : i32
    return %c0_i32, %c0_i32_0 : i32, i32
  }
  func.func @transform_2(%arg0: i32) -> (i32, i32) {
    %c0_i32 = arith.constant 0 : i32
    %c0_i32_0 = arith.constant 0 : i32
    %c0_i32_1 = arith.constant 0 : i32
    return %c0_i32, %c0_i32_0 : i32, i32
  }
  func.func @transform_3(%arg0: i32) -> (i32, i32) {
    %c0_i32 = arith.constant 0 : i32
    %c0_i32_0 = arith.constant 0 : i32
    %c0_i32_1 = arith.constant 0 : i32
    return %c0_i32, %c0_i32_0 : i32, i32
  }
  func.func @transform_4(%arg0: i32) -> (i32, i32) {
    %c0_i32 = arith.constant 0 : i32
    %c0_i32_0 = arith.constant 0 : i32
    %c0_i32_1 = arith.constant 0 : i32
    return %c0_i32, %c0_i32_0 : i32, i32
  }
  func.func @transform_5(%arg0: i32) -> (i32, i32) {
    %c0_i32 = arith.constant 0 : i32
    %c0_i32_0 = arith.constant 0 : i32
    %c0_i32_1 = arith.constant 0 : i32
    return %c0_i32, %c0_i32_0 : i32, i32
  }
  func.func @transform_6(%arg0: i32) -> (i32, i32) {
    %c0_i32 = arith.constant 0 : i32
    %c0_i32_0 = arith.constant 0 : i32
    %c0_i32_1 = arith.constant 0 : i32
    return %c0_i32, %c0_i32_0 : i32, i32
  }
  func.func @transform_7(%arg0: i32) -> (i32, i32) {
    %c0_i32 = arith.constant 0 : i32
    %c0_i32_0 = arith.constant 0 : i32
    %c0_i32_1 = arith.constant 0 : i32
    return %c0_i32, %c0_i32_0 : i32, i32
  }
  func.func @transform_8(%arg0: i32) -> (i32, i32) {
    %c0_i32 = arith.constant 0 : i32
    %c0_i32_0 = arith.constant 0 : i32
    %c0_i32_1 = arith.constant 0 : i32
    return %c0_i32, %c0_i32_0 : i32, i32
  }
  func.func @transform_9(%arg0: i32) -> (i32, i32) {
    %c0_i32 = arith.constant 0 : i32
    %c0_i32_0 = arith.constant 0 : i32
    %c0_i32_1 = arith.constant 0 : i32
    return %c0_i32, %c0_i32_0 : i32, i32
  }
  func.func @transform_10(%arg0: i32) -> (i32, i32) {
    %c0_i32 = arith.constant 0 : i32
    %c0_i32_0 = arith.constant 0 : i32
    %c0_i32_1 = arith.constant 0 : i32
    return %c0_i32, %c0_i32_0 : i32, i32
  }
  func.func @transform_11(%arg0: i32) -> (i32, i32) {
    %c0_i32 = arith.constant 0 : i32
    %c0_i32_0 = arith.constant 0 : i32
    %c0_i32_1 = arith.constant 0 : i32
    return %c0_i32, %c0_i32_0 : i32, i32
  }
  func.func @transform_12(%arg0: i32) -> (i32, i32) {
    %c0_i32 = arith.constant 0 : i32
    %c0_i32_0 = arith.constant 0 : i32
    %c0_i32_1 = arith.constant 0 : i32
    return %c0_i32, %c0_i32_0 : i32, i32
  }
  func.func @transform_13(%arg0: i32) -> (i32, i32, i32) {
    %c0_i32 = arith.constant 0 : i32
    %c0_i32_0 = arith.constant 0 : i32
    %c0_i32_1 = arith.constant 0 : i32
    return %arg0, %c0_i32, %c0_i32_0 : i32, i32, i32
  }
}

</mosaic_0001>

<bundles_post_ra>
// kernel: tpu_custom_call.1
= control target key start
LH: loop header
LB: loop body
LE: loop exit
PB: predicated region body
PF: predicated region fallthrough
CT: control target
= control target key end

     0   :  { %s18200_s0 = inlined_call_operand.hbm [shape: f32[2,8,512], index: 0, kind: input, shape index: {}]   ;;  %s18201_s1 = inlined_call_operand.hbm [shape: bf16[512,1536], index: 1, kind: input, shape index: {}]   ;;  %s18202_s2 = inlined_call_operand.hbm [shape: f32[1,1536], index: 2, kind: input, shape index: {}]   ;;  %s18203_s3 = inlined_call_operand.hbm [shape: bf16[512,512], index: 3, kind: input, shape index: {}]   ;;  %s18204_s4 = inlined_call_operand.hbm [shape: f32[1,512], index: 4, kind: input, shape index: {}]   ;;  %s18205_s5 = inlined_call_operand.hbm [shape: f32[1,512], index: 5, kind: input, shape index: {}]   ;;  %s18206_s6 = inlined_call_operand.hbm [shape: f32[1,512], index: 6, kind: input, shape index: {}]   ;;  %s18207_s7 = inlined_call_operand.hbm [shape: bf16[512,2048], index: 7, kind: input, shape index: {}]   ;;  %s18208_s8 = inlined_call_operand.hbm [shape: f32[1,2048], index: 8, kind: input, shape index: {}]   ;;  %s18209_s9 = inlined_call_operand.hbm [shape: bf16[2048,512], index: 9, kind: input, shape index: {}]   ;;  %s18210_s10 = inlined_call_operand.hbm [shape: f32[1,512], index: 10, kind: input, shape index: {}]   ;;  %s18211_s11 = inlined_call_operand.hbm [shape: f32[1,512], index: 11, kind: input, shape index: {}]   ;;  %s18212_s12 = inlined_call_operand.hbm [shape: f32[1,512], index: 12, kind: input, shape index: {}]   ;;  %s18213_s13 = inlined_call_operand.hbm [shape: f32[2,8,512], index: 13, kind: output, shape index: {}]  }
   0x1   :  { %18221 = sst [smem:[#allocation32_spill]] %s18201_s1 }
   0x2   :  { %18222 = sst [smem:[#allocation33_spill]] %s18202_s2 }
   0x3   :  { %18223 = sst [smem:[#allocation34_spill]] %s18203_s3 }
   0x4   :  { %18224 = sst [smem:[#allocation35_spill]] %s18204_s4 }
   0x5   :  { %18225 = sst [smem:[#allocation36_spill]] %s18205_s5 }
   0x6   :  { %18226 = sst [smem:[#allocation37_spill]] %s18206_s6 }
   0x7   :  { %18227 = sst [smem:[#allocation38_spill]] %s18207_s7 }
   0x8   :  { %18228 = sst [smem:[#allocation39_spill]] %s18213_s13 }
   0x9   :  { %18 = vsyncpa [#allocation3], 0 }
   0xa   :  { %20 = vsyncpa [#allocation3 + $0x1], 0 }
   0xb   :  { %21 = vsyncpa [#allocation6], 0 }
   0xc   :  { %22 = vsyncpa [#allocation9], 0 }
   0xd   :  { %23 = vsyncpa [#allocation12], 0 }
   0xe   :  { %24 = vsyncpa [#allocation15], 0 }
   0xf   :  { %25 = vsyncpa [#allocation18], 0 }
  0x10   :  { %26 = vsyncpa [#allocation21], 0 }
  0x11   :  { %27 = vsyncpa [#allocation4], 0 }
  0x12   :  { %29 = vsyncpa [#allocation4 + $0x1], 0  ;;  %s17324_s25 = smov 0   ;;  %s17326_s26 = smov 0  }
  0x13   :  { %s17328_s27 = smov 0   ;;  %s17330_s28 = smov 0  }
  0x14 LB: > { %s17231_s29 = smov [#allocation5]   ;;  %s17345_s14 = sadd.s32 4294967295, %s17229_s28   ;;  %s17229_s28 = sphi %s17330_s28, %s18268_s28   ;;  %s17225_s27 = sphi %s17328_s27, %s18267_s27   ;;  %s17221_s26 = sphi %s17326_s26, %s18266_s26   ;;  %s17217_s25 = sphi %s17324_s25, %s18265_s25  }
  0x15   : > { %s356_s30 = sshll.u32 %s17231_s29, 4  ;;  %p13316_p0 = scmp.ge.s32.totalorder %s17229_s28, 1  ;;  %s357_s30 = int_to_ptr.vmem [resolvable:$true] %s356_s30 }
  0x16   : > { %p18217_p1 = scmp.eq.s32.totalorder %s17345_s14, 0  ;;  %p344_p2 = scmp.lt.s32.totalorder %s17229_s28, 3 }
  0x17   : > { %s17232_s16 = smov [#allocation8]   ;;  %s17233_s19 = smov [#allocation11]  }
  0x18   : > { %p17350_p3 = pnand %p13316_p0, %p344_p2  ;;  %s380_s17 = sshll.u32 %s17232_s16, 4  ;;  %s17363_s17 = int_to_ptr.vmem [resolvable:$true] %s380_s17 }
  0x19   : > { %s17365_s20 = sshll.u32 %s17233_s19, 4  ;;  %s16812_s22 = scalar_lea.vmem %s357_s30, 49152  ;;  %s406_s20 = int_to_ptr.vmem [resolvable:$true] %s17365_s20 }
  0x1a   : > { %s18229_s15 = scalar_select %p17350_p3, 1, 0 }
  0x1b   : > { %p15087_p5 = pneg %p17350_p3  ;;  %p16813_p8 = scmp.ne.s32.totalorder %s357_s30, %s16812_s22 }
  0x1c   : > { %p16820_p11 = scmp.lt.s32.totalorder %s357_s30, %s357_s30  ;;  %p16821_p12 = scmp.lt.s32.totalorder %s16812_s22, %s16812_s22 }
  0x1d   : > { %p17359_p6 = pnand %p15087_p5, %p18217_p1 }
  0x1e   : > { %p16822_p13 = por %p16821_p12, %p16820_p11 }
  0x1f   : > { %p17369_p7 = pneg %p17359_p6 }
  0x21   : > { %p16815_p9 = pnand %p16813_p8, %p17369_p7 }
  0x23   : > { %p16816_p10 = pneg %p16815_p9 }
  0x25   : > { %p16823_p0 = pnand %p16822_p13, %p16816_p10 }
  0x27   : > { %16826 = shalt.err (!%p16823_p0)
}
  0x28   : > { %s17234_s23 = smov 768   ;;  %s17235_s24 = smov 48  }
  0x29   : > { %s18232_s1 = sld [smem:[#allocation32_spill]]  ;;  %s16838_s19 = scalar_lea.vmem %s17363_s17, 16384 }
  0x2a   : > { %p16839_p2 = scmp.ne.s32.totalorder %s17363_s17, %s16838_s19  ;;  %p16846_p9 = scmp.lt.s32.totalorder %s17363_s17, %s17363_s17 }
  0x2b   : > { %p16847_p10 = scmp.lt.s32.totalorder %s16838_s19, %s16838_s19 }
  0x2c   : > { %p16841_p5 = pnand %p16839_p2, %p17369_p7 }
  0x2d   : > { %p16848_p11 = por %p16847_p10, %p16846_p9 }
  0x2e   : > { %p16842_p8 = pneg %p16841_p5 }
  0x2f   : > { %15090 = dma.hbm_to_vmem [thread:$0]  (!%p17359_p6), %s18232_s1, 49152, %s357_s30, [#allocation6], %s17234_s23, %s17234_s23, %s17235_s24  }
  0x30   : > { %p16849_p12 = pnand %p16848_p11, %p16842_p8 }
  0x32   : > { %16852 = shalt.err (!%p16849_p12)
}
  0x33   : > { %s18215_s22 = smov 256   ;;  %s18216_s13 = smov 16  }
  0x34   : > { %s18233_s3 = sld [smem:[#allocation34_spill]]  ;;  %s16864_s24 = scalar_lea.vmem %s406_s20, 64 }
  0x35   : > { %p16865_p13 = scmp.ne.s32.totalorder %s406_s20, %s16864_s24  ;;  %p16872_p5 = scmp.lt.s32.totalorder %s406_s20, %s406_s20 }
  0x36   : > { %p16873_p8 = scmp.lt.s32.totalorder %s16864_s24, %s16864_s24 }
  0x37   : > { %p16867_p0 = pnand %p16865_p13, %p17369_p7 }
  0x38   : > { %p16874_p9 = por %p16873_p8, %p16872_p5 }
  0x39   : > { %p16868_p2 = pneg %p16867_p0 }
  0x3a   : > { %15096 = dma.hbm_to_vmem [thread:$0]  (!%p17359_p6), %s18233_s3, 16384, %s17363_s17, [#allocation9], %s18215_s22, %s18215_s22, %s18216_s13  }
  0x3b   : > { %p16875_p10 = pnand %p16874_p9, %p16868_p2 }
  0x3d   : > { %16878 = shalt.err (!%p16875_p10)
}
  0x3e   : > { %s18234_s5 = sld [smem:[#allocation36_spill]]  ;;  %s17238_s19 = smov [#allocation14]  }
  0x3f   : > { %s426_s17 = sshll.u32 %s17238_s19, 4  ;;  %s427_s17 = int_to_ptr.vmem [resolvable:$true] %s426_s17 }
  0x40   : > { %s16890_s30 = scalar_lea.vmem %s427_s17, 65536  ;;  %p16898_p0 = scmp.lt.s32.totalorder %s427_s17, %s427_s17 }
  0x41   : > { %p16891_p11 = scmp.ne.s32.totalorder %s427_s17, %s16890_s30  ;;  %p16899_p4 = scmp.lt.s32.totalorder %s16890_s30, %s16890_s30 }
  0x43   : > { %p16893_p12 = pnand %p16891_p11, %p17369_p7  ;;  %p16900_p5 = por %p16899_p4, %p16898_p0 }
  0x44   : > { %15102 = dma.hbm_to_vmem [thread:$0]  (!%p17359_p6), %s18234_s5, 64, %s406_s20, [#allocation12]  }
  0x45   : > { %p16894_p13 = pneg %p16893_p12 }
  0x47   : > { %p16901_p2 = pnand %p16900_p5, %p16894_p13 }
  0x49   : > { %16904 = shalt.err (!%p16901_p2)
}
  0x4a   : > { %s17239_s23 = smov 1024   ;;  %s17240_s24 = smov 64  }
  0x4b   : > { %s18235_s7 = sld [smem:[#allocation38_spill]]  ;;  %s17241_s16 = smov [#allocation17]  }
  0x4c   : > { %s450_s19 = sshll.u32 %s17241_s16, 4  ;;  %s17242_s22 = smov [#allocation20]   ;;  %s451_s19 = int_to_ptr.vmem [resolvable:$true] %s450_s19 }
  0x4d   : > { %s475_s13 = sshll.u32 %s17242_s22, 4  ;;  %s16916_s1 = scalar_lea.vmem %s451_s19, 65536  ;;  %s476_s13 = int_to_ptr.vmem [resolvable:$true] %s475_s13 }
  0x4e   : > { %p16917_p8 = scmp.ne.s32.totalorder %s451_s19, %s16916_s1  ;;  %p16924_p10 = scmp.lt.s32.totalorder %s451_s19, %s451_s19 }
  0x4f   : > { %p16925_p11 = scmp.lt.s32.totalorder %s16916_s1, %s16916_s1 }
  0x50   : > { %p16919_p4 = pnand %p16917_p8, %p17369_p7 }
  0x51   : > { %15108 = dma.hbm_to_vmem [thread:$0]  (!%p17359_p6), %s18235_s7, 65536, %s427_s17, [#allocation15], %s17239_s23, %s17239_s23, %s17240_s24  }
  0x52   : > { %p16920_p9 = pneg %p16919_p4  ;;  %p16926_p12 = por %p16925_p11, %p16924_p10 }
  0x54   : > { %p16927_p13 = pnand %p16926_p12, %p16920_p9 }
  0x56   : > { %16930 = shalt.err (!%p16927_p13)
}
  0x57   : > { %s18236_s30 = smov 16   ;;  %s18237_s17 = smov 256  }
  0x58   : > { %15114 = dma.hbm_to_vmem [thread:$0]  (!%p17359_p6), %s18209_s9, 65536, %s451_s19, [#allocation18], %s18237_s17, %s18237_s17, %s18236_s30  }
  0x59   : > { %s16942_s22 = scalar_lea.vmem %s476_s13, 64  ;;  %p16950_p8 = scmp.lt.s32.totalorder %s476_s13, %s476_s13 }
  0x5a   : > { %p16943_p0 = scmp.ne.s32.totalorder %s476_s13, %s16942_s22  ;;  %p16951_p4 = scmp.lt.s32.totalorder %s16942_s22, %s16942_s22 }
  0x5c   : > { %p16945_p5 = pnand %p16943_p0, %p17369_p7  ;;  %p16952_p10 = por %p16951_p4, %p16950_p8 }
  0x5e   : > { %p16946_p2 = pneg %p16945_p5 }
  0x60   : > { %p16953_p9 = pnand %p16952_p10, %p16946_p2 }
  0x62   : > { %16956 = shalt.err (!%p16953_p9)
}
  0x63   : > { %15120 = dma.hbm_to_vmem [thread:$0]  (!%p17359_p6), %s18211_s11, 64, %s476_s13, [#allocation21]  }
  0x64   : > { %s17243_s20 = smov [#allocation7]   ;;  %s17244_s19 = smov [#allocation10]  }
  0x65   : > { %s370_s16 = sshll.u32 %s17243_s20, 4  ;;  %s394_s30 = sshll.u32 %s17244_s19, 4  ;;  %s371_s16 = int_to_ptr.vmem [resolvable:$true] %s370_s16  ;;  %s395_s30 = int_to_ptr.vmem [resolvable:$true] %s394_s30 }
  0x66   : > { %s16968_s17 = scalar_lea.vmem %s371_s16, 192  ;;  %p16976_p0 = scmp.lt.s32.totalorder %s371_s16, %s371_s16 }
  0x67   : > { %p16969_p11 = scmp.ne.s32.totalorder %s371_s16, %s16968_s17  ;;  %p16977_p5 = scmp.lt.s32.totalorder %s16968_s17, %s16968_s17 }
  0x69   : > { %p16971_p12 = pnand %p16969_p11, %p17369_p7  ;;  %p16978_p2 = por %p16977_p5, %p16976_p0 }
  0x6b   : > { %p16972_p13 = pneg %p16971_p12 }
  0x6d   : > { %p16979_p8 = pnand %p16978_p2, %p16972_p13 }
  0x6f   : > { %16982 = shalt.err (!%p16979_p8)
}
  0x70   : > { %s18238_s2 = sld [smem:[#allocation33_spill]]  ;;  %s16994_s24 = scalar_lea.vmem %s395_s30, 64 }
  0x71   : > { %p16995_p4 = scmp.ne.s32.totalorder %s395_s30, %s16994_s24  ;;  %p17002_p1 = scmp.lt.s32.totalorder %s395_s30, %s395_s30 }
  0x72   : > { %p17003_p11 = scmp.lt.s32.totalorder %s16994_s24, %s16994_s24 }
  0x73   : > { %p16997_p10 = pnand %p16995_p4, %p17369_p7 }
  0x74   : > { %p17004_p12 = por %p17003_p11, %p17002_p1 }
  0x75   : > { %p16998_p9 = pneg %p16997_p10 }
  0x76   : > { %15093 = dma.hbm_to_vmem [thread:$0]  (!%p17359_p6), %s18238_s2, 192, %s371_s16, [#allocation6]  }
  0x77   : > { %p17005_p3 = pnand %p17004_p12, %p16998_p9 }
  0x79   : > { %17008 = shalt.err (!%p17005_p3)
}
  0x7a   : > { %s18239_s4 = sld [smem:[#allocation35_spill]]  ;;  %s17245_s29 = smov [#allocation13]  }
  0x7b   : > { %s416_s20 = sshll.u32 %s17245_s29, 4  ;;  %s17246_s16 = smov [#allocation16]   ;;  %s417_s20 = int_to_ptr.vmem [resolvable:$true] %s416_s20 }
  0x7c   : > { %s440_s19 = sshll.u32 %s17246_s16, 4  ;;  %s17020_s17 = scalar_lea.vmem %s417_s20, 64  ;;  %s441_s19 = int_to_ptr.vmem [resolvable:$true] %s440_s19 }
  0x7d   : > { %p17021_p13 = scmp.ne.s32.totalorder %s417_s20, %s17020_s17  ;;  %p17028_p5 = scmp.lt.s32.totalorder %s417_s20, %s417_s20 }
  0x7e   : > { %p17029_p3 = scmp.lt.s32.totalorder %s17020_s17, %s17020_s17 }
  0x7f   : > { %p17023_p0 = pnand %p17021_p13, %p17369_p7 }
  0x80   : > { %15099 = dma.hbm_to_vmem [thread:$0]  (!%p17359_p6), %s18239_s4, 64, %s395_s30, [#allocation9]  }
  0x81   : > { %p17024_p1 = pneg %p17023_p0  ;;  %p17030_p2 = por %p17029_p3, %p17028_p5 }
  0x83   : > { %p17031_p8 = pnand %p17030_p2, %p17024_p1 }
  0x85   : > { %17034 = shalt.err (!%p17031_p8)
}
  0x86   : > { %s18240_s6 = sld [smem:[#allocation37_spill]]  ;;  %s17046_s13 = scalar_lea.vmem %s441_s19, 256 }
  0x87   : > { %p17047_p4 = scmp.ne.s32.totalorder %s441_s19, %s17046_s13  ;;  %p17054_p11 = scmp.lt.s32.totalorder %s441_s19, %s441_s19 }
  0x88   : > { %p17055_p12 = scmp.lt.s32.totalorder %s17046_s13, %s17046_s13 }
  0x89   : > { %p17049_p10 = pnand %p17047_p4, %p17369_p7 }
  0x8a   : > { %p17056_p13 = por %p17055_p12, %p17054_p11 }
  0x8b   : > { %p17050_p9 = pneg %p17049_p10 }
  0x8c   : > { %15105 = dma.hbm_to_vmem [thread:$0]  (!%p17359_p6), %s18240_s6, 64, %s417_s20, [#allocation12]  }
  0x8d   : > { %p17057_p0 = pnand %p17056_p13, %p17050_p9 }
  0x8f   : > { %17060 = shalt.err (!%p17057_p0)
}
  0x90   : > { %15111 = dma.hbm_to_vmem [thread:$0]  (!%p17359_p6), %s18208_s8, 256, %s441_s19, [#allocation15]  }
  0x91   : > { %s17247_s1 = smov [#allocation19]   ;;  %s17248_s20 = smov [#allocation22]  }
  0x92   : > { %s464_s29 = sshll.u32 %s17247_s1, 4  ;;  %s486_s16 = sshll.u32 %s17248_s20, 4  ;;  %s465_s29 = int_to_ptr.vmem [resolvable:$true] %s464_s29  ;;  %s487_s16 = int_to_ptr.vmem [resolvable:$true] %s486_s16 }
  0x93   : > { %s17072_s17 = scalar_lea.vmem %s465_s29, 64  ;;  %p17080_p2 = scmp.lt.s32.totalorder %s465_s29, %s465_s29 }
  0x94   : > { %p17073_p1 = scmp.ne.s32.totalorder %s465_s29, %s17072_s17  ;;  %p17081_p8 = scmp.lt.s32.totalorder %s17072_s17, %s17072_s17 }
  0x96   : > { %p17075_p5 = pnand %p17073_p1, %p17369_p7  ;;  %p17082_p4 = por %p17081_p8, %p17080_p2 }
  0x98   : > { %p17076_p3 = pneg %p17075_p5 }
  0x9a   : > { %p17083_p10 = pnand %p17082_p4, %p17076_p3 }
  0x9c   : > { %17086 = shalt.err (!%p17083_p10)
}
  0x9d   : > { %15117 = dma.hbm_to_vmem [thread:$0]  (!%p17359_p6), %s18210_s10, 64, %s465_s29, [#allocation18]  }
  0x9e   : > { %s17098_s30 = scalar_lea.vmem %s487_s16, 64  ;;  %p17106_p13 = scmp.lt.s32.totalorder %s487_s16, %s487_s16 }
  0x9f   : > { %p17099_p9 = scmp.ne.s32.totalorder %s487_s16, %s17098_s30  ;;  %p17107_p0 = scmp.lt.s32.totalorder %s17098_s30, %s17098_s30 }
  0xa1   : > { %p17101_p11 = pnand %p17099_p9, %p17369_p7  ;;  %p17108_p1 = por %p17107_p0, %p17106_p13 }
  0xa3   : > { %p17102_p12 = pneg %p17101_p11 }
  0xa5   : > { %p17109_p5 = pnand %p17108_p1, %p17102_p12 }
  0xa7   : > { %17112 = shalt.err (!%p17109_p5)
}
  0xa8   : > { %15123 = dma.hbm_to_vmem [thread:$0]  (!%p17359_p6), %s18212_s12, 64, %s487_s16, [#allocation21]  }
  0xa9   : > { %s13315_s21 = sadd.s32 4294967294, %s17229_s28   ;;  %s17471_s18 = sadd.s32 1, %s17229_s28  }
  0xaa   : > { %s39_s22 = ssub.s32 %s17229_s28, %s17471_s18  ;;  %s42_s1 = sadd.s32 1, %s17225_s27 }
  0xab   : > { %p40_p7 = scmp.eq.s32.totalorder %s39_s22, 0  ;;  %p49_p3 = scmp.ne.s32.totalorder %s17225_s27, %s17221_s26 }
  0xac   : > { %p50_p2 = scmp.eq.s32.totalorder %s17229_s28, 0  ;;  %p55_p8 = scmp.ne.s32.totalorder %s17221_s26, %s17217_s25 }
  0xad   : > { %s17482_s29 = scalar_select %p40_p7, %s17225_s27, %s42_s1  }
  0xae   : > { %p17484_p4 = por %p50_p2, %p49_p3  ;;  %p18242_p10 = scmp.eq.s32.totalorder %s17345_s14, 0 }
  0xaf   : > { %p331_p9 = scmp.eq.s32.totalorder %s17345_s14, 1  ;;  %p337_p11 = scmp.eq.s32.totalorder %s13315_s21, 1 }
  0xb0   : > { %p17490_p6 = por %p18242_p10, %p55_p8  ;;  %p15144_p12 = scmp.lt.s32.totalorder %s17229_s28, 2 }
  0xb1   : > { %s497_s17 = sand.u32 1, %s17225_s27   ;;  %p17497_p13 = por %p331_p9, %p49_p3 }
  0xb2   : > { %s18243_s16 = scalar_select %p17490_p6, 1, 0 }
  0xb3   : > { %s18244_s23 = scalar_select %p17497_p13, 1, 0 }
  0xb4   : > { %p17501_p0 = por %p337_p11, %p55_p8  ;;  %s13330_s30 = sshll.u32 %s497_s17, 5 }
  0xb5   : > { %s14905_s13 = sshll.u32 %s17229_s28, 9  ;;  %s501_s21 = scalar_lea.vmem [#allocation2], %s13330_s30 }
  0xb6   : > { %s18245_s19 = scalar_select %p17501_p0, 1, 0 }
  0xb7   : > { %s17509_s1 = scalar_lea.hbm %s18200_s0, %s14905_s13  ;;  %s509_s2 = sshll.u32 %s501_s21, 4  ;;  %s510_s2 = int_to_ptr.vmem [resolvable:$true] %s509_s2 }
  0xb8   : > { %p17513_p1 = pnand %p15144_p12, %p17484_p4  ;;  %s498_s4 = scalar_lea.sflag [#allocation3], %s497_s17 }
  0xb9   : > { %s17113_s5 = scalar_lea.hbm %s17509_s1, 512  ;;  %s17118_s22 = scalar_lea.hbm %s18200_s0, 1024 }
  0xba   : > { %p17114_p5 = scmp.ne.s32.totalorder %s17509_s1, %s17113_s5  ;;  %p17115_p7 = pneg %p17513_p1 }
  0xbb   : > { %p17119_p8 = scmp.lt.s32.totalorder %s17509_s1, %s18200_s0  ;;  %p17120_p4 = scmp.lt.s32.totalorder %s17118_s22, %s17113_s5 }
  0xbc   : > { %p17116_p3 = pnand %p17115_p7, %p17114_p5 }
  0xbd   : > { %p17121_p10 = por %p17120_p4, %p17119_p8 }
  0xbe   : > { %p17117_p2 = pneg %p17116_p3 }
  0xc0   : > { %p17122_p9 = pnand %p17121_p10, %p17117_p2 }
  0xc2   : > { %17125 = shalt.err (!%p17122_p9)
}
  0xc3   : > { %s17126_s20 = scalar_lea.vmem %s510_s2, 512  ;;  %s17249_s17 = smov [#allocation2]  }
  0xc4   : > { %p17127_p11 = scmp.ne.s32.totalorder %s510_s2, %s17126_s20  ;;  %s17131_s6 = sshll.u32 %s17249_s17, 4  ;;  %s17132_s6 = int_to_ptr.vmem [resolvable:$false] %s17131_s6 }
  0xc5   : > { %s17133_s7 = scalar_lea.vmem %s17132_s6, 1024  ;;  %p17134_p5 = scmp.lt.s32.totalorder %s510_s2, %s17132_s6 }
  0xc6   : > { %p17129_p12 = pnand %p17127_p11, %p17115_p7  ;;  %p17135_p3 = scmp.lt.s32.totalorder %s17133_s7, %s17126_s20 }
  0xc8   : > { %p17130_p0 = pneg %p17129_p12  ;;  %p17136_p13 = por %p17135_p3, %p17134_p5 }
  0xca   : > { %p17137_p6 = pnand %p17136_p13, %p17130_p0 }
  0xcc   : > { %17140 = shalt.err (!%p17137_p6)
}
  0xcd   : > { %15127 = dma.hbm_to_vmem [thread:$0]  (!%p17513_p1), %s17509_s1, 512, %s510_s2, %s498_s4  }
  0xce   : > { %p18247_p2 = scmp.ne.s32.totalorder %s18229_s15, 0 }
  0xcf   : > { %s17534_s5 = sand.u32 (!%p18247_p2), 1, %s17221_s26   ;;  %p18248_p6 = scmp.ne.s32.totalorder (!%p18247_p2), %s18243_s16, 0 }
  0xd0   : > { %518 = sbr.rel (%p18247_p2) target bundleno = 3725 (0xe8d), region = 72  ;;  %s13334_s13 = sshll.u32 (!%p18247_p2), %s17534_s5, 5 }
  0xd1   : > { %s521_s6 = scalar_lea.sflag (!%p18247_p2), [#allocation3], %s17534_s5  ;;  %s17540_s7 = scalar_lea.vmem (!%p18247_p2), [#allocation2], %s13334_s13 }
  0xd5   : > { %17184 = dma.done.wait (%p18248_p6), %s521_s6, 512  }
  0xd6   : > { %17186 = vsyncadd (%p18248_p6), %s521_s6, 4294966784  ;;  %p18249_p13 = scmp.eq.s32.totalorder %s17345_s14, 0 }
  0xd8   : > { %17188 = dma.done.wait (%p18249_p13), [#allocation6], 49344   ;;  %p18250_p0 = pmov %p18249_p13 }
  0xda   : > { %17190 = vsyncadd (%p18250_p0), [#allocation6], 4294917952  ;;  %p18251_p1 = pmov %p18250_p0 }
  0xdb   : > { %p18252_p7 = pmov %p18250_p0 }
  0xdc   : > { %17192 = dma.done.wait (%p18251_p1), [#allocation9], 16448  }
  0xdd   : > { %17194 = vsyncadd (%p18252_p7), [#allocation9], 4294950848  ;;  %p18253_p8 = pmov %p18250_p0 }
  0xde   : > { %p18254_p4 = pmov %p18250_p0 }
  0xdf   : > { %17196 = dma.done.wait (%p18253_p8), [#allocation12], 128  }
  0xe0   : > { %17198 = vsyncadd (%p18254_p4), [#allocation12], 4294967168  ;;  %p18255_p10 = pmov %p18250_p0 }
  0xe1   : > { %p18256_p9 = pmov %p18250_p0 }
  0xe2   : > { %17200 = dma.done.wait (%p18255_p10), [#allocation15], 65792  }
  0xe3   : > { %17202 = vsyncadd (%p18256_p9), [#allocation15], 4294901504  ;;  %p18257_p11 = pmov %p18250_p0 }
  0xe4   : > { %p18258_p12 = pmov %p18250_p0 }
  0xe5   : > { %17204 = dma.done.wait (%p18257_p11), [#allocation18], 65600  }
  0xe6   : > { %17206 = vsyncadd (%p18258_p12), [#allocation18], 4294901696  ;;  %p18259_p5 = pmov %p18250_p0 }
  0xe7   : > { %p18260_p3 = pmov %p18250_p0 }
  0xe8   : > { %17208 = dma.done.wait (%p18259_p5), [#allocation21], 128  }
  0xe9   : > { %17210 = vsyncadd (%p18260_p3), [#allocation21], 4294967168  ;;  %v15221_v0 = vld [vmem:[#allocation5 + $0x2a4] ss:$48 sps:$4 sm:$0xff]   ;;  %v15225_v2 = vld [vmem:[#allocation5 + $0x2a0] ss:$48 sps:$4 sm:$0xff]  }
  0xea   : > { %v15223_v1 = vld [vmem:[#allocation5 + $0x8a4] ss:$48 sps:$4 sm:$0xff]   ;;  %2992 = vmatprep.subr.bf16.mxu0 %v15221_v0  ;;  %v15226_v3 = vld [vmem:[#allocation5 + $0x8a0] ss:$48 sps:$4 sm:$0xff]   ;;  %v617_v46 = vld [vmem:[%s17540_s7 + $0x8] sm:$0xff]  ;;  %vm17251_vm0 = vmmov 0  }
  0xeb   : > { %3033 = vmatprep.subr.bf16.mxu1 %v15223_v1  ;;  %v15227_v4 = vld [vmem:[#allocation5 + $0x244] ss:$48 sps:$4 sm:$0xff]   ;;  %2993 = vmatpush1.bf16.msra.mxu0 %v15225_v2  ;;  %v15231_v6 = vld [vmem:[#allocation5 + $0x240] ss:$48 sps:$4 sm:$0xff]   ;;  %v17571_v49 = vpack.c.bf16 %v617_v46, %v617_v46  ;;  %v619_v50 = vld [vmem:[%s17540_s7 + $0x18] sm:$0xff]  ;;  %vm3500_vm1 = vcmask 523264  }
  0xec   : > { %3034 = vmatpush1.bf16.msra.mxu1 %v15226_v3  ;;  %v15229_v5 = vld [vmem:[#allocation5 + $0x844] ss:$48 sps:$4 sm:$0xff]   ;;  %2994 = vmatprep.subr.bf16.mxu0 %v15227_v4  ;;  %v15232_v7 = vld [vmem:[#allocation5 + $0x840] ss:$48 sps:$4 sm:$0xff]   ;;  %v17574_v52 = vpack.c.bf16 %v619_v50, %v619_v50  ;;  %v15371_v46 = vld [vmem:[#allocation5 + $0x548] ss:$48 sps:$4 sm:$0xff]  }
  0xed   : > { %3035 = vmatprep.subr.bf16.mxu1 %v15229_v5  ;;  %v15233_v8 = vld [vmem:[#allocation5 + $0x1e4] ss:$48 sps:$4 sm:$0xff]   ;;  %v15237_v10 = vld [vmem:[#allocation5 + $0x1e0] ss:$48 sps:$4 sm:$0xff]   ;;  %3024 = vmatprep.mubr.bf16.mxu0 %v17571_v49  ;;  %v15382_v50 = vld [vmem:[#allocation5 + $0xaec] ss:$48 sps:$4 sm:$0xff]  }
  0xee   : > { %v15235_v9 = vld [vmem:[#allocation5 + $0x7e4] ss:$48 sps:$4 sm:$0xff]   ;;  %v15238_v11 = vld [vmem:[#allocation5 + $0x7e0] ss:$48 sps:$4 sm:$0xff]   ;;  %3065 = vmatprep.mubr.bf16.mxu1 %v17574_v52  ;;  %s17252_s2 = smov 64   ;;  %vm3563_vm2 = vcmask 1043456  }
  0xef   : > { %2995 = vmatpush1.bf16.msra.mxu0 %v15231_v6  ;;  %v15239_v12 = vld [vmem:[#allocation5 + $0x184] ss:$48 sps:$4 sm:$0xff]   ;;  %v15243_v14 = vld [vmem:[#allocation5 + $0x180] ss:$48 sps:$4 sm:$0xff]   ;;  %v15319_v6 = vld [vmem:[#allocation5 + $0x2ac] ss:$48 sps:$4 sm:$0xff]  }
  0xf0   : > { %3036 = vmatpush1.bf16.msra.mxu1 %v15232_v7  ;;  %2996 = vmatprep.subr.bf16.mxu0 %v15233_v8  ;;  %v15241_v13 = vld [vmem:[#allocation5 + $0x784] ss:$48 sps:$4 sm:$0xff]   ;;  %v15244_v15 = vld [vmem:[#allocation5 + $0x780] ss:$48 sps:$4 sm:$0xff]   ;;  %v15322_v7 = vld [vmem:[#allocation5 + $0x8ac] ss:$48 sps:$4 sm:$0xff]  }
  0xf1   : > { %3037 = vmatprep.subr.bf16.mxu1 %v15235_v9  ;;  %v15245_v16 = vld [vmem:[#allocation5 + $0x124] ss:$48 sps:$4 sm:$0xff]   ;;  %v15249_v18 = vld [vmem:[#allocation5 + $0x120] ss:$48 sps:$4 sm:$0xff]   ;;  %vm3547_vm3 = vcmask 64512   ;;  %s14906_s3 = sshll.u32 %s17345_s14, 9 }
  0xf2   : > { %v15247_v17 = vld [vmem:[#allocation5 + $0x724] ss:$48 sps:$4 sm:$0xff]   ;;  %v15250_v19 = vld [vmem:[#allocation5 + $0x720] ss:$48 sps:$4 sm:$0xff]   ;;  %s614_s4 = scalar_lea.vmem [#allocation23], %s13334_s13  ;;  %s18261_s24 = sld [smem:[#allocation39_spill]] }
  0xf3   : > { %2997 = vmatpush1.bf16.msra.mxu0 %v15237_v10  ;;  %v15251_v20 = vld [vmem:[#allocation5 + $0xc4] ss:$48 sps:$4 sm:$0xff]   ;;  %v15255_v22 = vld [vmem:[#allocation5 + $0xc0] ss:$48 sps:$4 sm:$0xff]   ;;  %v15317_v10 = vld [vmem:[#allocation5 + $0x2a8] ss:$48 sps:$4 sm:$0xff]  }
  0xf4   : > { %3038 = vmatpush1.bf16.msra.mxu1 %v15238_v11  ;;  %2998 = vmatprep.subr.bf16.mxu0 %v15239_v12  ;;  %v15253_v21 = vld [vmem:[#allocation5 + $0x6c4] ss:$48 sps:$4 sm:$0xff]   ;;  %v15256_v23 = vld [vmem:[#allocation5 + $0x6c0] ss:$48 sps:$4 sm:$0xff]   ;;  %v15320_v11 = vld [vmem:[#allocation5 + $0x8a8] ss:$48 sps:$4 sm:$0xff]  }
  0xf5   : > { %3039 = vmatprep.subr.bf16.mxu1 %v15241_v13  ;;  %v15257_v24 = vld [vmem:[#allocation5 + $0x64] ss:$48 sps:$4 sm:$0xff]   ;;  %v15261_v26 = vld [vmem:[#allocation5 + $0x60] ss:$48 sps:$4 sm:$0xff]   ;;  %v15325_v12 = vld [vmem:[#allocation5 + $0x24c] ss:$48 sps:$4 sm:$0xff]  }
  0xf6   : > { %v15259_v25 = vld [vmem:[#allocation5 + $0x664] ss:$48 sps:$4 sm:$0xff]   ;;  %v15262_v27 = vld [vmem:[#allocation5 + $0x660] ss:$48 sps:$4 sm:$0xff]   ;;  %v15328_v13 = vld [vmem:[#allocation5 + $0x84c] ss:$48 sps:$4 sm:$0xff]  }
  0xf7   : > { %2999 = vmatpush1.bf16.msra.mxu0 %v15243_v14  ;;  %v15263_v28 = vld [vmem:[#allocation5 + $0x4] ss:$48 sps:$4 sm:$0xff]   ;;  %v15267_v30 = vld [vmem:[#allocation5] ss:$48 sps:$4 sm:$0xff]   ;;  %v15323_v14 = vld [vmem:[#allocation5 + $0x248] ss:$48 sps:$4 sm:$0xff]  }
  0xf8   : > { %3040 = vmatpush1.bf16.msra.mxu1 %v15244_v15  ;;  %3000 = vmatprep.subr.bf16.mxu0 %v15245_v16  ;;  %v15265_v29 = vld [vmem:[#allocation5 + $0x604] ss:$48 sps:$4 sm:$0xff]   ;;  %v15268_v31 = vld [vmem:[#allocation5 + $0x600] ss:$48 sps:$4 sm:$0xff]   ;;  %v15326_v15 = vld [vmem:[#allocation5 + $0x848] ss:$48 sps:$4 sm:$0xff]   ;;  %s18157_s22 = scalar_lea.hbm %s18261_s24, %s14906_s3 }
  0xf9   : > { %3041 = vmatprep.subr.bf16.mxu1 %v15247_v17  ;;  %v15269_v32 = vld [vmem:[#allocation5 + $0x5a4] ss:$48 sps:$4 sm:$0xff]   ;;  %v15273_v34 = vld [vmem:[#allocation5 + $0x5a0] ss:$48 sps:$4 sm:$0xff]   ;;  %v15331_v16 = vld [vmem:[#allocation5 + $0x1ec] ss:$48 sps:$4 sm:$0xff]  }
  0xfa   : > { %v15271_v33 = vld [vmem:[#allocation5 + $0xba4] ss:$48 sps:$4 sm:$0xff]   ;;  %v15274_v35 = vld [vmem:[#allocation5 + $0xba0] ss:$48 sps:$4 sm:$0xff]   ;;  %v15334_v17 = vld [vmem:[#allocation5 + $0x7ec] ss:$48 sps:$4 sm:$0xff]  }
  0xfb   : > { %3001 = vmatpush1.bf16.msra.mxu0 %v15249_v18  ;;  %v15275_v36 = vld [vmem:[#allocation5 + $0x544] ss:$48 sps:$4 sm:$0xff]   ;;  %v15279_v38 = vld [vmem:[#allocation5 + $0x540] ss:$48 sps:$4 sm:$0xff]   ;;  %v15329_v18 = vld [vmem:[#allocation5 + $0x1e8] ss:$48 sps:$4 sm:$0xff]  }
  0xfc   : > { %3042 = vmatpush1.bf16.msra.mxu1 %v15250_v19  ;;  %3002 = vmatprep.subr.bf16.mxu0 %v15251_v20  ;;  %v15277_v37 = vld [vmem:[#allocation5 + $0xb44] ss:$48 sps:$4 sm:$0xff]   ;;  %v15280_v39 = vld [vmem:[#allocation5 + $0xb40] ss:$48 sps:$4 sm:$0xff]   ;;  %v15332_v19 = vld [vmem:[#allocation5 + $0x7e8] ss:$48 sps:$4 sm:$0xff]  }
  0xfd   : > { %3043 = vmatprep.subr.bf16.mxu1 %v15253_v21  ;;  %v15281_v40 = vld [vmem:[#allocation5 + $0x4e4] ss:$48 sps:$4 sm:$0xff]   ;;  %v15285_v42 = vld [vmem:[#allocation5 + $0x4e0] ss:$48 sps:$4 sm:$0xff]   ;;  %v15337_v20 = vld [vmem:[#allocation5 + $0x18c] ss:$48 sps:$4 sm:$0xff]  }
  0xfe   : > { %v15283_v41 = vld [vmem:[#allocation5 + $0xae4] ss:$48 sps:$4 sm:$0xff]   ;;  %v15286_v43 = vld [vmem:[#allocation5 + $0xae0] ss:$48 sps:$4 sm:$0xff]   ;;  %v15340_v21 = vld [vmem:[#allocation5 + $0x78c] ss:$48 sps:$4 sm:$0xff]  }
  0xff   : > { %3003 = vmatpush1.bf16.msra.mxu0 %v15255_v22  ;;  %v15287_v44 = vld [vmem:[#allocation5 + $0x484] ss:$48 sps:$4 sm:$0xff]   ;;  %v15291_v47 = vld [vmem:[#allocation5 + $0x480] ss:$48 sps:$4 sm:$0xff]   ;;  %v15335_v22 = vld [vmem:[#allocation5 + $0x188] ss:$48 sps:$4 sm:$0xff]  }
 0x100   : > { %3044 = vmatpush1.bf16.msra.mxu1 %v15256_v23  ;;  %3004 = vmatprep.subr.bf16.mxu0 %v15257_v24  ;;  %v15289_v45 = vld [vmem:[#allocation5 + $0xa84] ss:$48 sps:$4 sm:$0xff]   ;;  %v15292_v48 = vld [vmem:[#allocation5 + $0xa80] ss:$48 sps:$4 sm:$0xff]   ;;  %v15338_v23 = vld [vmem:[#allocation5 + $0x788] ss:$48 sps:$4 sm:$0xff]  }
 0x101   : > { %3045 = vmatprep.subr.bf16.mxu1 %v15259_v25  ;;  %v15293_v51 = vld [vmem:[#allocation5 + $0x424] ss:$48 sps:$4 sm:$0xff]   ;;  %v15297_v54 = vld [vmem:[#allocation5 + $0x420] ss:$48 sps:$4 sm:$0xff]   ;;  %v15343_v24 = vld [vmem:[#allocation5 + $0x12c] ss:$48 sps:$4 sm:$0xff]  }
 0x102   : > { %v15295_v53 = vld [vmem:[#allocation5 + $0xa24] ss:$48 sps:$4 sm:$0xff]   ;;  %v15298_v55 = vld [vmem:[#allocation5 + $0xa20] ss:$48 sps:$4 sm:$0xff]   ;;  %v15346_v25 = vld [vmem:[#allocation5 + $0x72c] ss:$48 sps:$4 sm:$0xff]  }
 0x103   : > { %3005 = vmatpush1.bf16.msra.mxu0 %v15261_v26  ;;  %v15299_v56 = vld [vmem:[#allocation5 + $0x3c4] ss:$48 sps:$4 sm:$0xff]   ;;  %v15303_v58 = vld [vmem:[#allocation5 + $0x3c0] ss:$48 sps:$4 sm:$0xff]   ;;  %v15341_v26 = vld [vmem:[#allocation5 + $0x128] ss:$48 sps:$4 sm:$0xff]  }
 0x104   : > { %3046 = vmatpush1.bf16.msra.mxu1 %v15262_v27  ;;  %3006 = vmatprep.subr.bf16.mxu0 %v15263_v28  ;;  %v15301_v57 = vld [vmem:[#allocation5 + $0x9c4] ss:$48 sps:$4 sm:$0xff]   ;;  %v15304_v59 = vld [vmem:[#allocation5 + $0x9c0] ss:$48 sps:$4 sm:$0xff]   ;;  %v15344_v27 = vld [vmem:[#allocation5 + $0x728] ss:$48 sps:$4 sm:$0xff]  }
 0x105   : > { %3047 = vmatprep.subr.bf16.mxu1 %v15265_v29  ;;  %v15305_v60 = vld [vmem:[#allocation5 + $0x364] ss:$48 sps:$4 sm:$0xff]   ;;  %v15309_v62 = vld [vmem:[#allocation5 + $0x360] ss:$48 sps:$4 sm:$0xff]   ;;  %v15349_v28 = vld [vmem:[#allocation5 + $0xcc] ss:$48 sps:$4 sm:$0xff]  }
 0x106   : > { %v15307_v61 = vld [vmem:[#allocation5 + $0x964] ss:$48 sps:$4 sm:$0xff]   ;;  %v15310_v63 = vld [vmem:[#allocation5 + $0x960] ss:$48 sps:$4 sm:$0xff]   ;;  %v15352_v29 = vld [vmem:[#allocation5 + $0x6cc] ss:$48 sps:$4 sm:$0xff]  }
 0x107   : > { %3007 = vmatpush1.bf16.msra.mxu0 %v15267_v30  ;;  %v15311_v0 = vld [vmem:[#allocation5 + $0x304] ss:$48 sps:$4 sm:$0xff]   ;;  %v15315_v2 = vld [vmem:[#allocation5 + $0x300] ss:$48 sps:$4 sm:$0xff]   ;;  %v15347_v30 = vld [vmem:[#allocation5 + $0xc8] ss:$48 sps:$4 sm:$0xff]  }
 0x108   : > { %3048 = vmatpush1.bf16.msra.mxu1 %v15268_v31  ;;  %3008 = vmatprep.subr.bf16.mxu0 %v15269_v32  ;;  %v15313_v1 = vld [vmem:[#allocation5 + $0x904] ss:$48 sps:$4 sm:$0xff]   ;;  %v15316_v3 = vld [vmem:[#allocation5 + $0x900] ss:$48 sps:$4 sm:$0xff]   ;;  %v15350_v31 = vld [vmem:[#allocation5 + $0x6c8] ss:$48 sps:$4 sm:$0xff]  }
 0x109   : > { %3049 = vmatprep.subr.bf16.mxu1 %v15271_v33  ;;  %v616_v4 = vld [vmem:[%s17540_s7] sm:$0xff]  ;;  %v618_v5 = vld [vmem:[%s17540_s7 + $0x10] sm:$0xff]  ;;  %v15355_v32 = vld [vmem:[#allocation5 + $0x6c] ss:$48 sps:$4 sm:$0xff]   ;;  %s13131_s15 = sshll.u32 %s614_s4, 4  ;;  %s13117_s14 = scalar_lea.sflag [#allocation4], %s17534_s5  ;;  %s18159_s15 = int_to_ptr.vmem [resolvable:$true] %s13131_s15 }
 0x10a   : > { %v17580_v8 = vpack.c.bf16 %v616_v4, %v616_v4  ;;  %v17582_v9 = vpack.c.bf16 %v618_v5, %v618_v5  ;;  %v15358_v33 = vld [vmem:[#allocation5 + $0x66c] ss:$48 sps:$4 sm:$0xff]   ;;  %v15401_v4 = vld [vmem:[#allocation5 + $0x368] ss:$48 sps:$4 sm:$0xff]   ;;  %s17141_s30 = scalar_lea.vmem %s18159_s15, 512  ;;  %p18262_p6 = scmp.ne.s32.totalorder %s18244_s23, 0 }
 0x10b   : > { %3009 = vmatpush2.bf16.msra.mxu0 %v15273_v34  ;;  %v15353_v34 = vld [vmem:[#allocation5 + $0x68] ss:$48 sps:$4 sm:$0xff]   ;;  %p17142_p2 = scmp.ne.s32.totalorder %s18159_s15, %s17141_s30  ;;  %s17253_s21 = smov [#allocation23]  }
 0x10c   : > { %3050 = vmatpush2.bf16.msra.mxu1 %v15274_v35  ;;  %3010 = vmatprep.subr.bf16.mxu0 %v15275_v36  ;;  %v15356_v35 = vld [vmem:[#allocation5 + $0x668] ss:$48 sps:$4 sm:$0xff]   ;;  %v15361_v36 = vld [vmem:[#allocation5 + $0xc] ss:$48 sps:$4 sm:$0xff]   ;;  %s17145_s20 = sshll.u32 %s17253_s21, 4  ;;  %s17146_s20 = int_to_ptr.vmem [resolvable:$false] %s17145_s20 }
 0x10d   : > { %3051 = vmatprep.subr.bf16.mxu1 %v15277_v37  ;;  %v15364_v37 = vld [vmem:[#allocation5 + $0x60c] ss:$48 sps:$4 sm:$0xff]   ;;  %v15404_v5 = vld [vmem:[#allocation5 + $0x968] ss:$48 sps:$4 sm:$0xff]   ;;  %p17143_p13 = pnand %p17142_p2, %p18262_p6  ;;  %s17147_s17 = scalar_lea.vmem %s17146_s20, 1024 }
 0x10e   : > { %p17148_p1 = scmp.lt.s32.totalorder %s18159_s15, %s17146_s20  ;;  %p17149_p7 = scmp.lt.s32.totalorder %s17147_s17, %s17141_s30 }
 0x10f   : > { %3011 = vmatpush2.bf16.msra.mxu0 %v15279_v38  ;;  %v15359_v38 = vld [vmem:[#allocation5 + $0x8] ss:$48 sps:$4 sm:$0xff]   ;;  %p17144_p0 = pneg %p17143_p13 }
 0x110   : > { %3052 = vmatpush2.bf16.msra.mxu1 %v15280_v39  ;;  %3012 = vmatprep.subr.bf16.mxu0 %v15281_v40  ;;  %v15362_v39 = vld [vmem:[#allocation5 + $0x608] ss:$48 sps:$4 sm:$0xff]   ;;  %v15367_v40 = vld [vmem:[#allocation5 + $0x5ac] ss:$48 sps:$4 sm:$0xff]   ;;  %p17150_p8 = por %p17149_p7, %p17148_p1 }
 0x111   : > { %3053 = vmatprep.subr.bf16.mxu1 %v15283_v41  ;;  %v15370_v41 = vld [vmem:[#allocation5 + $0xbac] ss:$48 sps:$4 sm:$0xff]  }
 0x112   : > { %p17151_p4 = pnand %p17150_p8, %p17144_p0 }
 0x113   : > { %3013 = vmatpush2.bf16.msra.mxu0 %v15285_v42  ;;  %v15365_v42 = vld [vmem:[#allocation5 + $0x5a8] ss:$48 sps:$4 sm:$0xff]  }
 0x114   : > { %3054 = vmatpush2.bf16.msra.mxu1 %v15286_v43  ;;  %3014 = vmatprep.subr.bf16.mxu0 %v15287_v44  ;;  %v15368_v43 = vld [vmem:[#allocation5 + $0xba8] ss:$48 sps:$4 sm:$0xff]   ;;  %v15373_v44 = vld [vmem:[#allocation5 + $0x54c] ss:$48 sps:$4 sm:$0xff]  }
 0x115   : > { %3055 = vmatprep.subr.bf16.mxu1 %v15289_v45  ;;  %v15376_v45 = vld [vmem:[#allocation5 + $0xb4c] ss:$48 sps:$4 sm:$0xff]  }
 0x117   : > { %3015 = vmatpush2.bf16.msra.mxu0 %v15291_v47  ;;  %v15374_v47 = vld [vmem:[#allocation5 + $0xb48] ss:$48 sps:$4 sm:$0xff]  }
 0x118   : > { %3056 = vmatpush2.bf16.msra.mxu1 %v15292_v48  ;;  %3016 = vmatprep.subr.bf16.mxu0 %v15293_v51  ;;  %v15379_v48 = vld [vmem:[#allocation5 + $0x4ec] ss:$48 sps:$4 sm:$0xff]   ;;  %v15377_v51 = vld [vmem:[#allocation5 + $0x4e8] ss:$48 sps:$4 sm:$0xff]  }
 0x119   : > { %3057 = vmatprep.subr.bf16.mxu1 %v15295_v53  ;;  %v15380_v53 = vld [vmem:[#allocation5 + $0xae8] ss:$48 sps:$4 sm:$0xff]  }
 0x11b   : > { %3017 = vmatpush2.bf16.msra.mxu0 %v15297_v54  ;;  %v15385_v54 = vld [vmem:[#allocation5 + $0x48c] ss:$48 sps:$4 sm:$0xff]  }
 0x11c   : > { %3058 = vmatpush2.bf16.msra.mxu1 %v15298_v55  ;;  %3018 = vmatprep.subr.bf16.mxu0 %v15299_v56  ;;  %v15388_v55 = vld [vmem:[#allocation5 + $0xa8c] ss:$48 sps:$4 sm:$0xff]   ;;  %v15383_v56 = vld [vmem:[#allocation5 + $0x488] ss:$48 sps:$4 sm:$0xff]  }
 0x11d   : > { %3059 = vmatprep.subr.bf16.mxu1 %v15301_v57  ;;  %v15386_v57 = vld [vmem:[#allocation5 + $0xa88] ss:$48 sps:$4 sm:$0xff]  }
 0x11f   : > { %3019 = vmatpush2.bf16.msra.mxu0 %v15303_v58  ;;  %v15391_v58 = vld [vmem:[#allocation5 + $0x42c] ss:$48 sps:$4 sm:$0xff]  }
 0x120   : > { %3060 = vmatpush2.bf16.msra.mxu1 %v15304_v59  ;;  %3020 = vmatprep.subr.bf16.mxu0 %v15305_v60  ;;  %v15394_v59 = vld [vmem:[#allocation5 + $0xa2c] ss:$48 sps:$4 sm:$0xff]   ;;  %v15389_v60 = vld [vmem:[#allocation5 + $0x428] ss:$48 sps:$4 sm:$0xff]  }
 0x121   : > { %3061 = vmatprep.subr.bf16.mxu1 %v15307_v61  ;;  %v15392_v61 = vld [vmem:[#allocation5 + $0xa28] ss:$48 sps:$4 sm:$0xff]  }
 0x123   : > { %3021 = vmatpush2.bf16.msra.mxu0 %v15309_v62  ;;  %v15397_v62 = vld [vmem:[#allocation5 + $0x3cc] ss:$48 sps:$4 sm:$0xff]  }
 0x124   : > { %3062 = vmatpush2.bf16.msra.mxu1 %v15310_v63  ;;  %3022 = vmatprep.subr.bf16.mxu0 %v15311_v0  ;;  %v15400_v63 = vld [vmem:[#allocation5 + $0x9cc] ss:$48 sps:$4 sm:$0xff]   ;;  %v15395_v0 = vld [vmem:[#allocation5 + $0x3c8] ss:$48 sps:$4 sm:$0xff]  }
 0x125   : > { %3063 = vmatprep.subr.bf16.mxu1 %v15313_v1  ;;  %v15398_v1 = vld [vmem:[#allocation5 + $0x9c8] ss:$48 sps:$4 sm:$0xff]  }
 0x127   : > { %3023 = vmatpush2.bf16.msra.mxu0 %v15315_v2  ;;  %v15403_v2 = vld [vmem:[#allocation5 + $0x36c] ss:$48 sps:$4 sm:$0xff]  }
 0x128   : > { %3064 = vmatpush2.bf16.msra.mxu1 %v15316_v3  ;;  %3074 = vmatprep.subr.bf16.mxu0 %v15319_v6  ;;  %v15406_v3 = vld [vmem:[#allocation5 + $0x96c] ss:$48 sps:$4 sm:$0xff]  }
 0x129   : > { %3115 = vmatprep.subr.bf16.mxu1 %v15322_v7  ;;  %v15409_v6 = vld [vmem:[#allocation5 + $0x30c] ss:$48 sps:$4 sm:$0xff]  }
 0x12a   : > { %3025 = vmatmul.mubr.bf16.vlgmr.msra.gmra.mxu0 %v17580_v8  ;;  %v15412_v7 = vld [vmem:[#allocation5 + $0x90c] ss:$48 sps:$4 sm:$0xff]  }
 0x12b   : > { %3066 = vmatmul.mubr.bf16.vlgmr.msra.gmra.mxu1 %v17582_v9  ;;  %3075 = vmatpush1.bf16.msra.mxu0 %v15317_v10  ;;  %v15407_v10 = vld [vmem:[#allocation5 + $0x308] ss:$48 sps:$4 sm:$0xff]  }
 0x12c   : > { %3116 = vmatpush1.bf16.msra.mxu1 %v15320_v11  ;;  %3076 = vmatprep.subr.bf16.mxu0 %v15325_v12  ;;  %v15410_v11 = vld [vmem:[#allocation5 + $0x908] ss:$48 sps:$4 sm:$0xff]   ;;  %v15415_v12 = vld [vmem:[#allocation5 + $0x2b4] ss:$48 sps:$4 sm:$0xff]  }
 0x12d   : > { %3117 = vmatprep.subr.bf16.mxu1 %v15328_v13  ;;  %3106 = vmatprep.mubr.bf16.mxu0 %v17571_v49  ;;  %v15418_v13 = vld [vmem:[#allocation5 + $0x8b4] ss:$48 sps:$4 sm:$0xff]  }
 0x12e   : > { %3147 = vmatprep.mubr.bf16.mxu1 %v17574_v52 }
 0x12f   : > { %3077 = vmatpush1.bf16.msra.mxu0 %v15323_v14  ;;  %v15413_v14 = vld [vmem:[#allocation5 + $0x2b0] ss:$48 sps:$4 sm:$0xff]  }
 0x130   : > { %3118 = vmatpush1.bf16.msra.mxu1 %v15326_v15  ;;  %3078 = vmatprep.subr.bf16.mxu0 %v15331_v16  ;;  %v15416_v15 = vld [vmem:[#allocation5 + $0x8b0] ss:$48 sps:$4 sm:$0xff]   ;;  %v15421_v16 = vld [vmem:[#allocation5 + $0x254] ss:$48 sps:$4 sm:$0xff]  }
 0x131   : > { %3119 = vmatprep.subr.bf16.mxu1 %v15334_v17  ;;  %v15424_v17 = vld [vmem:[#allocation5 + $0x854] ss:$48 sps:$4 sm:$0xff]  }
 0x133   : > { %3079 = vmatpush1.bf16.msra.mxu0 %v15329_v18  ;;  %v15419_v18 = vld [vmem:[#allocation5 + $0x250] ss:$48 sps:$4 sm:$0xff]  }
 0x134   : > { %3120 = vmatpush1.bf16.msra.mxu1 %v15332_v19  ;;  %3080 = vmatprep.subr.bf16.mxu0 %v15337_v20  ;;  %v15422_v19 = vld [vmem:[#allocation5 + $0x850] ss:$48 sps:$4 sm:$0xff]   ;;  %v15427_v20 = vld [vmem:[#allocation5 + $0x1f4] ss:$48 sps:$4 sm:$0xff]  }
 0x135   : > { %3121 = vmatprep.subr.bf16.mxu1 %v15340_v21  ;;  %v15430_v21 = vld [vmem:[#allocation5 + $0x7f4] ss:$48 sps:$4 sm:$0xff]  }
 0x137   : > { %3081 = vmatpush1.bf16.msra.mxu0 %v15335_v22  ;;  %v15425_v22 = vld [vmem:[#allocation5 + $0x1f0] ss:$48 sps:$4 sm:$0xff]  }
 0x138   : > { %3122 = vmatpush1.bf16.msra.mxu1 %v15338_v23  ;;  %3082 = vmatprep.subr.bf16.mxu0 %v15343_v24  ;;  %v15428_v23 = vld [vmem:[#allocation5 + $0x7f0] ss:$48 sps:$4 sm:$0xff]   ;;  %v15433_v24 = vld [vmem:[#allocation5 + $0x194] ss:$48 sps:$4 sm:$0xff]  }
 0x139   : > { %3123 = vmatprep.subr.bf16.mxu1 %v15346_v25  ;;  %v15436_v25 = vld [vmem:[#allocation5 + $0x794] ss:$48 sps:$4 sm:$0xff]  }
 0x13b   : > { %3083 = vmatpush1.bf16.msra.mxu0 %v15341_v26  ;;  %v15431_v26 = vld [vmem:[#allocation5 + $0x190] ss:$48 sps:$4 sm:$0xff]  }
 0x13c   : > { %3124 = vmatpush1.bf16.msra.mxu1 %v15344_v27  ;;  %3084 = vmatprep.subr.bf16.mxu0 %v15349_v28  ;;  %v15434_v27 = vld [vmem:[#allocation5 + $0x790] ss:$48 sps:$4 sm:$0xff]   ;;  %v15439_v28 = vld [vmem:[#allocation5 + $0x134] ss:$48 sps:$4 sm:$0xff]  }
 0x13d   : > { %3125 = vmatprep.subr.bf16.mxu1 %v15352_v29  ;;  %v15442_v29 = vld [vmem:[#allocation5 + $0x734] ss:$48 sps:$4 sm:$0xff]  }
 0x13f   : > { %3085 = vmatpush1.bf16.msra.mxu0 %v15347_v30  ;;  %v15437_v30 = vld [vmem:[#allocation5 + $0x130] ss:$48 sps:$4 sm:$0xff]  }
 0x140   : > { %3126 = vmatpush1.bf16.msra.mxu1 %v15350_v31  ;;  %3086 = vmatprep.subr.bf16.mxu0 %v15355_v32  ;;  %v15440_v31 = vld [vmem:[#allocation5 + $0x730] ss:$48 sps:$4 sm:$0xff]   ;;  %v15445_v32 = vld [vmem:[#allocation5 + $0xd4] ss:$48 sps:$4 sm:$0xff]  }
 0x141   : > { %3127 = vmatprep.subr.bf16.mxu1 %v15358_v33  ;;  %v15448_v33 = vld [vmem:[#allocation5 + $0x6d4] ss:$48 sps:$4 sm:$0xff]  }
 0x143   : > { %3087 = vmatpush1.bf16.msra.mxu0 %v15353_v34  ;;  %v15443_v34 = vld [vmem:[#allocation5 + $0xd0] ss:$48 sps:$4 sm:$0xff]  }
 0x144   : > { %3128 = vmatpush1.bf16.msra.mxu1 %v15356_v35  ;;  %3088 = vmatprep.subr.bf16.mxu0 %v15361_v36  ;;  %v15446_v35 = vld [vmem:[#allocation5 + $0x6d0] ss:$48 sps:$4 sm:$0xff]   ;;  %v15451_v36 = vld [vmem:[#allocation5 + $0x74] ss:$48 sps:$4 sm:$0xff]  }
 0x145   : > { %3129 = vmatprep.subr.bf16.mxu1 %v15364_v37  ;;  %v15454_v37 = vld [vmem:[#allocation5 + $0x674] ss:$48 sps:$4 sm:$0xff]  }
 0x147   : > { %3089 = vmatpush1.bf16.msra.mxu0 %v15359_v38  ;;  %v15449_v38 = vld [vmem:[#allocation5 + $0x70] ss:$48 sps:$4 sm:$0xff]  }
 0x148   : > { %3130 = vmatpush1.bf16.msra.mxu1 %v15362_v39  ;;  %3090 = vmatprep.subr.bf16.mxu0 %v15367_v40  ;;  %v15452_v39 = vld [vmem:[#allocation5 + $0x670] ss:$48 sps:$4 sm:$0xff]   ;;  %v15457_v40 = vld [vmem:[#allocation5 + $0x14] ss:$48 sps:$4 sm:$0xff]  }
 0x149   : > { %3131 = vmatprep.subr.bf16.mxu1 %v15370_v41  ;;  %v15460_v41 = vld [vmem:[#allocation5 + $0x614] ss:$48 sps:$4 sm:$0xff]  }
 0x14b   : > { %3091 = vmatpush2.bf16.msra.mxu0 %v15365_v42  ;;  %v15455_v42 = vld [vmem:[#allocation5 + $0x10] ss:$48 sps:$4 sm:$0xff]  }
 0x14c   : > { %3132 = vmatpush2.bf16.msra.mxu1 %v15368_v43  ;;  %3092 = vmatprep.subr.bf16.mxu0 %v15373_v44  ;;  %v15458_v43 = vld [vmem:[#allocation5 + $0x610] ss:$48 sps:$4 sm:$0xff]   ;;  %v15463_v44 = vld [vmem:[#allocation5 + $0x5b4] ss:$48 sps:$4 sm:$0xff]  }
 0x14d   : > { %3133 = vmatprep.subr.bf16.mxu1 %v15376_v45  ;;  %v15466_v45 = vld [vmem:[#allocation5 + $0xbb4] ss:$48 sps:$4 sm:$0xff]  }
 0x14f   : > { %3093 = vmatpush2.bf16.msra.mxu0 %v15371_v46  ;;  %v15461_v46 = vld [vmem:[#allocation5 + $0x5b0] ss:$48 sps:$4 sm:$0xff]  }
 0x150   : > { %3134 = vmatpush2.bf16.msra.mxu1 %v15374_v47  ;;  %3094 = vmatprep.subr.bf16.mxu0 %v15379_v48  ;;  %v15464_v47 = vld [vmem:[#allocation5 + $0xbb0] ss:$48 sps:$4 sm:$0xff]   ;;  %v15469_v48 = vld [vmem:[#allocation5 + $0x554] ss:$48 sps:$4 sm:$0xff]  }
 0x151   : > { %3135 = vmatprep.subr.bf16.mxu1 %v15382_v50  ;;  %v15472_v50 = vld [vmem:[#allocation5 + $0xb54] ss:$48 sps:$4 sm:$0xff]  }
 0x153   : > { %3095 = vmatpush2.bf16.msra.mxu0 %v15377_v51  ;;  %v15467_v51 = vld [vmem:[#allocation5 + $0x550] ss:$48 sps:$4 sm:$0xff]  }
 0x154   : > { %3136 = vmatpush2.bf16.msra.mxu1 %v15380_v53  ;;  %3096 = vmatprep.subr.bf16.mxu0 %v15385_v54  ;;  %v15470_v53 = vld [vmem:[#allocation5 + $0xb50] ss:$48 sps:$4 sm:$0xff]   ;;  %v15475_v54 = vld [vmem:[#allocation5 + $0x4f4] ss:$48 sps:$4 sm:$0xff]  }
 0x155   : > { %3137 = vmatprep.subr.bf16.mxu1 %v15388_v55  ;;  %v15478_v55 = vld [vmem:[#allocation5 + $0xaf4] ss:$48 sps:$4 sm:$0xff]  }
 0x157   : > { %3097 = vmatpush2.bf16.msra.mxu0 %v15383_v56  ;;  %v15473_v56 = vld [vmem:[#allocation5 + $0x4f0] ss:$48 sps:$4 sm:$0xff]  }
 0x158   : > { %3138 = vmatpush2.bf16.msra.mxu1 %v15386_v57  ;;  %3098 = vmatprep.subr.bf16.mxu0 %v15391_v58  ;;  %v15476_v57 = vld [vmem:[#allocation5 + $0xaf0] ss:$48 sps:$4 sm:$0xff]   ;;  %v15481_v58 = vld [vmem:[#allocation5 + $0x494] ss:$48 sps:$4 sm:$0xff]  }
 0x159   : > { %3139 = vmatprep.subr.bf16.mxu1 %v15394_v59  ;;  %v15484_v59 = vld [vmem:[#allocation5 + $0xa94] ss:$48 sps:$4 sm:$0xff]  }
 0x15b   : > { %3099 = vmatpush2.bf16.msra.mxu0 %v15389_v60  ;;  %v15479_v60 = vld [vmem:[#allocation5 + $0x490] ss:$48 sps:$4 sm:$0xff]  }
 0x15c   : > { %3140 = vmatpush2.bf16.msra.mxu1 %v15392_v61  ;;  %3100 = vmatprep.subr.bf16.mxu0 %v15397_v62  ;;  %v15482_v61 = vld [vmem:[#allocation5 + $0xa90] ss:$48 sps:$4 sm:$0xff]   ;;  %v15487_v62 = vld [vmem:[#allocation5 + $0x434] ss:$48 sps:$4 sm:$0xff]  }
 0x15d   : > { %3141 = vmatprep.subr.bf16.mxu1 %v15400_v63  ;;  %v15490_v63 = vld [vmem:[#allocation5 + $0xa34] ss:$48 sps:$4 sm:$0xff]  }
 0x15f   : > { %3101 = vmatpush2.bf16.msra.mxu0 %v15395_v0  ;;  %v15485_v0 = vld [vmem:[#allocation5 + $0x430] ss:$48 sps:$4 sm:$0xff]  }
 0x160   : > { %3142 = vmatpush2.bf16.msra.mxu1 %v15398_v1  ;;  %3102 = vmatprep.subr.bf16.mxu0 %v15403_v2  ;;  %v15488_v1 = vld [vmem:[#allocation5 + $0xa30] ss:$48 sps:$4 sm:$0xff]   ;;  %v15493_v2 = vld [vmem:[#allocation5 + $0x3d4] ss:$48 sps:$4 sm:$0xff]  }
 0x161   : > { %3143 = vmatprep.subr.bf16.mxu1 %v15406_v3  ;;  %v15496_v3 = vld [vmem:[#allocation5 + $0x9d4] ss:$48 sps:$4 sm:$0xff]  }
 0x163   : > { %3103 = vmatpush2.bf16.msra.mxu0 %v15401_v4  ;;  %v15491_v4 = vld [vmem:[#allocation5 + $0x3d0] ss:$48 sps:$4 sm:$0xff]  }
 0x164   : > { %3144 = vmatpush2.bf16.msra.mxu1 %v15404_v5  ;;  %3104 = vmatprep.subr.bf16.mxu0 %v15409_v6  ;;  %v15494_v5 = vld [vmem:[#allocation5 + $0x9d0] ss:$48 sps:$4 sm:$0xff]   ;;  %v15499_v6 = vld [vmem:[#allocation5 + $0x374] ss:$48 sps:$4 sm:$0xff]  }
 0x165   : > { %3145 = vmatprep.subr.bf16.mxu1 %v15412_v7  ;;  %v15502_v7 = vld [vmem:[#allocation5 + $0x974] ss:$48 sps:$4 sm:$0xff]  }
 0x167   : > { %3105 = vmatpush2.bf16.msra.mxu0 %v15407_v10  ;;  %v15497_v10 = vld [vmem:[#allocation5 + $0x370] ss:$48 sps:$4 sm:$0xff]  }
 0x168   : > { %3146 = vmatpush2.bf16.msra.mxu1 %v15410_v11  ;;  %3156 = vmatprep.subr.bf16.mxu0 %v15415_v12  ;;  %v15500_v11 = vld [vmem:[#allocation5 + $0x970] ss:$48 sps:$4 sm:$0xff]   ;;  %v15505_v12 = vld [vmem:[#allocation5 + $0x314] ss:$48 sps:$4 sm:$0xff]  }
 0x169   : > { %3197 = vmatprep.subr.bf16.mxu1 %v15418_v13  ;;  %v15508_v13 = vld [vmem:[#allocation5 + $0x914] ss:$48 sps:$4 sm:$0xff]  }
 0x16a   : > { %3107 = vmatmul.mubr.bf16.vlgmr.msra.gmra.mxu0 %v17580_v8 }
 0x16b   : > { %3148 = vmatmul.mubr.bf16.vlgmr.msra.gmra.mxu1 %v17582_v9  ;;  %3157 = vmatpush1.bf16.msra.mxu0 %v15413_v14  ;;  %v15503_v14 = vld [vmem:[#allocation5 + $0x310] ss:$48 sps:$4 sm:$0xff]  }
 0x16c   : > { %3198 = vmatpush1.bf16.msra.mxu1 %v15416_v15  ;;  %3158 = vmatprep.subr.bf16.mxu0 %v15421_v16  ;;  %v15506_v15 = vld [vmem:[#allocation5 + $0x910] ss:$48 sps:$4 sm:$0xff]   ;;  %v15511_v16 = vld [vmem:[#allocation5 + $0x2bc] ss:$48 sps:$4 sm:$0xff]  }
 0x16d   : > { %3199 = vmatprep.subr.bf16.mxu1 %v15424_v17  ;;  %3188 = vmatprep.mubr.bf16.mxu0 %v17571_v49  ;;  %v15514_v17 = vld [vmem:[#allocation5 + $0x8bc] ss:$48 sps:$4 sm:$0xff]  }
 0x16e   : > { %3229 = vmatprep.mubr.bf16.mxu1 %v17574_v52 }
 0x16f   : > { %3159 = vmatpush1.bf16.msra.mxu0 %v15419_v18  ;;  %v15509_v18 = vld [vmem:[#allocation5 + $0x2b8] ss:$48 sps:$4 sm:$0xff]  }
 0x170   : > { %3200 = vmatpush1.bf16.msra.mxu1 %v15422_v19  ;;  %3160 = vmatprep.subr.bf16.mxu0 %v15427_v20  ;;  %v15512_v19 = vld [vmem:[#allocation5 + $0x8b8] ss:$48 sps:$4 sm:$0xff]   ;;  %v15517_v20 = vld [vmem:[#allocation5 + $0x25c] ss:$48 sps:$4 sm:$0xff]  }
 0x171   : > { %3201 = vmatprep.subr.bf16.mxu1 %v15430_v21  ;;  %v15520_v21 = vld [vmem:[#allocation5 + $0x85c] ss:$48 sps:$4 sm:$0xff]  }
 0x173   : > { %3161 = vmatpush1.bf16.msra.mxu0 %v15425_v22  ;;  %v15515_v22 = vld [vmem:[#allocation5 + $0x258] ss:$48 sps:$4 sm:$0xff]  }
 0x174   : > { %3202 = vmatpush1.bf16.msra.mxu1 %v15428_v23  ;;  %3162 = vmatprep.subr.bf16.mxu0 %v15433_v24  ;;  %v15518_v23 = vld [vmem:[#allocation5 + $0x858] ss:$48 sps:$4 sm:$0xff]   ;;  %v15523_v24 = vld [vmem:[#allocation5 + $0x1fc] ss:$48 sps:$4 sm:$0xff]  }
 0x175   : > { %3203 = vmatprep.subr.bf16.mxu1 %v15436_v25  ;;  %v15526_v25 = vld [vmem:[#allocation5 + $0x7fc] ss:$48 sps:$4 sm:$0xff]  }
 0x177   : > { %3163 = vmatpush1.bf16.msra.mxu0 %v15431_v26  ;;  %v15521_v26 = vld [vmem:[#allocation5 + $0x1f8] ss:$48 sps:$4 sm:$0xff]  }
 0x178   : > { %3204 = vmatpush1.bf16.msra.mxu1 %v15434_v27  ;;  %3164 = vmatprep.subr.bf16.mxu0 %v15439_v28  ;;  %v15524_v27 = vld [vmem:[#allocation5 + $0x7f8] ss:$48 sps:$4 sm:$0xff]   ;;  %v15529_v28 = vld [vmem:[#allocation5 + $0x19c] ss:$48 sps:$4 sm:$0xff]  }
 0x179   : > { %3205 = vmatprep.subr.bf16.mxu1 %v15442_v29  ;;  %v15532_v29 = vld [vmem:[#allocation5 + $0x79c] ss:$48 sps:$4 sm:$0xff]  }
 0x17b   : > { %3165 = vmatpush1.bf16.msra.mxu0 %v15437_v30  ;;  %v15527_v30 = vld [vmem:[#allocation5 + $0x198] ss:$48 sps:$4 sm:$0xff]  }
 0x17c   : > { %3206 = vmatpush1.bf16.msra.mxu1 %v15440_v31  ;;  %3166 = vmatprep.subr.bf16.mxu0 %v15445_v32  ;;  %v15530_v31 = vld [vmem:[#allocation5 + $0x798] ss:$48 sps:$4 sm:$0xff]   ;;  %v15535_v32 = vld [vmem:[#allocation5 + $0x13c] ss:$48 sps:$4 sm:$0xff]  }
 0x17d   : > { %3207 = vmatprep.subr.bf16.mxu1 %v15448_v33  ;;  %v15538_v33 = vld [vmem:[#allocation5 + $0x73c] ss:$48 sps:$4 sm:$0xff]  }
 0x17f   : > { %3167 = vmatpush1.bf16.msra.mxu0 %v15443_v34  ;;  %v15533_v34 = vld [vmem:[#allocation5 + $0x138] ss:$48 sps:$4 sm:$0xff]  }
 0x180   : > { %3208 = vmatpush1.bf16.msra.mxu1 %v15446_v35  ;;  %3168 = vmatprep.subr.bf16.mxu0 %v15451_v36  ;;  %v15536_v35 = vld [vmem:[#allocation5 + $0x738] ss:$48 sps:$4 sm:$0xff]   ;;  %v15541_v36 = vld [vmem:[#allocation5 + $0xdc] ss:$48 sps:$4 sm:$0xff]  }
 0x181   : > { %3209 = vmatprep.subr.bf16.mxu1 %v15454_v37  ;;  %v15544_v37 = vld [vmem:[#allocation5 + $0x6dc] ss:$48 sps:$4 sm:$0xff]  }
 0x183   : > { %3169 = vmatpush1.bf16.msra.mxu0 %v15449_v38  ;;  %v15539_v38 = vld [vmem:[#allocation5 + $0xd8] ss:$48 sps:$4 sm:$0xff]  }
 0x184   : > { %3210 = vmatpush1.bf16.msra.mxu1 %v15452_v39  ;;  %3170 = vmatprep.subr.bf16.mxu0 %v15457_v40  ;;  %v15542_v39 = vld [vmem:[#allocation5 + $0x6d8] ss:$48 sps:$4 sm:$0xff]   ;;  %v15547_v40 = vld [vmem:[#allocation5 + $0x7c] ss:$48 sps:$4 sm:$0xff]  }
 0x185   : > { %3211 = vmatprep.subr.bf16.mxu1 %v15460_v41  ;;  %v15550_v41 = vld [vmem:[#allocation5 + $0x67c] ss:$48 sps:$4 sm:$0xff]  }
 0x187   : > { %3171 = vmatpush1.bf16.msra.mxu0 %v15455_v42  ;;  %v15545_v42 = vld [vmem:[#allocation5 + $0x78] ss:$48 sps:$4 sm:$0xff]  }
 0x188   : > { %3212 = vmatpush1.bf16.msra.mxu1 %v15458_v43  ;;  %3172 = vmatprep.subr.bf16.mxu0 %v15463_v44  ;;  %v15548_v43 = vld [vmem:[#allocation5 + $0x678] ss:$48 sps:$4 sm:$0xff]   ;;  %v15553_v44 = vld [vmem:[#allocation5 + $0x1c] ss:$48 sps:$4 sm:$0xff]  }
 0x189   : > { %3213 = vmatprep.subr.bf16.mxu1 %v15466_v45  ;;  %v15556_v45 = vld [vmem:[#allocation5 + $0x61c] ss:$48 sps:$4 sm:$0xff]  }
 0x18b   : > { %3173 = vmatpush2.bf16.msra.mxu0 %v15461_v46  ;;  %v15551_v46 = vld [vmem:[#allocation5 + $0x18] ss:$48 sps:$4 sm:$0xff]  }
 0x18c   : > { %3214 = vmatpush2.bf16.msra.mxu1 %v15464_v47  ;;  %3174 = vmatprep.subr.bf16.mxu0 %v15469_v48  ;;  %v15554_v47 = vld [vmem:[#allocation5 + $0x618] ss:$48 sps:$4 sm:$0xff]   ;;  %v15559_v48 = vld [vmem:[#allocation5 + $0x5bc] ss:$48 sps:$4 sm:$0xff]  }
 0x18d   : > { %3215 = vmatprep.subr.bf16.mxu1 %v15472_v50  ;;  %v15562_v50 = vld [vmem:[#allocation5 + $0xbbc] ss:$48 sps:$4 sm:$0xff]  }
 0x18f   : > { %3175 = vmatpush2.bf16.msra.mxu0 %v15467_v51  ;;  %v15557_v51 = vld [vmem:[#allocation5 + $0x5b8] ss:$48 sps:$4 sm:$0xff]  }
 0x190   : > { %3216 = vmatpush2.bf16.msra.mxu1 %v15470_v53  ;;  %3176 = vmatprep.subr.bf16.mxu0 %v15475_v54  ;;  %v15560_v53 = vld [vmem:[#allocation5 + $0xbb8] ss:$48 sps:$4 sm:$0xff]   ;;  %v15565_v54 = vld [vmem:[#allocation5 + $0x55c] ss:$48 sps:$4 sm:$0xff]  }
 0x191   : > { %3217 = vmatprep.subr.bf16.mxu1 %v15478_v55  ;;  %v15568_v55 = vld [vmem:[#allocation5 + $0xb5c] ss:$48 sps:$4 sm:$0xff]  }
 0x193   : > { %3177 = vmatpush2.bf16.msra.mxu0 %v15473_v56  ;;  %v15563_v56 = vld [vmem:[#allocation5 + $0x558] ss:$48 sps:$4 sm:$0xff]  }
 0x194   : > { %3218 = vmatpush2.bf16.msra.mxu1 %v15476_v57  ;;  %3178 = vmatprep.subr.bf16.mxu0 %v15481_v58  ;;  %v15566_v57 = vld [vmem:[#allocation5 + $0xb58] ss:$48 sps:$4 sm:$0xff]   ;;  %v15571_v58 = vld [vmem:[#allocation5 + $0x4fc] ss:$48 sps:$4 sm:$0xff]  }
 0x195   : > { %3219 = vmatprep.subr.bf16.mxu1 %v15484_v59  ;;  %v15574_v59 = vld [vmem:[#allocation5 + $0xafc] ss:$48 sps:$4 sm:$0xff]  }
 0x197   : > { %3179 = vmatpush2.bf16.msra.mxu0 %v15479_v60  ;;  %v15569_v60 = vld [vmem:[#allocation5 + $0x4f8] ss:$48 sps:$4 sm:$0xff]  }
 0x198   : > { %3220 = vmatpush2.bf16.msra.mxu1 %v15482_v61  ;;  %3180 = vmatprep.subr.bf16.mxu0 %v15487_v62  ;;  %v15572_v61 = vld [vmem:[#allocation5 + $0xaf8] ss:$48 sps:$4 sm:$0xff]   ;;  %v15577_v62 = vld [vmem:[#allocation5 + $0x49c] ss:$48 sps:$4 sm:$0xff]  }
 0x199   : > { %3221 = vmatprep.subr.bf16.mxu1 %v15490_v63  ;;  %v15580_v63 = vld [vmem:[#allocation5 + $0xa9c] ss:$48 sps:$4 sm:$0xff]  }
 0x19b   : > { %3181 = vmatpush2.bf16.msra.mxu0 %v15485_v0  ;;  %v15575_v0 = vld [vmem:[#allocation5 + $0x498] ss:$48 sps:$4 sm:$0xff]  }
 0x19c   : > { %3222 = vmatpush2.bf16.msra.mxu1 %v15488_v1  ;;  %3182 = vmatprep.subr.bf16.mxu0 %v15493_v2  ;;  %v15578_v1 = vld [vmem:[#allocation5 + $0xa98] ss:$48 sps:$4 sm:$0xff]   ;;  %v15583_v2 = vld [vmem:[#allocation5 + $0x43c] ss:$48 sps:$4 sm:$0xff]  }
 0x19d   : > { %3223 = vmatprep.subr.bf16.mxu1 %v15496_v3  ;;  %v15586_v3 = vld [vmem:[#allocation5 + $0xa3c] ss:$48 sps:$4 sm:$0xff]  }
 0x19f   : > { %3183 = vmatpush2.bf16.msra.mxu0 %v15491_v4  ;;  %v15581_v4 = vld [vmem:[#allocation5 + $0x438] ss:$48 sps:$4 sm:$0xff]  }
 0x1a0   : > { %3224 = vmatpush2.bf16.msra.mxu1 %v15494_v5  ;;  %3184 = vmatprep.subr.bf16.mxu0 %v15499_v6  ;;  %v15584_v5 = vld [vmem:[#allocation5 + $0xa38] ss:$48 sps:$4 sm:$0xff]   ;;  %v15589_v6 = vld [vmem:[#allocation5 + $0x3dc] ss:$48 sps:$4 sm:$0xff]  }
 0x1a1   : > { %3225 = vmatprep.subr.bf16.mxu1 %v15502_v7  ;;  %v15592_v7 = vld [vmem:[#allocation5 + $0x9dc] ss:$48 sps:$4 sm:$0xff]  }
 0x1a3   : > { %3185 = vmatpush2.bf16.msra.mxu0 %v15497_v10  ;;  %v1012_v10 = vlaneseq }
 0x1a4   : > { %3226 = vmatpush2.bf16.msra.mxu1 %v15500_v11  ;;  %3186 = vmatprep.subr.bf16.mxu0 %v15505_v12  ;;  %v15587_v11 = vld [vmem:[#allocation5 + $0x3d8] ss:$48 sps:$4 sm:$0xff]  }
 0x1a5   : > { %3227 = vmatprep.subr.bf16.mxu1 %v15508_v13  ;;  %v15590_v12 = vld [vmem:[#allocation5 + $0x9d8] ss:$48 sps:$4 sm:$0xff]   ;;  %v15595_v13 = vld [vmem:[#allocation5 + $0x37c] ss:$48 sps:$4 sm:$0xff]  }
 0x1a7   : > { %3187 = vmatpush2.bf16.msra.mxu0 %v15503_v14  ;;  %v15598_v14 = vld [vmem:[#allocation5 + $0x97c] ss:$48 sps:$4 sm:$0xff]  }
 0x1a8   : > { %3228 = vmatpush2.bf16.msra.mxu1 %v15506_v15  ;;  %3238 = vmatprep.subr.bf16.mxu0 %v15511_v16  ;;  %v17596_v15 = vshrl.u32 %v1012_v10, 7  ;;  %v15593_v16 = vld [vmem:[#allocation5 + $0x378] ss:$48 sps:$4 sm:$0xff]   ;;  %v15631_v10 = vld [vmem:[#allocation5 + $0x5c4] ss:$48 sps:$4 sm:$0xff]  }
 0x1a9   : > { %3279 = vmatprep.subr.bf16.mxu1 %v15514_v17  ;;  %v15596_v17 = vld [vmem:[#allocation5 + $0x978] ss:$48 sps:$4 sm:$0xff]  }
 0x1aa   : > { %3189 = vmatmul.mubr.bf16.vlgmr.msra.gmra.mxu0 %v17580_v8 }
 0x1ab   : > { %3230 = vmatmul.mubr.bf16.vlgmr.msra.gmra.mxu1 %v17582_v9  ;;  %3239 = vmatpush1.bf16.msra.mxu0 %v15509_v18  ;;  %v15601_v18 = vld [vmem:[#allocation5 + $0x31c] ss:$48 sps:$4 sm:$0xff]  }
 0x1ac   : > { %3280 = vmatpush1.bf16.msra.mxu1 %v15512_v19  ;;  %3240 = vmatprep.subr.bf16.mxu0 %v15517_v20  ;;  %v15604_v19 = vld [vmem:[#allocation5 + $0x91c] ss:$48 sps:$4 sm:$0xff]   ;;  %v15599_v20 = vld [vmem:[#allocation5 + $0x318] ss:$48 sps:$4 sm:$0xff]  }
 0x1ad   : > { %3281 = vmatprep.subr.bf16.mxu1 %v15520_v21  ;;  %3270 = vmatprep.mubr.bf16.mxu0 %v17571_v49  ;;  %v15602_v21 = vld [vmem:[#allocation5 + $0x918] ss:$48 sps:$4 sm:$0xff]  }
 0x1ae   : > { %3311 = vmatprep.mubr.bf16.mxu1 %v17574_v52 }
 0x1af   : > { %3241 = vmatpush1.bf16.msra.mxu0 %v15515_v22  ;;  %v17598_v22 = vld [vmem:[#allocation7] sm:$0xff] }
 0x1b0   : > { %3282 = vmatpush1.bf16.msra.mxu1 %v15518_v23  ;;  %3242 = vmatprep.subr.bf16.mxu0 %v15523_v24  ;;  %v15607_v23 = vld [vmem:[#allocation5 + $0x2c4] ss:$48 sps:$4 sm:$0xff]  }
 0x1b1   : > { %3283 = vmatprep.subr.bf16.mxu1 %v15526_v25  ;;  %v15688_v24 = vld [vmem:[#allocation5 + $0x8c4] ss:$48 sps:$4 sm:$0xff]   ;;  %v17601_v25 = vsub.s32 0, %v17596_v15 }
 0x1b3   : > { %3243 = vmatpush1.bf16.msra.mxu0 %v15521_v26  ;;  %v17604_v26 = vsub.s32 1, %v17596_v15 }
 0x1b4   : > { %3284 = vmatpush1.bf16.msra.mxu1 %v15524_v27  ;;  %3244 = vmatprep.subr.bf16.mxu0 %v15529_v28  ;;  %v15605_v27 = vld [vmem:[#allocation5 + $0x2c0] ss:$48 sps:$4 sm:$0xff]   ;;  %v15610_v28 = vld [vmem:[#allocation5 + $0x264] ss:$48 sps:$4 sm:$0xff]  }
 0x1b5   : > { %3285 = vmatprep.subr.bf16.mxu1 %v15532_v29  ;;  %v15686_v29 = vld [vmem:[#allocation5 + $0x8c0] ss:$48 sps:$4 sm:$0xff]  }
 0x1b7   : > { %3245 = vmatpush1.bf16.msra.mxu0 %v15527_v30  ;;  %v1015_v30 = vrot.slane %v17598_v22, %v17601_v25 }
 0x1b8   : > { %3286 = vmatpush1.bf16.msra.mxu1 %v15530_v31  ;;  %3246 = vmatprep.subr.bf16.mxu0 %v15535_v32  ;;  %v15694_v31 = vld [vmem:[#allocation5 + $0x864] ss:$48 sps:$4 sm:$0xff]   ;;  %v1019_v32 = vrot.slane %v17598_v22, %v17604_v26 }
 0x1b9   : > { %3287 = vmatprep.subr.bf16.mxu1 %v15538_v33 }
 0x1bb   : > { %3247 = vmatpush1.bf16.msra.mxu0 %v15533_v34 }
 0x1bc   : > { %3288 = vmatpush1.bf16.msra.mxu1 %v15536_v35  ;;  %3248 = vmatprep.subr.bf16.mxu0 %v15541_v36  ;;  %v15608_v35 = vld [vmem:[#allocation5 + $0x260] ss:$48 sps:$4 sm:$0xff]  }
 0x1bd   : > { %3289 = vmatprep.subr.bf16.mxu1 %v15544_v37  ;;  %v15613_v37 = vld [vmem:[#allocation5 + $0x204] ss:$48 sps:$4 sm:$0xff]  }
 0x1bf   : > { %3249 = vmatpush1.bf16.msra.mxu0 %v15539_v38  ;;  %v15692_v38 = vld [vmem:[#allocation5 + $0x860] ss:$48 sps:$4 sm:$0xff]  }
 0x1c0   : > { %3290 = vmatpush1.bf16.msra.mxu1 %v15542_v39  ;;  %3250 = vmatprep.subr.bf16.mxu0 %v15547_v40 }
 0x1c1   : > { %3291 = vmatprep.subr.bf16.mxu1 %v15550_v41  ;;  %v15700_v41 = vld [vmem:[#allocation5 + $0x804] ss:$48 sps:$4 sm:$0xff]  }
 0x1c3   : > { %3251 = vmatpush1.bf16.msra.mxu0 %v15545_v42 }
 0x1c4   : > { %3292 = vmatpush1.bf16.msra.mxu1 %v15548_v43  ;;  %3252 = vmatprep.subr.bf16.mxu0 %v15553_v44  ;;  %v15611_v44 = vld [vmem:[#allocation5 + $0x200] ss:$48 sps:$4 sm:$0xff]  }
 0x1c5   : > { %3293 = vmatprep.subr.bf16.mxu1 %v15556_v45 }
 0x1c7   : > { %3253 = vmatpush1.bf16.msra.mxu0 %v15551_v46 }
 0x1c8   : > { %3294 = vmatpush1.bf16.msra.mxu1 %v15554_v47  ;;  %3254 = vmatprep.subr.bf16.mxu0 %v15559_v48  ;;  %v15616_v47 = vld [vmem:[#allocation5 + $0x1a4] ss:$48 sps:$4 sm:$0xff]   ;;  %v15698_v48 = vld [vmem:[#allocation5 + $0x800] ss:$48 sps:$4 sm:$0xff]  }
 0x1c9   : > { %3295 = vmatprep.subr.bf16.mxu1 %v15562_v50 }
 0x1cb   : > { %3255 = vmatpush2.bf16.msra.mxu0 %v15557_v51  ;;  %v15706_v51 = vld [vmem:[#allocation5 + $0x7a4] ss:$48 sps:$4 sm:$0xff]  }
 0x1cc   : > { %3296 = vmatpush2.bf16.msra.mxu1 %v15560_v53  ;;  %3256 = vmatprep.subr.bf16.mxu0 %v15565_v54 }
 0x1cd   : > { %3297 = vmatprep.subr.bf16.mxu1 %v15568_v55  ;;  %v15614_v55 = vld [vmem:[#allocation5 + $0x1a0] ss:$48 sps:$4 sm:$0xff]  }
 0x1cf   : > { %3257 = vmatpush2.bf16.msra.mxu0 %v15563_v56  ;;  %v15619_v56 = vld [vmem:[#allocation5 + $0x144] ss:$48 sps:$4 sm:$0xff]  }
 0x1d0   : > { %3298 = vmatpush2.bf16.msra.mxu1 %v15566_v57  ;;  %3258 = vmatprep.subr.bf16.mxu0 %v15571_v58  ;;  %v15704_v57 = vld [vmem:[#allocation5 + $0x7a0] ss:$48 sps:$4 sm:$0xff]   ;;  %v15712_v58 = vld [vmem:[#allocation5 + $0x744] ss:$48 sps:$4 sm:$0xff]  }
 0x1d1   : > { %3299 = vmatprep.subr.bf16.mxu1 %v15574_v59  ;;  %v15617_v59 = vld [vmem:[#allocation5 + $0x140] ss:$48 sps:$4 sm:$0xff]  }
 0x1d3   : > { %3259 = vmatpush2.bf16.msra.mxu0 %v15569_v60  ;;  %v15622_v60 = vld [vmem:[#allocation5 + $0xe4] ss:$48 sps:$4 sm:$0xff]  }
 0x1d4   : > { %3300 = vmatpush2.bf16.msra.mxu1 %v15572_v61  ;;  %3260 = vmatprep.subr.bf16.mxu0 %v15577_v62  ;;  %v15710_v61 = vld [vmem:[#allocation5 + $0x740] ss:$48 sps:$4 sm:$0xff]   ;;  %v15718_v62 = vld [vmem:[#allocation5 + $0x6e4] ss:$48 sps:$4 sm:$0xff]  }
 0x1d5   : > { %3301 = vmatprep.subr.bf16.mxu1 %v15580_v63  ;;  %v15620_v63 = vld [vmem:[#allocation5 + $0xe0] ss:$48 sps:$4 sm:$0xff]  }
 0x1d7   : > { %3261 = vmatpush2.bf16.msra.mxu0 %v15575_v0  ;;  %v15625_v0 = vld [vmem:[#allocation5 + $0x84] ss:$48 sps:$4 sm:$0xff]  }
 0x1d8   : > { %3302 = vmatpush2.bf16.msra.mxu1 %v15578_v1  ;;  %3262 = vmatprep.subr.bf16.mxu0 %v15583_v2  ;;  %v15716_v1 = vld [vmem:[#allocation5 + $0x6e0] ss:$48 sps:$4 sm:$0xff]   ;;  %v15721_v2 = vld [vmem:[#allocation5 + $0x684] ss:$48 sps:$4 sm:$0xff]  }
 0x1d9   : > { %3303 = vmatprep.subr.bf16.mxu1 %v15586_v3  ;;  %v15623_v3 = vld [vmem:[#allocation5 + $0x80] ss:$48 sps:$4 sm:$0xff]  }
 0x1db   : > { %3263 = vmatpush2.bf16.msra.mxu0 %v15581_v4  ;;  %v15628_v4 = vld [vmem:[#allocation5 + $0x24] ss:$48 sps:$4 sm:$0xff]  }
 0x1dc   : > { %3304 = vmatpush2.bf16.msra.mxu1 %v15584_v5  ;;  %3264 = vmatprep.subr.bf16.mxu0 %v15589_v6  ;;  %v15719_v5 = vld [vmem:[#allocation5 + $0x680] ss:$48 sps:$4 sm:$0xff]   ;;  %v15724_v6 = vld [vmem:[#allocation5 + $0x624] ss:$48 sps:$4 sm:$0xff]  }
 0x1dd   : > { %3305 = vmatprep.subr.bf16.mxu1 %v15592_v7  ;;  %v15626_v7 = vld [vmem:[#allocation5 + $0x20] ss:$48 sps:$4 sm:$0xff]  }
 0x1df   : > { %3265 = vmatpush2.bf16.msra.mxu0 %v15587_v11  ;;  %v15722_v11 = vld [vmem:[#allocation5 + $0x620] ss:$48 sps:$4 sm:$0xff]  }
 0x1e0   : > { %3306 = vmatpush2.bf16.msra.mxu1 %v15590_v12  ;;  %3266 = vmatprep.subr.bf16.mxu0 %v15595_v13  ;;  %v15629_v12 = vld [vmem:[#allocation5 + $0x5c0] ss:$48 sps:$4 sm:$0xff]   ;;  %v15727_v13 = vld [vmem:[#allocation5 + $0xbc4] ss:$48 sps:$4 sm:$0xff]  }
 0x1e1   : > { %3307 = vmatprep.subr.bf16.mxu1 %v15598_v14  ;;  %v15634_v14 = vld [vmem:[#allocation5 + $0x564] ss:$48 sps:$4 sm:$0xff]  }
 0x1e3   : > { %3267 = vmatpush2.bf16.msra.mxu0 %v15593_v16  ;;  %v15725_v16 = vld [vmem:[#allocation5 + $0xbc0] ss:$48 sps:$4 sm:$0xff]  }
 0x1e4   : > { %3308 = vmatpush2.bf16.msra.mxu1 %v15596_v17  ;;  %3268 = vmatprep.subr.bf16.mxu0 %v15601_v18  ;;  %v15730_v17 = vld [vmem:[#allocation5 + $0xb64] ss:$48 sps:$4 sm:$0xff]   ;;  %v15632_v18 = vld [vmem:[#allocation5 + $0x560] ss:$48 sps:$4 sm:$0xff]  }
 0x1e5   : > { %3309 = vmatprep.subr.bf16.mxu1 %v15604_v19  ;;  %v15637_v19 = vld [vmem:[#allocation5 + $0x504] ss:$48 sps:$4 sm:$0xff]  }
 0x1e7   : > { %3269 = vmatpush2.bf16.msra.mxu0 %v15599_v20  ;;  %v15728_v20 = vld [vmem:[#allocation5 + $0xb60] ss:$48 sps:$4 sm:$0xff]  }
 0x1e8   : > { %3310 = vmatpush2.bf16.msra.mxu1 %v15602_v21  ;;  %3320 = vmatprep.subr.bf16.mxu0 %v15607_v23  ;;  %v15733_v21 = vld [vmem:[#allocation5 + $0xb04] ss:$48 sps:$4 sm:$0xff]   ;;  %v15635_v23 = vld [vmem:[#allocation5 + $0x500] ss:$48 sps:$4 sm:$0xff]  }
 0x1e9   : > { %3361 = vmatprep.subr.bf16.mxu1 %v15688_v24  ;;  %v15640_v24 = vld [vmem:[#allocation5 + $0x4a4] ss:$48 sps:$4 sm:$0xff]  }
 0x1ea   : > { %v3026_v33 = vpop.f32.mrf.mxu0  ;;  %3271 = vmatmul.mubr.bf16.vlgmr.msra.gmra.mxu0 %v17580_v8 }
 0x1eb   : > { %v3067_v34 = vpop.f32.mrf.mxu1  ;;  %3312 = vmatmul.mubr.bf16.vlgmr.msra.gmra.mxu1 %v17582_v9  ;;  %v3027_v36 = vadd.f32 %v3026_v33, %v1015_v30  ;;  %3321 = vmatpush1.bf16.msra.mxu0 %v15605_v27  ;;  %v15731_v27 = vld [vmem:[#allocation5 + $0xb00] ss:$48 sps:$4 sm:$0xff]   ;;  %v15643_v30 = vld [vmem:[#allocation5 + $0x444] ss:$48 sps:$4 sm:$0xff]  }
 0x1ec   : > { %3352 = vmatprep.mubr.bf16.mxu0 %v17571_v49  ;;  %v3028_v39 = vpop.f32.mrf.mxu0  ;;  %3322 = vmatprep.subr.bf16.mxu0 %v15610_v28  ;;  %v15736_v28 = vld [vmem:[#allocation5 + $0xaa4] ss:$48 sps:$4 sm:$0xff]   ;;  %v15641_v33 = vld [vmem:[#allocation5 + $0x440] ss:$48 sps:$4 sm:$0xff]  }
 0x1ed   : > { %v3069_v40 = vpop.f32.mrf.mxu1  ;;  %3362 = vmatpush1.bf16.msra.mxu1 %v15686_v29  ;;  %v17613_v42 = vadd.f32 %v3067_v34, %v3027_v36  ;;  %v3029_v43 = vadd.f32 %v3028_v39, %v1019_v32  ;;  %3393 = vmatprep.mubr.bf16.mxu1 %v17574_v52  ;;  %v15638_v29 = vld [vmem:[#allocation5 + $0x4a0] ss:$48 sps:$4 sm:$0xff]   ;;  %v15739_v32 = vld [vmem:[#allocation5 + $0xa44] ss:$48 sps:$4 sm:$0xff]  }
 0x1ee   : > { %3363 = vmatprep.subr.bf16.mxu1 %v15694_v31  ;;  %v3030_v45 = vpop.f32.mrf.mxu0  ;;  %v15734_v31 = vld [vmem:[#allocation5 + $0xaa0] ss:$48 sps:$4 sm:$0xff]   ;;  %v15646_v34 = vld [vmem:[#allocation5 + $0x3e4] ss:$48 sps:$4 sm:$0xff]  }
 0x1ef   : > { %v3071_v46 = vpop.f32.mrf.mxu1  ;;  %v17616_v50 = vadd.f32 %v3069_v40, %v3029_v43  ;;  %3323 = vmatpush1.bf16.msra.mxu0 %v15608_v35  ;;  %v15737_v35 = vld [vmem:[#allocation5 + $0xa40] ss:$48 sps:$4 sm:$0xff]   ;;  %v15742_v36 = vld [vmem:[#allocation5 + $0x9e4] ss:$48 sps:$4 sm:$0xff]  }
 0x1f0   : > { %v3031_v53 = vpop.f32.mrf.mxu0  ;;  %3324 = vmatprep.subr.bf16.mxu0 %v15613_v37  ;;  %v15644_v37 = vld [vmem:[#allocation5 + $0x3e0] ss:$48 sps:$4 sm:$0xff]   ;;  %v15745_v40 = vld [vmem:[#allocation5 + $0x984] ss:$48 sps:$4 sm:$0xff]  }
 0x1f1   : > { %v3072_v54 = vpop.f32.mrf.mxu1  ;;  %3364 = vmatpush1.bf16.msra.mxu1 %v15692_v38  ;;  %v15649_v38 = vld [vmem:[#allocation5 + $0x384] ss:$48 sps:$4 sm:$0xff]   ;;  %v15740_v39 = vld [vmem:[#allocation5 + $0x9e0] ss:$48 sps:$4 sm:$0xff]   ;;  %v15751_v53 = vld [vmem:[#allocation5 + $0x8cc] ss:$48 sps:$4 sm:$0xff]  }
 0x1f2   : > { %3365 = vmatprep.subr.bf16.mxu1 %v15700_v41  ;;  %v15647_v41 = vld [vmem:[#allocation5 + $0x380] ss:$48 sps:$4 sm:$0xff]   ;;  %v15652_v43 = vld [vmem:[#allocation5 + $0x324] ss:$48 sps:$4 sm:$0xff]   ;;  %v17622_v54 = vsub.s32 3, %v17596_v15 }
 0x1f3   : > { %3325 = vmatpush1.bf16.msra.mxu0 %v15611_v44  ;;  %v15743_v44 = vld [vmem:[#allocation5 + $0x980] ss:$48 sps:$4 sm:$0xff]   ;;  %v15748_v45 = vld [vmem:[#allocation5 + $0x924] ss:$48 sps:$4 sm:$0xff]  }
 0x1f4   : > { %3326 = vmatprep.subr.bf16.mxu0 %v15616_v47  ;;  %v15650_v46 = vld [vmem:[#allocation5 + $0x320] ss:$48 sps:$4 sm:$0xff]   ;;  %v15655_v47 = vld [vmem:[#allocation5 + $0x2cc] ss:$48 sps:$4 sm:$0xff]  }
 0x1f5   : > { %3366 = vmatpush1.bf16.msra.mxu1 %v15698_v48  ;;  %v15746_v48 = vld [vmem:[#allocation5 + $0x920] ss:$48 sps:$4 sm:$0xff]  }
 0x1f6   : > { %3367 = vmatprep.subr.bf16.mxu1 %v15706_v51  ;;  %v17619_v51 = vsub.s32 2, %v17596_v15 }
 0x1f7   : > { %3327 = vmatpush1.bf16.msra.mxu0 %v15614_v55  ;;  %v15653_v55 = vld [vmem:[#allocation5 + $0x2c8] ss:$48 sps:$4 sm:$0xff]  }
 0x1f8   : > { %3328 = vmatprep.subr.bf16.mxu0 %v15619_v56  ;;  %v15658_v56 = vld [vmem:[#allocation5 + $0x26c] ss:$48 sps:$4 sm:$0xff]  }
 0x1f9   : > { %3368 = vmatpush1.bf16.msra.mxu1 %v15704_v57  ;;  %v1023_v57 = vrot.slane %v17598_v22, %v17619_v51 }
 0x1fa   : > { %3369 = vmatprep.subr.bf16.mxu1 %v15712_v58  ;;  %v15749_v58 = vld [vmem:[#allocation5 + $0x8c8] ss:$48 sps:$4 sm:$0xff]  }
 0x1fb   : > { %3329 = vmatpush1.bf16.msra.mxu0 %v15617_v59  ;;  %v1027_v59 = vrot.slane %v17598_v22, %v17622_v54 }
 0x1fc   : > { %3330 = vmatprep.subr.bf16.mxu0 %v15622_v60  ;;  %v15656_v60 = vld [vmem:[#allocation5 + $0x268] ss:$48 sps:$4 sm:$0xff]  }
 0x1fd   : > { %3370 = vmatpush1.bf16.msra.mxu1 %v15710_v61 }
 0x1fe   : > { %3371 = vmatprep.subr.bf16.mxu1 %v15718_v62 }
 0x1ff   : > { %3331 = vmatpush1.bf16.msra.mxu0 %v15620_v63  ;;  %v15661_v63 = vld [vmem:[#allocation5 + $0x20c] ss:$48 sps:$4 sm:$0xff]  }
 0x200   : > { %3332 = vmatprep.subr.bf16.mxu0 %v15625_v0  ;;  %v15754_v0 = vld [vmem:[#allocation5 + $0x86c] ss:$48 sps:$4 sm:$0xff]  }
 0x201   : > { %3372 = vmatpush1.bf16.msra.mxu1 %v15716_v1 }
 0x202   : > { %3373 = vmatprep.subr.bf16.mxu1 %v15721_v2  ;;  %v15752_v2 = vld [vmem:[#allocation5 + $0x868] ss:$48 sps:$4 sm:$0xff]  }
 0x203   : > { %3333 = vmatpush1.bf16.msra.mxu0 %v15623_v3 }
 0x204   : > { %3334 = vmatprep.subr.bf16.mxu0 %v15628_v4 }
 0x205   : > { %3374 = vmatpush1.bf16.msra.mxu1 %v15719_v5 }
 0x206   : > { %3375 = vmatprep.subr.bf16.mxu1 %v15724_v6  ;;  %v15659_v6 = vld [vmem:[#allocation5 + $0x208] ss:$48 sps:$4 sm:$0xff]  }
 0x207   : > { %3335 = vmatpush1.bf16.msra.mxu0 %v15626_v7 }
 0x208   : > { %3336 = vmatprep.subr.bf16.mxu0 %v15631_v10 }
 0x209   : > { %3376 = vmatpush1.bf16.msra.mxu1 %v15722_v11  ;;  %v15664_v11 = vld [vmem:[#allocation5 + $0x1ac] ss:$48 sps:$4 sm:$0xff]  }
 0x20a   : > { %3377 = vmatprep.subr.bf16.mxu1 %v15727_v13 }
 0x20b   : > { %3337 = vmatpush2.bf16.msra.mxu0 %v15629_v12  ;;  %v15757_v12 = vld [vmem:[#allocation5 + $0x80c] ss:$48 sps:$4 sm:$0xff]  }
 0x20c   : > { %3338 = vmatprep.subr.bf16.mxu0 %v15634_v14 }
 0x20d   : > { %3378 = vmatpush2.bf16.msra.mxu1 %v15725_v16 }
 0x20e   : > { %3379 = vmatprep.subr.bf16.mxu1 %v15730_v17  ;;  %v15662_v17 = vld [vmem:[#allocation5 + $0x1a8] ss:$48 sps:$4 sm:$0xff]  }
 0x20f   : > { %3339 = vmatpush2.bf16.msra.mxu0 %v15632_v18  ;;  %v15760_v18 = vld [vmem:[#allocation5 + $0x7ac] ss:$48 sps:$4 sm:$0xff]  }
 0x210   : > { %3340 = vmatprep.subr.bf16.mxu0 %v15637_v19  ;;  %v15667_v19 = vld [vmem:[#allocation5 + $0x14c] ss:$48 sps:$4 sm:$0xff]  }
 0x211   : > { %3380 = vmatpush2.bf16.msra.mxu1 %v15728_v20  ;;  %v15763_v20 = vld [vmem:[#allocation5 + $0x74c] ss:$48 sps:$4 sm:$0xff]  }
 0x212   : > { %3381 = vmatprep.subr.bf16.mxu1 %v15733_v21  ;;  %v15665_v21 = vld [vmem:[#allocation5 + $0x148] ss:$48 sps:$4 sm:$0xff]  }
 0x213   : > { %3341 = vmatpush2.bf16.msra.mxu0 %v15635_v23  ;;  %v15670_v23 = vld [vmem:[#allocation5 + $0xec] ss:$48 sps:$4 sm:$0xff]  }
 0x214   : > { %3342 = vmatprep.subr.bf16.mxu0 %v15640_v24  ;;  %v15761_v24 = vld [vmem:[#allocation5 + $0x748] ss:$48 sps:$4 sm:$0xff]  }
 0x215   : > { %3382 = vmatpush2.bf16.msra.mxu1 %v15731_v27  ;;  %v15668_v27 = vld [vmem:[#allocation5 + $0xe8] ss:$48 sps:$4 sm:$0xff]  }
 0x216   : > { %3383 = vmatprep.subr.bf16.mxu1 %v15736_v28  ;;  %v15673_v28 = vld [vmem:[#allocation5 + $0x8c] ss:$48 sps:$4 sm:$0xff]  }
 0x217   : > { %3343 = vmatpush2.bf16.msra.mxu0 %v15638_v29  ;;  %v15766_v29 = vld [vmem:[#allocation5 + $0x6ec] ss:$48 sps:$4 sm:$0xff]  }
 0x218   : > { %3344 = vmatprep.subr.bf16.mxu0 %v15643_v30  ;;  %v15764_v30 = vld [vmem:[#allocation5 + $0x6e8] ss:$48 sps:$4 sm:$0xff]  }
 0x219   : > { %3384 = vmatpush2.bf16.msra.mxu1 %v15734_v31  ;;  %v15769_v31 = vld [vmem:[#allocation5 + $0x68c] ss:$48 sps:$4 sm:$0xff]  }
 0x21a   : > { %3385 = vmatprep.subr.bf16.mxu1 %v15739_v32  ;;  %v15671_v32 = vld [vmem:[#allocation5 + $0x88] ss:$48 sps:$4 sm:$0xff]  }
 0x21b   : > { %3345 = vmatpush2.bf16.msra.mxu0 %v15641_v33  ;;  %v15676_v33 = vld [vmem:[#allocation5 + $0x2c] ss:$48 sps:$4 sm:$0xff]  }
 0x21c   : > { %3346 = vmatprep.subr.bf16.mxu0 %v15646_v34  ;;  %v15767_v34 = vld [vmem:[#allocation5 + $0x688] ss:$48 sps:$4 sm:$0xff]  }
 0x21d   : > { %3386 = vmatpush2.bf16.msra.mxu1 %v15737_v35  ;;  %v15772_v35 = vld [vmem:[#allocation5 + $0x62c] ss:$48 sps:$4 sm:$0xff]  }
 0x21e   : > { %3387 = vmatprep.subr.bf16.mxu1 %v15742_v36  ;;  %v15674_v36 = vld [vmem:[#allocation5 + $0x28] ss:$48 sps:$4 sm:$0xff]  }
 0x21f   : > { %3347 = vmatpush2.bf16.msra.mxu0 %v15644_v37  ;;  %v15679_v37 = vld [vmem:[#allocation5 + $0x5cc] ss:$48 sps:$4 sm:$0xff]  }
 0x220   : > { %3348 = vmatprep.subr.bf16.mxu0 %v15649_v38  ;;  %v15770_v38 = vld [vmem:[#allocation5 + $0x628] ss:$48 sps:$4 sm:$0xff]  }
 0x221   : > { %3388 = vmatpush2.bf16.msra.mxu1 %v15740_v39  ;;  %v15775_v39 = vld [vmem:[#allocation5 + $0xbcc] ss:$48 sps:$4 sm:$0xff]  }
 0x222   : > { %3389 = vmatprep.subr.bf16.mxu1 %v15745_v40  ;;  %v15677_v40 = vld [vmem:[#allocation5 + $0x5c8] ss:$48 sps:$4 sm:$0xff]  }
 0x223   : > { %3349 = vmatpush2.bf16.msra.mxu0 %v15647_v41  ;;  %v15682_v41 = vld [vmem:[#allocation5 + $0x56c] ss:$48 sps:$4 sm:$0xff]  }
 0x224   : > { %3350 = vmatprep.subr.bf16.mxu0 %v15652_v43  ;;  %v15773_v43 = vld [vmem:[#allocation5 + $0xbc8] ss:$48 sps:$4 sm:$0xff]  }
 0x225   : > { %3390 = vmatpush2.bf16.msra.mxu1 %v15743_v44  ;;  %v15778_v44 = vld [vmem:[#allocation5 + $0xb6c] ss:$48 sps:$4 sm:$0xff]  }
 0x226   : > { %3391 = vmatprep.subr.bf16.mxu1 %v15748_v45  ;;  %v15680_v45 = vld [vmem:[#allocation5 + $0x568] ss:$48 sps:$4 sm:$0xff]  }
 0x227   : > { %3351 = vmatpush2.bf16.msra.mxu0 %v15650_v46  ;;  %v15685_v46 = vld [vmem:[#allocation5 + $0x50c] ss:$48 sps:$4 sm:$0xff]  }
 0x228   : > { %3402 = vmatprep.subr.bf16.mxu0 %v15655_v47  ;;  %v15776_v47 = vld [vmem:[#allocation5 + $0xb68] ss:$48 sps:$4 sm:$0xff]  }
 0x229   : > { %3392 = vmatpush2.bf16.msra.mxu1 %v15746_v48  ;;  %v15781_v48 = vld [vmem:[#allocation5 + $0xb0c] ss:$48 sps:$4 sm:$0xff]  }
 0x22a   : > { %3443 = vmatprep.subr.bf16.mxu1 %v15751_v53  ;;  %v3108_v61 = vpop.f32.mrf.mxu0  ;;  %3353 = vmatmul.mubr.bf16.vlgmr.msra.gmra.mxu0 %v17580_v8  ;;  %v15683_v53 = vld [vmem:[#allocation5 + $0x508] ss:$48 sps:$4 sm:$0xff]  }
 0x22b   : > { %v3149_v62 = vpop.f32.mrf.mxu1  ;;  %v3109_v1 = vadd.f32 %v3108_v61, %v1023_v57  ;;  %3403 = vmatpush1.bf16.msra.mxu0 %v15653_v55  ;;  %3434 = vmatprep.mubr.bf16.mxu0 %v17571_v49  ;;  %v15755_v49 = vld [vmem:[#allocation5 + $0x808] ss:$48 sps:$4 sm:$0xff]   ;;  %v15691_v55 = vld [vmem:[#allocation5 + $0x4ac] ss:$48 sps:$4 sm:$0xff]  }
 0x22c   : > { %v3110_v3 = vpop.f32.mrf.mxu0  ;;  %3404 = vmatprep.subr.bf16.mxu0 %v15658_v56  ;;  %3394 = vmatmul.mubr.bf16.vlgmr.msra.gmra.mxu1 %v17582_v9  ;;  %v15779_v56 = vld [vmem:[#allocation5 + $0xb08] ss:$48 sps:$4 sm:$0xff]   ;;  %v15784_v57 = vld [vmem:[#allocation5 + $0xaac] ss:$48 sps:$4 sm:$0xff]  }
 0x22d   : > { %v3151_v4 = vpop.f32.mrf.mxu1  ;;  %v17631_v5 = vadd.f32 %v3149_v62, %v3109_v1  ;;  %v3111_v22 = vadd.f32 %v3110_v3, %v1027_v59  ;;  %3444 = vmatpush1.bf16.msra.mxu1 %v15749_v58  ;;  %3475 = vmatprep.mubr.bf16.mxu1 %v17574_v52  ;;  %v15758_v52 = vld [vmem:[#allocation5 + $0x7a8] ss:$48 sps:$4 sm:$0xff]   ;;  %v15697_v59 = vld [vmem:[#allocation5 + $0x44c] ss:$48 sps:$4 sm:$0xff]  }
 0x22e   : > { %v3112_v7 = vpop.f32.mrf.mxu0  ;;  %3445 = vmatprep.subr.bf16.mxu1 %v15754_v0  ;;  %v15689_v58 = vld [vmem:[#allocation5 + $0x4a8] ss:$48 sps:$4 sm:$0xff]   ;;  %v15787_v61 = vld [vmem:[#allocation5 + $0xa4c] ss:$48 sps:$4 sm:$0xff]  }
 0x22f   : > { %v3153_v10 = vpop.f32.mrf.mxu1  ;;  %v17634_v13 = vadd.f32 %v3151_v4, %v3111_v22  ;;  %3405 = vmatpush1.bf16.msra.mxu0 %v15656_v60  ;;  %v15782_v60 = vld [vmem:[#allocation5 + $0xaa8] ss:$48 sps:$4 sm:$0xff]   ;;  %v15790_v1 = vld [vmem:[#allocation5 + $0x9ec] ss:$48 sps:$4 sm:$0xff]  }
 0x230   : > { %v3113_v14 = vpop.f32.mrf.mxu0  ;;  %3406 = vmatprep.subr.bf16.mxu0 %v15661_v63  ;;  %v15695_v62 = vld [vmem:[#allocation5 + $0x448] ss:$48 sps:$4 sm:$0xff]   ;;  %v15703_v63 = vld [vmem:[#allocation5 + $0x3ec] ss:$48 sps:$4 sm:$0xff]  }
 0x231   : > { %v3154_v16 = vpop.f32.mrf.mxu1  ;;  %3446 = vmatpush1.bf16.msra.mxu1 %v15752_v2  ;;  %v15785_v0 = vld [vmem:[#allocation5 + $0xa48] ss:$48 sps:$4 sm:$0xff]   ;;  %v15709_v3 = vld [vmem:[#allocation5 + $0x38c] ss:$48 sps:$4 sm:$0xff]  }
 0x232   : > { %3447 = vmatprep.subr.bf16.mxu1 %v15757_v12  ;;  %v15701_v2 = vld [vmem:[#allocation5 + $0x3e8] ss:$48 sps:$4 sm:$0xff]   ;;  %v15793_v22 = vld [vmem:[#allocation5 + $0x98c] ss:$48 sps:$4 sm:$0xff]   ;;  %v17640_v16 = vsub.s32 5, %v17596_v15 }
 0x233   : > { %3407 = vmatpush1.bf16.msra.mxu0 %v15659_v6  ;;  %v15788_v4 = vld [vmem:[#allocation5 + $0x9e8] ss:$48 sps:$4 sm:$0xff]   ;;  %v15715_v7 = vld [vmem:[#allocation5 + $0x32c] ss:$48 sps:$4 sm:$0xff]  }
 0x234   : > { %3408 = vmatprep.subr.bf16.mxu0 %v15664_v11  ;;  %v15707_v6 = vld [vmem:[#allocation5 + $0x388] ss:$48 sps:$4 sm:$0xff]   ;;  %v15796_v11 = vld [vmem:[#allocation5 + $0x92c] ss:$48 sps:$4 sm:$0xff]  }
 0x235   : > { %3448 = vmatpush1.bf16.msra.mxu1 %v15755_v49  ;;  %v15791_v10 = vld [vmem:[#allocation5 + $0x988] ss:$48 sps:$4 sm:$0xff]   ;;  %v17637_v49 = vsub.s32 4, %v17596_v15 }
 0x236   : > { %3449 = vmatprep.subr.bf16.mxu1 %v15760_v18  ;;  %v15713_v12 = vld [vmem:[#allocation5 + $0x328] ss:$48 sps:$4 sm:$0xff]  }
 0x237   : > { %3409 = vmatpush1.bf16.msra.mxu0 %v15662_v17  ;;  %v15794_v14 = vld [vmem:[#allocation5 + $0x928] ss:$48 sps:$4 sm:$0xff]   ;;  %v16793_v17 = vld [vmem:[#allocation7] sm:$0xff] }
 0x238   : > { %3410 = vmatprep.subr.bf16.mxu0 %v15667_v19  ;;  %v1031_v18 = vrot.slane %v16793_v17, %v17637_v49  ;;  %v17250_v19 = vmov 0.0  }
 0x239   : > { %3450 = vmatpush1.bf16.msra.mxu1 %v15758_v52  ;;  %v1035_v52 = vrot.slane %v16793_v17, %v17640_v16 }
 0x23a   : > { %3451 = vmatprep.subr.bf16.mxu1 %v15763_v20 }
 0x23b   : > { %3411 = vmatpush1.bf16.msra.mxu0 %v15665_v21 }
 0x23c   : > { %3412 = vmatprep.subr.bf16.mxu0 %v15670_v23 }
 0x23d   : > { %3452 = vmatpush1.bf16.msra.mxu1 %v15761_v24 }
 0x23e   : > { %3453 = vmatprep.subr.bf16.mxu1 %v15766_v29 }
 0x23f   : > { %3413 = vmatpush1.bf16.msra.mxu0 %v15668_v27 }
 0x240   : > { %3414 = vmatprep.subr.bf16.mxu0 %v15673_v28 }
 0x241   : > { %3454 = vmatpush1.bf16.msra.mxu1 %v15764_v30 }
 0x242   : > { %3455 = vmatprep.subr.bf16.mxu1 %v15769_v31 }
 0x243   : > { %3415 = vmatpush1.bf16.msra.mxu0 %v15671_v32 }
 0x244   : > { %3416 = vmatprep.subr.bf16.mxu0 %v15676_v33 }
 0x245   : > { %3456 = vmatpush1.bf16.msra.mxu1 %v15767_v34 }
 0x246   : > { %3457 = vmatprep.subr.bf16.mxu1 %v15772_v35 }
 0x247   : > { %3417 = vmatpush1.bf16.msra.mxu0 %v15674_v36  ;;  %v3485_v36 = vmul.f32 0.125, %v17616_v50 }
 0x248   : > { %3418 = vmatprep.subr.bf16.mxu0 %v15679_v37 }
 0x249   : > { %3458 = vmatpush1.bf16.msra.mxu1 %v15770_v38 }
 0x24a   : > { %3459 = vmatprep.subr.bf16.mxu1 %v15775_v39  ;;  %v17658_v39 = vpack.c.bf16 %v3485_v36, %v3485_v36 }
 0x24b   : > { %3419 = vmatpush2.bf16.msra.mxu0 %v15677_v40  ;;  %v3487_v40 = vmul.f32 0.125, %v17634_v13 }
 0x24c   : > { %3420 = vmatprep.subr.bf16.mxu0 %v15682_v41 }
 0x24d   : > { %3460 = vmatpush2.bf16.msra.mxu1 %v15773_v43  ;;  %v17672_v41 = vpack.c.bf16 %v3487_v40, %v3487_v40  ;;  %v17680_v43 = vsub.s32 7, %v17596_v15 }
 0x24e   : > { %3461 = vmatprep.subr.bf16.mxu1 %v15778_v44 }
 0x24f   : > { %3421 = vmatpush2.bf16.msra.mxu0 %v15680_v45  ;;  %v1043_v44 = vrot.slane %v16793_v17, %v17680_v43 }
 0x250   : > { %3422 = vmatprep.subr.bf16.mxu0 %v15685_v46 }
 0x251   : > { %3462 = vmatpush2.bf16.msra.mxu1 %v15776_v47 }
 0x252   : > { %3463 = vmatprep.subr.bf16.mxu1 %v15781_v48 }
 0x253   : > { %3423 = vmatpush2.bf16.msra.mxu0 %v15683_v53 }
 0x254   : > { %3424 = vmatprep.subr.bf16.mxu0 %v15691_v55 }
 0x255   : > { %3464 = vmatpush2.bf16.msra.mxu1 %v15779_v56 }
 0x256   : > { %3465 = vmatprep.subr.bf16.mxu1 %v15784_v57 }
 0x257   : > { %3425 = vmatpush2.bf16.msra.mxu0 %v15689_v58 }
 0x258   : > { %3426 = vmatprep.subr.bf16.mxu0 %v15697_v59 }
 0x259   : > { %3466 = vmatpush2.bf16.msra.mxu1 %v15782_v60 }
 0x25a   : > { %3467 = vmatprep.subr.bf16.mxu1 %v15787_v61 }
 0x25b   : > { %3427 = vmatpush2.bf16.msra.mxu0 %v15695_v62 }
 0x25c   : > { %3428 = vmatprep.subr.bf16.mxu0 %v15703_v63 }
 0x25d   : > { %3468 = vmatpush2.bf16.msra.mxu1 %v15785_v0 }
 0x25e   : > { %3469 = vmatprep.subr.bf16.mxu1 %v15790_v1  ;;  %v1009_v1 = vld [vmem:[#allocation7 + $0x8] sm:$0xf] }
 0x25f   : > { %3429 = vmatpush2.bf16.msra.mxu0 %v15701_v2  ;;  %v1047_v2 = vrot.slane %v1009_v1, %v17601_v25 }
 0x260   : > { %3430 = vmatprep.subr.bf16.mxu0 %v15709_v3  ;;  %v1051_v3 = vrot.slane %v1009_v1, %v17604_v26 }
 0x261   : > { %3470 = vmatpush2.bf16.msra.mxu1 %v15788_v4 }
 0x262   : > { %3471 = vmatprep.subr.bf16.mxu1 %v15793_v22 }
 0x263   : > { %3431 = vmatpush2.bf16.msra.mxu0 %v15707_v6 }
 0x264   : > { %3432 = vmatprep.subr.bf16.mxu0 %v15715_v7 }
 0x265   : > { %3472 = vmatpush2.bf16.msra.mxu1 %v15791_v10 }
 0x266   : > { %3473 = vmatprep.subr.bf16.mxu1 %v15796_v11 }
 0x267   : > { %3433 = vmatpush2.bf16.msra.mxu0 %v15713_v12 }
 0x268   : > { %14939 = vmatprep.subr.bf16.mxu0 %v17250_v19 }
 0x269   : > { %3474 = vmatpush2.bf16.msra.mxu1 %v15794_v14 }
 0x26a   : > { %v3190_v20 = vpop.f32.mrf.mxu0  ;;  %3435 = vmatmul.mubr.bf16.vlgmr.msra.gmra.mxu0 %v17580_v8  ;;  %14945 = vmatprep.subr.bf16.mxu1 %v17250_v19  ;;  %v3484_v8 = vmul.f32 0.125, %v17613_v42  ;;  %v3486_v42 = vmul.f32 0.125, %v17631_v5  ;;  %v17677_v5 = vsub.s32 6, %v17596_v15 }
 0x26b   : > { %v3231_v21 = vpop.f32.mrf.mxu1  ;;  %v3191_v23 = vadd.f32 %v3190_v20, %v1031_v18  ;;  %14941 = vmatprep.mubr.msk.bf16.mxu0 %vm17251_vm0, %v17250_v19 }
 0x26c   : > { %v3192_v24 = vpop.f32.mrf.mxu0  ;;  %3476 = vmatmul.mubr.bf16.vlgmr.msra.gmra.mxu1 %v17582_v9  ;;  %v3488_v9 = vpack.c.bf16 %v3484_v8, %v3484_v8  ;;  %v17664_v50 = vpack.c.bf16 %v3486_v42, %v3486_v42  ;;  %v1039_v13 = vrot.slane %v16793_v17, %v17677_v5 }
 0x26d   : > { %v3233_v27 = vpop.f32.mrf.mxu1  ;;  %v3232_v28 = vadd.f32 %v3231_v21, %v3191_v23  ;;  %v3193_v29 = vadd.f32 %v3192_v24, %v1035_v52  ;;  %14947 = vmatprep.mubr.msk.bf16.mxu1 %vm17251_vm0, %v17250_v19 }
 0x26e   : > { %v3194_v30 = vpop.f32.mrf.mxu0 }
 0x26f   : > { %v3235_v31 = vpop.f32.mrf.mxu1  ;;  %v3492_v32 = vpack.c.bf16 %v3232_v28, %v3232_v28  ;;  %v3234_v33 = vadd.f32 %v3233_v27, %v3193_v29 }
 0x270   : > { %v3195_v34 = vpop.f32.mrf.mxu0 }
 0x271   : > { %v3236_v35 = vpop.f32.mrf.mxu1  ;;  %v3505_v37 = vsel %vm3500_vm1, %v3492_v32, 0  ;;  %v3493_v38 = vpack.c.bf16 %v3234_v33, %v3234_v33  ;;  %3611 = vrot.lane.b32.xlu0 %v3492_v32, %s17252_s2  ;;  %v1055_v33 = vrot.slane %v1009_v1, %v17619_v51  ;;  %v1059_v34 = vrot.slane %v1009_v1, %v17622_v54 }
 0x272   : > { %14940 = vmatpush3.bf16.xpose.msra.mxu0 %v3505_v37 }
 0x273   : > { %3828 = vrot.lane.b32.xlu1 %v3493_v38, %s17252_s2  ;;  %14951 = vmatprep.subr.bf16.mxu0 %v17250_v19  ;;  %v3724_v7 = vsel %vm3500_vm1, %v3493_v38, 0 }
 0x275   : > { %3608 = vrot.lane.b32.xlu0 %v3488_v9, %s17252_s2 }
 0x277   : > { %3825 = vrot.lane.b32.xlu1 %v17658_v39, %s17252_s2 }
 0x279   : > { %14942 = vmatmul.mubr.msk.bf16.vlgmr.msra.gmra.mxu0 %vm3500_vm1, %v3488_v9 }
 0x27a   : > { %14953 = vmatprep.mubr.msk.bf16.mxu0 %vm17251_vm0, %v17250_v19 }
 0x27b   : > { %4042 = vrot.lane.b32.xlu1 %v17664_v50, %s17252_s2 }
 0x27f   : > { %4259 = vrot.lane.b32.xlu1 %v17672_v41, %s17252_s2 }
 0x2aa   : > { %v3272_v45 = vpop.f32.mrf.mxu0 }
 0x2ab   : > { %v3313_v46 = vpop.f32.mrf.mxu1  ;;  %v3273_v47 = vadd.f32 %v3272_v45, %v1039_v13 }
 0x2ac   : > { %v3274_v48 = vpop.f32.mrf.mxu0 }
 0x2ad   : > { %v3315_v53 = vpop.f32.mrf.mxu1  ;;  %v3314_v55 = vadd.f32 %v3313_v46, %v3273_v47  ;;  %v3275_v56 = vadd.f32 %v3274_v48, %v1043_v44 }
 0x2ae   : > { %v3276_v57 = vpop.f32.mrf.mxu0 }
 0x2af   : > { %v3317_v58 = vpop.f32.mrf.mxu1  ;;  %v3494_v59 = vpack.c.bf16 %v3314_v55, %v3314_v55  ;;  %v3316_v60 = vadd.f32 %v3315_v53, %v3275_v56 }
 0x2b0   : > { %v3277_v61 = vpop.f32.mrf.mxu0 }
 0x2b1   : > { %v3318_v62 = vpop.f32.mrf.mxu1  ;;  %v3495_v63 = vpack.c.bf16 %v3316_v60, %v3316_v60  ;;  %4045 = vrot.lane.b32.xlu0 %v3494_v59, %s17252_s2  ;;  %v3941_v31 = vsel %vm3500_vm1, %v3494_v59, 0 }
 0x2b3   : > { %v4158_v38 = vsel %vm3500_vm1, %v3495_v63, 0 }
 0x2b5   : > { %4262 = vrot.lane.b32.xlu0 %v3495_v63, %s17252_s2 }
 0x2e3   : > { %v3612_v15 = vpop.permute.xlu0 %3611 }
 0x2e4   : > { %v3617_v0 = vsel %vm3500_vm1, %v3612_v15, 0 }
 0x2e5   : > { %14952 = vmatpush3.bf16.xpose.msra.mxu0 %v3617_v0  ;;  %v3829_v24 = vpop.permute.xlu1 %3828 }
 0x2e6   : > { %14963 = vmatprep.subr.bf16.mxu0 %v17250_v19  ;;  %v3834_v29 = vsel %vm3500_vm1, %v3829_v24, 0 }
 0x2e7   : > { %v3609_v22 = vpop.permute.xlu0 %3608 }
 0x2e9   : > { %v3826_v30 = vpop.permute.xlu1 %3825 }
 0x2ea   : > { %v3354_v4 = vpop.f32.mrf.mxu0 }
 0x2eb   : > { %v3355_v6 = vadd.f32 %v3354_v4, %v1047_v2 }
 0x2ec   : > { %14954 = vmatmul.mubr.msk.bf16.vlgmr.msra.gmra.mxu0 %vm3500_vm1, %v3609_v22  ;;  %v3356_v10 = vpop.f32.mrf.mxu0  ;;  %v3395_v11 = vpop.f32.mrf.mxu1 }
 0x2ed   : > { %14964 = vmatpush3.bf16.xpose.msra.mxu0 %v3724_v7  ;;  %14965 = vmatprep.mubr.msk.bf16.mxu0 %vm17251_vm0, %v17250_v19  ;;  %v3357_v12 = vadd.f32 %v3356_v10, %v1051_v3  ;;  %v3396_v14 = vadd.f32 %v3395_v11, %v3355_v6  ;;  %v4043_v36 = vpop.permute.xlu1 %4042 }
 0x2ee   : > { %14975 = vmatprep.subr.bf16.mxu0 %v17250_v19  ;;  %v3358_v17 = vpop.f32.mrf.mxu0  ;;  %v3397_v18 = vpop.f32.mrf.mxu1 }
 0x2ef   : > { %v17695_v52 = vpack.c.bf16 %v3396_v14, %v3396_v14  ;;  %v17697_v20 = vadd.f32 %v3397_v18, %v3357_v12 }
 0x2f0   : > { %v3359_v21 = vpop.f32.mrf.mxu0  ;;  %v3399_v23 = vpop.f32.mrf.mxu1 }
 0x2f1   : > { %v3565_v27 = vsel %vm3563_vm2, %v17695_v52, 0  ;;  %v4260_v57 = vpop.permute.xlu1 %4259 }
 0x2f2   : > { %14946 = vmatpush3.bf16.msra.mxu1 %v3565_v27  ;;  %v3400_v28 = vpop.f32.mrf.mxu1 }
 0x2f3   : > { %14957 = vmatprep.subr.bf16.mxu1 %v17250_v19 }
 0x2f4   : > { %14966 = vmatmul.mubr.msk.bf16.vlgmr.msra.gmra.mxu0 %vm3500_vm1, %v17658_v39 }
 0x2f5   : > { %14976 = vmatpush3.bf16.xpose.msra.mxu0 %v3834_v29  ;;  %14977 = vmatprep.mubr.msk.bf16.mxu0 %vm17251_vm0, %v17250_v19 }
 0x2f6   : > { %14987 = vmatprep.subr.bf16.mxu0 %v17250_v19 }
 0x2fc   : > { %14978 = vmatmul.mubr.msk.bf16.vlgmr.msra.gmra.mxu0 %vm3500_vm1, %v3826_v30 }
 0x2fd   : > { %14988 = vmatpush3.bf16.xpose.msra.mxu0 %v3941_v31  ;;  %14989 = vmatprep.mubr.msk.bf16.mxu0 %vm17251_vm0, %v17250_v19 }
 0x2fe   : > { %14999 = vmatprep.subr.bf16.mxu0 %v17250_v19 }
 0x304   : > { %14990 = vmatmul.mubr.msk.bf16.vlgmr.msra.gmra.mxu0 %vm3500_vm1, %v17664_v50 }
 0x305   : > { %15001 = vmatprep.mubr.msk.bf16.mxu0 %vm17251_vm0, %v17250_v19 }
 0x323   : > { %v4046_v8 = vpop.permute.xlu0 %4045 }
 0x324   : > { %v4051_v32 = vsel %vm3500_vm1, %v4046_v8, 0 }
 0x325   : > { %15000 = vmatpush3.bf16.xpose.msra.mxu0 %v4051_v32 }
 0x326   : > { %15011 = vmatprep.subr.bf16.mxu0 %v17250_v19 }
 0x327   : > { %v4263_v47 = vpop.permute.xlu0 %4262 }
 0x328   : > { %v4268_v53 = vsel %vm3500_vm1, %v4263_v47, 0 }
 0x32a   : > { %v3436_v35 = vpop.f32.mrf.mxu0 }
 0x32b   : > { %v3437_v37 = vadd.f32 %v3436_v35, %v1055_v33 }
 0x32c   : > { %15002 = vmatmul.mubr.msk.bf16.vlgmr.msra.gmra.mxu0 %vm3500_vm1, %v4043_v36  ;;  %v3438_v9 = vpop.f32.mrf.mxu0  ;;  %v3477_v39 = vpop.f32.mrf.mxu1 }
 0x32d   : > { %15012 = vmatpush3.bf16.xpose.msra.mxu0 %v4158_v38  ;;  %v3439_v42 = vadd.f32 %v3438_v9, %v1059_v34  ;;  %15013 = vmatprep.mubr.msk.bf16.mxu0 %vm17251_vm0, %v17250_v19  ;;  %v17725_v50 = vadd.f32 %v3477_v39, %v3437_v37 }
 0x32e   : > { %15023 = vmatprep.subr.bf16.mxu0 %v17250_v19  ;;  %v3440_v40 = vpop.f32.mrf.mxu0  ;;  %v3479_v13 = vpop.f32.mrf.mxu1 }
 0x32f   : > { %v17728_v44 = vadd.f32 %v3479_v13, %v3439_v42 }
 0x330   : > { %v3441_v45 = vpop.f32.mrf.mxu0  ;;  %v3481_v46 = vpop.f32.mrf.mxu1 }
 0x332   : > { %v3482_v48 = vpop.f32.mrf.mxu1 }
 0x334   : > { %15014 = vmatmul.mubr.msk.bf16.vlgmr.msra.gmra.mxu0 %vm3500_vm1, %v17672_v41 }
 0x335   : > { %15024 = vmatpush3.bf16.xpose.msra.mxu0 %v4268_v53  ;;  %15025 = vmatprep.mubr.msk.bf16.mxu0 %vm17251_vm0, %v17250_v19 }
 0x339   : > { %v3541_v55 = vpop.f32.mrf.mxu0 }
 0x33a   : > { %v3548_v56 = vsel %vm3547_vm3, %v3541_v55, -inf }
 0x33b   : > { %3549 = vmax.xlane.f32.xlu0 %v3548_v56  ;;  %v14943_v58 = vpop.f32.mrf.mxu0 }
 0x33c   : > { %15026 = vmatmul.mubr.msk.bf16.vlgmr.msra.gmra.mxu0 %vm3500_vm1, %v4260_v57 }
 0x33d   : > { %v3544_v59 = vpop.f32.mrf.mxu0 }
 0x33f   : > { %v14944_v60 = vpop.f32.mrf.mxu0 }
 0x3ac   : > { %v3653_v61 = vpop.f32.mrf.mxu0 }
 0x3ad   : > { %v3659_v62 = vsel %vm3547_vm3, %v3653_v61, -inf }
 0x3ae   : > { %3660 = vmax.xlane.f32.xlu1 %v3659_v62  ;;  %v14955_v41 = vpop.f32.mrf.mxu0 }
 0x3b0   : > { %v3656_v63 = vpop.f32.mrf.mxu0 }
 0x3b2   : > { %v14956_v15 = vpop.f32.mrf.mxu0 }
 0x3b3   : > { %v3497_v15 = vpack.c.bf16 %v17697_v20, %v17697_v20 }
 0x3b4   : > { %v3760_v0 = vpop.f32.mrf.mxu0 }
 0x3b5   : > { %v3766_v1 = vsel %vm3547_vm3, %v3760_v0, -inf }
 0x3b6   : > { %3767 = vmax.xlane.f32.xlu0 %v3766_v1  ;;  %v14967_v2 = vpop.f32.mrf.mxu0 }
 0x3b8   : > { %v3763_v3 = vpop.f32.mrf.mxu0 }
 0x3ba   : > { %v14968_v4 = vpop.f32.mrf.mxu0 }
 0x3bc   : > { %v3870_v22 = vpop.f32.mrf.mxu0 }
 0x3bd   : > { %v3876_v6 = vsel %vm3547_vm3, %v3870_v22, -inf }
 0x3be   : > { %3877 = vmax.xlane.f32.xlu0 %v3876_v6  ;;  %v14979_v7 = vpop.f32.mrf.mxu0 }
 0x3c0   : > { %v3873_v10 = vpop.f32.mrf.mxu0 }
 0x3c2   : > { %v14980_v11 = vpop.f32.mrf.mxu0 }
 0x3c4   : > { %v3977_v12 = vpop.f32.mrf.mxu0  ;;  %v3550_v23 = vpop.xlane.xlu0 %3549 }
 0x3c5   : > { %v3983_v14 = vsel %vm3547_vm3, %v3977_v12, -inf  ;;  %v3551_v24 = vsub.f32 %v3541_v55, %v3550_v23 }
 0x3c6   : > { %3984 = vmax.xlane.f32.xlu1 %v3983_v14  ;;  %v14991_v17 = vpop.f32.mrf.mxu0 }
 0x3c7   : > { %v3552_v27 = vmul.f32 1.442695, %v3551_v24 }
 0x3c8   : > { %v3980_v18 = vpop.f32.mrf.mxu0 }
 0x3c9   : > { %16757 = vpow2.f32 %v3552_v27 }
 0x3ca   : > { %v14992_v21 = vpop.f32.mrf.mxu0 }
 0x3d6   : > { %v17743_v34 = vpop.eup %16757 }
 0x3d7   : > { %v3554_v37 = vsel %vm3547_vm3, %v17743_v34, 0.0 }
 0x3ec   : > { %v4087_v28 = vpop.f32.mrf.mxu0 }
 0x3ed   : > { %v4093_v29 = vsel %vm3547_vm3, %v4087_v28, -inf }
 0x3ee   : > { %4094 = vmax.xlane.f32.xlu0 %v4093_v29  ;;  %v15003_v30 = vpop.f32.mrf.mxu0 }
 0x3f0   : > { %v4090_v31 = vpop.f32.mrf.mxu0 }
 0x3f2   : > { %v15004_v8 = vpop.f32.mrf.mxu0 }
 0x3f3   : > { %v3498_v8 = vpack.c.bf16 %v17725_v50, %v17725_v50 }
 0x3f4   : > { %v4194_v32 = vpop.f32.mrf.mxu0 }
 0x3f5   : > { %v4200_v33 = vsel %vm3547_vm3, %v4194_v32, -inf }
 0x3f6   : > { %4201 = vmax.xlane.f32.xlu1 %v4200_v33  ;;  %v15015_v35 = vpop.f32.mrf.mxu0 }
 0x3f8   : > { %v4197_v36 = vpop.f32.mrf.mxu0 }
 0x3fa   : > { %3555 = vadd.xlane.f32.xlu1 %v3554_v37  ;;  %v15016_v38 = vpop.f32.mrf.mxu0 }
 0x3fc   : > { %v4304_v9 = vpop.f32.mrf.mxu0 }
 0x3fd   : > { %v4310_v39 = vsel %vm3547_vm3, %v4304_v9, -inf }
 0x3fe   : > { %4311 = vmax.xlane.f32.xlu0 %v4310_v39  ;;  %v15027_v42 = vpop.f32.mrf.mxu0 }
 0x400   : > { %v4307_v40 = vpop.f32.mrf.mxu0 }
 0x402   : > { %v15028_v13 = vpop.f32.mrf.mxu0 }
 0x437   : > { %v3661_v45 = vpop.xlane.xlu1 %3660 }
 0x438   : > { %v3662_v46 = vsub.f32 %v3653_v61, %v3661_v45 }
 0x43a   : > { %v3663_v47 = vmul.f32 1.442695, %v3662_v46 }
 0x43c   : > { %16759 = vpow2.f32 %v3663_v47 }
 0x43f   : > { %v3768_v48 = vpop.xlane.xlu0 %3767 }
 0x440   : > { %v3769_v53 = vsub.f32 %v3760_v0, %v3768_v48 }
 0x442   : > { %v3770_v55 = vmul.f32 1.442695, %v3769_v53  ;;  %v3999_v53 = vsel %vm3563_vm2, %v3498_v8, 0 }
 0x444   : > { %16761 = vpow2.f32 %v3770_v55 }
 0x447   : > { %v3878_v56 = vpop.xlane.xlu0 %3877 }
 0x448   : > { %v3879_v57 = vsub.f32 %v3870_v22, %v3878_v56 }
 0x449   : > { %v16760_v58 = vpop.eup %16759 }
 0x44a   : > { %v3880_v59 = vmul.f32 1.442695, %v3879_v57  ;;  %v3665_v60 = vsel %vm3547_vm3, %v16760_v58, 0.0 }
 0x44b   : > { %3666 = vadd.xlane.f32.xlu0 %v3665_v60 }
 0x44c   : > { %16763 = vpow2.f32 %v3880_v59 }
 0x44f   : > { %v3985_v0 = vpop.xlane.xlu1 %3984 }
 0x450   : > { %v3986_v1 = vsub.f32 %v3977_v12, %v3985_v0 }
 0x451   : > { %v17749_v62 = vpop.eup %16761 }
 0x452   : > { %v3772_v41 = vsel %vm3547_vm3, %v17749_v62, 0.0  ;;  %v3987_v2 = vmul.f32 1.442695, %v3986_v1 }
 0x453   : > { %3773 = vadd.xlane.f32.xlu1 %v3772_v41 }
 0x454   : > { %16765 = vpow2.f32 %v3987_v2 }
 0x459   : > { %v17753_v61 = vpop.eup %16763 }
 0x45a   : > { %v3882_v63 = vsel %vm3547_vm3, %v17753_v61, 0.0 }
 0x45b   : > { %3883 = vadd.xlane.f32.xlu0 %v3882_v63 }
 0x461   : > { %v17762_v14 = vpop.eup %16765 }
 0x462   : > { %v3989_v12 = vsel %vm3547_vm3, %v17762_v14, 0.0 }
 0x464   : > { %3889 = vrot.lane.b32.xlu1 %v3497_v15, %s17252_s2 }
 0x471   : > { %3672 = vrot.lane.b32.xlu0 %v17695_v52, %s17252_s2 }
 0x477   : > { %v4095_v3 = vpop.xlane.xlu0 %4094 }
 0x478   : > { %v4096_v4 = vsub.f32 %v4087_v28, %v4095_v3 }
 0x47a   : > { %v4097_v22 = vmul.f32 1.442695, %v4096_v4 }
 0x47c   : > { %16767 = vpow2.f32 %v4097_v22 }
 0x47f   : > { %v4202_v6 = vpop.xlane.xlu1 %4201 }
 0x480   : > { %v4203_v7 = vsub.f32 %v4194_v32, %v4202_v6  ;;  %v3499_v32 = vpack.c.bf16 %v17728_v44, %v17728_v44  ;;  %v3782_v44 = vsel %vm3563_vm2, %v3497_v15, 0 }
 0x482   : > { %v4204_v10 = vmul.f32 1.442695, %v4203_v7  ;;  %v4216_v2 = vsel %vm3563_vm2, %v3499_v32, 0 }
 0x483   : > { %v3556_v11 = vpop.xlane.xlu1 %3555 }
 0x484   : > { %16769 = vpow2.f32 %v4204_v10 }
 0x485   : > { %16771 = vrcp.f32 %v3556_v11 }
 0x487   : > { %v4312_v20 = vpop.xlane.xlu0 %4311 }
 0x488   : > { %v4313_v17 = vsub.f32 %v4304_v9, %v4312_v20  ;;  %3990 = vadd.xlane.f32.xlu1 %v3989_v12 }
 0x489   : > { %v17766_v52 = vpop.eup %16767 }
 0x48a   : > { %v4314_v18 = vmul.f32 1.442695, %v4313_v17  ;;  %v4099_v21 = vsel %vm3547_vm3, %v17766_v52, 0.0 }
 0x48c   : > { %16773 = vpow2.f32 %v4314_v18  ;;  %4100 = vadd.xlane.f32.xlu1 %v4099_v21  ;;  %v15797_v18 = vld [vmem:[#allocation8 + $0xe0] ss:$16 sps:$4 sm:$0xff]   ;;  %v15802_v21 = vld [vmem:[#allocation8 + $0xc4] ss:$16 sps:$4 sm:$0xff]  }
 0x491   : > { %v17770_v23 = vpop.eup %16769 }
 0x492   : > { %v16772_v24 = vpop.eup %16771  ;;  %v4206_v27 = vsel %vm3547_vm3, %v17770_v23, 0.0 }
 0x493   : > { %4207 = vadd.xlane.f32.xlu1 %v4206_v27  ;;  %v3558_v28 = vmul.f32 %v16772_v24, %v17743_v34  ;;  %v15805_v24 = vld [vmem:[#allocation8 + $0xa4] ss:$16 sps:$4 sm:$0xff]   ;;  %v15806_v27 = vld [vmem:[#allocation8 + $0x80] ss:$16 sps:$4 sm:$0xff]  }
 0x495   : > { %v3559_v29 = vpack.c.bf16 %v3558_v28, %v3558_v28  ;;  %v15808_v28 = vld [vmem:[#allocation8 + $0x84] ss:$16 sps:$4 sm:$0xff]  }
 0x497   : > { %14948 = vmatmul.mubr.msk.bf16.vlgmr.msra.gmra.mxu1 %vm3547_vm3, %v3559_v29  ;;  %v15811_v29 = vld [vmem:[#allocation8 + $0x64] ss:$16 sps:$4 sm:$0xff]  }
 0x498   : > { %14959 = vmatprep.mubr.msk.bf16.mxu1 %vm17251_vm0, %v17250_v19 }
 0x499   : > { %v17778_v30 = vpop.eup %16773 }
 0x49a   : > { %v4316_v31 = vsel %vm3547_vm3, %v17778_v30, 0.0 }
 0x49b   : > { %4317 = vadd.xlane.f32.xlu0 %v4316_v31  ;;  %v15814_v31 = vld [vmem:[#allocation8 + $0x44] ss:$16 sps:$4 sm:$0xff]  }
 0x4a4   : > { %4106 = vrot.lane.b32.xlu1 %v3498_v8, %s17252_s2  ;;  %v15812_v8 = vld [vmem:[#allocation8 + $0x40] ss:$16 sps:$4 sm:$0xff]  }
 0x4a8   : > { %4323 = vrot.lane.b32.xlu1 %v3499_v32, %s17252_s2  ;;  %v15817_v32 = vld [vmem:[#allocation8 + $0x24] ss:$16 sps:$4 sm:$0xff]  }
 0x4d4   : > { %v3667_v33 = vpop.xlane.xlu0 %3666 }
 0x4d5   : > { %16775 = vrcp.f32 %v3667_v33  ;;  %v15815_v33 = vld [vmem:[#allocation8 + $0x20] ss:$16 sps:$4 sm:$0xff]  }
 0x4dc   : > { %v3774_v34 = vpop.xlane.xlu1 %3773 }
 0x4dd   : > { %16777 = vrcp.f32 %v3774_v34  ;;  %v15820_v34 = vld [vmem:[#allocation8 + $0x4] ss:$16 sps:$4 sm:$0xff]  }
 0x4e0   : > { %v3890_v40 = vpop.permute.xlu1 %3889 }
 0x4e1   : > { %v3895_v46 = vsel %vm3563_vm2, %v3890_v40, 0  ;;  %v15835_v40 = vld [vmem:[#allocation8 + $0x164] ss:$16 sps:$4 sm:$0xff]  }
 0x4e2   : > { %v16776_v35 = vpop.eup %16775 }
 0x4e3   : > { %v3669_v37 = vmul.f32 %v16776_v35, %v16760_v58  ;;  %v15818_v35 = vld [vmem:[#allocation8] ss:$16 sps:$4 sm:$0xff]  }
 0x4e4   : > { %v3884_v36 = vpop.xlane.xlu0 %3883 }
 0x4e5   : > { %16779 = vrcp.f32 %v3884_v36  ;;  %v3670_v50 = vpack.c.bf16 %v3669_v37, %v3669_v37  ;;  %v15823_v36 = vld [vmem:[#allocation8 + $0x1e4] ss:$16 sps:$4 sm:$0xff]   ;;  %v15821_v37 = vld [vmem:[#allocation8 + $0x1e0] ss:$16 sps:$4 sm:$0xff]  }
 0x4e8   : > { %v3673_v38 = vpop.permute.xlu0 %3672 }
 0x4e9   : > { %v3678_v9 = vsel %vm3563_vm2, %v3673_v38, 0  ;;  %v15826_v38 = vld [vmem:[#allocation8 + $0x1c4] ss:$16 sps:$4 sm:$0xff]  }
 0x4ea   : > { %14958 = vmatpush3.bf16.msra.mxu1 %v3678_v9  ;;  %v16778_v39 = vpop.eup %16777  ;;  %v15824_v9 = vld [vmem:[#allocation8 + $0x1c0] ss:$16 sps:$4 sm:$0xff]  }
 0x4eb   : > { %14969 = vmatprep.subr.bf16.mxu1 %v17250_v19  ;;  %v3776_v42 = vmul.f32 %v16778_v39, %v17749_v62  ;;  %v15827_v39 = vld [vmem:[#allocation8 + $0x1a0] ss:$16 sps:$4 sm:$0xff]  }
 0x4ed   : > { %14960 = vmatmul.mubr.msk.bf16.vlgmr.msra.gmra.mxu1 %vm3547_vm3, %v3670_v50  ;;  %v3777_v13 = vpack.c.bf16 %v3776_v42, %v3776_v42  ;;  %v15829_v50 = vld [vmem:[#allocation8 + $0x1a4] ss:$16 sps:$4 sm:$0xff]   ;;  %v15830_v42 = vld [vmem:[#allocation8 + $0x180] ss:$16 sps:$4 sm:$0xff]  }
 0x4ee   : > { %14970 = vmatpush3.bf16.msra.mxu1 %v3782_v44  ;;  %14971 = vmatprep.mubr.msk.bf16.mxu1 %vm17251_vm0, %v17250_v19  ;;  %v15832_v44 = vld [vmem:[#allocation8 + $0x184] ss:$16 sps:$4 sm:$0xff]  }
 0x4ef   : > { %14981 = vmatprep.subr.bf16.mxu1 %v17250_v19 }
 0x4f2   : > { %v16780_v45 = vpop.eup %16779 }
 0x4f3   : > { %v3886_v47 = vmul.f32 %v16780_v45, %v17753_v61  ;;  %v15838_v45 = vld [vmem:[#allocation8 + $0x144] ss:$16 sps:$4 sm:$0xff]  }
 0x4f5   : > { %14972 = vmatmul.mubr.msk.bf16.vlgmr.msra.gmra.mxu1 %vm3547_vm3, %v3777_v13  ;;  %v3887_v48 = vpack.c.bf16 %v3886_v47, %v3886_v47  ;;  %v15833_v13 = vld [vmem:[#allocation8 + $0x160] ss:$16 sps:$4 sm:$0xff]   ;;  %v15841_v47 = vld [vmem:[#allocation8 + $0x124] ss:$16 sps:$4 sm:$0xff]  }
 0x4f6   : > { %14982 = vmatpush3.bf16.msra.mxu1 %v3895_v46  ;;  %14983 = vmatprep.mubr.msk.bf16.mxu1 %vm17251_vm0, %v17250_v19  ;;  %v15836_v46 = vld [vmem:[#allocation8 + $0x140] ss:$16 sps:$4 sm:$0xff]  }
 0x4f7   : > { %14993 = vmatprep.subr.bf16.mxu1 %v17250_v19 }
 0x4fd   : > { %14984 = vmatmul.mubr.msk.bf16.vlgmr.msra.gmra.mxu1 %vm3547_vm3, %v3887_v48 }
 0x4fe   : > { %14994 = vmatpush3.bf16.msra.mxu1 %v3999_v53  ;;  %14995 = vmatprep.mubr.msk.bf16.mxu1 %vm17251_vm0, %v17250_v19  ;;  %v15839_v53 = vld [vmem:[#allocation8 + $0x120] ss:$16 sps:$4 sm:$0xff]  }
 0x4ff   : > { %15005 = vmatprep.subr.bf16.mxu1 %v17250_v19 }
 0x511   : > { %v3991_v55 = vpop.xlane.xlu1 %3990 }
 0x512   : > { %16781 = vrcp.f32 %v3991_v55 }
 0x515   : > { %v4101_v56 = vpop.xlane.xlu1 %4100 }
 0x516   : > { %16783 = vrcp.f32 %v4101_v56 }
 0x51c   : > { %v4208_v57 = vpop.xlane.xlu1 %4207 }
 0x51d   : > { %16785 = vrcp.f32 %v4208_v57 }
 0x51f   : > { %v16782_v58 = vpop.eup %16781 }
 0x520   : > { %v3993_v59 = vmul.f32 %v16782_v58, %v17762_v14  ;;  %v4107_v60 = vpop.permute.xlu1 %4106  ;;  %v15844_v58 = vld [vmem:[#allocation8 + $0x104] ss:$16 sps:$4 sm:$0xff]  }
 0x521   : > { %v4112_v61 = vsel %vm3563_vm2, %v4107_v60, 0 }
 0x522   : > { %v3994_v62 = vpack.c.bf16 %v3993_v59, %v3993_v59  ;;  %v15842_v59 = vld [vmem:[#allocation8 + $0x100] ss:$16 sps:$4 sm:$0xff]  }
 0x523   : > { %v16784_v41 = vpop.eup %16783 }
 0x524   : > { %14996 = vmatmul.mubr.msk.bf16.vlgmr.msra.gmra.mxu1 %vm3547_vm3, %v3994_v62  ;;  %v4318_v63 = vpop.xlane.xlu0 %4317  ;;  %v4103_v15 = vmul.f32 %v16784_v41, %v17766_v52  ;;  %v4324_v4 = vpop.permute.xlu1 %4323  ;;  %v15799_v52 = vld [vmem:[#allocation8 + $0xe4] ss:$16 sps:$4 sm:$0xff]   ;;  %v15845_v62 = vld [vmem:[#allocation8 + $0x2e0] ss:$16 sps:$4 sm:$0xff]  }
 0x525   : > { %15006 = vmatpush3.bf16.msra.mxu1 %v4112_v61  ;;  %15007 = vmatprep.mubr.msk.bf16.mxu1 %vm17251_vm0, %v17250_v19  ;;  %16787 = vrcp.f32 %v4318_v63  ;;  %v4329_v7 = vsel %vm3563_vm2, %v4324_v4, 0  ;;  %v15847_v41 = vld [vmem:[#allocation8 + $0x2e4] ss:$16 sps:$4 sm:$0xff]   ;;  %v15850_v63 = vld [vmem:[#allocation8 + $0xec] ss:$16 sps:$4 sm:$0xff]  }
 0x526   : > { %15017 = vmatprep.subr.bf16.mxu1 %v17250_v19  ;;  %v4104_v0 = vpack.c.bf16 %v4103_v15, %v4103_v15  ;;  %5185 = vmatprep.subr.bf16.mxu0 %v15799_v52  ;;  %v15871_v52 = vld [vmem:[#allocation8 + $0x264] ss:$16 sps:$4 sm:$0xff]  }
 0x527   : > { %5186 = vmatpush1.bf16.msra.mxu0 %v15797_v18  ;;  %v15875_v18 = vld [vmem:[#allocation8 + $0x240] ss:$16 sps:$4 sm:$0xff]  }
 0x528   : > { %5187 = vmatprep.subr.bf16.mxu0 %v15802_v21  ;;  %v15877_v21 = vld [vmem:[#allocation8 + $0x244] ss:$16 sps:$4 sm:$0xff]  }
 0x52a   : > { %v16786_v1 = vpop.eup %16785 }
 0x52b   : > { %v4210_v3 = vmul.f32 %v16786_v1, %v17770_v23  ;;  %v15800_v23 = vld [vmem:[#allocation8 + $0xc0] ss:$16 sps:$4 sm:$0xff]   ;;  %v15853_v1 = vld [vmem:[#allocation8 + $0x2c4] ss:$16 sps:$4 sm:$0xff]  }
 0x52c   : > { %15008 = vmatmul.mubr.msk.bf16.vlgmr.msra.gmra.mxu1 %vm3547_vm3, %v4104_v0  ;;  %5188 = vmatpush1.bf16.msra.mxu0 %v15800_v23  ;;  %v15851_v0 = vld [vmem:[#allocation8 + $0x2c0] ss:$16 sps:$4 sm:$0xff]  }
 0x52d   : > { %15018 = vmatpush3.bf16.msra.mxu1 %v4216_v2  ;;  %15019 = vmatprep.mubr.msk.bf16.mxu1 %vm17251_vm0, %v17250_v19  ;;  %v4211_v22 = vpack.c.bf16 %v4210_v3, %v4210_v3  ;;  %v15881_v23 = vld [vmem:[#allocation8 + $0x220] ss:$16 sps:$4 sm:$0xff]  }
 0x52e   : > { %15029 = vmatprep.subr.bf16.mxu1 %v17250_v19  ;;  %5189 = vmatprep.subr.bf16.mxu0 %v15805_v24  ;;  %v15883_v24 = vld [vmem:[#allocation8 + $0x224] ss:$16 sps:$4 sm:$0xff]  }
 0x532   : > { %v16788_v6 = vpop.eup %16787 }
 0x533   : > { %v4320_v10 = vmul.f32 %v16788_v6, %v17778_v30  ;;  %v15809_v30 = vld [vmem:[#allocation8 + $0x60] ss:$16 sps:$4 sm:$0xff]   ;;  %v15859_v6 = vld [vmem:[#allocation8 + $0x2a4] ss:$16 sps:$4 sm:$0xff]  }
 0x534   : > { %15020 = vmatmul.mubr.msk.bf16.vlgmr.msra.gmra.mxu1 %vm3547_vm3, %v4211_v22  ;;  %v15857_v22 = vld [vmem:[#allocation8 + $0x2a0] ss:$16 sps:$4 sm:$0xff]  }
 0x535   : > { %15030 = vmatpush3.bf16.msra.mxu1 %v4329_v7  ;;  %15031 = vmatprep.mubr.msk.bf16.mxu1 %vm17251_vm0, %v17250_v19  ;;  %v4321_v11 = vpack.c.bf16 %v4320_v10, %v4320_v10  ;;  %v15803_v19 = vld [vmem:[#allocation8 + $0xa0] ss:$16 sps:$4 sm:$0xff]  }
 0x536   : > { %5190 = vmatpush1.bf16.msra.mxu0 %v15803_v19  ;;  %5226 = vmatprep.subr.bf16.mxu1 %v15847_v41  ;;  %v15887_v19 = vld [vmem:[#allocation8 + $0x200] ss:$16 sps:$4 sm:$0xff]  }
 0x537   : > { %5191 = vmatprep.subr.bf16.mxu0 %v15808_v28  ;;  %v15893_v28 = vld [vmem:[#allocation8 + $0x3e0] ss:$16 sps:$4 sm:$0xff]  }
 0x53a   : > { %5192 = vmatpush1.bf16.msra.mxu0 %v15806_v27  ;;  %v15889_v27 = vld [vmem:[#allocation8 + $0x204] ss:$16 sps:$4 sm:$0xff]  }
 0x53b   : > { %5193 = vmatprep.subr.bf16.mxu0 %v15811_v29  ;;  %v15895_v29 = vld [vmem:[#allocation8 + $0x3e4] ss:$16 sps:$4 sm:$0xff]  }
 0x53c   : > { %15032 = vmatmul.mubr.msk.bf16.vlgmr.msra.gmra.mxu1 %vm3547_vm3, %v4321_v11  ;;  %v15863_v11 = vld [vmem:[#allocation8 + $0x280] ss:$16 sps:$4 sm:$0xff]  }
 0x53d   : > { %5227 = vmatpush1.bf16.msra.mxu1 %v15845_v62 }
 0x53e   : > { %5194 = vmatpush1.bf16.msra.mxu0 %v15809_v30  ;;  %5228 = vmatprep.subr.bf16.mxu1 %v15853_v1  ;;  %v15899_v30 = vld [vmem:[#allocation8 + $0x3c0] ss:$16 sps:$4 sm:$0xff]  }
 0x53f   : > { %5195 = vmatprep.subr.bf16.mxu0 %v15814_v31  ;;  %v15901_v31 = vld [vmem:[#allocation8 + $0x3c4] ss:$16 sps:$4 sm:$0xff]  }
 0x541   : > { %5229 = vmatpush1.bf16.msra.mxu1 %v15851_v0 }
 0x542   : > { %5196 = vmatpush1.bf16.msra.mxu0 %v15812_v8  ;;  %5230 = vmatprep.subr.bf16.mxu1 %v15859_v6  ;;  %v15905_v8 = vld [vmem:[#allocation8 + $0x3a0] ss:$16 sps:$4 sm:$0xff]  }
 0x543   : > { %5197 = vmatprep.subr.bf16.mxu0 %v15817_v32  ;;  %v15907_v32 = vld [vmem:[#allocation8 + $0x3a4] ss:$16 sps:$4 sm:$0xff]  }
 0x545   : > { %5231 = vmatpush1.bf16.msra.mxu1 %v15857_v22 }
 0x546   : > { %5198 = vmatpush1.bf16.msra.mxu0 %v15815_v33  ;;  %v15911_v33 = vld [vmem:[#allocation8 + $0x380] ss:$16 sps:$4 sm:$0xff]  }
 0x547   : > { %5199 = vmatprep.subr.bf16.mxu0 %v15820_v34  ;;  %v15913_v34 = vld [vmem:[#allocation8 + $0x384] ss:$16 sps:$4 sm:$0xff]  }
 0x54a   : > { %5200 = vmatpush1.bf16.msra.mxu0 %v15818_v35 }
 0x54b   : > { %5201 = vmatprep.subr.bf16.mxu0 %v15823_v36 }
 0x54e   : > { %5202 = vmatpush2.bf16.msra.mxu0 %v15821_v37  ;;  %v15917_v37 = vld [vmem:[#allocation8 + $0x360] ss:$16 sps:$4 sm:$0xff]  }
 0x54f   : > { %5203 = vmatprep.subr.bf16.mxu0 %v15826_v38  ;;  %v15919_v38 = vld [vmem:[#allocation8 + $0x364] ss:$16 sps:$4 sm:$0xff]  }
 0x552   : > { %5204 = vmatpush2.bf16.msra.mxu0 %v15824_v9 }
 0x553   : > { %5205 = vmatprep.subr.bf16.mxu0 %v15829_v50 }
 0x556   : > { %5206 = vmatpush2.bf16.msra.mxu0 %v15827_v39  ;;  %v15923_v39 = vld [vmem:[#allocation8 + $0x340] ss:$16 sps:$4 sm:$0xff]  }
 0x557   : > { %v17826_v14 = vpop.f32.mrf.mxu1  ;;  %5207 = vmatprep.subr.bf16.mxu0 %v15832_v44  ;;  %v15925_v44 = vld [vmem:[#allocation8 + $0x344] ss:$16 sps:$4 sm:$0xff]  }
 0x559   : > { %v14949_v20 = vpop.f32.mrf.mxu1 }
 0x55a   : > { %5208 = vmatpush2.bf16.msra.mxu0 %v15830_v42  ;;  %v15865_v20 = vld [vmem:[#allocation8 + $0x284] ss:$16 sps:$4 sm:$0xff]  }
 0x55b   : > { %v3604_v12 = vpop.f32.mrf.mxu1  ;;  %5209 = vmatprep.subr.bf16.mxu0 %v15835_v40  ;;  %5232 = vmatprep.subr.bf16.mxu1 %v15865_v20  ;;  %v15862_v20 = vld [vmem:[#allocation8 + $0xac] ss:$16 sps:$4 sm:$0xff]  }
 0x55c   : > { %5233 = vmatpush1.bf16.msra.mxu1 %v15863_v11  ;;  %v15854_v11 = vld [vmem:[#allocation8 + $0xc8] ss:$16 sps:$4 sm:$0xff]  }
 0x55d   : > { %v14950_v17 = vpop.f32.mrf.mxu1  ;;  %5234 = vmatprep.subr.bf16.mxu1 %v15871_v52  ;;  %v15872_v52 = vld [vmem:[#allocation8 + $0x68] ss:$16 sps:$4 sm:$0xff]  }
 0x55e   : > { %5210 = vmatpush2.bf16.msra.mxu0 %v15833_v13  ;;  %v15869_v17 = vld [vmem:[#allocation8 + $0x260] ss:$16 sps:$4 sm:$0xff]  }
 0x55f   : > { %5211 = vmatprep.subr.bf16.mxu0 %v15838_v45  ;;  %v15929_v13 = vld [vmem:[#allocation8 + $0x320] ss:$16 sps:$4 sm:$0xff]   ;;  %v15931_v45 = vld [vmem:[#allocation8 + $0x324] ss:$16 sps:$4 sm:$0xff]  }
 0x560   : > { %5235 = vmatpush1.bf16.msra.mxu1 %v15869_v17  ;;  %v15866_v17 = vld [vmem:[#allocation8 + $0x88] ss:$16 sps:$4 sm:$0xff]  }
 0x561   : > { %5236 = vmatprep.subr.bf16.mxu1 %v15877_v21  ;;  %v15878_v21 = vld [vmem:[#allocation8 + $0x48] ss:$16 sps:$4 sm:$0xff]  }
 0x562   : > { %5212 = vmatpush2.bf16.msra.mxu0 %v15836_v46 }
 0x563   : > { %5213 = vmatprep.subr.bf16.mxu0 %v15841_v47 }
 0x564   : > { %5237 = vmatpush1.bf16.msra.mxu1 %v15875_v18  ;;  %v15880_v18 = vld [vmem:[#allocation8 + $0x4c] ss:$16 sps:$4 sm:$0xff]  }
 0x565   : > { %5238 = vmatprep.subr.bf16.mxu1 %v15883_v24  ;;  %v15884_v24 = vld [vmem:[#allocation8 + $0x28] ss:$16 sps:$4 sm:$0xff]  }
 0x566   : > { %5214 = vmatpush2.bf16.msra.mxu0 %v15839_v53  ;;  %v15935_v53 = vld [vmem:[#allocation8 + $0x300] ss:$16 sps:$4 sm:$0xff]  }
 0x567   : > { %5215 = vmatprep.subr.bf16.mxu0 %v15844_v58 }
 0x568   : > { %5239 = vmatpush1.bf16.msra.mxu1 %v15881_v23  ;;  %v15886_v23 = vld [vmem:[#allocation8 + $0x2c] ss:$16 sps:$4 sm:$0xff]  }
 0x569   : > { %5240 = vmatprep.subr.bf16.mxu1 %v15889_v27  ;;  %v15890_v27 = vld [vmem:[#allocation8 + $0x8] ss:$16 sps:$4 sm:$0xff]  }
 0x56a   : > { %5216 = vmatpush2.bf16.msra.mxu0 %v15842_v59 }
 0x56b   : > { %5267 = vmatprep.subr.bf16.mxu0 %v15850_v63 }
 0x56c   : > { %5241 = vmatpush1.bf16.msra.mxu1 %v15887_v19  ;;  %v15892_v19 = vld [vmem:[#allocation8 + $0xc] ss:$16 sps:$4 sm:$0xff]  }
 0x56d   : > { %5242 = vmatprep.subr.bf16.mxu1 %v15895_v29  ;;  %v15896_v29 = vld [vmem:[#allocation8 + $0x1e8] ss:$16 sps:$4 sm:$0xff]  }
 0x570   : > { %5243 = vmatpush2.bf16.msra.mxu1 %v15893_v28  ;;  %v15898_v28 = vld [vmem:[#allocation8 + $0x1ec] ss:$16 sps:$4 sm:$0xff]  }
 0x571   : > { %5244 = vmatprep.subr.bf16.mxu1 %v15901_v31  ;;  %v15902_v31 = vld [vmem:[#allocation8 + $0x1c8] ss:$16 sps:$4 sm:$0xff]  }
 0x574   : > { %5245 = vmatpush2.bf16.msra.mxu1 %v15899_v30  ;;  %v15904_v30 = vld [vmem:[#allocation8 + $0x1cc] ss:$16 sps:$4 sm:$0xff]  }
 0x575   : > { %5246 = vmatprep.subr.bf16.mxu1 %v15907_v32  ;;  %v15908_v32 = vld [vmem:[#allocation8 + $0x1a8] ss:$16 sps:$4 sm:$0xff]  }
 0x578   : > { %5247 = vmatpush2.bf16.msra.mxu1 %v15905_v8  ;;  %v15910_v8 = vld [vmem:[#allocation8 + $0x1ac] ss:$16 sps:$4 sm:$0xff]  }
 0x579   : > { %5248 = vmatprep.subr.bf16.mxu1 %v15913_v34  ;;  %v15914_v34 = vld [vmem:[#allocation8 + $0x188] ss:$16 sps:$4 sm:$0xff]  }
 0x57c   : > { %5249 = vmatpush2.bf16.msra.mxu1 %v15911_v33  ;;  %v15916_v33 = vld [vmem:[#allocation8 + $0x18c] ss:$16 sps:$4 sm:$0xff]  }
 0x57d   : > { %5250 = vmatprep.subr.bf16.mxu1 %v15919_v38  ;;  %v15928_v38 = vld [vmem:[#allocation8 + $0x14c] ss:$16 sps:$4 sm:$0xff]  }
 0x580   : > { %5251 = vmatpush2.bf16.msra.mxu1 %v15917_v37  ;;  %v15920_v37 = vld [vmem:[#allocation8 + $0x168] ss:$16 sps:$4 sm:$0xff]  }
 0x581   : > { %5252 = vmatprep.subr.bf16.mxu1 %v15925_v44  ;;  %v15940_v44 = vld [vmem:[#allocation8 + $0x10c] ss:$16 sps:$4 sm:$0xff]  }
 0x584   : > { %5253 = vmatpush2.bf16.msra.mxu1 %v15923_v39  ;;  %v15932_v39 = vld [vmem:[#allocation8 + $0x128] ss:$16 sps:$4 sm:$0xff]  }
 0x585   : > { %5254 = vmatprep.subr.bf16.mxu1 %v15931_v45  ;;  %v15938_v45 = vld [vmem:[#allocation8 + $0x108] ss:$16 sps:$4 sm:$0xff]  }
 0x588   : > { %5255 = vmatpush2.bf16.msra.mxu1 %v15929_v13 }
 0x5ad   : > { %v3714_v48 = vpop.f32.mrf.mxu1 }
 0x5af   : > { %v14961_v55 = vpop.f32.mrf.mxu1 }
 0x5b1   : > { %v3717_v56 = vpop.f32.mrf.mxu1 }
 0x5b3   : > { %v14962_v57 = vpop.f32.mrf.mxu1 }
 0x5b4   : > { %v15943_v57 = vld [vmem:[#allocation8 + $0x2ec] ss:$16 sps:$4 sm:$0xff]  }
 0x5b5   : > { %v17828_v60 = vpop.f32.mrf.mxu1 }
 0x5b7   : > { %v14973_v61 = vpop.f32.mrf.mxu1 }
 0x5b9   : > { %v3821_v15 = vpop.f32.mrf.mxu1 }
 0x5bb   : > { %v14974_v2 = vpop.f32.mrf.mxu1 }
 0x5bd   : > { %v3931_v3 = vpop.f32.mrf.mxu1 }
 0x5be   : > { %v15211_v4 = vpack.i.bf16 %v3714_v48, %v3931_v3  ;;  %v15937_v48 = vld [vmem:[#allocation8 + $0x304] ss:$16 sps:$4 sm:$0xff]  }
 0x5bf   : > { %v14985_v7 = vpop.f32.mrf.mxu1  ;;  %5256 = vmatprep.subr.bf16.mxu1 %v15937_v48 }
 0x5c0   : > { %15212 = vrot.lane.b32.xlu1 %v15211_v4, %s17252_s2  ;;  %5257 = vmatpush2.bf16.msra.mxu1 %v15935_v53  ;;  %v15848_v7 = vld [vmem:[#allocation8 + $0xe8] ss:$16 sps:$4 sm:$0xff]  }
 0x5c1   : > { %v3934_v10 = vpop.f32.mrf.mxu1  ;;  %5308 = vmatprep.subr.bf16.mxu1 %v15943_v57  ;;  %v15946_v57 = vld [vmem:[#allocation8 + $0x2cc] ss:$16 sps:$4 sm:$0xff]  }
 0x5c2   : > { %v15856_v10 = vld [vmem:[#allocation8 + $0xcc] ss:$16 sps:$4 sm:$0xff]  }
 0x5c3   : > { %v14986_v12 = vpop.f32.mrf.mxu1 }
 0x5c4   : > { %v15860_v12 = vld [vmem:[#allocation8 + $0xa8] ss:$16 sps:$4 sm:$0xff]  }
 0x5e4   : > { %v17831_v35 = vpop.f32.mrf.mxu1 }
 0x5e6   : > { %v14997_v36 = vpop.f32.mrf.mxu1 }
 0x5e7   : > { %v15922_v36 = vld [vmem:[#allocation8 + $0x16c] ss:$16 sps:$4 sm:$0xff]  }
 0x5e8   : > { %v4038_v9 = vpop.f32.mrf.mxu1 }
 0x5e9   : > { %v15926_v9 = vld [vmem:[#allocation8 + $0x148] ss:$16 sps:$4 sm:$0xff]  }
 0x5ea   : > { %v14998_v50 = vpop.f32.mrf.mxu1 }
 0x5eb   : > { %v15934_v50 = vld [vmem:[#allocation8 + $0x12c] ss:$16 sps:$4 sm:$0xff]  }
 0x5ec   : > { %v4148_v42 = vpop.f32.mrf.mxu1 }
 0x5ee   : > { %v15009_v40 = vpop.f32.mrf.mxu1 }
 0x5f0   : > { %v4151_v46 = vpop.f32.mrf.mxu1 }
 0x5f2   : > { %v15010_v47 = vpop.f32.mrf.mxu1 }
 0x5f4   : > { %v17833_v55 = vpop.f32.mrf.mxu1 }
 0x5f6   : > { %v15021_v56 = vpop.f32.mrf.mxu1 }
 0x5f7   : > { %v15941_v56 = vld [vmem:[#allocation8 + $0x2e8] ss:$16 sps:$4 sm:$0xff]  }
 0x5f8   : > { %v4255_v58 = vpop.f32.mrf.mxu1 }
 0x5f9   : > { %v15944_v58 = vld [vmem:[#allocation8 + $0x2c8] ss:$16 sps:$4 sm:$0xff]  }
 0x5fa   : > { %v15022_v59 = vpop.f32.mrf.mxu1 }
 0x5fb   : > { %v15949_v59 = vld [vmem:[#allocation8 + $0x2ac] ss:$16 sps:$4 sm:$0xff]  }
 0x5fc   : > { %v4365_v62 = vpop.f32.mrf.mxu1 }
 0x5fd   : > { %v15216_v41 = vpack.i.bf16 %v4148_v42, %v4365_v62  ;;  %v15950_v62 = vld [vmem:[#allocation8 + $0x288] ss:$16 sps:$4 sm:$0xff]  }
 0x5fe   : > { %v15033_v61 = vpop.f32.mrf.mxu1 }
 0x5ff   : > { %15217 = vrot.lane.b32.xlu1 %v15216_v41, %s17252_s2  ;;  %v15955_v41 = vld [vmem:[#allocation8 + $0x26c] ss:$16 sps:$4 sm:$0xff]   ;;  %v15953_v61 = vld [vmem:[#allocation8 + $0x268] ss:$16 sps:$4 sm:$0xff]  }
 0x600   : > { %v4368_v63 = vpop.f32.mrf.mxu1 }
 0x601   : > { %v15958_v63 = vld [vmem:[#allocation8 + $0x24c] ss:$16 sps:$4 sm:$0xff]  }
 0x602   : > { %v15034_v15 = vpop.f32.mrf.mxu1 }
 0x603   : > { %v15956_v15 = vld [vmem:[#allocation8 + $0x248] ss:$16 sps:$4 sm:$0xff]  }
 0x632   : > { %v15213_v0 = vpop.permute.xlu1 %15212 }
 0x633   : > { %v15215_v1 = vunpack.i.h.bf16 %v15213_v0  ;;  %v15214_v2 = vunpack.i.l.bf16 %v15213_v0  ;;  %v15961_v0 = vld [vmem:[#allocation8 + $0x22c] ss:$16 sps:$4 sm:$0xff]  }
 0x635   : > { %v4387_v3 = vsel %vm3500_vm1, %v17826_v14, %v15215_v1  ;;  %v4388_v4 = vsel %vm3500_vm1, %v17828_v60, %v15214_v2  ;;  %v15868_v14 = vld [vmem:[#allocation8 + $0x8c] ss:$16 sps:$4 sm:$0xff]   ;;  %v15959_v1 = vld [vmem:[#allocation8 + $0x228] ss:$16 sps:$4 sm:$0xff]  }
 0x636   : > { %v17840_v22 = vpack.c.bf16 %v4387_v3, %v4387_v3  ;;  %v4392_v6 = vpack.c.bf16 %v4388_v4, %v4388_v4  ;;  %v15874_v60 = vld [vmem:[#allocation8 + $0x6c] ss:$16 sps:$4 sm:$0xff]   ;;  %v15962_v3 = vld [vmem:[#allocation8 + $0x208] ss:$16 sps:$4 sm:$0xff]  }
 0x637   : > { %v15964_v2 = vld [vmem:[#allocation8 + $0x20c] ss:$16 sps:$4 sm:$0xff]  }
 0x638   : > { %5217 = vmatprep.mubr.bf16.mxu0 %v4392_v6  ;;  %v15967_v4 = vld [vmem:[#allocation8 + $0x3ec] ss:$16 sps:$4 sm:$0xff]  }
 0x639   : > { %5218 = vmatmul.mubr.bf16.vlgmr.msra.gmra.mxu0 %v17840_v22 }
 0x63a   : > { %5268 = vmatpush1.bf16.msra.mxu0 %v15848_v7  ;;  %5299 = vmatprep.mubr.bf16.mxu0 %v4392_v6  ;;  %v15970_v6 = vld [vmem:[#allocation8 + $0x3cc] ss:$16 sps:$4 sm:$0xff]   ;;  %v15968_v7 = vld [vmem:[#allocation8 + $0x3c8] ss:$16 sps:$4 sm:$0xff]  }
 0x63b   : > { %5269 = vmatprep.subr.bf16.mxu0 %v15856_v10  ;;  %v15973_v10 = vld [vmem:[#allocation8 + $0x3ac] ss:$16 sps:$4 sm:$0xff]  }
 0x63e   : > { %5270 = vmatpush1.bf16.msra.mxu0 %v15854_v11  ;;  %v15971_v11 = vld [vmem:[#allocation8 + $0x3a8] ss:$16 sps:$4 sm:$0xff]  }
 0x63f   : > { %5271 = vmatprep.subr.bf16.mxu0 %v15862_v20  ;;  %v15976_v20 = vld [vmem:[#allocation8 + $0x38c] ss:$16 sps:$4 sm:$0xff]  }
 0x642   : > { %5272 = vmatpush1.bf16.msra.mxu0 %v15860_v12  ;;  %v15974_v12 = vld [vmem:[#allocation8 + $0x388] ss:$16 sps:$4 sm:$0xff]  }
 0x643   : > { %5273 = vmatprep.subr.bf16.mxu0 %v15868_v14  ;;  %v15979_v14 = vld [vmem:[#allocation8 + $0x36c] ss:$16 sps:$4 sm:$0xff]  }
 0x646   : > { %5274 = vmatpush1.bf16.msra.mxu0 %v15866_v17  ;;  %v15977_v17 = vld [vmem:[#allocation8 + $0x368] ss:$16 sps:$4 sm:$0xff]  }
 0x647   : > { %5275 = vmatprep.subr.bf16.mxu0 %v15874_v60  ;;  %v15982_v60 = vld [vmem:[#allocation8 + $0x34c] ss:$16 sps:$4 sm:$0xff]  }
 0x64a   : > { %5276 = vmatpush1.bf16.msra.mxu0 %v15872_v52  ;;  %v15980_v52 = vld [vmem:[#allocation8 + $0x348] ss:$16 sps:$4 sm:$0xff]  }
 0x64b   : > { %5277 = vmatprep.subr.bf16.mxu0 %v15880_v18  ;;  %v15985_v18 = vld [vmem:[#allocation8 + $0x32c] ss:$16 sps:$4 sm:$0xff]  }
 0x64e   : > { %5278 = vmatpush1.bf16.msra.mxu0 %v15878_v21  ;;  %v15983_v21 = vld [vmem:[#allocation8 + $0x328] ss:$16 sps:$4 sm:$0xff]  }
 0x64f   : > { %5279 = vmatprep.subr.bf16.mxu0 %v15886_v23  ;;  %v15988_v23 = vld [vmem:[#allocation8 + $0x30c] ss:$16 sps:$4 sm:$0xff]  }
 0x652   : > { %5280 = vmatpush1.bf16.msra.mxu0 %v15884_v24  ;;  %v15986_v24 = vld [vmem:[#allocation8 + $0x308] ss:$16 sps:$4 sm:$0xff]  }
 0x653   : > { %5281 = vmatprep.subr.bf16.mxu0 %v15892_v19 }
 0x656   : > { %5282 = vmatpush1.bf16.msra.mxu0 %v15890_v27 }
 0x657   : > { %5283 = vmatprep.subr.bf16.mxu0 %v15898_v28 }
 0x65a   : > { %5284 = vmatpush2.bf16.msra.mxu0 %v15896_v29 }
 0x65b   : > { %5285 = vmatprep.subr.bf16.mxu0 %v15904_v30 }
 0x65e   : > { %5286 = vmatpush2.bf16.msra.mxu0 %v15902_v31 }
 0x65f   : > { %5287 = vmatprep.subr.bf16.mxu0 %v15910_v8 }
 0x662   : > { %5288 = vmatpush2.bf16.msra.mxu0 %v15908_v32 }
 0x663   : > { %5289 = vmatprep.subr.bf16.mxu0 %v15916_v33 }
 0x666   : > { %5290 = vmatpush2.bf16.msra.mxu0 %v15914_v34 }
 0x667   : > { %5291 = vmatprep.subr.bf16.mxu0 %v15922_v36 }
 0x66a   : > { %5292 = vmatpush2.bf16.msra.mxu0 %v15920_v37 }
 0x66b   : > { %5293 = vmatprep.subr.bf16.mxu0 %v15928_v38  ;;  %v4523_v38 = vld [vmem:[#allocation10] sm:$0xf] }
 0x66e   : > { %5294 = vmatpush2.bf16.msra.mxu0 %v15926_v9  ;;  %v4532_v9 = vrot.slane %v4523_v38, %v17604_v26 }
 0x66f   : > { %5295 = vmatprep.subr.bf16.mxu0 %v15934_v50  ;;  %v4528_v50 = vrot.slane %v4523_v38, %v17601_v25 }
 0x671   : > { %v15218_v42 = vpop.permute.xlu1 %15217 }
 0x672   : > { %5296 = vmatpush2.bf16.msra.mxu0 %v15932_v39  ;;  %v15220_v40 = vunpack.i.h.bf16 %v15218_v42  ;;  %v15219_v13 = vunpack.i.l.bf16 %v15218_v42  ;;  %v4536_v42 = vrot.slane %v4523_v38, %v17619_v51 }
 0x673   : > { %5297 = vmatprep.subr.bf16.mxu0 %v15940_v44 }
 0x674   : > { %v4389_v46 = vsel %vm3500_vm1, %v17831_v35, %v15220_v40  ;;  %v4390_v47 = vsel %vm3500_vm1, %v17833_v55, %v15219_v13  ;;  %v15947_v35 = vld [vmem:[#allocation8 + $0x2a8] ss:$16 sps:$4 sm:$0xff]   ;;  %v15952_v55 = vld [vmem:[#allocation8 + $0x28c] ss:$16 sps:$4 sm:$0xff]  }
 0x675   : > { %v17847_v48 = vpack.c.bf16 %v4389_v46, %v4389_v46  ;;  %v4394_v53 = vpack.c.bf16 %v4390_v47, %v4390_v47  ;;  %v16794_v47 = vld [vmem:[%s17540_s7 + $0x8] sm:$0xff] }
 0x676   : > { %5298 = vmatpush2.bf16.msra.mxu0 %v15938_v45  ;;  %v4540_v45 = vrot.slane %v4523_v38, %v17622_v54 }
 0x677   : > { %5258 = vmatprep.mubr.bf16.mxu1 %v4394_v53 }
 0x678   : > { %5259 = vmatmul.mubr.bf16.vlgmr.msra.gmra.mxu1 %v17847_v48 }
 0x679   : > { %5300 = vmatmul.mubr.bf16.vlgmr.msra.gmra.mxu0 %v17840_v22  ;;  %5309 = vmatpush1.bf16.msra.mxu1 %v15941_v56  ;;  %v15965_v22 = vld [vmem:[#allocation8 + $0x3e8] ss:$16 sps:$4 sm:$0xff]  }
 0x67a   : > { %5340 = vmatprep.mubr.bf16.mxu1 %v4394_v53  ;;  %5310 = vmatprep.subr.bf16.mxu1 %v15946_v57  ;;  %v16795_v56 = vld [vmem:[%s17540_s7] sm:$0xff] }
 0x67d   : > { %5311 = vmatpush1.bf16.msra.mxu1 %v15944_v58 }
 0x67e   : > { %5312 = vmatprep.subr.bf16.mxu1 %v15949_v59 }
 0x681   : > { %5313 = vmatpush1.bf16.msra.mxu1 %v15947_v35 }
 0x682   : > { %5314 = vmatprep.subr.bf16.mxu1 %v15952_v55 }
 0x685   : > { %5315 = vmatpush1.bf16.msra.mxu1 %v15950_v62  ;;  %v16796_v62 = vld [vmem:[%s17540_s7 + $0x10] sm:$0xff] }
 0x686   : > { %5316 = vmatprep.subr.bf16.mxu1 %v15955_v41 }
 0x689   : > { %5317 = vmatpush1.bf16.msra.mxu1 %v15953_v61 }
 0x68a   : > { %5318 = vmatprep.subr.bf16.mxu1 %v15958_v63 }
 0x68d   : > { %5319 = vmatpush1.bf16.msra.mxu1 %v15956_v15  ;;  %v16797_v15 = vld [vmem:[%s17540_s7 + $0x18] sm:$0xff] }
 0x68e   : > { %5320 = vmatprep.subr.bf16.mxu1 %v15961_v0 }
 0x691   : > { %5321 = vmatpush1.bf16.msra.mxu1 %v15959_v1 }
 0x692   : > { %5322 = vmatprep.subr.bf16.mxu1 %v15964_v2 }
 0x695   : > { %5323 = vmatpush1.bf16.msra.mxu1 %v15962_v3 }
 0x696   : > { %5324 = vmatprep.subr.bf16.mxu1 %v15967_v4  ;;  %v5548_v4 = vld [vmem:[#allocation14 + $0x380] sm:$0xff] }
 0x699   : > { %5325 = vmatpush2.bf16.msra.mxu1 %v15965_v22  ;;  %v5556_v22 = vld [vmem:[#allocation14 + $0x3c0] sm:$0xff] }
 0x69a   : > { %5326 = vmatprep.subr.bf16.mxu1 %v15970_v6  ;;  %v5804_v6 = vld [vmem:[#allocation14 + $0xb80] sm:$0xff] }
 0x69d   : > { %5327 = vmatpush2.bf16.msra.mxu1 %v15968_v7  ;;  %v13988_v7 = vcombine.low %v5548_v4, %v5556_v22 }
 0x69e   : > { %5328 = vmatprep.subr.bf16.mxu1 %v15973_v10  ;;  %v13989_v10 = vcombine.high %v5548_v4, %v5556_v22 }
 0x6a0   : > { %8592 = vmatprep.subr.bf16.mxu0 %v13989_v10  ;;  %v5692_v10 = vld [vmem:[#allocation14 + $0x800] sm:$0xff] }
 0x6a1   : > { %5329 = vmatpush2.bf16.msra.mxu1 %v15971_v11  ;;  %v5812_v11 = vld [vmem:[#allocation14 + $0xbc0] sm:$0xff]  ;;  %8593 = vmatpush1.bf16.msra.mxu0 %v13988_v7 }
 0x6a2   : > { %5330 = vmatprep.subr.bf16.mxu1 %v15976_v20  ;;  %v5532_v20 = vld [vmem:[#allocation14 + $0x300] sm:$0xff] }
 0x6a3   : > { %v5444_v7 = vld [vmem:[#allocation14 + $0x40] sm:$0xff] }
 0x6a5   : > { %5331 = vmatpush2.bf16.msra.mxu1 %v15974_v12  ;;  %v5540_v12 = vld [vmem:[#allocation14 + $0x340] sm:$0xff] }
 0x6a6   : > { %5332 = vmatprep.subr.bf16.mxu1 %v15979_v14  ;;  %v14244_v14 = vcombine.low %v5804_v6, %v5812_v11 }
 0x6a9   : > { %5333 = vmatpush2.bf16.msra.mxu1 %v15977_v17  ;;  %v14245_v17 = vcombine.high %v5804_v6, %v5812_v11  ;;  %v5436_v6 = vld [vmem:[#allocation14] sm:$0xff] }
 0x6aa   : > { %5334 = vmatprep.subr.bf16.mxu1 %v15982_v60  ;;  %v13973_v60 = vcombine.high %v5532_v20, %v5540_v12  ;;  %v5700_v11 = vld [vmem:[#allocation14 + $0x840] sm:$0xff] }
 0x6ac   : > { %8594 = vmatprep.subr.bf16.mxu0 %v13973_v60  ;;  %v5676_v60 = vld [vmem:[#allocation14 + $0x780] sm:$0xff] }
 0x6ad   : > { %5335 = vmatpush2.bf16.msra.mxu1 %v15980_v52  ;;  %v5788_v52 = vld [vmem:[#allocation14 + $0xb00] sm:$0xff] }
 0x6ae   : > { %5336 = vmatprep.subr.bf16.mxu1 %v15985_v18  ;;  %v5796_v18 = vld [vmem:[#allocation14 + $0xb40] sm:$0xff] }
 0x6b1   : > { %5337 = vmatpush2.bf16.msra.mxu1 %v15983_v21  ;;  %v5516_v21 = vld [vmem:[#allocation14 + $0x280] sm:$0xff] }
 0x6b2   : > { %5338 = vmatprep.subr.bf16.mxu1 %v15988_v23  ;;  %v14229_v23 = vcombine.high %v5788_v52, %v5796_v18 }
 0x6b5   : > { %5339 = vmatpush2.bf16.msra.mxu1 %v15986_v24  ;;  %v5524_v24 = vld [vmem:[#allocation14 + $0x2c0] sm:$0xff] }
 0x6b6   : > { %8633 = vmatprep.subr.bf16.mxu1 %v14245_v17  ;;  %v14133_v17 = vcombine.high %v5692_v10, %v5700_v11 }
 0x6b8   : > { %5341 = vmatmul.mubr.bf16.vlgmr.msra.gmra.mxu1 %v17847_v48 }
 0x6b9   : > { %8634 = vmatpush1.bf16.msra.mxu1 %v14244_v14  ;;  %v13877_v14 = vcombine.high %v5436_v6, %v5444_v7 }
 0x6ba   : > { %8635 = vmatprep.subr.bf16.mxu1 %v14229_v23  ;;  %v13876_v23 = vcombine.low %v5436_v6, %v5444_v7 }
 0x6f9   : > { %v5219_v19 = vpop.f32.mrf.mxu0 }
 0x6fa   : > { %v5220_v44 = vadd.f32 %v5219_v19, %v4528_v50  ;;  %v5772_v19 = vld [vmem:[#allocation14 + $0xa80] sm:$0xff] }
 0x6fb   : > { %v5221_v27 = vpop.f32.mrf.mxu0  ;;  %v5484_v50 = vld [vmem:[#allocation14 + $0x180] sm:$0xff] }
 0x6fc   : > { %v5222_v39 = vadd.f32 %v5221_v27, %v4532_v9  ;;  %v5780_v27 = vld [vmem:[#allocation14 + $0xac0] sm:$0xff] }
 0x6fd   : > { %v5223_v28 = vpop.f32.mrf.mxu0 }
 0x6fe   : > { %v13972_v28 = vcombine.low %v5532_v20, %v5540_v12 }
 0x6ff   : > { %v5224_v29 = vpop.f32.mrf.mxu0 }
 0x700   : > { %v14228_v29 = vcombine.low %v5788_v52, %v5796_v18  ;;  %8595 = vmatpush1.bf16.msra.mxu0 %v13972_v28  ;;  %v5684_v52 = vld [vmem:[#allocation14 + $0x7c0] sm:$0xff] }
 0x701   : > { %v5932_v18 = vld [vmem:[#allocation14 + $0xf80] sm:$0xff] }
 0x702   : > { %8636 = vmatpush1.bf16.msra.mxu1 %v14228_v29  ;;  %v5660_v28 = vld [vmem:[#allocation14 + $0x700] sm:$0xff] }
 0x703   : > { %v5668_v29 = vld [vmem:[#allocation14 + $0x740] sm:$0xff] }
 0x738   : > { %v5260_v30 = vpop.f32.mrf.mxu1 }
 0x739   : > { %v5301_v31 = vpop.f32.mrf.mxu0  ;;  %v5261_v13 = vadd.f32 %v5260_v30, %v5220_v44  ;;  %v13957_v30 = vcombine.high %v5516_v21, %v5524_v24  ;;  %v5740_v44 = vld [vmem:[#allocation14 + $0x980] sm:$0xff] }
 0x73a   : > { %v5262_v8 = vpop.f32.mrf.mxu1  ;;  %v5302_v46 = vadd.f32 %v5301_v31, %v4536_v42  ;;  %v14213_v31 = vcombine.high %v5772_v19, %v5780_v27  ;;  %v5748_v42 = vld [vmem:[#allocation14 + $0x9c0] sm:$0xff] }
 0x73b   : > { %v5303_v32 = vpop.f32.mrf.mxu0  ;;  %v5263_v40 = vadd.f32 %v5262_v8, %v5222_v39  ;;  %v17860_v57 = vadd.f32 %v16795_v56, %v5261_v13  ;;  %v5500_v8 = vld [vmem:[#allocation14 + $0x200] sm:$0xff]  ;;  %8596 = vmatprep.subr.bf16.mxu0 %v13957_v30 }
 0x73c   : > { %v5264_v33 = vpop.f32.mrf.mxu1  ;;  %v5304_v58 = vadd.f32 %v5303_v32, %v4540_v45  ;;  %v5508_v32 = vld [vmem:[#allocation14 + $0x240] sm:$0xff]  ;;  %8637 = vmatprep.subr.bf16.mxu1 %v14213_v31 }
 0x73d   : > { %v5305_v34 = vpop.f32.mrf.mxu0  ;;  %v17857_v48 = vadd.f32 %v16794_v47, %v5263_v40  ;;  %v5756_v33 = vld [vmem:[#allocation14 + $0xa00] sm:$0xff]  ;;  %v13941_v38 = vcombine.high %v5500_v8, %v5508_v32  ;;  %v13940_v40 = vcombine.low %v5500_v8, %v5508_v32  ;;  %v14116_v8 = vcombine.low %v5676_v60, %v5684_v52 }
 0x73e   : > { %v5265_v36 = vpop.f32.mrf.mxu1  ;;  %v5764_v34 = vld [vmem:[#allocation14 + $0xa40] sm:$0xff] }
 0x73f   : > { %v5306_v37 = vpop.f32.mrf.mxu0  ;;  %v5355_v55 = vadd.f32 %v17857_v48, %v17860_v57  ;;  %v13956_v36 = vcombine.low %v5516_v21, %v5524_v24  ;;  %v14197_v9 = vcombine.high %v5756_v33, %v5764_v34  ;;  %v5492_v39 = vld [vmem:[#allocation14 + $0x1c0] sm:$0xff]  ;;  %v14196_v13 = vcombine.low %v5756_v33, %v5764_v34 }
 0x740   : > { %v14212_v37 = vcombine.low %v5772_v19, %v5780_v27  ;;  %v13925_v45 = vcombine.high %v5484_v50, %v5492_v39  ;;  %v5468_v47 = vld [vmem:[#allocation14 + $0x100] sm:$0xff]  ;;  %v14132_v24 = vcombine.low %v5692_v10, %v5700_v11  ;;  %v14117_v19 = vcombine.high %v5676_v60, %v5684_v52 }
 0x741   : > { %8597 = vmatpush1.bf16.msra.mxu0 %v13956_v36  ;;  %v5724_v56 = vld [vmem:[#allocation14 + $0x900] sm:$0xff]  ;;  %v14101_v33 = vcombine.high %v5660_v28, %v5668_v29  ;;  %v14100_v36 = vcombine.low %v5660_v28, %v5668_v29 }
 0x742   : > { %8638 = vmatpush1.bf16.msra.mxu1 %v14212_v37  ;;  %8598 = vmatprep.subr.bf16.mxu0 %v13941_v38  ;;  %v5940_v21 = vld [vmem:[#allocation14 + $0xfc0] sm:$0xff] }
 0x743   : > { %8639 = vmatprep.subr.bf16.mxu1 %v14197_v9  ;;  %v14373_v27 = vcombine.high %v5932_v18, %v5940_v21  ;;  %v5916_v30 = vld [vmem:[#allocation14 + $0xf00] sm:$0xff]  ;;  %v14372_v32 = vcombine.low %v5932_v18, %v5940_v21 }
 0x744   : > { %v5924_v31 = vld [vmem:[#allocation14 + $0xf40] sm:$0xff] }
 0x745   : > { %8599 = vmatpush1.bf16.msra.mxu0 %v13940_v40  ;;  %v14357_v34 = vcombine.high %v5916_v30, %v5924_v31  ;;  %v14356_v37 = vcombine.low %v5916_v30, %v5924_v31  ;;  %v5868_v10 = vld [vmem:[#allocation14 + $0xd80] sm:$0xff] }
 0x746   : > { %8640 = vmatpush1.bf16.msra.mxu1 %v14196_v13  ;;  %8600 = vmatprep.subr.bf16.mxu0 %v13925_v45  ;;  %v5876_v11 = vld [vmem:[#allocation14 + $0xdc0] sm:$0xff] }
 0x747   : > { %v5860_v60 = vld [vmem:[#allocation14 + $0xd40] sm:$0xff]  ;;  %v14308_v18 = vcombine.low %v5868_v10, %v5876_v11 }
 0x748   : > { %v5844_v28 = vld [vmem:[#allocation14 + $0xcc0] sm:$0xff] }
 0x778   : > { %v5342_v53 = vpop.f32.mrf.mxu1 }
 0x779   : > { %v5343_v59 = vadd.f32 %v5342_v53, %v5302_v46  ;;  %v14181_v46 = vcombine.high %v5740_v44, %v5748_v42  ;;  %v5476_v53 = vld [vmem:[#allocation14 + $0x140] sm:$0xff] }
 0x77a   : > { %v5344_v35 = vpop.f32.mrf.mxu1 }
 0x77b   : > { %v17865_v41 = vadd.f32 %v16796_v62, %v5343_v59  ;;  %v5345_v61 = vadd.f32 %v5344_v35, %v5304_v58  ;;  %v5732_v58 = vld [vmem:[#allocation14 + $0x940] sm:$0xff]  ;;  %v13924_v59 = vcombine.low %v5484_v50, %v5492_v39  ;;  %v14180_v35 = vcombine.low %v5740_v44, %v5748_v42  ;;  %8641 = vmatprep.subr.bf16.mxu1 %v14181_v46 }
 0x77c   : > { %v5346_v63 = vpop.f32.mrf.mxu1  ;;  %v14165_v62 = vcombine.high %v5724_v56, %v5732_v58 }
 0x77d   : > { %v17868_v0 = vadd.f32 %v16797_v15, %v5345_v61  ;;  %v5356_v1 = vadd.f32 %v5355_v55, %v17865_v41  ;;  %v13909_v55 = vcombine.high %v5468_v47, %v5476_v53  ;;  %v5452_v61 = vld [vmem:[#allocation14 + $0x80] sm:$0xff]  ;;  %8601 = vmatpush1.bf16.msra.mxu0 %v13924_v59  ;;  %8642 = vmatpush1.bf16.msra.mxu1 %v14180_v35 }
 0x77e   : > { %v5347_v2 = vpop.f32.mrf.mxu1  ;;  %v5460_v63 = vld [vmem:[#allocation14 + $0xc0] sm:$0xff]  ;;  %8643 = vmatprep.subr.bf16.mxu1 %v14165_v62 }
 0x77f   : > { %v5357_v3 = vadd.f32 %v5356_v1, %v17868_v0  ;;  %v5708_v15 = vld [vmem:[#allocation14 + $0x880] sm:$0xff]  ;;  %v13908_v2 = vcombine.low %v5468_v47, %v5476_v53  ;;  %8602 = vmatprep.subr.bf16.mxu0 %v13909_v55  ;;  %v13893_v4 = vcombine.high %v5452_v61, %v5460_v63  ;;  %v13892_v20 = vcombine.low %v5452_v61, %v5460_v63 }
 0x780   : > { %v5716_v1 = vld [vmem:[#allocation14 + $0x8c0] sm:$0xff] }
 0x781   : > { %5358 = vadd.xlane.f32.xlu1 %v5357_v3  ;;  %v14164_v3 = vcombine.low %v5724_v56, %v5732_v58  ;;  %v14149_v22 = vcombine.high %v5708_v15, %v5716_v1  ;;  %8603 = vmatpush1.bf16.msra.mxu0 %v13908_v2  ;;  %v14148_v12 = vcombine.low %v5708_v15, %v5716_v1  ;;  %v5652_v53 = vld [vmem:[#allocation14 + $0x6c0] sm:$0xff] }
 0x782   : > { %8604 = vmatprep.subr.bf16.mxu0 %v13893_v4  ;;  %v5908_v58 = vld [vmem:[#allocation14 + $0xec0] sm:$0xff] }
 0x783   : > { %8644 = vmatpush1.bf16.msra.mxu1 %v14164_v3  ;;  %v5628_v62 = vld [vmem:[#allocation14 + $0x600] sm:$0xff] }
 0x784   : > { %8645 = vmatprep.subr.bf16.mxu1 %v14149_v22  ;;  %v5636_v61 = vld [vmem:[#allocation14 + $0x640] sm:$0xff] }
 0x785   : > { %8605 = vmatpush1.bf16.msra.mxu0 %v13892_v20  ;;  %v5884_v63 = vld [vmem:[#allocation14 + $0xe00] sm:$0xff]  ;;  %v14068_v15 = vcombine.low %v5628_v62, %v5636_v61  ;;  %v14069_v1 = vcombine.high %v5628_v62, %v5636_v61  ;;  %v5354_v62 = vld [vmem:[#allocation13] sm:$0xf] }
 0x786   : > { %8606 = vmatprep.subr.bf16.mxu0 %v13877_v14  ;;  %v5892_v2 = vld [vmem:[#allocation14 + $0xe40] sm:$0xff] }
 0x787   : > { %8646 = vmatpush1.bf16.msra.mxu1 %v14148_v12  ;;  %v5612_v3 = vld [vmem:[#allocation14 + $0x580] sm:$0xff]  ;;  %v14324_v22 = vcombine.low %v5884_v63, %v5892_v2  ;;  %v14325_v6 = vcombine.high %v5884_v63, %v5892_v2  ;;  %v14309_v12 = vcombine.high %v5868_v10, %v5876_v11 }
 0x788   : > { %8647 = vmatprep.subr.bf16.mxu1 %v14133_v17  ;;  %v5620_v4 = vld [vmem:[#allocation14 + $0x5c0] sm:$0xff] }
 0x789   : > { %8607 = vmatpush1.bf16.msra.mxu0 %v13876_v23  ;;  %v14053_v7 = vcombine.high %v5612_v3, %v5620_v4  ;;  %v5596_v20 = vld [vmem:[#allocation14 + $0x500] sm:$0xff]  ;;  %v14052_v52 = vcombine.low %v5612_v3, %v5620_v4  ;;  %v5415_v3 = vrot.slane %v5354_v62, %v17604_v26  ;;  %v5423_v4 = vrot.slane %v5354_v62, %v17622_v54 }
 0x78a   : > { %8608 = vmatprep.subr.bf16.mxu0 %v14117_v19  ;;  %v5604_v14 = vld [vmem:[#allocation14 + $0x540] sm:$0xff] }
 0x78b   : > { %8648 = vmatpush1.bf16.msra.mxu1 %v14132_v24  ;;  %v5852_v17 = vld [vmem:[#allocation14 + $0xd00] sm:$0xff]  ;;  %v14037_v21 = vcombine.high %v5596_v20, %v5604_v14  ;;  %v14036_v29 = vcombine.low %v5596_v20, %v5604_v14 }
 0x78c   : > { %8649 = vmatprep.subr.bf16.mxu1 %v14373_v27  ;;  %v14293_v23 = vcombine.high %v5852_v17, %v5860_v60  ;;  %v5580_v24 = vld [vmem:[#allocation14 + $0x480] sm:$0xff]  ;;  %v14292_v30 = vcombine.low %v5852_v17, %v5860_v60 }
 0x78d   : > { %8609 = vmatpush2.bf16.msra.mxu0 %v14116_v8  ;;  %v5588_v19 = vld [vmem:[#allocation14 + $0x4c0] sm:$0xff] }
 0x78e   : > { %8610 = vmatprep.subr.bf16.mxu0 %v14101_v33  ;;  %v5836_v27 = vld [vmem:[#allocation14 + $0xc80] sm:$0xff]  ;;  %v14021_v31 = vcombine.high %v5580_v24, %v5588_v19 }
 0x78f   : > { %8650 = vmatpush2.bf16.msra.mxu1 %v14372_v32  ;;  %v14277_v8 = vcombine.high %v5836_v27, %v5844_v28  ;;  %v5564_v32 = vld [vmem:[#allocation14 + $0x400] sm:$0xff] }
 0x790   : > { %8651 = vmatprep.subr.bf16.mxu1 %v14357_v34  ;;  %v5572_v33 = vld [vmem:[#allocation14 + $0x440] sm:$0xff] }
 0x791   : > { %8611 = vmatpush2.bf16.msra.mxu0 %v14100_v36  ;;  %v5820_v34 = vld [vmem:[#allocation14 + $0xc00] sm:$0xff] }
 0x792   : > { %v5828_v36 = vld [vmem:[#allocation14 + $0xc40] sm:$0xff] }
 0x793   : > { %8652 = vmatpush2.bf16.msra.mxu1 %v14356_v37  ;;  %v14020_v37 = vcombine.low %v5580_v24, %v5588_v19  ;;  %v5533_v24 = vld [vmem:[#allocation14 + $0x308] sm:$0xff] }
 0x794   : > { %v5789_v19 = vld [vmem:[#allocation14 + $0xb08] sm:$0xff] }
 0x80a   : > { %v5359_v38 = vpop.xlane.xlu1 %5358 }
 0x80b   : > { %v5361_v9 = vmul.f32 0.001953125, %v5359_v38  ;;  %v14276_v38 = vcombine.low %v5836_v27, %v5844_v28 }
 0x80d   : > { %v17873_v50 = vsub.f32 %v17860_v57, %v5361_v9  ;;  %v17876_v39 = vsub.f32 %v17857_v48, %v5361_v9  ;;  %v17879_v44 = vsub.f32 %v17865_v41, %v5361_v9  ;;  %v17882_v42 = vsub.f32 %v17868_v0, %v5361_v9  ;;  %v5644_v41 = vld [vmem:[#allocation14 + $0x680] sm:$0xff] }
 0x80e   : > { %v5900_v0 = vld [vmem:[#allocation14 + $0xe80] sm:$0xff]  ;;  %v14085_v56 = vcombine.high %v5644_v41, %v5652_v53  ;;  %v14084_v59 = vcombine.low %v5644_v41, %v5652_v53  ;;  %v14005_v9 = vcombine.high %v5564_v32, %v5572_v33  ;;  %v5813_v41 = vld [vmem:[#allocation14 + $0xbc8] sm:$0xff] }
 0x80f   : > { %v5366_v40 = vmul.f32 %v17873_v50, %v17873_v50  ;;  %v5367_v13 = vmul.f32 %v17876_v39, %v17876_v39  ;;  %v5368_v45 = vmul.f32 %v17879_v44, %v17879_v44  ;;  %v5369_v48 = vmul.f32 %v17882_v42, %v17882_v42 }
 0x810   : > { %v14340_v35 = vcombine.low %v5900_v0, %v5908_v58  ;;  %v14341_v55 = vcombine.high %v5900_v0, %v5908_v58  ;;  %8612 = vmatprep.subr.bf16.mxu0 %v14085_v56 }
 0x811   : > { %v5370_v57 = vadd.f32 %v5367_v13, %v5366_v40  ;;  %8613 = vmatpush2.bf16.msra.mxu0 %v14084_v59  ;;  %v14261_v40 = vcombine.high %v5820_v34, %v5828_v36  ;;  %v14004_v13 = vcombine.low %v5564_v32, %v5572_v33  ;;  %v5773_v32 = vld [vmem:[#allocation14 + $0xa88] sm:$0xff] }
 0x812   : > { %8653 = vmatprep.subr.bf16.mxu1 %v14341_v55  ;;  %8614 = vmatprep.subr.bf16.mxu0 %v14069_v1  ;;  %v5353_v55 = vld [vmem:[#allocation11] sm:$0xf]  ;;  %v5781_v33 = vld [vmem:[#allocation14 + $0xac8] sm:$0xff] }
 0x813   : > { %v5371_v46 = vadd.f32 %v5370_v57, %v5368_v45  ;;  %8654 = vmatpush2.bf16.msra.mxu1 %v14340_v35  ;;  %v14260_v45 = vcombine.low %v5820_v34, %v5828_v36  ;;  %v5549_v57 = vld [vmem:[#allocation14 + $0x388] sm:$0xff]  ;;  %v5390_v61 = vrot.slane %v5353_v55, %v17604_v26  ;;  %v5398_v63 = vrot.slane %v5353_v55, %v17622_v54 }
 0x814   : > { %8655 = vmatprep.subr.bf16.mxu1 %v14325_v6  ;;  %v5394_v1 = vrot.slane %v5353_v55, %v17619_v51  ;;  %v5419_v6 = vrot.slane %v5354_v62, %v17619_v51 }
 0x815   : > { %v5372_v47 = vadd.f32 %v5371_v46, %v5369_v48  ;;  %8615 = vmatpush2.bf16.msra.mxu0 %v14068_v15  ;;  %v5557_v48 = vld [vmem:[#allocation14 + $0x3c8] sm:$0xff]  ;;  %v5386_v15 = vrot.slane %v5353_v55, %v17601_v25 }
 0x816   : > { %8616 = vmatprep.subr.bf16.mxu0 %v14053_v7  ;;  %v5805_v46 = vld [vmem:[#allocation14 + $0xb88] sm:$0xff]  ;;  %v13990_v53 = vcombine.low %v5549_v57, %v5557_v48 }
 0x817   : > { %5373 = vadd.xlane.f32.xlu0 %v5372_v47  ;;  %8656 = vmatpush2.bf16.msra.mxu1 %v14324_v22  ;;  %v13991_v47 = vcombine.high %v5549_v57, %v5557_v48  ;;  %v14246_v0 = vcombine.low %v5805_v46, %v5813_v41  ;;  %v14247_v56 = vcombine.high %v5805_v46, %v5813_v41  ;;  %v5485_v41 = vld [vmem:[#allocation14 + $0x188] sm:$0xff] }
 0x818   : > { %8657 = vmatprep.subr.bf16.mxu1 %v14309_v12  ;;  %v5411_v22 = vrot.slane %v5354_v62, %v17601_v25  ;;  %v14214_v48 = vcombine.low %v5773_v32, %v5781_v33  ;;  %v5469_v62 = vld [vmem:[#allocation14 + $0x108] sm:$0xff] }
 0x819   : > { %8617 = vmatpush2.bf16.msra.mxu0 %v14052_v52 }
 0x81a   : > { %8618 = vmatprep.subr.bf16.mxu0 %v14037_v21 }
 0x81b   : > { %8658 = vmatpush2.bf16.msra.mxu1 %v14308_v18 }
 0x81c   : > { %8659 = vmatprep.subr.bf16.mxu1 %v14293_v23 }
 0x81d   : > { %8619 = vmatpush2.bf16.msra.mxu0 %v14036_v29  ;;  %v5517_v29 = vld [vmem:[#allocation14 + $0x288] sm:$0xff] }
 0x81e   : > { %8620 = vmatprep.subr.bf16.mxu0 %v14021_v31 }
 0x81f   : > { %8660 = vmatpush2.bf16.msra.mxu1 %v14292_v30 }
 0x820   : > { %8661 = vmatprep.subr.bf16.mxu1 %v14277_v8  ;;  %v5525_v8 = vld [vmem:[#allocation14 + $0x2c8] sm:$0xff] }
 0x821   : > { %8621 = vmatpush2.bf16.msra.mxu0 %v14020_v37  ;;  %v13959_v37 = vcombine.high %v5517_v29, %v5525_v8  ;;  %v13958_v57 = vcombine.low %v5517_v29, %v5525_v8  ;;  %v5685_v8 = vld [vmem:[#allocation14 + $0x7c8] sm:$0xff] }
 0x822   : > { %8622 = vmatprep.subr.bf16.mxu0 %v14005_v9  ;;  %v5501_v9 = vld [vmem:[#allocation14 + $0x208] sm:$0xff] }
 0x823   : > { %8662 = vmatpush2.bf16.msra.mxu1 %v14276_v38  ;;  %v14215_v38 = vcombine.high %v5773_v32, %v5781_v33  ;;  %v5933_v32 = vld [vmem:[#allocation14 + $0xf88] sm:$0xff] }
 0x824   : > { %8663 = vmatprep.subr.bf16.mxu1 %v14261_v40  ;;  %v5509_v40 = vld [vmem:[#allocation14 + $0x248] sm:$0xff] }
 0x825   : > { %8623 = vmatpush2.bf16.msra.mxu0 %v14004_v13  ;;  %v5757_v13 = vld [vmem:[#allocation14 + $0xa08] sm:$0xff]  ;;  %v13943_v46 = vcombine.high %v5501_v9, %v5509_v40 }
 0x826   : > { %8674 = vmatprep.subr.bf16.mxu0 %v13991_v47  ;;  %v5941_v33 = vld [vmem:[#allocation14 + $0xfc8] sm:$0xff] }
 0x827   : > { %8664 = vmatpush2.bf16.msra.mxu1 %v14260_v45  ;;  %v5765_v45 = vld [vmem:[#allocation14 + $0xa48] sm:$0xff] }
 0x828   : > { %8715 = vmatprep.subr.bf16.mxu1 %v14247_v56  ;;  %v14199_v47 = vcombine.high %v5757_v13, %v5765_v45  ;;  %v5749_v56 = vld [vmem:[#allocation14 + $0x9c8] sm:$0xff] }
 0x8a0   : > { %v5374_v58 = vpop.xlane.xlu0 %5373 }
 0x8a1   : > { %v5375_v59 = vmul.f32 0.001953125, %v5374_v58  ;;  %v13942_v58 = vcombine.low %v5501_v9, %v5509_v40  ;;  %v5661_v9 = vld [vmem:[#allocation14 + $0x708] sm:$0xff] }
 0x8a2   : > { %v5669_v40 = vld [vmem:[#allocation14 + $0x748] sm:$0xff] }
 0x8a3   : > { %v5376_v35 = vadd.f32 1e-05, %v5375_v59  ;;  %v14198_v59 = vcombine.low %v5757_v13, %v5765_v45  ;;  %v5917_v13 = vld [vmem:[#allocation14 + $0xf08] sm:$0xff] }
 0x8a4   : > { %v5925_v45 = vld [vmem:[#allocation14 + $0xf48] sm:$0xff] }
 0x8a5   : > { %16789 = vrsqrt.f32 %v5376_v35 }
 0x8b2   : > { %v16790_v2 = vpop.eup %16789 }
 0x8b3   : > { %v5379_v7 = vmul.f32 %v16790_v2, %v17876_v39  ;;  %v5381_v10 = vmul.f32 %v16790_v2, %v17882_v42  ;;  %v5378_v11 = vmul.f32 %v16790_v2, %v17873_v50  ;;  %v5380_v20 = vmul.f32 %v16790_v2, %v17879_v44  ;;  %v5541_v39 = vld [vmem:[#allocation14 + $0x348] sm:$0xff] }
 0x8b4   : > { %v5797_v42 = vld [vmem:[#allocation14 + $0xb48] sm:$0xff]  ;;  %v13975_v30 = vcombine.high %v5533_v24, %v5541_v39  ;;  %v13974_v34 = vcombine.low %v5533_v24, %v5541_v39 }
 0x8b5   : > { %v5404_v12 = vmul.f32 %v5390_v61, %v5379_v7  ;;  %v5406_v14 = vmul.f32 %v5398_v63, %v5381_v10  ;;  %v5403_v17 = vmul.f32 %v5386_v15, %v5378_v11  ;;  %v5405_v60 = vmul.f32 %v5394_v1, %v5380_v20  ;;  %v5477_v61 = vld [vmem:[#allocation14 + $0x148] sm:$0xff] }
 0x8b6   : > { %v14231_v31 = vcombine.high %v5789_v19, %v5797_v42  ;;  %v14230_v36 = vcombine.low %v5789_v19, %v5797_v42  ;;  %v5725_v63 = vld [vmem:[#allocation14 + $0x908] sm:$0xff]  ;;  %v13910_v11 = vcombine.low %v5469_v62, %v5477_v61 }
 0x8b7   : > { %v17904_v52 = vadd.f32 %v5415_v3, %v5404_v12  ;;  %v17906_v18 = vadd.f32 %v5423_v4, %v5406_v14  ;;  %v17908_v21 = vadd.f32 %v5411_v22, %v5403_v17  ;;  %v17910_v23 = vadd.f32 %v5419_v6, %v5405_v60  ;;  %v5733_v15 = vld [vmem:[#allocation14 + $0x948] sm:$0xff] }
 0x8b8   : > { %v13911_v3 = vcombine.high %v5469_v62, %v5477_v61  ;;  %v14167_v4 = vcombine.high %v5725_v63, %v5733_v15  ;;  %v5453_v22 = vld [vmem:[#allocation14 + $0x88] sm:$0xff]  ;;  %v14166_v20 = vcombine.low %v5725_v63, %v5733_v15 }
 0x8b9   : > { %v17914_v50 = vpack.c.bf16 %v17904_v52, %v17904_v52  ;;  %v17918_v44 = vpack.c.bf16 %v17906_v18, %v17906_v18  ;;  %v17922_v27 = vpack.c.bf16 %v17908_v21, %v17908_v21  ;;  %v17926_v28 = vpack.c.bf16 %v17910_v23, %v17910_v23  ;;  %v5461_v6 = vld [vmem:[#allocation14 + $0xc8] sm:$0xff] }
 0x8ba   : > { %v5709_v7 = vld [vmem:[#allocation14 + $0x888] sm:$0xff]  ;;  %v13895_v12 = vcombine.high %v5453_v22, %v5461_v6  ;;  %v13894_v19 = vcombine.low %v5453_v22, %v5461_v6 }
 0x8bb   : > { %8624 = vmatprep.mubr.bf16.mxu0 %v17914_v50  ;;  %8665 = vmatprep.mubr.bf16.mxu1 %v17918_v44  ;;  %v5717_v10 = vld [vmem:[#allocation14 + $0x8c8] sm:$0xff] }
 0x8bc   : > { %8625 = vmatmul.mubr.bf16.vlgmr.msra.gmra.mxu0 %v17922_v27  ;;  %8666 = vmatmul.mubr.bf16.vlgmr.msra.gmra.mxu1 %v17926_v28  ;;  %v14151_v14 = vcombine.high %v5709_v7, %v5717_v10  ;;  %v5437_v17 = vld [vmem:[#allocation14 + $0x8] sm:$0xff]  ;;  %v14150_v42 = vcombine.low %v5709_v7, %v5717_v10 }
 0x8bd   : > { %8675 = vmatpush1.bf16.msra.mxu0 %v13990_v53  ;;  %8716 = vmatpush1.bf16.msra.mxu1 %v14246_v0  ;;  %v5493_v53 = vld [vmem:[#allocation14 + $0x1c8] sm:$0xff] }
 0x8be   : > { %8706 = vmatprep.mubr.bf16.mxu0 %v17914_v50  ;;  %8747 = vmatprep.mubr.bf16.mxu1 %v17918_v44  ;;  %v5741_v0 = vld [vmem:[#allocation14 + $0x988] sm:$0xff]  ;;  %v13927_v35 = vcombine.high %v5485_v41, %v5493_v53  ;;  %v13926_v1 = vcombine.low %v5485_v41, %v5493_v53 }
 0x8bf   : > { %8676 = vmatprep.subr.bf16.mxu0 %v13975_v30  ;;  %8717 = vmatprep.subr.bf16.mxu1 %v14231_v31  ;;  %v14183_v55 = vcombine.high %v5741_v0, %v5749_v56  ;;  %v14182_v2 = vcombine.low %v5741_v0, %v5749_v56  ;;  %v5445_v60 = vld [vmem:[#allocation14 + $0x48] sm:$0xff] }
 0x8c0   : > { %v5693_v24 = vld [vmem:[#allocation14 + $0x808] sm:$0xff]  ;;  %v13879_v29 = vcombine.high %v5437_v17, %v5445_v60 }
 0x8c1   : > { %8677 = vmatpush1.bf16.msra.mxu0 %v13974_v34  ;;  %8718 = vmatpush1.bf16.msra.mxu1 %v14230_v36  ;;  %v5701_v39 = vld [vmem:[#allocation14 + $0x848] sm:$0xff]  ;;  %v13878_v34 = vcombine.low %v5437_v17, %v5445_v60 }
 0x8c2   : > { %8678 = vmatprep.subr.bf16.mxu0 %v13959_v37  ;;  %8719 = vmatprep.subr.bf16.mxu1 %v14215_v38  ;;  %v14135_v30 = vcombine.high %v5693_v24, %v5701_v39  ;;  %v5677_v31 = vld [vmem:[#allocation14 + $0x788] sm:$0xff]  ;;  %v14134_v36 = vcombine.low %v5693_v24, %v5701_v39  ;;  %v14375_v38 = vcombine.high %v5933_v32, %v5941_v33 }
 0x8c3   : > { %v14119_v37 = vcombine.high %v5677_v31, %v5685_v8  ;;  %v5645_v41 = vld [vmem:[#allocation14 + $0x688] sm:$0xff] }
 0x8c4   : > { %v5653_v53 = vld [vmem:[#allocation14 + $0x6c8] sm:$0xff] }
 0x8c5   : > { %8679 = vmatpush1.bf16.msra.mxu0 %v13958_v57  ;;  %8720 = vmatpush1.bf16.msra.mxu1 %v14214_v48  ;;  %v14118_v57 = vcombine.low %v5677_v31, %v5685_v8  ;;  %v14374_v48 = vcombine.low %v5933_v32, %v5941_v33  ;;  %v5901_v0 = vld [vmem:[#allocation14 + $0xe88] sm:$0xff] }
 0x8c6   : > { %8680 = vmatprep.subr.bf16.mxu0 %v13943_v46  ;;  %8721 = vmatprep.subr.bf16.mxu1 %v14199_v47  ;;  %v14103_v46 = vcombine.high %v5661_v9, %v5669_v40  ;;  %v14359_v47 = vcombine.high %v5917_v13, %v5925_v45  ;;  %v5909_v56 = vld [vmem:[#allocation14 + $0xec8] sm:$0xff] }
 0x8c7   : > { %v5629_v62 = vld [vmem:[#allocation14 + $0x608] sm:$0xff] }
 0x8c8   : > { %v5637_v61 = vld [vmem:[#allocation14 + $0x648] sm:$0xff] }
 0x8c9   : > { %8681 = vmatpush1.bf16.msra.mxu0 %v13942_v58  ;;  %8722 = vmatpush1.bf16.msra.mxu1 %v14198_v59  ;;  %v14102_v58 = vcombine.low %v5661_v9, %v5669_v40  ;;  %v14358_v59 = vcombine.low %v5917_v13, %v5925_v45  ;;  %v5885_v63 = vld [vmem:[#allocation14 + $0xe08] sm:$0xff] }
 0x8ca   : > { %8682 = vmatprep.subr.bf16.mxu0 %v13927_v35  ;;  %8723 = vmatprep.subr.bf16.mxu1 %v14183_v55  ;;  %v14087_v35 = vcombine.high %v5645_v41, %v5653_v53  ;;  %v14343_v55 = vcombine.high %v5901_v0, %v5909_v56  ;;  %v5893_v15 = vld [vmem:[#allocation14 + $0xe48] sm:$0xff] }
 0x8cb   : > { %v5613_v22 = vld [vmem:[#allocation14 + $0x588] sm:$0xff] }
 0x8cc   : > { %v5621_v6 = vld [vmem:[#allocation14 + $0x5c8] sm:$0xff] }
 0x8cd   : > { %8683 = vmatpush1.bf16.msra.mxu0 %v13926_v1  ;;  %8724 = vmatpush1.bf16.msra.mxu1 %v14182_v2  ;;  %v14086_v1 = vcombine.low %v5645_v41, %v5653_v53  ;;  %v14342_v2 = vcombine.low %v5901_v0, %v5909_v56  ;;  %v5869_v7 = vld [vmem:[#allocation14 + $0xd88] sm:$0xff]  ;;  %v5550_v41 = vld [vmem:[#allocation14 + $0x390] sm:$0xff] }
 0x8ce   : > { %8684 = vmatprep.subr.bf16.mxu0 %v13911_v3  ;;  %8725 = vmatprep.subr.bf16.mxu1 %v14167_v4  ;;  %v14071_v3 = vcombine.high %v5629_v62, %v5637_v61  ;;  %v14327_v4 = vcombine.high %v5885_v63, %v5893_v15  ;;  %v5877_v10 = vld [vmem:[#allocation14 + $0xdc8] sm:$0xff]  ;;  %v5558_v53 = vld [vmem:[#allocation14 + $0x3d0] sm:$0xff] }
 0x8cf   : > { %v5597_v17 = vld [vmem:[#allocation14 + $0x508] sm:$0xff]  ;;  %v5806_v0 = vld [vmem:[#allocation14 + $0xb90] sm:$0xff] }
 0x8d0   : > { %v5605_v60 = vld [vmem:[#allocation14 + $0x548] sm:$0xff]  ;;  %v5814_v56 = vld [vmem:[#allocation14 + $0xbd0] sm:$0xff] }
 0x8d1   : > { %8685 = vmatpush1.bf16.msra.mxu0 %v13910_v11  ;;  %8726 = vmatpush1.bf16.msra.mxu1 %v14166_v20  ;;  %v14070_v11 = vcombine.low %v5629_v62, %v5637_v61  ;;  %v14326_v20 = vcombine.low %v5885_v63, %v5893_v15  ;;  %v5853_v24 = vld [vmem:[#allocation14 + $0xd08] sm:$0xff]  ;;  %v5534_v62 = vld [vmem:[#allocation14 + $0x310] sm:$0xff] }
 0x8d2   : > { %8686 = vmatprep.subr.bf16.mxu0 %v13895_v12  ;;  %8727 = vmatprep.subr.bf16.mxu1 %v14151_v14  ;;  %v14055_v12 = vcombine.high %v5613_v22, %v5621_v6  ;;  %v14311_v14 = vcombine.high %v5869_v7, %v5877_v10  ;;  %v5861_v39 = vld [vmem:[#allocation14 + $0xd48] sm:$0xff]  ;;  %v5542_v61 = vld [vmem:[#allocation14 + $0x350] sm:$0xff] }
 0x8d3   : > { %v5581_v31 = vld [vmem:[#allocation14 + $0x488] sm:$0xff]  ;;  %v5790_v63 = vld [vmem:[#allocation14 + $0xb10] sm:$0xff] }
 0x8d4   : > { %v5589_v8 = vld [vmem:[#allocation14 + $0x4c8] sm:$0xff]  ;;  %v5798_v15 = vld [vmem:[#allocation14 + $0xb50] sm:$0xff] }
 0x8d5   : > { %8687 = vmatpush1.bf16.msra.mxu0 %v13894_v19  ;;  %8728 = vmatpush1.bf16.msra.mxu1 %v14150_v42  ;;  %v14054_v19 = vcombine.low %v5613_v22, %v5621_v6  ;;  %v14310_v42 = vcombine.low %v5869_v7, %v5877_v10  ;;  %v5837_v32 = vld [vmem:[#allocation14 + $0xc88] sm:$0xff]  ;;  %v5518_v22 = vld [vmem:[#allocation14 + $0x290] sm:$0xff] }
 0x8d6   : > { %8688 = vmatprep.subr.bf16.mxu0 %v13879_v29  ;;  %8729 = vmatprep.subr.bf16.mxu1 %v14135_v30  ;;  %v14039_v29 = vcombine.high %v5597_v17, %v5605_v60  ;;  %v14295_v30 = vcombine.high %v5853_v24, %v5861_v39  ;;  %v5845_v33 = vld [vmem:[#allocation14 + $0xcc8] sm:$0xff]  ;;  %v5526_v6 = vld [vmem:[#allocation14 + $0x2d0] sm:$0xff] }
 0x8d7   : > { %v5565_v9 = vld [vmem:[#allocation14 + $0x408] sm:$0xff]  ;;  %v5774_v7 = vld [vmem:[#allocation14 + $0xa90] sm:$0xff] }
 0x8d8   : > { %v5573_v40 = vld [vmem:[#allocation14 + $0x448] sm:$0xff]  ;;  %v5782_v10 = vld [vmem:[#allocation14 + $0xad0] sm:$0xff] }
 0x8d9   : > { %8689 = vmatpush1.bf16.msra.mxu0 %v13878_v34  ;;  %8730 = vmatpush1.bf16.msra.mxu1 %v14134_v36  ;;  %v14038_v34 = vcombine.low %v5597_v17, %v5605_v60  ;;  %v14294_v36 = vcombine.low %v5853_v24, %v5861_v39  ;;  %v5821_v13 = vld [vmem:[#allocation14 + $0xc08] sm:$0xff]  ;;  %v5502_v17 = vld [vmem:[#allocation14 + $0x210] sm:$0xff] }
 0x8da   : > { %8690 = vmatprep.subr.bf16.mxu0 %v14119_v37  ;;  %8731 = vmatprep.subr.bf16.mxu1 %v14375_v38  ;;  %v14023_v37 = vcombine.high %v5581_v31, %v5589_v8  ;;  %v14279_v38 = vcombine.high %v5837_v32, %v5845_v33  ;;  %v5829_v45 = vld [vmem:[#allocation14 + $0xc48] sm:$0xff]  ;;  %v5510_v60 = vld [vmem:[#allocation14 + $0x250] sm:$0xff] }
 0x8db   : > { %v5758_v24 = vld [vmem:[#allocation14 + $0xa10] sm:$0xff] }
 0x8dc   : > { %v5766_v39 = vld [vmem:[#allocation14 + $0xa50] sm:$0xff] }
 0x8dd   : > { %8691 = vmatpush2.bf16.msra.mxu0 %v14118_v57  ;;  %8732 = vmatpush2.bf16.msra.mxu1 %v14374_v48  ;;  %v14022_v57 = vcombine.low %v5581_v31, %v5589_v8  ;;  %v14278_v48 = vcombine.low %v5837_v32, %v5845_v33  ;;  %v5486_v31 = vld [vmem:[#allocation14 + $0x190] sm:$0xff] }
 0x8de   : > { %8692 = vmatprep.subr.bf16.mxu0 %v14103_v46  ;;  %8733 = vmatprep.subr.bf16.mxu1 %v14359_v47  ;;  %v14007_v46 = vcombine.high %v5565_v9, %v5573_v40  ;;  %v14263_v47 = vcombine.high %v5821_v13, %v5829_v45  ;;  %v5494_v8 = vld [vmem:[#allocation14 + $0x1d0] sm:$0xff] }
 0x8df   : > { %v5742_v32 = vld [vmem:[#allocation14 + $0x990] sm:$0xff] }
 0x8e0   : > { %v5750_v33 = vld [vmem:[#allocation14 + $0x9d0] sm:$0xff] }
 0x8e1   : > { %8693 = vmatpush2.bf16.msra.mxu0 %v14102_v58  ;;  %8734 = vmatpush2.bf16.msra.mxu1 %v14358_v59  ;;  %v14006_v58 = vcombine.low %v5565_v9, %v5573_v40  ;;  %v14262_v59 = vcombine.low %v5821_v13, %v5829_v45  ;;  %v5470_v9 = vld [vmem:[#allocation14 + $0x110] sm:$0xff] }
 0x8e2   : > { %8694 = vmatprep.subr.bf16.mxu0 %v14087_v35  ;;  %8735 = vmatprep.subr.bf16.mxu1 %v14343_v55  ;;  %v13993_v35 = vcombine.high %v5550_v41, %v5558_v53  ;;  %v14249_v55 = vcombine.high %v5806_v0, %v5814_v56  ;;  %v5478_v40 = vld [vmem:[#allocation14 + $0x150] sm:$0xff] }
 0x8e3   : > { %v5726_v13 = vld [vmem:[#allocation14 + $0x910] sm:$0xff] }
 0x8e4   : > { %v5734_v45 = vld [vmem:[#allocation14 + $0x950] sm:$0xff] }
 0x8e5   : > { %8695 = vmatpush2.bf16.msra.mxu0 %v14086_v1  ;;  %8736 = vmatpush2.bf16.msra.mxu1 %v14342_v2  ;;  %v13992_v1 = vcombine.low %v5550_v41, %v5558_v53  ;;  %v14248_v2 = vcombine.low %v5806_v0, %v5814_v56  ;;  %v5454_v41 = vld [vmem:[#allocation14 + $0x90] sm:$0xff] }
 0x8e6   : > { %8696 = vmatprep.subr.bf16.mxu0 %v14071_v3  ;;  %8737 = vmatprep.subr.bf16.mxu1 %v14327_v4  ;;  %v13977_v3 = vcombine.high %v5534_v62, %v5542_v61  ;;  %v14233_v4 = vcombine.high %v5790_v63, %v5798_v15  ;;  %v5462_v53 = vld [vmem:[#allocation14 + $0xd0] sm:$0xff] }
 0x8e7   : > { %v5710_v0 = vld [vmem:[#allocation14 + $0x890] sm:$0xff] }
 0x8e8   : > { %v5718_v56 = vld [vmem:[#allocation14 + $0x8d0] sm:$0xff] }
 0x8e9   : > { %8697 = vmatpush2.bf16.msra.mxu0 %v14070_v11  ;;  %8738 = vmatpush2.bf16.msra.mxu1 %v14326_v20  ;;  %v13976_v11 = vcombine.low %v5534_v62, %v5542_v61  ;;  %v14232_v20 = vcombine.low %v5790_v63, %v5798_v15  ;;  %v5438_v62 = vld [vmem:[#allocation14 + $0x10] sm:$0xff] }
 0x8ea   : > { %8698 = vmatprep.subr.bf16.mxu0 %v14055_v12  ;;  %8739 = vmatprep.subr.bf16.mxu1 %v14311_v14  ;;  %v13961_v12 = vcombine.high %v5518_v22, %v5526_v6  ;;  %v14217_v14 = vcombine.high %v5774_v7, %v5782_v10  ;;  %v5446_v61 = vld [vmem:[#allocation14 + $0x50] sm:$0xff] }
 0x8eb   : > { %v5694_v63 = vld [vmem:[#allocation14 + $0x810] sm:$0xff] }
 0x8ec   : > { %v5702_v15 = vld [vmem:[#allocation14 + $0x850] sm:$0xff] }
 0x8ed   : > { %8699 = vmatpush2.bf16.msra.mxu0 %v14054_v19  ;;  %8740 = vmatpush2.bf16.msra.mxu1 %v14310_v42  ;;  %v13960_v19 = vcombine.low %v5518_v22, %v5526_v6  ;;  %v14216_v42 = vcombine.low %v5774_v7, %v5782_v10  ;;  %v5678_v22 = vld [vmem:[#allocation14 + $0x790] sm:$0xff] }
 0x8ee   : > { %8700 = vmatprep.subr.bf16.mxu0 %v14039_v29  ;;  %8741 = vmatprep.subr.bf16.mxu1 %v14295_v30  ;;  %v13945_v29 = vcombine.high %v5502_v17, %v5510_v60  ;;  %v14201_v30 = vcombine.high %v5758_v24, %v5766_v39  ;;  %v5686_v6 = vld [vmem:[#allocation14 + $0x7d0] sm:$0xff] }
 0x8ef   : > { %v5934_v7 = vld [vmem:[#allocation14 + $0xf90] sm:$0xff] }
 0x8f0   : > { %v5942_v10 = vld [vmem:[#allocation14 + $0xfd0] sm:$0xff] }
 0x8f1   : > { %8701 = vmatpush2.bf16.msra.mxu0 %v14038_v34  ;;  %8742 = vmatpush2.bf16.msra.mxu1 %v14294_v36  ;;  %v13944_v34 = vcombine.low %v5502_v17, %v5510_v60  ;;  %v14200_v36 = vcombine.low %v5758_v24, %v5766_v39  ;;  %v5662_v17 = vld [vmem:[#allocation14 + $0x710] sm:$0xff] }
 0x8f2   : > { %8702 = vmatprep.subr.bf16.mxu0 %v14023_v37  ;;  %8743 = vmatprep.subr.bf16.mxu1 %v14279_v38  ;;  %v13929_v37 = vcombine.high %v5486_v31, %v5494_v8  ;;  %v14185_v38 = vcombine.high %v5742_v32, %v5750_v33  ;;  %v5670_v60 = vld [vmem:[#allocation14 + $0x750] sm:$0xff] }
 0x8f3   : > { %v5918_v24 = vld [vmem:[#allocation14 + $0xf10] sm:$0xff] }
 0x8f4   : > { %v5926_v39 = vld [vmem:[#allocation14 + $0xf50] sm:$0xff] }
 0x8f5   : > { %8703 = vmatpush2.bf16.msra.mxu0 %v14022_v57  ;;  %8744 = vmatpush2.bf16.msra.mxu1 %v14278_v48  ;;  %v13928_v57 = vcombine.low %v5486_v31, %v5494_v8  ;;  %v14184_v48 = vcombine.low %v5742_v32, %v5750_v33  ;;  %v5646_v31 = vld [vmem:[#allocation14 + $0x690] sm:$0xff] }
 0x8f6   : > { %8704 = vmatprep.subr.bf16.mxu0 %v14007_v46  ;;  %8745 = vmatprep.subr.bf16.mxu1 %v14263_v47  ;;  %v13913_v46 = vcombine.high %v5470_v9, %v5478_v40  ;;  %v14169_v47 = vcombine.high %v5726_v13, %v5734_v45  ;;  %v5654_v8 = vld [vmem:[#allocation14 + $0x6d0] sm:$0xff] }
 0x8f7   : > { %v5902_v32 = vld [vmem:[#allocation14 + $0xe90] sm:$0xff] }
 0x8f8   : > { %v5910_v33 = vld [vmem:[#allocation14 + $0xed0] sm:$0xff] }
 0x8f9   : > { %8705 = vmatpush2.bf16.msra.mxu0 %v14006_v58  ;;  %8746 = vmatpush2.bf16.msra.mxu1 %v14262_v59  ;;  %v13912_v58 = vcombine.low %v5470_v9, %v5478_v40  ;;  %v14168_v59 = vcombine.low %v5726_v13, %v5734_v45  ;;  %v5630_v9 = vld [vmem:[#allocation14 + $0x610] sm:$0xff] }
 0x8fa   : > { %8756 = vmatprep.subr.bf16.mxu0 %v13993_v35  ;;  %8797 = vmatprep.subr.bf16.mxu1 %v14249_v55  ;;  %v13897_v35 = vcombine.high %v5454_v41, %v5462_v53  ;;  %v14153_v55 = vcombine.high %v5710_v0, %v5718_v56  ;;  %v5638_v40 = vld [vmem:[#allocation14 + $0x650] sm:$0xff] }
 0x8fb   : > { %v5886_v13 = vld [vmem:[#allocation14 + $0xe10] sm:$0xff] }
 0x8fc   : > { %8707 = vmatmul.mubr.bf16.vlgmr.msra.gmra.mxu0 %v17922_v27  ;;  %8748 = vmatmul.mubr.bf16.vlgmr.msra.gmra.mxu1 %v17926_v28  ;;  %v5894_v45 = vld [vmem:[#allocation14 + $0xe50] sm:$0xff] }
 0x8fd   : > { %8757 = vmatpush1.bf16.msra.mxu0 %v13992_v1  ;;  %8788 = vmatprep.mubr.bf16.mxu0 %v17914_v50  ;;  %v13896_v1 = vcombine.low %v5454_v41, %v5462_v53  ;;  %v5614_v41 = vld [vmem:[#allocation14 + $0x590] sm:$0xff] }
 0x8fe   : > { %8798 = vmatpush1.bf16.msra.mxu1 %v14248_v2  ;;  %8829 = vmatprep.mubr.bf16.mxu1 %v17918_v44  ;;  %v14152_v2 = vcombine.low %v5710_v0, %v5718_v56  ;;  %v5622_v53 = vld [vmem:[#allocation14 + $0x5d0] sm:$0xff] }
 0x8ff   : > { %8758 = vmatprep.subr.bf16.mxu0 %v13977_v3  ;;  %8799 = vmatprep.subr.bf16.mxu1 %v14233_v4  ;;  %v13881_v3 = vcombine.high %v5438_v62, %v5446_v61  ;;  %v14137_v4 = vcombine.high %v5694_v63, %v5702_v15  ;;  %v5870_v0 = vld [vmem:[#allocation14 + $0xd90] sm:$0xff] }
 0x900   : > { %v5878_v56 = vld [vmem:[#allocation14 + $0xdd0] sm:$0xff] }
 0x901   : > { %8759 = vmatpush1.bf16.msra.mxu0 %v13976_v11  ;;  %v13880_v11 = vcombine.low %v5438_v62, %v5446_v61  ;;  %v5598_v62 = vld [vmem:[#allocation14 + $0x510] sm:$0xff] }
 0x902   : > { %8800 = vmatpush1.bf16.msra.mxu1 %v14232_v20  ;;  %8760 = vmatprep.subr.bf16.mxu0 %v13961_v12  ;;  %v14136_v20 = vcombine.low %v5694_v63, %v5702_v15  ;;  %v14121_v12 = vcombine.high %v5678_v22, %v5686_v6  ;;  %v5606_v61 = vld [vmem:[#allocation14 + $0x550] sm:$0xff] }
 0x903   : > { %8801 = vmatprep.subr.bf16.mxu1 %v14217_v14  ;;  %v14377_v14 = vcombine.high %v5934_v7, %v5942_v10  ;;  %v5854_v63 = vld [vmem:[#allocation14 + $0xd10] sm:$0xff] }
 0x904   : > { %v5862_v15 = vld [vmem:[#allocation14 + $0xd50] sm:$0xff] }
 0x905   : > { %8761 = vmatpush1.bf16.msra.mxu0 %v13960_v19  ;;  %v14120_v19 = vcombine.low %v5678_v22, %v5686_v6  ;;  %v5582_v22 = vld [vmem:[#allocation14 + $0x490] sm:$0xff] }
 0x906   : > { %8802 = vmatpush1.bf16.msra.mxu1 %v14216_v42  ;;  %8762 = vmatprep.subr.bf16.mxu0 %v13945_v29  ;;  %v14376_v42 = vcombine.low %v5934_v7, %v5942_v10  ;;  %v14105_v29 = vcombine.high %v5662_v17, %v5670_v60  ;;  %v5590_v6 = vld [vmem:[#allocation14 + $0x4d0] sm:$0xff] }
 0x907   : > { %8803 = vmatprep.subr.bf16.mxu1 %v14201_v30  ;;  %v14361_v30 = vcombine.high %v5918_v24, %v5926_v39  ;;  %v5838_v7 = vld [vmem:[#allocation14 + $0xc90] sm:$0xff] }
 0x908   : > { %v5846_v10 = vld [vmem:[#allocation14 + $0xcd0] sm:$0xff] }
 0x909   : > { %8763 = vmatpush1.bf16.msra.mxu0 %v13944_v34  ;;  %v14104_v34 = vcombine.low %v5662_v17, %v5670_v60  ;;  %v5566_v17 = vld [vmem:[#allocation14 + $0x410] sm:$0xff] }
 0x90a   : > { %8804 = vmatpush1.bf16.msra.mxu1 %v14200_v36  ;;  %8764 = vmatprep.subr.bf16.mxu0 %v13929_v37  ;;  %v14360_v36 = vcombine.low %v5918_v24, %v5926_v39  ;;  %v14089_v37 = vcombine.high %v5646_v31, %v5654_v8  ;;  %v5574_v60 = vld [vmem:[#allocation14 + $0x450] sm:$0xff] }
 0x90b   : > { %8805 = vmatprep.subr.bf16.mxu1 %v14185_v38  ;;  %v14345_v38 = vcombine.high %v5902_v32, %v5910_v33  ;;  %v5822_v24 = vld [vmem:[#allocation14 + $0xc10] sm:$0xff] }
 0x90c   : > { %v5830_v39 = vld [vmem:[#allocation14 + $0xc50] sm:$0xff] }
 0x90d   : > { %8765 = vmatpush1.bf16.msra.mxu0 %v13928_v57  ;;  %v14088_v57 = vcombine.low %v5646_v31, %v5654_v8  ;;  %v5551_v31 = vld [vmem:[#allocation14 + $0x398] sm:$0xff] }
 0x90e   : > { %8806 = vmatpush1.bf16.msra.mxu1 %v14184_v48  ;;  %8766 = vmatprep.subr.bf16.mxu0 %v13913_v46  ;;  %v14344_v48 = vcombine.low %v5902_v32, %v5910_v33  ;;  %v14073_v46 = vcombine.high %v5630_v9, %v5638_v40  ;;  %v5559_v8 = vld [vmem:[#allocation14 + $0x3d8] sm:$0xff] }
 0x90f   : > { %8807 = vmatprep.subr.bf16.mxu1 %v14169_v47  ;;  %v14329_v47 = vcombine.high %v5886_v13, %v5894_v45  ;;  %v5807_v32 = vld [vmem:[#allocation14 + $0xb98] sm:$0xff] }
 0x910   : > { %v5815_v33 = vld [vmem:[#allocation14 + $0xbd8] sm:$0xff] }
 0x911   : > { %8767 = vmatpush1.bf16.msra.mxu0 %v13912_v58  ;;  %v14072_v58 = vcombine.low %v5630_v9, %v5638_v40  ;;  %v5535_v9 = vld [vmem:[#allocation14 + $0x318] sm:$0xff] }
 0x912   : > { %8808 = vmatpush1.bf16.msra.mxu1 %v14168_v59  ;;  %8768 = vmatprep.subr.bf16.mxu0 %v13897_v35  ;;  %v14328_v59 = vcombine.low %v5886_v13, %v5894_v45  ;;  %v14057_v35 = vcombine.high %v5614_v41, %v5622_v53  ;;  %v5543_v40 = vld [vmem:[#allocation14 + $0x358] sm:$0xff]  ;;  %v13994_v13 = vcombine.low %v5551_v31, %v5559_v8 }
 0x913   : > { %8809 = vmatprep.subr.bf16.mxu1 %v14153_v55  ;;  %v14313_v55 = vcombine.high %v5870_v0, %v5878_v56  ;;  %v5791_v45 = vld [vmem:[#allocation14 + $0xb18] sm:$0xff] }
 0x915   : > { %8769 = vmatpush1.bf16.msra.mxu0 %v13896_v1  ;;  %v14056_v1 = vcombine.low %v5614_v41, %v5622_v53  ;;  %v5527_v41 = vld [vmem:[#allocation14 + $0x2d8] sm:$0xff] }
 0x916   : > { %8810 = vmatpush1.bf16.msra.mxu1 %v14152_v2  ;;  %8770 = vmatprep.subr.bf16.mxu0 %v13881_v3  ;;  %v14312_v2 = vcombine.low %v5870_v0, %v5878_v56  ;;  %v14041_v3 = vcombine.high %v5598_v62, %v5606_v61  ;;  %v5775_v0 = vld [vmem:[#allocation14 + $0xa98] sm:$0xff] }
 0x917   : > { %8811 = vmatprep.subr.bf16.mxu1 %v14137_v4  ;;  %v14297_v4 = vcombine.high %v5854_v63, %v5862_v15  ;;  %v5783_v56 = vld [vmem:[#allocation14 + $0xad8] sm:$0xff] }
 0x919   : > { %8771 = vmatpush1.bf16.msra.mxu0 %v13880_v11  ;;  %v14040_v11 = vcombine.low %v5598_v62, %v5606_v61  ;;  %v5503_v62 = vld [vmem:[#allocation14 + $0x218] sm:$0xff] }
 0x91a   : > { %8812 = vmatpush1.bf16.msra.mxu1 %v14136_v20  ;;  %8772 = vmatprep.subr.bf16.mxu0 %v14121_v12  ;;  %v14296_v20 = vcombine.low %v5854_v63, %v5862_v15  ;;  %v14025_v12 = vcombine.high %v5582_v22, %v5590_v6  ;;  %v5511_v61 = vld [vmem:[#allocation14 + $0x258] sm:$0xff] }
 0x91b   : > { %8813 = vmatprep.subr.bf16.mxu1 %v14377_v14  ;;  %v14281_v14 = vcombine.high %v5838_v7, %v5846_v10  ;;  %v5759_v63 = vld [vmem:[#allocation14 + $0xa18] sm:$0xff] }
 0x91c   : > { %v5767_v15 = vld [vmem:[#allocation14 + $0xa58] sm:$0xff] }
 0x91d   : > { %8773 = vmatpush2.bf16.msra.mxu0 %v14120_v19  ;;  %v14024_v19 = vcombine.low %v5582_v22, %v5590_v6  ;;  %v5487_v22 = vld [vmem:[#allocation14 + $0x198] sm:$0xff] }
 0x91e   : > { %8814 = vmatpush2.bf16.msra.mxu1 %v14376_v42  ;;  %8774 = vmatprep.subr.bf16.mxu0 %v14105_v29  ;;  %v14280_v42 = vcombine.low %v5838_v7, %v5846_v10  ;;  %v14009_v29 = vcombine.high %v5566_v17, %v5574_v60  ;;  %v5495_v6 = vld [vmem:[#allocation14 + $0x1d8] sm:$0xff] }
 0x91f   : > { %8815 = vmatprep.subr.bf16.mxu1 %v14361_v30  ;;  %v14265_v30 = vcombine.high %v5822_v24, %v5830_v39  ;;  %v5743_v7 = vld [vmem:[#allocation14 + $0x998] sm:$0xff] }
 0x920   : > { %v5751_v10 = vld [vmem:[#allocation14 + $0x9d8] sm:$0xff] }
 0x921   : > { %8775 = vmatpush2.bf16.msra.mxu0 %v14104_v34  ;;  %v14008_v34 = vcombine.low %v5566_v17, %v5574_v60  ;;  %v5471_v17 = vld [vmem:[#allocation14 + $0x118] sm:$0xff] }
 0x922   : > { %8816 = vmatpush2.bf16.msra.mxu1 %v14360_v36  ;;  %8776 = vmatprep.subr.bf16.mxu0 %v14089_v37  ;;  %v14264_v36 = vcombine.low %v5822_v24, %v5830_v39  ;;  %v13995_v37 = vcombine.high %v5551_v31, %v5559_v8  ;;  %v5479_v60 = vld [vmem:[#allocation14 + $0x158] sm:$0xff] }
 0x923   : > { %8817 = vmatprep.subr.bf16.mxu1 %v14345_v38  ;;  %v14251_v38 = vcombine.high %v5807_v32, %v5815_v33  ;;  %v5727_v24 = vld [vmem:[#allocation14 + $0x918] sm:$0xff] }
 0x924   : > { %v5735_v39 = vld [vmem:[#allocation14 + $0x958] sm:$0xff] }
 0x925   : > { %8777 = vmatpush2.bf16.msra.mxu0 %v14088_v57  ;;  %v5799_v57 = vld [vmem:[#allocation14 + $0xb58] sm:$0xff] }
 0x926   : > { %8818 = vmatpush2.bf16.msra.mxu1 %v14344_v48  ;;  %8778 = vmatprep.subr.bf16.mxu0 %v14073_v46  ;;  %v14250_v48 = vcombine.low %v5807_v32, %v5815_v33  ;;  %v13979_v46 = vcombine.high %v5535_v9, %v5543_v40  ;;  %v14235_v53 = vcombine.high %v5791_v45, %v5799_v57  ;;  %v5455_v31 = vld [vmem:[#allocation14 + $0x98] sm:$0xff] }
 0x927   : > { %8819 = vmatprep.subr.bf16.mxu1 %v14329_v47  ;;  %v5519_v47 = vld [vmem:[#allocation14 + $0x298] sm:$0xff] }
 0x928   : > { %v5463_v8 = vld [vmem:[#allocation14 + $0xd8] sm:$0xff] }
 0x929   : > { %8779 = vmatpush2.bf16.msra.mxu0 %v14072_v58  ;;  %v13978_v58 = vcombine.low %v5535_v9, %v5543_v40  ;;  %v5711_v32 = vld [vmem:[#allocation14 + $0x898] sm:$0xff] }
 0x92a   : > { %8820 = vmatpush2.bf16.msra.mxu1 %v14328_v59  ;;  %8780 = vmatprep.subr.bf16.mxu0 %v14057_v35  ;;  %v14234_v59 = vcombine.low %v5791_v45, %v5799_v57  ;;  %v13963_v35 = vcombine.high %v5519_v47, %v5527_v41  ;;  %v5719_v33 = vld [vmem:[#allocation14 + $0x8d8] sm:$0xff]  ;;  %v13898_v57 = vcombine.low %v5455_v31, %v5463_v8 }
 0x92b   : > { %8821 = vmatprep.subr.bf16.mxu1 %v14313_v55  ;;  %v14219_v55 = vcombine.high %v5775_v0, %v5783_v56  ;;  %v5439_v9 = vld [vmem:[#allocation14 + $0x18] sm:$0xff] }
 0x92c   : > { %v5447_v40 = vld [vmem:[#allocation14 + $0x58] sm:$0xff] }
 0x92d   : > { %8781 = vmatpush2.bf16.msra.mxu0 %v14056_v1  ;;  %v13962_v1 = vcombine.low %v5519_v47, %v5527_v41  ;;  %v5703_v45 = vld [vmem:[#allocation14 + $0x858] sm:$0xff] }
 0x92e   : > { %8822 = vmatpush2.bf16.msra.mxu1 %v14312_v2  ;;  %8782 = vmatprep.subr.bf16.mxu0 %v14041_v3  ;;  %v14218_v2 = vcombine.low %v5775_v0, %v5783_v56  ;;  %v13947_v3 = vcombine.high %v5503_v62, %v5511_v61  ;;  %v5679_v41 = vld [vmem:[#allocation14 + $0x798] sm:$0xff] }
 0x92f   : > { %8823 = vmatprep.subr.bf16.mxu1 %v14297_v4  ;;  %v14203_v4 = vcombine.high %v5759_v63, %v5767_v15  ;;  %v5935_v0 = vld [vmem:[#allocation14 + $0xf98] sm:$0xff] }
 0x930   : > { %v5943_v56 = vld [vmem:[#allocation14 + $0xfd8] sm:$0xff] }
 0x931   : > { %8783 = vmatpush2.bf16.msra.mxu0 %v14040_v11  ;;  %v13946_v11 = vcombine.low %v5503_v62, %v5511_v61  ;;  %v5663_v62 = vld [vmem:[#allocation14 + $0x718] sm:$0xff] }
 0x932   : > { %8824 = vmatpush2.bf16.msra.mxu1 %v14296_v20  ;;  %8784 = vmatprep.subr.bf16.mxu0 %v14025_v12  ;;  %v14202_v20 = vcombine.low %v5759_v63, %v5767_v15  ;;  %v13931_v12 = vcombine.high %v5487_v22, %v5495_v6  ;;  %v5671_v61 = vld [vmem:[#allocation14 + $0x758] sm:$0xff] }
 0x933   : > { %8825 = vmatprep.subr.bf16.mxu1 %v14281_v14  ;;  %v14187_v14 = vcombine.high %v5743_v7, %v5751_v10  ;;  %v5919_v63 = vld [vmem:[#allocation14 + $0xf18] sm:$0xff] }
 0x934   : > { %v5927_v15 = vld [vmem:[#allocation14 + $0xf58] sm:$0xff] }
 0x935   : > { %8785 = vmatpush2.bf16.msra.mxu0 %v14024_v19  ;;  %v13930_v19 = vcombine.low %v5487_v22, %v5495_v6  ;;  %v5647_v22 = vld [vmem:[#allocation14 + $0x698] sm:$0xff] }
 0x936   : > { %8826 = vmatpush2.bf16.msra.mxu1 %v14280_v42  ;;  %8786 = vmatprep.subr.bf16.mxu0 %v14009_v29  ;;  %v14186_v42 = vcombine.low %v5743_v7, %v5751_v10  ;;  %v13915_v29 = vcombine.high %v5471_v17, %v5479_v60  ;;  %v5655_v6 = vld [vmem:[#allocation14 + $0x6d8] sm:$0xff] }
 0x937   : > { %8827 = vmatprep.subr.bf16.mxu1 %v14265_v30  ;;  %v14171_v30 = vcombine.high %v5727_v24, %v5735_v39  ;;  %v5903_v7 = vld [vmem:[#allocation14 + $0xe98] sm:$0xff] }
 0x938   : > { %v5911_v10 = vld [vmem:[#allocation14 + $0xed8] sm:$0xff] }
 0x939   : > { %8787 = vmatpush2.bf16.msra.mxu0 %v14008_v34  ;;  %v13914_v34 = vcombine.low %v5471_v17, %v5479_v60  ;;  %v5631_v17 = vld [vmem:[#allocation14 + $0x618] sm:$0xff] }
 0x93a   : > { %8828 = vmatpush2.bf16.msra.mxu1 %v14264_v36  ;;  %8838 = vmatprep.subr.bf16.mxu0 %v13995_v37  ;;  %v14170_v36 = vcombine.low %v5727_v24, %v5735_v39  ;;  %v13899_v37 = vcombine.high %v5455_v31, %v5463_v8  ;;  %v5639_v60 = vld [vmem:[#allocation14 + $0x658] sm:$0xff] }
 0x93b   : > { %8879 = vmatprep.subr.bf16.mxu1 %v14251_v38  ;;  %v14155_v38 = vcombine.high %v5711_v32, %v5719_v33  ;;  %v5887_v24 = vld [vmem:[#allocation14 + $0xe18] sm:$0xff] }
 0x93c   : > { %8789 = vmatmul.mubr.bf16.vlgmr.msra.gmra.mxu0 %v17922_v27  ;;  %v5895_v39 = vld [vmem:[#allocation14 + $0xe58] sm:$0xff] }
 0x93d   : > { %8830 = vmatmul.mubr.bf16.vlgmr.msra.gmra.mxu1 %v17926_v28  ;;  %8839 = vmatpush1.bf16.msra.mxu0 %v13994_v13  ;;  %v5695_v13 = vld [vmem:[#allocation14 + $0x818] sm:$0xff] }
 0x93e   : > { %8870 = vmatprep.mubr.bf16.mxu0 %v17914_v50  ;;  %8880 = vmatpush1.bf16.msra.mxu1 %v14250_v48  ;;  %v14154_v48 = vcombine.low %v5711_v32, %v5719_v33  ;;  %v14139_v47 = vcombine.high %v5695_v13, %v5703_v45  ;;  %v5615_v31 = vld [vmem:[#allocation14 + $0x598] sm:$0xff] }
 0x93f   : > { %8911 = vmatprep.mubr.bf16.mxu1 %v17918_v44  ;;  %8840 = vmatprep.subr.bf16.mxu0 %v13979_v46  ;;  %v13883_v46 = vcombine.high %v5439_v9, %v5447_v40  ;;  %v5623_v8 = vld [vmem:[#allocation14 + $0x5d8] sm:$0xff] }
 0x940   : > { %8881 = vmatprep.subr.bf16.mxu1 %v14235_v53  ;;  %v5687_v53 = vld [vmem:[#allocation14 + $0x7d8] sm:$0xff] }
 0x941   : > { %8841 = vmatpush1.bf16.msra.mxu0 %v13978_v58  ;;  %v13882_v58 = vcombine.low %v5439_v9, %v5447_v40  ;;  %v5871_v32 = vld [vmem:[#allocation14 + $0xd98] sm:$0xff] }
 0x942   : > { %8882 = vmatpush1.bf16.msra.mxu1 %v14234_v59  ;;  %8842 = vmatprep.subr.bf16.mxu0 %v13963_v35  ;;  %v14138_v59 = vcombine.low %v5695_v13, %v5703_v45  ;;  %v14123_v35 = vcombine.high %v5679_v41, %v5687_v53  ;;  %v5879_v33 = vld [vmem:[#allocation14 + $0xdd8] sm:$0xff] }
 0x943   : > { %8883 = vmatprep.subr.bf16.mxu1 %v14219_v55  ;;  %v14379_v55 = vcombine.high %v5935_v0, %v5943_v56  ;;  %v5599_v9 = vld [vmem:[#allocation14 + $0x518] sm:$0xff] }
 0x944   : > { %v5607_v40 = vld [vmem:[#allocation14 + $0x558] sm:$0xff] }
 0x945   : > { %8843 = vmatpush1.bf16.msra.mxu0 %v13962_v1  ;;  %v14122_v1 = vcombine.low %v5679_v41, %v5687_v53  ;;  %v5855_v13 = vld [vmem:[#allocation14 + $0xd18] sm:$0xff] }
 0x946   : > { %8884 = vmatpush1.bf16.msra.mxu1 %v14218_v2  ;;  %8844 = vmatprep.subr.bf16.mxu0 %v13947_v3  ;;  %v14378_v2 = vcombine.low %v5935_v0, %v5943_v56  ;;  %v14107_v3 = vcombine.high %v5663_v62, %v5671_v61  ;;  %v5863_v45 = vld [vmem:[#allocation14 + $0xd58] sm:$0xff] }
 0x947   : > { %8885 = vmatprep.subr.bf16.mxu1 %v14203_v4  ;;  %v14363_v4 = vcombine.high %v5919_v63, %v5927_v15  ;;  %v5583_v41 = vld [vmem:[#allocation14 + $0x498] sm:$0xff] }
 0x948   : > { %v5591_v53 = vld [vmem:[#allocation14 + $0x4d8] sm:$0xff] }
 0x949   : > { %8845 = vmatpush1.bf16.msra.mxu0 %v13946_v11  ;;  %v14106_v11 = vcombine.low %v5663_v62, %v5671_v61  ;;  %v5839_v0 = vld [vmem:[#allocation14 + $0xc98] sm:$0xff] }
 0x94a   : > { %8886 = vmatpush1.bf16.msra.mxu1 %v14202_v20  ;;  %8846 = vmatprep.subr.bf16.mxu0 %v13931_v12  ;;  %v14362_v20 = vcombine.low %v5919_v63, %v5927_v15  ;;  %v14091_v12 = vcombine.high %v5647_v22, %v5655_v6  ;;  %v5847_v56 = vld [vmem:[#allocation14 + $0xcd8] sm:$0xff] }
 0x94b   : > { %8887 = vmatprep.subr.bf16.mxu1 %v14187_v14  ;;  %v14347_v14 = vcombine.high %v5903_v7, %v5911_v10  ;;  %v5567_v62 = vld [vmem:[#allocation14 + $0x418] sm:$0xff] }
 0x94c   : > { %v5575_v61 = vld [vmem:[#allocation14 + $0x458] sm:$0xff] }
 0x94d   : > { %8847 = vmatpush1.bf16.msra.mxu0 %v13930_v19  ;;  %v14090_v19 = vcombine.low %v5647_v22, %v5655_v6  ;;  %v5823_v63 = vld [vmem:[#allocation14 + $0xc18] sm:$0xff]  ;;  %v5552_v22 = vld [vmem:[#allocation14 + $0x3a0] sm:$0xff] }
 0x94e   : > { %8888 = vmatpush1.bf16.msra.mxu1 %v14186_v42  ;;  %8848 = vmatprep.subr.bf16.mxu0 %v13915_v29  ;;  %v14346_v42 = vcombine.low %v5903_v7, %v5911_v10  ;;  %v14075_v29 = vcombine.high %v5631_v17, %v5639_v60  ;;  %v5831_v15 = vld [vmem:[#allocation14 + $0xc58] sm:$0xff]  ;;  %v5560_v6 = vld [vmem:[#allocation14 + $0x3e0] sm:$0xff] }
 0x94f   : > { %8889 = vmatprep.subr.bf16.mxu1 %v14171_v30  ;;  %v14331_v30 = vcombine.high %v5887_v24, %v5895_v39  ;;  %v5808_v7 = vld [vmem:[#allocation14 + $0xba0] sm:$0xff] }
 0x950   : > { %v5816_v10 = vld [vmem:[#allocation14 + $0xbe0] sm:$0xff] }
 0x951   : > { %8849 = vmatpush1.bf16.msra.mxu0 %v13914_v34  ;;  %v14074_v34 = vcombine.low %v5631_v17, %v5639_v60  ;;  %v14253_v17 = vcombine.high %v5808_v7, %v5816_v10  ;;  %v5536_v60 = vld [vmem:[#allocation14 + $0x320] sm:$0xff] }
 0x952   : > { %8890 = vmatpush1.bf16.msra.mxu1 %v14170_v36  ;;  %8850 = vmatprep.subr.bf16.mxu0 %v13899_v37  ;;  %v14330_v36 = vcombine.low %v5887_v24, %v5895_v39  ;;  %v14059_v37 = vcombine.high %v5615_v31, %v5623_v8  ;;  %v5544_v24 = vld [vmem:[#allocation14 + $0x360] sm:$0xff]  ;;  %v13996_v39 = vcombine.low %v5552_v22, %v5560_v6 }
 0x953   : > { %8891 = vmatprep.subr.bf16.mxu1 %v14155_v38  ;;  %v14315_v38 = vcombine.high %v5871_v32, %v5879_v33 }
 0x955   : > { %8851 = vmatpush1.bf16.msra.mxu0 %v13898_v57  ;;  %v14058_v57 = vcombine.low %v5615_v31, %v5623_v8  ;;  %v13981_v8 = vcombine.high %v5536_v60, %v5544_v24 }
 0x956   : > { %8892 = vmatpush1.bf16.msra.mxu1 %v14154_v48  ;;  %8852 = vmatprep.subr.bf16.mxu0 %v13883_v46  ;;  %v14314_v48 = vcombine.low %v5871_v32, %v5879_v33  ;;  %v14043_v46 = vcombine.high %v5599_v9, %v5607_v40  ;;  %v5520_v32 = vld [vmem:[#allocation14 + $0x2a0] sm:$0xff] }
 0x957   : > { %8893 = vmatprep.subr.bf16.mxu1 %v14139_v47  ;;  %v14299_v47 = vcombine.high %v5855_v13, %v5863_v45  ;;  %v5528_v33 = vld [vmem:[#allocation14 + $0x2e0] sm:$0xff] }
 0x959   : > { %8853 = vmatpush1.bf16.msra.mxu0 %v13882_v58  ;;  %v14042_v58 = vcombine.low %v5599_v9, %v5607_v40  ;;  %v5784_v9 = vld [vmem:[#allocation14 + $0xae0] sm:$0xff] }
 0x95a   : > { %8894 = vmatpush1.bf16.msra.mxu1 %v14138_v59  ;;  %8854 = vmatprep.subr.bf16.mxu0 %v14123_v35  ;;  %v14298_v59 = vcombine.low %v5855_v13, %v5863_v45  ;;  %v14027_v35 = vcombine.high %v5583_v41, %v5591_v53  ;;  %v13980_v13 = vcombine.low %v5536_v60, %v5544_v24  ;;  %v5480_v60 = vld [vmem:[#allocation14 + $0x160] sm:$0xff] }
 0x95b   : > { %8895 = vmatprep.subr.bf16.mxu1 %v14379_v55  ;;  %v14283_v55 = vcombine.high %v5839_v0, %v5847_v56  ;;  %v5728_v24 = vld [vmem:[#allocation14 + $0x920] sm:$0xff] }
 0x95d   : > { %8855 = vmatpush2.bf16.msra.mxu0 %v14122_v1  ;;  %v14026_v1 = vcombine.low %v5583_v41, %v5591_v53 }
 0x95e   : > { %8896 = vmatpush2.bf16.msra.mxu1 %v14378_v2  ;;  %8856 = vmatprep.subr.bf16.mxu0 %v14107_v3  ;;  %v14282_v2 = vcombine.low %v5839_v0, %v5847_v56  ;;  %v14011_v3 = vcombine.high %v5567_v62, %v5575_v61  ;;  %v5504_v0 = vld [vmem:[#allocation14 + $0x220] sm:$0xff] }
 0x95f   : > { %8897 = vmatprep.subr.bf16.mxu1 %v14363_v4  ;;  %v14267_v4 = vcombine.high %v5823_v63, %v5831_v15  ;;  %v5512_v56 = vld [vmem:[#allocation14 + $0x260] sm:$0xff] }
 0x961   : > { %8857 = vmatpush2.bf16.msra.mxu0 %v14106_v11  ;;  %v14010_v11 = vcombine.low %v5567_v62, %v5575_v61  ;;  %v13964_v61 = vcombine.low %v5520_v32, %v5528_v33 }
 0x962   : > { %8898 = vmatpush2.bf16.msra.mxu1 %v14362_v20  ;;  %8858 = vmatprep.subr.bf16.mxu0 %v14091_v12  ;;  %v14266_v20 = vcombine.low %v5823_v63, %v5831_v15  ;;  %v13997_v12 = vcombine.high %v5552_v22, %v5560_v6  ;;  %v5496_v22 = vld [vmem:[#allocation14 + $0x1e0] sm:$0xff] }
 0x963   : > { %8899 = vmatprep.subr.bf16.mxu1 %v14347_v14  ;;  %v17942_v14 = vld [vmem:[#allocation16] sm:$0xff] }
 0x964   : > { %v5959_v31 = vrot.slane %v17942_v14, %v17604_v26  ;;  %v5744_v6 = vld [vmem:[#allocation14 + $0x9a0] sm:$0xff] }
 0x965   : > { %8859 = vmatpush2.bf16.msra.mxu0 %v14090_v19  ;;  %v5955_v19 = vrot.slane %v17942_v14, %v17601_v25 }
 0x966   : > { %8900 = vmatpush2.bf16.msra.mxu1 %v14346_v42  ;;  %8860 = vmatprep.subr.bf16.mxu0 %v14075_v29  ;;  %v5792_v42 = vld [vmem:[#allocation14 + $0xb20] sm:$0xff] }
 0x967   : > { %8901 = vmatprep.subr.bf16.mxu1 %v14331_v30  ;;  %v5800_v29 = vld [vmem:[#allocation14 + $0xb60] sm:$0xff]  ;;  %v14252_v30 = vcombine.low %v5808_v7, %v5816_v10  ;;  %v13948_v10 = vcombine.low %v5504_v0, %v5512_v56 }
 0x968   : > { %v5752_v7 = vld [vmem:[#allocation14 + $0x9e0] sm:$0xff] }
 0x969   : > { %8861 = vmatpush2.bf16.msra.mxu0 %v14074_v34 }
 0x96a   : > { %8902 = vmatpush2.bf16.msra.mxu1 %v14330_v36  ;;  %8862 = vmatprep.subr.bf16.mxu0 %v14059_v37  ;;  %v14237_v37 = vcombine.high %v5792_v42, %v5800_v29 }
 0x96b   : > { %8903 = vmatprep.subr.bf16.mxu1 %v14315_v38  ;;  %v5776_v38 = vld [vmem:[#allocation14 + $0xaa0] sm:$0xff] }
 0x96c   : > { %v14221_v53 = vcombine.high %v5776_v38, %v5784_v9 }
 0x96d   : > { %8863 = vmatpush2.bf16.msra.mxu0 %v14058_v57 }
 0x96e   : > { %8904 = vmatpush2.bf16.msra.mxu1 %v14314_v48  ;;  %8864 = vmatprep.subr.bf16.mxu0 %v14043_v46  ;;  %v14236_v48 = vcombine.low %v5792_v42, %v5800_v29  ;;  %v13965_v46 = vcombine.high %v5520_v32, %v5528_v33  ;;  %v14188_v42 = vcombine.low %v5744_v6, %v5752_v7  ;;  %v5712_v32 = vld [vmem:[#allocation14 + $0x8a0] sm:$0xff] }
 0x96f   : > { %8905 = vmatprep.subr.bf16.mxu1 %v14299_v47  ;;  %v5720_v33 = vld [vmem:[#allocation14 + $0x8e0] sm:$0xff] }
 0x971   : > { %8865 = vmatpush2.bf16.msra.mxu0 %v14042_v58 }
 0x972   : > { %8906 = vmatpush2.bf16.msra.mxu1 %v14298_v59  ;;  %8866 = vmatprep.subr.bf16.mxu0 %v14027_v35  ;;  %v5760_v35 = vld [vmem:[#allocation14 + $0xa20] sm:$0xff] }
 0x973   : > { %8907 = vmatprep.subr.bf16.mxu1 %v14283_v55  ;;  %v5768_v55 = vld [vmem:[#allocation14 + $0xa60] sm:$0xff] }
 0x975   : > { %8867 = vmatpush2.bf16.msra.mxu0 %v14026_v1  ;;  %v14220_v1 = vcombine.low %v5776_v38, %v5784_v9  ;;  %v14157_v38 = vcombine.high %v5712_v32, %v5720_v33  ;;  %v5440_v9 = vld [vmem:[#allocation14 + $0x20] sm:$0xff] }
 0x976   : > { %8908 = vmatpush2.bf16.msra.mxu1 %v14282_v2  ;;  %8868 = vmatprep.subr.bf16.mxu0 %v14011_v3  ;;  %v13949_v2 = vcombine.high %v5504_v0, %v5512_v56  ;;  %v14205_v3 = vcombine.high %v5760_v35, %v5768_v55  ;;  %v5688_v0 = vld [vmem:[#allocation14 + $0x7e0] sm:$0xff] }
 0x977   : > { %8909 = vmatprep.subr.bf16.mxu1 %v14267_v4  ;;  %v5488_v4 = vld [vmem:[#allocation14 + $0x1a0] sm:$0xff] }
 0x978   : > { %v5936_v56 = vld [vmem:[#allocation14 + $0xfa0] sm:$0xff] }
 0x979   : > { %8869 = vmatpush2.bf16.msra.mxu0 %v14010_v11  ;;  %v14204_v11 = vcombine.low %v5760_v35, %v5768_v55 }
 0x97a   : > { %8910 = vmatpush2.bf16.msra.mxu1 %v14266_v20  ;;  %8920 = vmatprep.subr.bf16.mxu0 %v13997_v12  ;;  %v13933_v20 = vcombine.high %v5488_v4, %v5496_v22  ;;  %v14189_v12 = vcombine.high %v5744_v6, %v5752_v7  ;;  %v5648_v7 = vld [vmem:[#allocation14 + $0x6a0] sm:$0xff] }
 0x97b   : > { %8961 = vmatprep.subr.bf16.mxu1 %v14253_v17  ;;  %v5472_v17 = vld [vmem:[#allocation14 + $0x120] sm:$0xff] }
 0x97c   : > { %8871 = vmatmul.mubr.bf16.vlgmr.msra.gmra.mxu0 %v17922_v27  ;;  %v8626_v34 = vpop.f32.mrf.mxu0  ;;  %v8667_v36 = vpop.f32.mrf.mxu1  ;;  %v13917_v29 = vcombine.high %v5472_v17, %v5480_v60 }
 0x97d   : > { %8912 = vmatmul.mubr.bf16.vlgmr.msra.gmra.mxu1 %v17926_v28  ;;  %v8627_v40 = vadd.f32 %v8626_v34, %v5955_v19  ;;  %8921 = vmatpush1.bf16.msra.mxu0 %v13996_v39  ;;  %v5736_v39 = vld [vmem:[#allocation14 + $0x960] sm:$0xff]  ;;  %v13932_v19 = vcombine.low %v5488_v4, %v5496_v22  ;;  %v13916_v34 = vcombine.low %v5472_v17, %v5480_v60 }
 0x97e   : > { %8952 = vmatprep.mubr.bf16.mxu0 %v17914_v50  ;;  %8962 = vmatpush1.bf16.msra.mxu1 %v14252_v30  ;;  %v8628_v45 = vpop.f32.mrf.mxu0  ;;  %v8669_v57 = vpop.f32.mrf.mxu1  ;;  %v14173_v30 = vcombine.high %v5728_v24, %v5736_v39 }
 0x97f   : > { %v17951_v47 = vadd.f32 %v8667_v36, %v8627_v40  ;;  %8993 = vmatprep.mubr.bf16.mxu1 %v17918_v44  ;;  %v8629_v41 = vadd.f32 %v8628_v45, %v5959_v31  ;;  %8922 = vmatprep.subr.bf16.mxu0 %v13981_v8  ;;  %v5456_v31 = vld [vmem:[#allocation14 + $0xa0] sm:$0xff]  ;;  %v14172_v36 = vcombine.low %v5728_v24, %v5736_v39 }
 0x980   : > { %8963 = vmatprep.subr.bf16.mxu1 %v14237_v37  ;;  %v8630_v58 = vpop.f32.mrf.mxu0  ;;  %v8671_v59 = vpop.f32.mrf.mxu1  ;;  %v5464_v8 = vld [vmem:[#allocation14 + $0xe0] sm:$0xff] }
 0x981   : > { %v17954_v62 = vadd.f32 %v8669_v57, %v8629_v41  ;;  %8923 = vmatpush1.bf16.msra.mxu0 %v13980_v13  ;;  %v13901_v37 = vcombine.high %v5456_v31, %v5464_v8  ;;  %v5448_v40 = vld [vmem:[#allocation14 + $0x60] sm:$0xff]  ;;  %v13900_v57 = vcombine.low %v5456_v31, %v5464_v8 }
 0x982   : > { %8964 = vmatpush1.bf16.msra.mxu1 %v14236_v48  ;;  %v8631_v63 = vpop.f32.mrf.mxu0  ;;  %v8672_v15 = vpop.f32.mrf.mxu1  ;;  %8924 = vmatprep.subr.bf16.mxu0 %v13965_v46  ;;  %v5696_v13 = vld [vmem:[#allocation14 + $0x820] sm:$0xff]  ;;  %v14156_v48 = vcombine.low %v5712_v32, %v5720_v33  ;;  %v13885_v46 = vcombine.high %v5440_v9, %v5448_v40  ;;  %v13884_v59 = vcombine.low %v5440_v9, %v5448_v40 }
 0x983   : > { %8965 = vmatprep.subr.bf16.mxu1 %v14221_v53  ;;  %v5704_v45 = vld [vmem:[#allocation14 + $0x860] sm:$0xff] }
 0x984   : > { %v14141_v41 = vcombine.high %v5696_v13, %v5704_v45  ;;  %v5680_v53 = vld [vmem:[#allocation14 + $0x7a0] sm:$0xff]  ;;  %v14140_v35 = vcombine.low %v5696_v13, %v5704_v45 }
 0x985   : > { %8925 = vmatpush1.bf16.msra.mxu0 %v13964_v61  ;;  %v5944_v58 = vld [vmem:[#allocation14 + $0xfe0] sm:$0xff]  ;;  %v14125_v55 = vcombine.high %v5680_v53, %v5688_v0 }
 0x986   : > { %8966 = vmatpush1.bf16.msra.mxu1 %v14220_v1  ;;  %8926 = vmatprep.subr.bf16.mxu0 %v13949_v2  ;;  %v14381_v61 = vcombine.high %v5936_v56, %v5944_v58  ;;  %v5664_v63 = vld [vmem:[#allocation14 + $0x720] sm:$0xff]  ;;  %v14380_v4 = vcombine.low %v5936_v56, %v5944_v58 }
 0x987   : > { %8967 = vmatprep.subr.bf16.mxu1 %v14205_v3  ;;  %v5672_v15 = vld [vmem:[#allocation14 + $0x760] sm:$0xff]  ;;  %v14124_v3 = vcombine.low %v5680_v53, %v5688_v0 }
 0x988   : > { %v5920_v1 = vld [vmem:[#allocation14 + $0xf20] sm:$0xff]  ;;  %v14109_v22 = vcombine.high %v5664_v63, %v5672_v15 }
 0x989   : > { %8927 = vmatpush1.bf16.msra.mxu0 %v13948_v10  ;;  %v5928_v2 = vld [vmem:[#allocation14 + $0xf60] sm:$0xff] }
 0x98a   : > { %8968 = vmatpush1.bf16.msra.mxu1 %v14204_v11  ;;  %8928 = vmatprep.subr.bf16.mxu0 %v13933_v20  ;;  %v14365_v6 = vcombine.high %v5920_v1, %v5928_v2  ;;  %v5656_v10 = vld [vmem:[#allocation14 + $0x6e0] sm:$0xff]  ;;  %v14364_v17 = vcombine.low %v5920_v1, %v5928_v2 }
 0x98b   : > { %8969 = vmatprep.subr.bf16.mxu1 %v14189_v12  ;;  %v5904_v11 = vld [vmem:[#allocation14 + $0xea0] sm:$0xff]  ;;  %v14108_v12 = vcombine.low %v5664_v63, %v5672_v15  ;;  %v14093_v60 = vcombine.high %v5648_v7, %v5656_v10 }
 0x98c   : > { %v5912_v20 = vld [vmem:[#allocation14 + $0xee0] sm:$0xff] }
 0x98d   : > { %8929 = vmatpush1.bf16.msra.mxu0 %v13932_v19  ;;  %v14349_v24 = vcombine.high %v5904_v11, %v5912_v20  ;;  %v5632_v39 = vld [vmem:[#allocation14 + $0x620] sm:$0xff]  ;;  %v14348_v31 = vcombine.low %v5904_v11, %v5912_v20  ;;  %v5553_v20 = vld [vmem:[#allocation14 + $0x3a8] sm:$0xff] }
 0x98e   : > { %8970 = vmatpush1.bf16.msra.mxu1 %v14188_v42  ;;  %8930 = vmatprep.subr.bf16.mxu0 %v13917_v29  ;;  %v5640_v19 = vld [vmem:[#allocation14 + $0x660] sm:$0xff] }
 0x98f   : > { %8971 = vmatprep.subr.bf16.mxu1 %v14173_v30  ;;  %v5888_v42 = vld [vmem:[#allocation14 + $0xe20] sm:$0xff]  ;;  %v14092_v30 = vcombine.low %v5648_v7, %v5656_v10  ;;  %v14077_v8 = vcombine.high %v5632_v39, %v5640_v19 }
 0x990   : > { %v5896_v29 = vld [vmem:[#allocation14 + $0xe60] sm:$0xff] }
 0x991   : > { %8931 = vmatpush1.bf16.msra.mxu0 %v13916_v34  ;;  %v14333_v32 = vcombine.high %v5888_v42, %v5896_v29  ;;  %v5616_v33 = vld [vmem:[#allocation14 + $0x5a0] sm:$0xff]  ;;  %v14332_v9 = vcombine.low %v5888_v42, %v5896_v29  ;;  %v5537_v29 = vld [vmem:[#allocation14 + $0x328] sm:$0xff] }
 0x992   : > { %8972 = vmatpush1.bf16.msra.mxu1 %v14172_v36  ;;  %8932 = vmatprep.subr.bf16.mxu0 %v13901_v37  ;;  %v5624_v34 = vld [vmem:[#allocation14 + $0x5e0] sm:$0xff] }
 0x993   : > { %8973 = vmatprep.subr.bf16.mxu1 %v14157_v38  ;;  %v5872_v36 = vld [vmem:[#allocation14 + $0xda0] sm:$0xff]  ;;  %v14076_v38 = vcombine.low %v5632_v39, %v5640_v19  ;;  %v14061_v40 = vcombine.high %v5616_v33, %v5624_v34 }
 0x994   : > { %v5880_v37 = vld [vmem:[#allocation14 + $0xde0] sm:$0xff] }
 0x995   : > { %8933 = vmatpush1.bf16.msra.mxu0 %v13900_v57  ;;  %v14317_v13 = vcombine.high %v5872_v36, %v5880_v37  ;;  %v5600_v45 = vld [vmem:[#allocation14 + $0x520] sm:$0xff]  ;;  %v14316_v53 = vcombine.low %v5872_v36, %v5880_v37  ;;  %v5967_v36 = vrot.slane %v17942_v14, %v17622_v54 }
 0x996   : > { %8974 = vmatpush1.bf16.msra.mxu1 %v14156_v48  ;;  %8934 = vmatprep.subr.bf16.mxu0 %v13885_v46  ;;  %v5608_v57 = vld [vmem:[#allocation14 + $0x560] sm:$0xff] }
 0x997   : > { %8975 = vmatprep.subr.bf16.mxu1 %v14141_v41  ;;  %v5856_v48 = vld [vmem:[#allocation14 + $0xd20] sm:$0xff]  ;;  %v14060_v41 = vcombine.low %v5616_v33, %v5624_v34  ;;  %v14045_v0 = vcombine.high %v5600_v45, %v5608_v57  ;;  %v5801_v33 = vld [vmem:[#allocation14 + $0xb68] sm:$0xff] }
 0x998   : > { %v5864_v46 = vld [vmem:[#allocation14 + $0xd60] sm:$0xff] }
 0x999   : > { %8935 = vmatpush1.bf16.msra.mxu0 %v13884_v59  ;;  %v14301_v56 = vcombine.high %v5856_v48, %v5864_v46  ;;  %v5584_v58 = vld [vmem:[#allocation14 + $0x4a0] sm:$0xff]  ;;  %v14300_v63 = vcombine.low %v5856_v48, %v5864_v46  ;;  %v5785_v48 = vld [vmem:[#allocation14 + $0xae8] sm:$0xff] }
 0x99a   : > { %8976 = vmatpush1.bf16.msra.mxu1 %v14140_v35  ;;  %8936 = vmatprep.subr.bf16.mxu0 %v14125_v55  ;;  %v5592_v59 = vld [vmem:[#allocation14 + $0x4e0] sm:$0xff] }
 0x99b   : > { %8977 = vmatprep.subr.bf16.mxu1 %v14381_v61  ;;  %v5840_v35 = vld [vmem:[#allocation14 + $0xca0] sm:$0xff]  ;;  %v14044_v61 = vcombine.low %v5600_v45, %v5608_v57  ;;  %v14029_v15 = vcombine.high %v5584_v58, %v5592_v59  ;;  %v5777_v57 = vld [vmem:[#allocation14 + $0xaa8] sm:$0xff] }
 0x99c   : > { %v5848_v55 = vld [vmem:[#allocation14 + $0xce0] sm:$0xff] }
 0x99d   : > { %8937 = vmatpush2.bf16.msra.mxu0 %v14124_v3  ;;  %v14285_v1 = vcombine.high %v5840_v35, %v5848_v55  ;;  %v5568_v2 = vld [vmem:[#allocation14 + $0x420] sm:$0xff]  ;;  %v14284_v7 = vcombine.low %v5840_v35, %v5848_v55  ;;  %v14223_v55 = vcombine.high %v5777_v57, %v5785_v48 }
 0x99e   : > { %8978 = vmatpush2.bf16.msra.mxu1 %v14380_v4  ;;  %8938 = vmatprep.subr.bf16.mxu0 %v14109_v22  ;;  %v5576_v3 = vld [vmem:[#allocation14 + $0x460] sm:$0xff] }
 0x99f   : > { %8979 = vmatprep.subr.bf16.mxu1 %v14365_v6  ;;  %v5824_v4 = vld [vmem:[#allocation14 + $0xc20] sm:$0xff]  ;;  %v14028_v6 = vcombine.low %v5584_v58, %v5592_v59  ;;  %v14013_v10 = vcombine.high %v5568_v2, %v5576_v3 }
 0x9a0   : > { %v5832_v22 = vld [vmem:[#allocation14 + $0xc60] sm:$0xff] }
 0x9a1   : > { %8939 = vmatpush2.bf16.msra.mxu0 %v14108_v12  ;;  %v14269_v11 = vcombine.high %v5824_v4, %v5832_v22  ;;  %v5561_v12 = vld [vmem:[#allocation14 + $0x3e8] sm:$0xff]  ;;  %v14268_v39 = vcombine.low %v5824_v4, %v5832_v22 }
 0x9a2   : > { %8980 = vmatpush2.bf16.msra.mxu1 %v14364_v17  ;;  %8940 = vmatprep.subr.bf16.mxu0 %v14093_v60  ;;  %v5809_v17 = vld [vmem:[#allocation14 + $0xba8] sm:$0xff]  ;;  %v13999_v19 = vcombine.high %v5553_v20, %v5561_v12 }
 0x9a3   : > { %8981 = vmatprep.subr.bf16.mxu1 %v14349_v24  ;;  %v5817_v60 = vld [vmem:[#allocation14 + $0xbe8] sm:$0xff]  ;;  %v14012_v24 = vcombine.low %v5568_v2, %v5576_v3 }
 0x9a4   : > { %v14255_v42 = vcombine.high %v5809_v17, %v5817_v60  ;;  %v14254_v34 = vcombine.low %v5809_v17, %v5817_v60  ;;  %v5761_v2 = vld [vmem:[#allocation14 + $0xa28] sm:$0xff] }
 0x9a5   : > { %8941 = vmatpush2.bf16.msra.mxu0 %v14092_v30  ;;  %v5545_v30 = vld [vmem:[#allocation14 + $0x368] sm:$0xff] }
 0x9a6   : > { %8982 = vmatpush2.bf16.msra.mxu1 %v14348_v31  ;;  %8942 = vmatprep.subr.bf16.mxu0 %v14077_v8  ;;  %v5963_v31 = vrot.slane %v17942_v14, %v17619_v51  ;;  %v13998_v8 = vcombine.low %v5553_v20, %v5561_v12  ;;  %v13983_v37 = vcombine.high %v5537_v29, %v5545_v30  ;;  %v5769_v3 = vld [vmem:[#allocation14 + $0xa68] sm:$0xff] }
 0x9a7   : > { %8983 = vmatprep.subr.bf16.mxu1 %v14333_v32  ;;  %v5793_v32 = vld [vmem:[#allocation14 + $0xb28] sm:$0xff]  ;;  %v14207_v20 = vcombine.high %v5761_v2, %v5769_v3 }
 0x9a8   : > { %v14239_v45 = vcombine.high %v5793_v32, %v5801_v33  ;;  %v5489_v12 = vld [vmem:[#allocation14 + $0x1a8] sm:$0xff] }
 0x9a9   : > { %8943 = vmatpush2.bf16.msra.mxu0 %v14076_v38  ;;  %v5521_v38 = vld [vmem:[#allocation14 + $0x2a8] sm:$0xff] }
 0x9aa   : > { %8984 = vmatpush2.bf16.msra.mxu1 %v14332_v9  ;;  %8944 = vmatprep.subr.bf16.mxu0 %v14061_v40  ;;  %v5529_v9 = vld [vmem:[#allocation14 + $0x2e8] sm:$0xff] }
 0x9ab   : > { %8985 = vmatprep.subr.bf16.mxu1 %v14317_v13  ;;  %v13967_v58 = vcombine.high %v5521_v38, %v5529_v9  ;;  %v13966_v22 = vcombine.low %v5521_v38, %v5529_v9  ;;  %v5497_v17 = vld [vmem:[#allocation14 + $0x1e8] sm:$0xff] }
 0x9ac   : > { %v5745_v60 = vld [vmem:[#allocation14 + $0x9a8] sm:$0xff] }
 0x9ad   : > { %8945 = vmatpush2.bf16.msra.mxu0 %v14060_v41  ;;  %v13982_v41 = vcombine.low %v5537_v29, %v5545_v30  ;;  %v5473_v30 = vld [vmem:[#allocation14 + $0x128] sm:$0xff] }
 0x9ae   : > { %8986 = vmatpush2.bf16.msra.mxu1 %v14316_v53  ;;  %8946 = vmatprep.subr.bf16.mxu0 %v14045_v0  ;;  %v5457_v38 = vld [vmem:[#allocation14 + $0xa8] sm:$0xff] }
 0x9af   : > { %8987 = vmatprep.subr.bf16.mxu1 %v14301_v56  ;;  %v14238_v56 = vcombine.low %v5793_v32, %v5801_v33  ;;  %v5737_v32 = vld [vmem:[#allocation14 + $0x968] sm:$0xff]  ;;  %v13934_v33 = vcombine.low %v5489_v12, %v5497_v17 }
 0x9b0   : > { %v5465_v9 = vld [vmem:[#allocation14 + $0xe8] sm:$0xff] }
 0x9b1   : > { %8947 = vmatpush2.bf16.msra.mxu0 %v14044_v61  ;;  %v5505_v61 = vld [vmem:[#allocation14 + $0x228] sm:$0xff] }
 0x9b2   : > { %8988 = vmatpush2.bf16.msra.mxu1 %v14300_v63  ;;  %8948 = vmatprep.subr.bf16.mxu0 %v14029_v15  ;;  %v5513_v63 = vld [vmem:[#allocation14 + $0x268] sm:$0xff] }
 0x9b3   : > { %8989 = vmatprep.subr.bf16.mxu1 %v14285_v1 }
 0x9b5   : > { %8949 = vmatpush2.bf16.msra.mxu0 %v14028_v6 }
 0x9b6   : > { %8990 = vmatpush2.bf16.msra.mxu1 %v14284_v7  ;;  %8950 = vmatprep.subr.bf16.mxu0 %v14013_v10  ;;  %v14222_v10 = vcombine.low %v5777_v57, %v5785_v48  ;;  %v13903_v48 = vcombine.high %v5457_v38, %v5465_v9 }
 0x9b7   : > { %8991 = vmatprep.subr.bf16.mxu1 %v14269_v11  ;;  %v13951_v11 = vcombine.high %v5505_v61, %v5513_v63 }
 0x9b9   : > { %8951 = vmatpush2.bf16.msra.mxu0 %v14012_v24  ;;  %v5753_v24 = vld [vmem:[#allocation14 + $0x9e8] sm:$0xff] }
 0x9ba   : > { %8992 = vmatpush2.bf16.msra.mxu1 %v14268_v39  ;;  %9002 = vmatprep.subr.bf16.mxu0 %v13999_v19  ;;  %v13950_v39 = vcombine.low %v5505_v61, %v5513_v63  ;;  %v14206_v19 = vcombine.low %v5761_v2, %v5769_v3  ;;  %v14191_v29 = vcombine.high %v5745_v60, %v5753_v24  ;;  %v5681_v63 = vld [vmem:[#allocation14 + $0x7a8] sm:$0xff] }
 0x9bb   : > { %9043 = vmatprep.subr.bf16.mxu1 %v14255_v42  ;;  %v13935_v42 = vcombine.high %v5489_v12, %v5497_v17  ;;  %v5945_v2 = vld [vmem:[#allocation14 + $0xfe8] sm:$0xff] }
 0x9bc   : > { %v8708_v40 = vpop.f32.mrf.mxu0  ;;  %v8749_v13 = vpop.f32.mrf.mxu1  ;;  %8953 = vmatmul.mubr.bf16.vlgmr.msra.gmra.mxu0 %v17922_v27  ;;  %v5929_v12 = vld [vmem:[#allocation14 + $0xf68] sm:$0xff] }
 0x9bd   : > { %v8709_v46 = vadd.f32 %v8708_v40, %v5963_v31  ;;  %8994 = vmatmul.mubr.bf16.vlgmr.msra.gmra.mxu1 %v17926_v28  ;;  %9003 = vmatpush1.bf16.msra.mxu0 %v13998_v8  ;;  %v5481_v31 = vld [vmem:[#allocation14 + $0x168] sm:$0xff] }
 0x9be   : > { %9034 = vmatprep.mubr.bf16.mxu0 %v17914_v50  ;;  %9044 = vmatpush1.bf16.msra.mxu1 %v14254_v34  ;;  %v8710_v53 = vpop.f32.mrf.mxu0  ;;  %v8751_v0 = vpop.f32.mrf.mxu1  ;;  %v5729_v8 = vld [vmem:[#allocation14 + $0x928] sm:$0xff]  ;;  %v14190_v34 = vcombine.low %v5745_v60, %v5753_v24 }
 0x9bf   : > { %v17963_v59 = vadd.f32 %v8749_v13, %v8709_v46  ;;  %9075 = vmatprep.mubr.bf16.mxu1 %v17918_v44  ;;  %v8711_v35 = vadd.f32 %v8710_v53, %v5967_v36  ;;  %9004 = vmatprep.subr.bf16.mxu0 %v13983_v37  ;;  %v13919_v36 = vcombine.high %v5473_v30, %v5481_v31  ;;  %v5713_v40 = vld [vmem:[#allocation14 + $0x8a8] sm:$0xff] }
 0x9c0   : > { %v8712_v15 = vpop.f32.mrf.mxu0  ;;  %v8753_v1 = vpop.f32.mrf.mxu1  ;;  %9045 = vmatprep.subr.bf16.mxu1 %v14239_v45  ;;  %v14175_v37 = vcombine.high %v5729_v8, %v5737_v32  ;;  %v5721_v13 = vld [vmem:[#allocation14 + $0x8e8] sm:$0xff]  ;;  %v13918_v45 = vcombine.low %v5473_v30, %v5481_v31  ;;  %v14174_v57 = vcombine.low %v5729_v8, %v5737_v32 }
 0x9c1   : > { %v17966_v4 = vadd.f32 %v8751_v0, %v8711_v35  ;;  %9005 = vmatpush1.bf16.msra.mxu0 %v13982_v41  ;;  %v14159_v46 = vcombine.high %v5713_v40, %v5721_v13  ;;  %v5441_v41 = vld [vmem:[#allocation14 + $0x28] sm:$0xff]  ;;  %v14158_v35 = vcombine.low %v5713_v40, %v5721_v13 }
 0x9c2   : > { %9046 = vmatpush1.bf16.msra.mxu1 %v14238_v56  ;;  %v8713_v6 = vpop.f32.mrf.mxu0  ;;  %v8754_v7 = vpop.f32.mrf.mxu1  ;;  %9006 = vmatprep.subr.bf16.mxu0 %v13967_v58  ;;  %v5449_v53 = vld [vmem:[#allocation14 + $0x68] sm:$0xff]  ;;  %v13902_v58 = vcombine.low %v5457_v38, %v5465_v9 }
 0x9c3   : > { %9047 = vmatprep.subr.bf16.mxu1 %v14223_v55  ;;  %v5697_v0 = vld [vmem:[#allocation14 + $0x828] sm:$0xff]  ;;  %v13887_v55 = vcombine.high %v5441_v41, %v5449_v53  ;;  %v13886_v3 = vcombine.low %v5441_v41, %v5449_v53 }
 0x9c4   : > { %v5705_v56 = vld [vmem:[#allocation14 + $0x868] sm:$0xff] }
 0x9c5   : > { %9007 = vmatpush1.bf16.msra.mxu0 %v13966_v22  ;;  %v14143_v61 = vcombine.high %v5697_v0, %v5705_v56  ;;  %v5689_v15 = vld [vmem:[#allocation14 + $0x7e8] sm:$0xff]  ;;  %v14142_v22 = vcombine.low %v5697_v0, %v5705_v56 }
 0x9c6   : > { %9048 = vmatpush1.bf16.msra.mxu1 %v14222_v10  ;;  %9008 = vmatprep.subr.bf16.mxu0 %v13951_v11  ;;  %v5937_v1 = vld [vmem:[#allocation14 + $0xfa8] sm:$0xff]  ;;  %v14127_v6 = vcombine.high %v5681_v63, %v5689_v15  ;;  %v14126_v17 = vcombine.low %v5681_v63, %v5689_v15 }
 0x9c7   : > { %9049 = vmatprep.subr.bf16.mxu1 %v14207_v20  ;;  %v14383_v7 = vcombine.high %v5937_v1, %v5945_v2  ;;  %v5665_v10 = vld [vmem:[#allocation14 + $0x728] sm:$0xff]  ;;  %v14382_v60 = vcombine.low %v5937_v1, %v5945_v2 }
 0x9c8   : > { %v5673_v11 = vld [vmem:[#allocation14 + $0x768] sm:$0xff] }
 0x9c9   : > { %9009 = vmatpush1.bf16.msra.mxu0 %v13950_v39  ;;  %v5921_v20 = vld [vmem:[#allocation14 + $0xf28] sm:$0xff]  ;;  %v14111_v24 = vcombine.high %v5665_v10, %v5673_v11  ;;  %v14110_v31 = vcombine.low %v5665_v10, %v5673_v11 }
 0x9ca   : > { %9050 = vmatpush1.bf16.msra.mxu1 %v14206_v19  ;;  %9010 = vmatprep.subr.bf16.mxu0 %v13935_v42  ;;  %v14367_v39 = vcombine.high %v5921_v20, %v5929_v12  ;;  %v5649_v19 = vld [vmem:[#allocation14 + $0x6a8] sm:$0xff]  ;;  %v14366_v8 = vcombine.low %v5921_v20, %v5929_v12 }
 0x9cb   : > { %9051 = vmatprep.subr.bf16.mxu1 %v14191_v29  ;;  %v5657_v42 = vld [vmem:[#allocation14 + $0x6e8] sm:$0xff] }
 0x9cc   : > { %v5905_v29 = vld [vmem:[#allocation14 + $0xea8] sm:$0xff]  ;;  %v14095_v32 = vcombine.high %v5649_v19, %v5657_v42  ;;  %v14094_v9 = vcombine.low %v5649_v19, %v5657_v42 }
 0x9cd   : > { %9011 = vmatpush1.bf16.msra.mxu0 %v13934_v33  ;;  %v5913_v30 = vld [vmem:[#allocation14 + $0xee8] sm:$0xff] }
 0x9ce   : > { %9052 = vmatpush1.bf16.msra.mxu1 %v14190_v34  ;;  %9012 = vmatprep.subr.bf16.mxu0 %v13919_v36  ;;  %v14351_v33 = vcombine.high %v5905_v29, %v5913_v30  ;;  %v5633_v34 = vld [vmem:[#allocation14 + $0x628] sm:$0xff]  ;;  %v14350_v40 = vcombine.low %v5905_v29, %v5913_v30 }
 0x9cf   : > { %9053 = vmatprep.subr.bf16.mxu1 %v14175_v37  ;;  %v5641_v36 = vld [vmem:[#allocation14 + $0x668] sm:$0xff] }
 0x9d0   : > { %v5889_v37 = vld [vmem:[#allocation14 + $0xe28] sm:$0xff]  ;;  %v14079_v13 = vcombine.high %v5633_v34, %v5641_v36  ;;  %v14078_v53 = vcombine.low %v5633_v34, %v5641_v36  ;;  %v5818_v34 = vld [vmem:[#allocation14 + $0xbf0] sm:$0xff] }
 0x9d1   : > { %9013 = vmatpush1.bf16.msra.mxu0 %v13918_v45  ;;  %v5897_v38 = vld [vmem:[#allocation14 + $0xe68] sm:$0xff] }
 0x9d2   : > { %9054 = vmatpush1.bf16.msra.mxu1 %v14174_v57  ;;  %9014 = vmatprep.subr.bf16.mxu0 %v13903_v48  ;;  %v14335_v45 = vcombine.high %v5889_v37, %v5897_v38  ;;  %v5617_v57 = vld [vmem:[#allocation14 + $0x5a8] sm:$0xff]  ;;  %v14334_v0 = vcombine.low %v5889_v37, %v5897_v38 }
 0x9d3   : > { %9055 = vmatprep.subr.bf16.mxu1 %v14159_v46  ;;  %v5625_v48 = vld [vmem:[#allocation14 + $0x5e8] sm:$0xff] }
 0x9d4   : > { %v5873_v46 = vld [vmem:[#allocation14 + $0xda8] sm:$0xff]  ;;  %v14063_v56 = vcombine.high %v5617_v57, %v5625_v48  ;;  %v14062_v15 = vcombine.low %v5617_v57, %v5625_v48  ;;  %v5794_v48 = vld [vmem:[#allocation14 + $0xb30] sm:$0xff] }
 0x9d5   : > { %9015 = vmatpush1.bf16.msra.mxu0 %v13902_v58  ;;  %v5881_v41 = vld [vmem:[#allocation14 + $0xde8] sm:$0xff] }
 0x9d6   : > { %9056 = vmatpush1.bf16.msra.mxu1 %v14158_v35  ;;  %9016 = vmatprep.subr.bf16.mxu0 %v13887_v55  ;;  %v14319_v58 = vcombine.high %v5873_v46, %v5881_v41  ;;  %v5601_v35 = vld [vmem:[#allocation14 + $0x528] sm:$0xff]  ;;  %v14318_v1 = vcombine.low %v5873_v46, %v5881_v41  ;;  %v5802_v46 = vld [vmem:[#allocation14 + $0xb70] sm:$0xff] }
 0x9d7   : > { %9057 = vmatprep.subr.bf16.mxu1 %v14143_v61  ;;  %v5609_v55 = vld [vmem:[#allocation14 + $0x568] sm:$0xff] }
 0x9d8   : > { %v5857_v61 = vld [vmem:[#allocation14 + $0xd28] sm:$0xff]  ;;  %v14047_v2 = vcombine.high %v5601_v35, %v5609_v55  ;;  %v14046_v11 = vcombine.low %v5601_v35, %v5609_v55  ;;  %v14241_v55 = vcombine.high %v5794_v48, %v5802_v46 }
 0x9d9   : > { %9017 = vmatpush1.bf16.msra.mxu0 %v13886_v3  ;;  %v5865_v63 = vld [vmem:[#allocation14 + $0xd68] sm:$0xff] }
 0x9da   : > { %9058 = vmatpush1.bf16.msra.mxu1 %v14142_v22  ;;  %9018 = vmatprep.subr.bf16.mxu0 %v14127_v6  ;;  %v14303_v3 = vcombine.high %v5857_v61, %v5865_v63  ;;  %v5585_v22 = vld [vmem:[#allocation14 + $0x4a8] sm:$0xff]  ;;  %v14302_v20 = vcombine.low %v5857_v61, %v5865_v63  ;;  %v5778_v61 = vld [vmem:[#allocation14 + $0xab0] sm:$0xff] }
 0x9db   : > { %9059 = vmatprep.subr.bf16.mxu1 %v14383_v7  ;;  %v5593_v6 = vld [vmem:[#allocation14 + $0x4e8] sm:$0xff]  ;;  %v5786_v63 = vld [vmem:[#allocation14 + $0xaf0] sm:$0xff] }
 0x9dc   : > { %v5841_v7 = vld [vmem:[#allocation14 + $0xca8] sm:$0xff]  ;;  %v14031_v12 = vcombine.high %v5585_v22, %v5593_v6  ;;  %v14030_v42 = vcombine.low %v5585_v22, %v5593_v6 }
 0x9dd   : > { %9019 = vmatpush2.bf16.msra.mxu0 %v14126_v17  ;;  %v5849_v10 = vld [vmem:[#allocation14 + $0xce8] sm:$0xff] }
 0x9de   : > { %9060 = vmatpush2.bf16.msra.mxu1 %v14382_v60  ;;  %9020 = vmatprep.subr.bf16.mxu0 %v14111_v24  ;;  %v14287_v17 = vcombine.high %v5841_v7, %v5849_v10  ;;  %v5569_v60 = vld [vmem:[#allocation14 + $0x428] sm:$0xff]  ;;  %v14286_v29 = vcombine.low %v5841_v7, %v5849_v10 }
 0x9df   : > { %9061 = vmatprep.subr.bf16.mxu1 %v14367_v39  ;;  %v5577_v24 = vld [vmem:[#allocation14 + $0x468] sm:$0xff] }
 0x9e0   : > { %v5825_v39 = vld [vmem:[#allocation14 + $0xc28] sm:$0xff]  ;;  %v14015_v30 = vcombine.high %v5569_v60, %v5577_v24  ;;  %v14014_v36 = vcombine.low %v5569_v60, %v5577_v24  ;;  %v5762_v60 = vld [vmem:[#allocation14 + $0xa30] sm:$0xff] }
 0x9e1   : > { %9021 = vmatpush2.bf16.msra.mxu0 %v14110_v31  ;;  %v5833_v19 = vld [vmem:[#allocation14 + $0xc68] sm:$0xff]  ;;  %v5770_v24 = vld [vmem:[#allocation14 + $0xa70] sm:$0xff] }
 0x9e2   : > { %9062 = vmatpush2.bf16.msra.mxu1 %v14366_v8  ;;  %9022 = vmatprep.subr.bf16.mxu0 %v14095_v32  ;;  %v14271_v31 = vcombine.high %v5825_v39, %v5833_v19  ;;  %v5554_v8 = vld [vmem:[#allocation14 + $0x3b0] sm:$0xff]  ;;  %v14270_v37 = vcombine.low %v5825_v39, %v5833_v19 }
 0x9e3   : > { %9063 = vmatprep.subr.bf16.mxu1 %v14351_v33  ;;  %v5562_v32 = vld [vmem:[#allocation14 + $0x3f0] sm:$0xff] }
 0x9e4   : > { %v5810_v33 = vld [vmem:[#allocation14 + $0xbb0] sm:$0xff]  ;;  %v14001_v38 = vcombine.high %v5554_v8, %v5562_v32  ;;  %v14000_v57 = vcombine.low %v5554_v8, %v5562_v32  ;;  %v14209_v32 = vcombine.high %v5762_v60, %v5770_v24 }
 0x9e5   : > { %9023 = vmatpush2.bf16.msra.mxu0 %v14094_v9  ;;  %v14257_v9 = vcombine.high %v5810_v33, %v5818_v34  ;;  %v14256_v41 = vcombine.low %v5810_v33, %v5818_v34  ;;  %v5490_v33 = vld [vmem:[#allocation14 + $0x1b0] sm:$0xff] }
 0x9e6   : > { %9064 = vmatpush2.bf16.msra.mxu1 %v14350_v40  ;;  %9024 = vmatprep.subr.bf16.mxu0 %v14079_v13  ;;  %v5538_v40 = vld [vmem:[#allocation14 + $0x330] sm:$0xff] }
 0x9e7   : > { %9065 = vmatprep.subr.bf16.mxu1 %v14335_v45  ;;  %v5546_v13 = vld [vmem:[#allocation14 + $0x370] sm:$0xff]  ;;  %v5971_v45 = vrot.slane %v17942_v14, %v17637_v49 }
 0x9e8   : > { %v5498_v34 = vld [vmem:[#allocation14 + $0x1f0] sm:$0xff] }
 0x9e9   : > { %9025 = vmatpush2.bf16.msra.mxu0 %v14078_v53  ;;  %v5975_v53 = vrot.slane %v17942_v14, %v17640_v16  ;;  %v14240_v14 = vcombine.low %v5794_v48, %v5802_v46  ;;  %v5730_v48 = vld [vmem:[#allocation14 + $0x930] sm:$0xff] }
 0x9ea   : > { %9066 = vmatpush2.bf16.msra.mxu1 %v14334_v0  ;;  %9026 = vmatprep.subr.bf16.mxu0 %v14063_v56  ;;  %v13985_v0 = vcombine.high %v5538_v40, %v5546_v13  ;;  %v5522_v56 = vld [vmem:[#allocation14 + $0x2b0] sm:$0xff] }
 0x9eb   : > { %9067 = vmatprep.subr.bf16.mxu1 %v14319_v58  ;;  %v5530_v58 = vld [vmem:[#allocation14 + $0x2f0] sm:$0xff] }
 0x9ec   : > { %v13969_v22 = vcombine.high %v5522_v56, %v5530_v58  ;;  %v5738_v46 = vld [vmem:[#allocation14 + $0x970] sm:$0xff] }
 0x9ed   : > { %9027 = vmatpush2.bf16.msra.mxu0 %v14062_v15 }
 0x9ee   : > { %9068 = vmatpush2.bf16.msra.mxu1 %v14318_v1  ;;  %9028 = vmatprep.subr.bf16.mxu0 %v14047_v2  ;;  %v13984_v2 = vcombine.low %v5538_v40, %v5546_v13  ;;  %v13937_v40 = vcombine.high %v5490_v33, %v5498_v34 }
 0x9ef   : > { %9069 = vmatprep.subr.bf16.mxu1 %v14303_v3 }
 0x9f1   : > { %9029 = vmatpush2.bf16.msra.mxu0 %v14046_v11  ;;  %v14225_v11 = vcombine.high %v5778_v61, %v5786_v63 }
 0x9f2   : > { %9070 = vmatpush2.bf16.msra.mxu1 %v14302_v20  ;;  %9030 = vmatprep.subr.bf16.mxu0 %v14031_v12  ;;  %v5506_v20 = vld [vmem:[#allocation14 + $0x230] sm:$0xff] }
 0x9f3   : > { %9071 = vmatprep.subr.bf16.mxu1 %v14287_v17  ;;  %v5514_v12 = vld [vmem:[#allocation14 + $0x270] sm:$0xff] }
 0x9f5   : > { %9031 = vmatpush2.bf16.msra.mxu0 %v14030_v42  ;;  %v13968_v42 = vcombine.low %v5522_v56, %v5530_v58  ;;  %v14177_v56 = vcombine.high %v5730_v48, %v5738_v46  ;;  %v5458_v58 = vld [vmem:[#allocation14 + $0xb0] sm:$0xff] }
 0x9f6   : > { %9072 = vmatpush2.bf16.msra.mxu1 %v14286_v29  ;;  %9032 = vmatprep.subr.bf16.mxu0 %v14015_v30  ;;  %v14224_v30 = vcombine.low %v5778_v61, %v5786_v63  ;;  %v5722_v61 = vld [vmem:[#allocation14 + $0x8f0] sm:$0xff] }
 0x9f7   : > { %9073 = vmatprep.subr.bf16.mxu1 %v14271_v31  ;;  %v13953_v31 = vcombine.high %v5506_v20, %v5514_v12 }
 0x9f9   : > { %9033 = vmatpush2.bf16.msra.mxu0 %v14014_v36  ;;  %v5746_v36 = vld [vmem:[#allocation14 + $0x9b0] sm:$0xff] }
 0x9fa   : > { %9074 = vmatpush2.bf16.msra.mxu1 %v14270_v37  ;;  %9084 = vmatprep.subr.bf16.mxu0 %v14001_v38  ;;  %v5754_v37 = vld [vmem:[#allocation14 + $0x9f0] sm:$0xff]  ;;  %v13952_v38 = vcombine.low %v5506_v20, %v5514_v12 }
 0x9fb   : > { %9125 = vmatprep.subr.bf16.mxu1 %v14257_v9  ;;  %v14208_v9 = vcombine.low %v5762_v60, %v5770_v24  ;;  %v14193_v13 = vcombine.high %v5746_v36, %v5754_v37  ;;  %v5690_v60 = vld [vmem:[#allocation14 + $0x7f0] sm:$0xff] }
 0x9fc   : > { %v8790_v35 = vpop.f32.mrf.mxu0  ;;  %9035 = vmatmul.mubr.bf16.vlgmr.msra.gmra.mxu0 %v17922_v27  ;;  %v5938_v24 = vld [vmem:[#allocation14 + $0xfb0] sm:$0xff] }
 0x9fd   : > { %v8791_v15 = vadd.f32 %v8790_v35, %v5971_v45  ;;  %v8831_v1 = vpop.f32.mrf.mxu1  ;;  %9076 = vmatmul.mubr.bf16.vlgmr.msra.gmra.mxu1 %v17926_v28  ;;  %9085 = vmatpush1.bf16.msra.mxu0 %v14000_v57  ;;  %v5474_v45 = vld [vmem:[#allocation14 + $0x130] sm:$0xff] }
 0x9fe   : > { %9116 = vmatprep.mubr.bf16.mxu0 %v17914_v50  ;;  %9126 = vmatpush1.bf16.msra.mxu1 %v14256_v41  ;;  %v8792_v3 = vpop.f32.mrf.mxu0  ;;  %v5482_v57 = vld [vmem:[#allocation14 + $0x170] sm:$0xff]  ;;  %v13936_v41 = vcombine.low %v5490_v33, %v5498_v34 }
 0x9ff   : > { %v17975_v6 = vadd.f32 %v8831_v1, %v8791_v15  ;;  %9157 = vmatprep.mubr.bf16.mxu1 %v17918_v44  ;;  %v8793_v7 = vadd.f32 %v8792_v3, %v5975_v53  ;;  %v8833_v10 = vpop.f32.mrf.mxu1  ;;  %9086 = vmatprep.subr.bf16.mxu0 %v13985_v0  ;;  %v14192_v53 = vcombine.low %v5746_v36, %v5754_v37  ;;  %v5466_v35 = vld [vmem:[#allocation14 + $0xf0] sm:$0xff] }
 0xa00   : > { %v8794_v17 = vpop.f32.mrf.mxu0  ;;  %9127 = vmatprep.subr.bf16.mxu1 %v14241_v55  ;;  %v13921_v0 = vcombine.high %v5474_v45, %v5482_v57  ;;  %v5714_v55 = vld [vmem:[#allocation14 + $0x8b0] sm:$0xff]  ;;  %v13920_v63 = vcombine.low %v5474_v45, %v5482_v57  ;;  %v14176_v15 = vcombine.low %v5730_v48, %v5738_v46  ;;  %v13905_v1 = vcombine.high %v5458_v58, %v5466_v35 }
 0xa01   : > { %v17978_v39 = vadd.f32 %v8833_v10, %v8793_v7  ;;  %v8835_v19 = vpop.f32.mrf.mxu1  ;;  %9087 = vmatpush1.bf16.msra.mxu0 %v13984_v2  ;;  %v14161_v2 = vcombine.high %v5714_v55, %v5722_v61  ;;  %v5442_v3 = vld [vmem:[#allocation14 + $0x30] sm:$0xff]  ;;  %v13904_v10 = vcombine.low %v5458_v58, %v5466_v35 }
 0xa02   : > { %9128 = vmatpush1.bf16.msra.mxu1 %v14240_v14  ;;  %v8795_v29 = vpop.f32.mrf.mxu0  ;;  %9088 = vmatprep.subr.bf16.mxu0 %v13969_v22  ;;  %v5450_v14 = vld [vmem:[#allocation14 + $0x70] sm:$0xff] }
 0xa03   : > { %v8836_v8 = vpop.f32.mrf.mxu1  ;;  %9129 = vmatprep.subr.bf16.mxu1 %v14225_v11  ;;  %v5698_v22 = vld [vmem:[#allocation14 + $0x830] sm:$0xff]  ;;  %v14160_v11 = vcombine.low %v5714_v55, %v5722_v61  ;;  %v13889_v20 = vcombine.high %v5442_v3, %v5450_v14 }
 0xa04   : > { %v5706_v7 = vld [vmem:[#allocation14 + $0x870] sm:$0xff] }
 0xa05   : > { %9089 = vmatpush1.bf16.msra.mxu0 %v13968_v42  ;;  %v14145_v12 = vcombine.high %v5698_v22, %v5706_v7  ;;  %v5682_v17 = vld [vmem:[#allocation14 + $0x7b0] sm:$0xff]  ;;  %v13888_v42 = vcombine.low %v5442_v3, %v5450_v14  ;;  %v14144_v29 = vcombine.low %v5698_v22, %v5706_v7 }
 0xa06   : > { %9130 = vmatpush1.bf16.msra.mxu1 %v14224_v30  ;;  %9090 = vmatprep.subr.bf16.mxu0 %v13953_v31  ;;  %v5946_v19 = vld [vmem:[#allocation14 + $0xff0] sm:$0xff]  ;;  %v14129_v30 = vcombine.high %v5682_v17, %v5690_v60  ;;  %v14128_v36 = vcombine.low %v5682_v17, %v5690_v60 }
 0xa07   : > { %9131 = vmatprep.subr.bf16.mxu1 %v14209_v32  ;;  %v14385_v31 = vcombine.high %v5938_v24, %v5946_v19  ;;  %v5666_v8 = vld [vmem:[#allocation14 + $0x730] sm:$0xff]  ;;  %v14384_v37 = vcombine.low %v5938_v24, %v5946_v19 }
 0xa08   : > { %v5674_v32 = vld [vmem:[#allocation14 + $0x770] sm:$0xff] }
 0xa09   : > { %9091 = vmatpush1.bf16.msra.mxu0 %v13952_v38  ;;  %v5922_v33 = vld [vmem:[#allocation14 + $0xf30] sm:$0xff]  ;;  %v14113_v38 = vcombine.high %v5666_v8, %v5674_v32  ;;  %v14112_v48 = vcombine.low %v5666_v8, %v5674_v32 }
 0xa0a   : > { %9132 = vmatpush1.bf16.msra.mxu1 %v14208_v9  ;;  %9092 = vmatprep.subr.bf16.mxu0 %v13937_v40  ;;  %v5930_v34 = vld [vmem:[#allocation14 + $0xf70] sm:$0xff] }
 0xa0b   : > { %9133 = vmatprep.subr.bf16.mxu1 %v14193_v13  ;;  %v14369_v9 = vcombine.high %v5922_v33, %v5930_v34  ;;  %v5650_v40 = vld [vmem:[#allocation14 + $0x6b0] sm:$0xff]  ;;  %v14368_v46 = vcombine.low %v5922_v33, %v5930_v34 }
 0xa0c   : > { %v5658_v13 = vld [vmem:[#allocation14 + $0x6f0] sm:$0xff] }
 0xa0d   : > { %9093 = vmatpush1.bf16.msra.mxu0 %v13936_v41  ;;  %v5906_v45 = vld [vmem:[#allocation14 + $0xeb0] sm:$0xff]  ;;  %v14097_v41 = vcombine.high %v5650_v40, %v5658_v13  ;;  %v14096_v55 = vcombine.low %v5650_v40, %v5658_v13 }
 0xa0e   : > { %9134 = vmatpush1.bf16.msra.mxu1 %v14192_v53  ;;  %9094 = vmatprep.subr.bf16.mxu0 %v13921_v0  ;;  %v5914_v57 = vld [vmem:[#allocation14 + $0xef0] sm:$0xff] }
 0xa0f   : > { %9135 = vmatprep.subr.bf16.mxu1 %v14177_v56  ;;  %v14353_v53 = vcombine.high %v5906_v45, %v5914_v57  ;;  %v5634_v0 = vld [vmem:[#allocation14 + $0x630] sm:$0xff]  ;;  %v14352_v61 = vcombine.low %v5906_v45, %v5914_v57 }
 0xa10   : > { %v5642_v56 = vld [vmem:[#allocation14 + $0x670] sm:$0xff] }
 0xa11   : > { %9095 = vmatpush1.bf16.msra.mxu0 %v13920_v63  ;;  %v5890_v58 = vld [vmem:[#allocation14 + $0xe30] sm:$0xff]  ;;  %v14081_v63 = vcombine.high %v5634_v0, %v5642_v56  ;;  %v14080_v22 = vcombine.low %v5634_v0, %v5642_v56  ;;  %v5811_v0 = vld [vmem:[#allocation14 + $0xbb8] sm:$0xff] }
 0xa12   : > { %9136 = vmatpush1.bf16.msra.mxu1 %v14176_v15  ;;  %9096 = vmatprep.subr.bf16.mxu0 %v13905_v1  ;;  %v5898_v35 = vld [vmem:[#allocation14 + $0xe70] sm:$0xff]  ;;  %v5819_v56 = vld [vmem:[#allocation14 + $0xbf8] sm:$0xff] }
 0xa13   : > { %9137 = vmatprep.subr.bf16.mxu1 %v14161_v2  ;;  %v14337_v15 = vcombine.high %v5890_v58, %v5898_v35  ;;  %v5618_v1 = vld [vmem:[#allocation14 + $0x5b0] sm:$0xff]  ;;  %v14336_v7 = vcombine.low %v5890_v58, %v5898_v35 }
 0xa14   : > { %v5626_v2 = vld [vmem:[#allocation14 + $0x5f0] sm:$0xff] }
 0xa15   : > { %9097 = vmatpush1.bf16.msra.mxu0 %v13904_v10  ;;  %v5874_v3 = vld [vmem:[#allocation14 + $0xdb0] sm:$0xff]  ;;  %v14065_v10 = vcombine.high %v5618_v1, %v5626_v2  ;;  %v14064_v24 = vcombine.low %v5618_v1, %v5626_v2  ;;  %v16798_v1 = vld [vmem:[#allocation16] sm:$0xff] }
 0xa16   : > { %9138 = vmatpush1.bf16.msra.mxu1 %v14160_v11  ;;  %9098 = vmatprep.subr.bf16.mxu0 %v13889_v20  ;;  %v5882_v14 = vld [vmem:[#allocation14 + $0xdf0] sm:$0xff]  ;;  %v5979_v2 = vrot.slane %v16798_v1, %v17677_v5 }
 0xa17   : > { %9139 = vmatprep.subr.bf16.mxu1 %v14145_v12  ;;  %v14321_v11 = vcombine.high %v5874_v3, %v5882_v14  ;;  %v5602_v20 = vld [vmem:[#allocation14 + $0x530] sm:$0xff]  ;;  %v14320_v19 = vcombine.low %v5874_v3, %v5882_v14  ;;  %v5795_v14 = vld [vmem:[#allocation14 + $0xb38] sm:$0xff] }
 0xa18   : > { %v5610_v12 = vld [vmem:[#allocation14 + $0x570] sm:$0xff] }
 0xa19   : > { %9099 = vmatpush1.bf16.msra.mxu0 %v13888_v42  ;;  %v5858_v17 = vld [vmem:[#allocation14 + $0xd30] sm:$0xff]  ;;  %v14049_v42 = vcombine.high %v5602_v20, %v5610_v12  ;;  %v14048_v33 = vcombine.low %v5602_v20, %v5610_v12  ;;  %v5523_v20 = vld [vmem:[#allocation14 + $0x2b8] sm:$0xff] }
 0xa1a   : > { %9140 = vmatpush1.bf16.msra.mxu1 %v14144_v29  ;;  %9100 = vmatprep.subr.bf16.mxu0 %v14129_v30  ;;  %v5866_v60 = vld [vmem:[#allocation14 + $0xd70] sm:$0xff]  ;;  %v5531_v12 = vld [vmem:[#allocation14 + $0x2f8] sm:$0xff] }
 0xa1b   : > { %9141 = vmatprep.subr.bf16.mxu1 %v14385_v31  ;;  %v14305_v29 = vcombine.high %v5858_v17, %v5866_v60  ;;  %v5586_v30 = vld [vmem:[#allocation14 + $0x4b0] sm:$0xff]  ;;  %v14304_v34 = vcombine.low %v5858_v17, %v5866_v60 }
 0xa1c   : > { %v5594_v31 = vld [vmem:[#allocation14 + $0x4f0] sm:$0xff] }
 0xa1d   : > { %9101 = vmatpush2.bf16.msra.mxu0 %v14128_v36  ;;  %v5842_v8 = vld [vmem:[#allocation14 + $0xcb0] sm:$0xff]  ;;  %v14033_v36 = vcombine.high %v5586_v30, %v5594_v31  ;;  %v14032_v45 = vcombine.low %v5586_v30, %v5594_v31 }
 0xa1e   : > { %9142 = vmatpush2.bf16.msra.mxu1 %v14384_v37  ;;  %9102 = vmatprep.subr.bf16.mxu0 %v14113_v38  ;;  %v5850_v32 = vld [vmem:[#allocation14 + $0xcf0] sm:$0xff] }
 0xa1f   : > { %9143 = vmatprep.subr.bf16.mxu1 %v14369_v9  ;;  %v14289_v37 = vcombine.high %v5842_v8, %v5850_v32  ;;  %v5570_v38 = vld [vmem:[#allocation14 + $0x430] sm:$0xff]  ;;  %v14288_v57 = vcombine.low %v5842_v8, %v5850_v32  ;;  %v13971_v32 = vcombine.high %v5523_v20, %v5531_v12 }
 0xa20   : > { %v5578_v9 = vld [vmem:[#allocation14 + $0x470] sm:$0xff] }
 0xa21   : > { %9103 = vmatpush2.bf16.msra.mxu0 %v14112_v48  ;;  %v5826_v40 = vld [vmem:[#allocation14 + $0xc30] sm:$0xff]  ;;  %v14017_v48 = vcombine.high %v5570_v38, %v5578_v9  ;;  %v14016_v58 = vcombine.low %v5570_v38, %v5578_v9  ;;  %v5507_v38 = vld [vmem:[#allocation14 + $0x238] sm:$0xff] }
 0xa22   : > { %9144 = vmatpush2.bf16.msra.mxu1 %v14368_v46  ;;  %9104 = vmatprep.subr.bf16.mxu0 %v14097_v41  ;;  %v5834_v13 = vld [vmem:[#allocation14 + $0xc70] sm:$0xff]  ;;  %v5555_v41 = vld [vmem:[#allocation14 + $0x3b8] sm:$0xff] }
 0xa23   : > { %9145 = vmatprep.subr.bf16.mxu1 %v14353_v53  ;;  %v14273_v46 = vcombine.high %v5826_v40, %v5834_v13  ;;  %v5563_v53 = vld [vmem:[#allocation14 + $0x3f8] sm:$0xff]  ;;  %v14272_v35 = vcombine.low %v5826_v40, %v5834_v13 }
 0xa24   : > { %v14002_v3 = vcombine.low %v5555_v41, %v5563_v53  ;;  %v5515_v9 = vld [vmem:[#allocation14 + $0x278] sm:$0xff] }
 0xa25   : > { %9105 = vmatpush2.bf16.msra.mxu0 %v14096_v55  ;;  %v14003_v55 = vcombine.high %v5555_v41, %v5563_v53  ;;  %v5763_v13 = vld [vmem:[#allocation14 + $0xa38] sm:$0xff] }
 0xa26   : > { %9146 = vmatpush2.bf16.msra.mxu1 %v14352_v61  ;;  %9106 = vmatprep.subr.bf16.mxu0 %v14081_v63  ;;  %v14259_v61 = vcombine.high %v5811_v0, %v5819_v56  ;;  %v5539_v63 = vld [vmem:[#allocation14 + $0x338] sm:$0xff] }
 0xa27   : > { %9147 = vmatprep.subr.bf16.mxu1 %v14337_v15  ;;  %v5547_v15 = vld [vmem:[#allocation14 + $0x378] sm:$0xff] }
 0xa28   : > { %v13986_v30 = vcombine.low %v5539_v63, %v5547_v15 }
 0xa29   : > { %9107 = vmatpush2.bf16.msra.mxu0 %v14080_v22  ;;  %v5803_v22 = vld [vmem:[#allocation14 + $0xb78] sm:$0xff] }
 0xa2a   : > { %9148 = vmatpush2.bf16.msra.mxu1 %v14336_v7  ;;  %9108 = vmatprep.subr.bf16.mxu0 %v14065_v10  ;;  %v14258_v7 = vcombine.low %v5811_v0, %v5819_v56  ;;  %v5983_v10 = vrot.slane %v16798_v1, %v17680_v43  ;;  %v14243_v60 = vcombine.high %v5795_v14, %v5803_v22  ;;  %v5491_v56 = vld [vmem:[#allocation14 + $0x1b8] sm:$0xff] }
 0xa2b   : > { %9149 = vmatprep.subr.bf16.mxu1 %v14321_v11  ;;  %v13987_v11 = vcombine.high %v5539_v63, %v5547_v15  ;;  %v14242_v8 = vcombine.low %v5795_v14, %v5803_v22  ;;  %v5731_v14 = vld [vmem:[#allocation14 + $0x938] sm:$0xff] }
 0xa2c   : > { %v5739_v22 = vld [vmem:[#allocation14 + $0x978] sm:$0xff] }
 0xa2d   : > { %9109 = vmatpush2.bf16.msra.mxu0 %v14064_v24  ;;  %v5779_v24 = vld [vmem:[#allocation14 + $0xab8] sm:$0xff] }
 0xa2e   : > { %9150 = vmatpush2.bf16.msra.mxu1 %v14320_v19  ;;  %9110 = vmatprep.subr.bf16.mxu0 %v14049_v42  ;;  %v5787_v19 = vld [vmem:[#allocation14 + $0xaf8] sm:$0xff] }
 0xa2f   : > { %9151 = vmatprep.subr.bf16.mxu1 %v14305_v29  ;;  %v14226_v41 = vcombine.low %v5779_v24, %v5787_v19 }
 0xa31   : > { %9111 = vmatpush2.bf16.msra.mxu0 %v14048_v33 }
 0xa32   : > { %9152 = vmatpush2.bf16.msra.mxu1 %v14304_v34  ;;  %9112 = vmatprep.subr.bf16.mxu0 %v14033_v36 }
 0xa33   : > { %9153 = vmatprep.subr.bf16.mxu1 %v14289_v37  ;;  %v14227_v37 = vcombine.high %v5779_v24, %v5787_v19  ;;  %v5723_v24 = vld [vmem:[#allocation14 + $0x8f8] sm:$0xff] }
 0xa35   : > { %9113 = vmatpush2.bf16.msra.mxu0 %v14032_v45  ;;  %v5771_v45 = vld [vmem:[#allocation14 + $0xa78] sm:$0xff] }
 0xa36   : > { %9154 = vmatpush2.bf16.msra.mxu1 %v14288_v57  ;;  %9114 = vmatprep.subr.bf16.mxu0 %v14017_v48  ;;  %v13970_v48 = vcombine.low %v5523_v20, %v5531_v12  ;;  %v14211_v0 = vcombine.high %v5763_v13, %v5771_v45  ;;  %v14210_v63 = vcombine.low %v5763_v13, %v5771_v45  ;;  %v5459_v12 = vld [vmem:[#allocation14 + $0xb8] sm:$0xff] }
 0xa37   : > { %9155 = vmatprep.subr.bf16.mxu1 %v14273_v46  ;;  %v14179_v20 = vcombine.high %v5731_v14, %v5739_v22  ;;  %v5691_v13 = vld [vmem:[#allocation14 + $0x7f8] sm:$0xff] }
 0xa38   : > { %v5939_v45 = vld [vmem:[#allocation14 + $0xfb8] sm:$0xff] }
 0xa39   : > { %9115 = vmatpush2.bf16.msra.mxu0 %v14016_v58  ;;  %v5499_v58 = vld [vmem:[#allocation14 + $0x1f8] sm:$0xff] }
 0xa3a   : > { %9156 = vmatpush2.bf16.msra.mxu1 %v14272_v35  ;;  %9166 = vmatprep.subr.bf16.mxu0 %v14003_v55  ;;  %v5747_v35 = vld [vmem:[#allocation14 + $0x9b8] sm:$0xff]  ;;  %v13939_v15 = vcombine.high %v5491_v56, %v5499_v58 }
 0xa3b   : > { %9207 = vmatprep.subr.bf16.mxu1 %v14259_v61  ;;  %v5755_v55 = vld [vmem:[#allocation14 + $0x9f8] sm:$0xff]  ;;  %v13954_v61 = vcombine.low %v5507_v38, %v5515_v9 }
 0xa3c   : > { %v8872_v17 = vpop.f32.mrf.mxu0  ;;  %9117 = vmatmul.mubr.bf16.vlgmr.msra.gmra.mxu0 %v17922_v27  ;;  %v14195_v1 = vcombine.high %v5747_v35, %v5755_v55 }
 0xa3d   : > { %v8873_v42 = vadd.f32 %v8872_v17, %v5979_v2  ;;  %v8913_v29 = vpop.f32.mrf.mxu1  ;;  %9158 = vmatmul.mubr.bf16.vlgmr.msra.gmra.mxu1 %v17926_v28  ;;  %9167 = vmatpush1.bf16.msra.mxu0 %v14002_v3  ;;  %v5475_v2 = vld [vmem:[#allocation14 + $0x138] sm:$0xff] }
 0xa3e   : > { %9198 = vmatprep.mubr.bf16.mxu0 %v17914_v50  ;;  %9208 = vmatpush1.bf16.msra.mxu1 %v14258_v7  ;;  %v8874_v31 = vpop.f32.mrf.mxu0  ;;  %v5483_v3 = vld [vmem:[#allocation14 + $0x178] sm:$0xff]  ;;  %v13938_v7 = vcombine.low %v5491_v56, %v5499_v58 }
 0xa3f   : > { %v17985_v33 = vadd.f32 %v8913_v29, %v8873_v42  ;;  %9239 = vmatprep.mubr.bf16.mxu1 %v17918_v44  ;;  %v8875_v34 = vadd.f32 %v8874_v31, %v5983_v10  ;;  %v8915_v36 = vpop.f32.mrf.mxu1  ;;  %9168 = vmatprep.subr.bf16.mxu0 %v13987_v11  ;;  %v13955_v44 = vcombine.high %v5507_v38, %v5515_v9  ;;  %v5467_v17 = vld [vmem:[#allocation14 + $0xf8] sm:$0xff] }
 0xa40   : > { %v8876_v40 = vpop.f32.mrf.mxu0  ;;  %9209 = vmatprep.subr.bf16.mxu1 %v14243_v60  ;;  %v14194_v10 = vcombine.low %v5747_v35, %v5755_v55  ;;  %v13923_v11 = vcombine.high %v5475_v2, %v5483_v3  ;;  %v5715_v60 = vld [vmem:[#allocation14 + $0x8b8] sm:$0xff]  ;;  %v13922_v19 = vcombine.low %v5475_v2, %v5483_v3  ;;  %v14178_v42 = vcombine.low %v5731_v14, %v5739_v22 }
 0xa41   : > { %v17988_v57 = vadd.f32 %v8915_v36, %v8875_v34  ;;  %v8917_v50 = vpop.f32.mrf.mxu1  ;;  %9169 = vmatpush1.bf16.msra.mxu0 %v13986_v30  ;;  %v13907_v29 = vcombine.high %v5459_v12, %v5467_v17  ;;  %v14163_v30 = vcombine.high %v5715_v60, %v5723_v24  ;;  %v5443_v31 = vld [vmem:[#allocation14 + $0x38] sm:$0xff]  ;;  %v13906_v36 = vcombine.low %v5459_v12, %v5467_v17 }
 0xa42   : > { %9210 = vmatpush1.bf16.msra.mxu1 %v14242_v8  ;;  %v8877_v46 = vpop.f32.mrf.mxu0  ;;  %9170 = vmatprep.subr.bf16.mxu0 %v13971_v32  ;;  %v5451_v8 = vld [vmem:[#allocation14 + $0x78] sm:$0xff] }
 0xa43   : > { %v8918_v53 = vpop.f32.mrf.mxu1  ;;  %9211 = vmatprep.subr.bf16.mxu1 %v14227_v37  ;;  %v5699_v32 = vld [vmem:[#allocation14 + $0x838] sm:$0xff]  ;;  %v14162_v37 = vcombine.low %v5715_v60, %v5723_v24  ;;  %v13891_v38 = vcombine.high %v5443_v31, %v5451_v8 }
 0xa44   : > { %v5707_v34 = vld [vmem:[#allocation14 + $0x878] sm:$0xff] }
 0xa45   : > { %9171 = vmatpush1.bf16.msra.mxu0 %v13970_v48  ;;  %v14147_v9 = vcombine.high %v5699_v32, %v5707_v34  ;;  %v5683_v40 = vld [vmem:[#allocation14 + $0x7b8] sm:$0xff]  ;;  %v13890_v48 = vcombine.low %v5443_v31, %v5451_v8  ;;  %v14146_v46 = vcombine.low %v5699_v32, %v5707_v34 }
 0xa46   : > { %9212 = vmatpush1.bf16.msra.mxu1 %v14226_v41  ;;  %9172 = vmatprep.subr.bf16.mxu0 %v13955_v44  ;;  %v5947_v50 = vld [vmem:[#allocation14 + $0xff8] sm:$0xff]  ;;  %v14131_v41 = vcombine.high %v5683_v40, %v5691_v13  ;;  %v14130_v35 = vcombine.low %v5683_v40, %v5691_v13 }
 0xa47   : > { %9213 = vmatprep.subr.bf16.mxu1 %v14211_v0  ;;  %v14387_v44 = vcombine.high %v5939_v45, %v5947_v50  ;;  %v5667_v53 = vld [vmem:[#allocation14 + $0x738] sm:$0xff]  ;;  %v14386_v55 = vcombine.low %v5939_v45, %v5947_v50 }
 0xa48   : > { %v5675_v0 = vld [vmem:[#allocation14 + $0x778] sm:$0xff] }
 0xa49   : > { %9173 = vmatpush1.bf16.msra.mxu0 %v13954_v61  ;;  %v5923_v56 = vld [vmem:[#allocation14 + $0xf38] sm:$0xff]  ;;  %v14115_v61 = vcombine.high %v5667_v53, %v5675_v0  ;;  %v14114_v14 = vcombine.low %v5667_v53, %v5675_v0 }
 0xa4a   : > { %9214 = vmatpush1.bf16.msra.mxu1 %v14210_v63  ;;  %9174 = vmatprep.subr.bf16.mxu0 %v13939_v15  ;;  %v5931_v58 = vld [vmem:[#allocation14 + $0xf78] sm:$0xff] }
 0xa4b   : > { %9215 = vmatprep.subr.bf16.mxu1 %v14195_v1  ;;  %v14371_v63 = vcombine.high %v5923_v56, %v5931_v58  ;;  %v5651_v15 = vld [vmem:[#allocation14 + $0x6b8] sm:$0xff]  ;;  %v14370_v22 = vcombine.low %v5923_v56, %v5931_v58 }
 0xa4c   : > { %v5659_v1 = vld [vmem:[#allocation14 + $0x6f8] sm:$0xff] }
 0xa4d   : > { %9175 = vmatpush1.bf16.msra.mxu0 %v13938_v7  ;;  %v5907_v2 = vld [vmem:[#allocation14 + $0xeb8] sm:$0xff]  ;;  %v14099_v7 = vcombine.high %v5651_v15, %v5659_v1  ;;  %v14098_v60 = vcombine.low %v5651_v15, %v5659_v1 }
 0xa4e   : > { %9216 = vmatpush1.bf16.msra.mxu1 %v14194_v10  ;;  %9176 = vmatprep.subr.bf16.mxu0 %v13923_v11  ;;  %v5915_v3 = vld [vmem:[#allocation14 + $0xef8] sm:$0xff] }
 0xa4f   : > { %9217 = vmatprep.subr.bf16.mxu1 %v14179_v20  ;;  %v14355_v10 = vcombine.high %v5907_v2, %v5915_v3  ;;  %v5635_v11 = vld [vmem:[#allocation14 + $0x638] sm:$0xff]  ;;  %v14354_v24 = vcombine.low %v5907_v2, %v5915_v3 }
 0xa50   : > { %v5643_v20 = vld [vmem:[#allocation14 + $0x678] sm:$0xff] }
 0xa51   : > { %9177 = vmatpush1.bf16.msra.mxu0 %v13922_v19  ;;  %v5891_v12 = vld [vmem:[#allocation14 + $0xe38] sm:$0xff]  ;;  %v14083_v19 = vcombine.high %v5635_v11, %v5643_v20  ;;  %v14082_v32 = vcombine.low %v5635_v11, %v5643_v20  ;;  %v17990_v11 = vld [vmem:[#allocation16 + $0x8] sm:$0xff]  ;;  %v15991_v20 = vld [vmem:[#allocation17 + $0xe4] ss:$16 sps:$4 sm:$0xff]  }
 0xa52   : > { %9218 = vmatpush1.bf16.msra.mxu1 %v14178_v42  ;;  %9178 = vmatprep.subr.bf16.mxu0 %v13907_v29  ;;  %v5899_v17 = vld [vmem:[#allocation14 + $0xe78] sm:$0xff] }
 0xa53   : > { %9219 = vmatprep.subr.bf16.mxu1 %v14163_v30  ;;  %v14339_v42 = vcombine.high %v5891_v12, %v5899_v17  ;;  %v5619_v29 = vld [vmem:[#allocation14 + $0x5b8] sm:$0xff]  ;;  %v14338_v34 = vcombine.low %v5891_v12, %v5899_v17  ;;  %v15994_v12 = vld [vmem:[#allocation17 + $0x2e4] ss:$16 sps:$4 sm:$0xff]   ;;  %v9249_v17 = vmax.f32 %v17954_v62, 0.0 }
 0xa54   : > { %v5627_v30 = vld [vmem:[#allocation14 + $0x5f8] sm:$0xff]  ;;  %v16000_v62 = vld [vmem:[#allocation17 + $0x2c4] ss:$16 sps:$4 sm:$0xff]  }
 0xa55   : > { %9179 = vmatpush1.bf16.msra.mxu0 %v13906_v36  ;;  %v5875_v31 = vld [vmem:[#allocation14 + $0xdb8] sm:$0xff]  ;;  %v14067_v36 = vcombine.high %v5619_v29, %v5627_v30  ;;  %v14066_v45 = vcombine.low %v5619_v29, %v5627_v30  ;;  %v5991_v29 = vrot.slane %v17990_v11, %v17604_v26  ;;  %v15997_v30 = vld [vmem:[#allocation17 + $0xc4] ss:$16 sps:$4 sm:$0xff]  }
 0xa56   : > { %9220 = vmatpush1.bf16.msra.mxu1 %v14162_v37  ;;  %9180 = vmatprep.subr.bf16.mxu0 %v13891_v38  ;;  %v5883_v8 = vld [vmem:[#allocation14 + $0xdf8] sm:$0xff] }
 0xa57   : > { %9221 = vmatprep.subr.bf16.mxu1 %v14147_v9  ;;  %v14323_v37 = vcombine.high %v5875_v31, %v5883_v8  ;;  %v5603_v38 = vld [vmem:[#allocation14 + $0x538] sm:$0xff]  ;;  %v14322_v50 = vcombine.low %v5875_v31, %v5883_v8  ;;  %v17998_v31 = vpack.c.bf16 %v9249_v17, %v9249_v17  ;;  %v16036_v17 = vld [vmem:[#allocation17 + $0x204] ss:$16 sps:$4 sm:$0xff]  }
 0xa58   : > { %v5611_v9 = vld [vmem:[#allocation14 + $0x578] sm:$0xff] }
 0xa59   : > { %9181 = vmatpush1.bf16.msra.mxu0 %v13890_v48  ;;  %v5859_v40 = vld [vmem:[#allocation14 + $0xd38] sm:$0xff]  ;;  %v14051_v48 = vcombine.high %v5603_v38, %v5611_v9  ;;  %v14050_v56 = vcombine.low %v5603_v38, %v5611_v9  ;;  %v15998_v38 = vld [vmem:[#allocation17 + $0x2c0] ss:$16 sps:$4 sm:$0xff]   ;;  %v16003_v9 = vld [vmem:[#allocation17 + $0xa4] ss:$16 sps:$4 sm:$0xff]  }
 0xa5a   : > { %9222 = vmatpush1.bf16.msra.mxu1 %v14146_v46  ;;  %9182 = vmatprep.subr.bf16.mxu0 %v14131_v41  ;;  %v5867_v13 = vld [vmem:[#allocation14 + $0xd78] sm:$0xff] }
 0xa5b   : > { %9223 = vmatprep.subr.bf16.mxu1 %v14387_v44  ;;  %v14307_v46 = vcombine.high %v5859_v40, %v5867_v13  ;;  %v5587_v41 = vld [vmem:[#allocation14 + $0x4b8] sm:$0xff]  ;;  %v14306_v58 = vcombine.low %v5859_v40, %v5867_v13 }
 0xa5c   : > { %v5595_v44 = vld [vmem:[#allocation14 + $0x4f8] sm:$0xff] }
 0xa5d   : > { %9183 = vmatpush2.bf16.msra.mxu0 %v14130_v35  ;;  %v5843_v53 = vld [vmem:[#allocation14 + $0xcb8] sm:$0xff]  ;;  %v14035_v35 = vcombine.high %v5587_v41, %v5595_v44  ;;  %v14034_v2 = vcombine.low %v5587_v41, %v5595_v44  ;;  %v16004_v44 = vld [vmem:[#allocation17 + $0x2a0] ss:$16 sps:$4 sm:$0xff]  }
 0xa5e   : > { %9224 = vmatpush2.bf16.msra.mxu1 %v14386_v55  ;;  %9184 = vmatprep.subr.bf16.mxu0 %v14115_v61  ;;  %v5851_v0 = vld [vmem:[#allocation14 + $0xcf8] sm:$0xff] }
 0xa5f   : > { %9225 = vmatprep.subr.bf16.mxu1 %v14371_v63  ;;  %v14291_v55 = vcombine.high %v5843_v53, %v5851_v0  ;;  %v5571_v61 = vld [vmem:[#allocation14 + $0x438] sm:$0xff]  ;;  %v14290_v3 = vcombine.low %v5843_v53, %v5851_v0  ;;  %v16009_v53 = vld [vmem:[#allocation17 + $0x84] ss:$16 sps:$4 sm:$0xff]  }
 0xa60   : > { %v5579_v63 = vld [vmem:[#allocation14 + $0x478] sm:$0xff] }
 0xa61   : > { %9185 = vmatpush2.bf16.msra.mxu0 %v14114_v14  ;;  %v5827_v15 = vld [vmem:[#allocation14 + $0xc38] sm:$0xff]  ;;  %v14019_v14 = vcombine.high %v5571_v61, %v5579_v63 }
 0xa62   : > { %9226 = vmatpush2.bf16.msra.mxu1 %v14370_v22  ;;  %9186 = vmatprep.subr.bf16.mxu0 %v14099_v7  ;;  %v5835_v1 = vld [vmem:[#allocation14 + $0xc78] sm:$0xff]  ;;  %v14018_v7 = vcombine.low %v5571_v61, %v5579_v63  ;;  %v16018_v61 = vld [vmem:[#allocation17 + $0x264] ss:$16 sps:$4 sm:$0xff]   ;;  %v16013_v63 = vld [vmem:[#allocation17 + $0x60] ss:$16 sps:$4 sm:$0xff]  }
 0xa63   : > { %9227 = vmatprep.subr.bf16.mxu1 %v14355_v10  ;;  %v14275_v22 = vcombine.high %v5827_v15, %v5835_v1  ;;  %v14274_v10 = vcombine.low %v5827_v15, %v5835_v1  ;;  %v16016_v15 = vld [vmem:[#allocation17 + $0x260] ss:$16 sps:$4 sm:$0xff]   ;;  %v16021_v1 = vld [vmem:[#allocation17 + $0x44] ss:$16 sps:$4 sm:$0xff]  }
 0xa65   : > { %9187 = vmatpush2.bf16.msra.mxu0 %v14098_v60  ;;  %v9251_v60 = vmax.f32 %v17966_v4, 0.0 }
 0xa66   : > { %9228 = vmatpush2.bf16.msra.mxu1 %v14354_v24  ;;  %9188 = vmatprep.subr.bf16.mxu0 %v14083_v19  ;;  %v5987_v24 = vrot.slane %v17990_v11, %v17601_v25  ;;  %v15989_v19 = vld [vmem:[#allocation17 + $0xe0] ss:$16 sps:$4 sm:$0xff]  }
 0xa67   : > { %9229 = vmatprep.subr.bf16.mxu1 %v14339_v42  ;;  %v15992_v42 = vld [vmem:[#allocation17 + $0x2e0] ss:$16 sps:$4 sm:$0xff]   ;;  %v18001_v4 = vpack.c.bf16 %v9251_v60, %v9251_v60 }
 0xa68   : > { %v16031_v60 = vld [vmem:[#allocation17] ss:$16 sps:$4 sm:$0xff]  }
 0xa69   : > { %9189 = vmatpush2.bf16.msra.mxu0 %v14082_v32 }
 0xa6a   : > { %9230 = vmatpush2.bf16.msra.mxu1 %v14338_v34  ;;  %9190 = vmatprep.subr.bf16.mxu0 %v14067_v36  ;;  %v15995_v36 = vld [vmem:[#allocation17 + $0xc0] ss:$16 sps:$4 sm:$0xff]  }
 0xa6b   : > { %9231 = vmatprep.subr.bf16.mxu1 %v14323_v37 }
 0xa6d   : > { %9191 = vmatpush2.bf16.msra.mxu0 %v14066_v45  ;;  %v16006_v45 = vld [vmem:[#allocation17 + $0x2a4] ss:$16 sps:$4 sm:$0xff]  }
 0xa6e   : > { %9232 = vmatpush2.bf16.msra.mxu1 %v14322_v50  ;;  %9192 = vmatprep.subr.bf16.mxu0 %v14051_v48 }
 0xa6f   : > { %9233 = vmatprep.subr.bf16.mxu1 %v14307_v46  ;;  %v16001_v46 = vld [vmem:[#allocation17 + $0xa0] ss:$16 sps:$4 sm:$0xff]  }
 0xa71   : > { %9193 = vmatpush2.bf16.msra.mxu0 %v14050_v56  ;;  %v16012_v56 = vld [vmem:[#allocation17 + $0x284] ss:$16 sps:$4 sm:$0xff]  }
 0xa72   : > { %9234 = vmatpush2.bf16.msra.mxu1 %v14306_v58  ;;  %9194 = vmatprep.subr.bf16.mxu0 %v14035_v35  ;;  %v16007_v58 = vld [vmem:[#allocation17 + $0x80] ss:$16 sps:$4 sm:$0xff]  }
 0xa73   : > { %9235 = vmatprep.subr.bf16.mxu1 %v14291_v55  ;;  %v16010_v35 = vld [vmem:[#allocation17 + $0x280] ss:$16 sps:$4 sm:$0xff]   ;;  %v16015_v55 = vld [vmem:[#allocation17 + $0x64] ss:$16 sps:$4 sm:$0xff]  }
 0xa75   : > { %9195 = vmatpush2.bf16.msra.mxu0 %v14034_v2  ;;  %v16024_v2 = vld [vmem:[#allocation17 + $0x244] ss:$16 sps:$4 sm:$0xff]  }
 0xa76   : > { %9236 = vmatpush2.bf16.msra.mxu1 %v14290_v3  ;;  %9196 = vmatprep.subr.bf16.mxu0 %v14019_v14  ;;  %v16019_v3 = vld [vmem:[#allocation17 + $0x40] ss:$16 sps:$4 sm:$0xff]  }
 0xa77   : > { %9237 = vmatprep.subr.bf16.mxu1 %v14275_v22  ;;  %v16022_v14 = vld [vmem:[#allocation17 + $0x240] ss:$16 sps:$4 sm:$0xff]   ;;  %v16027_v22 = vld [vmem:[#allocation17 + $0x24] ss:$16 sps:$4 sm:$0xff]  }
 0xa79   : > { %9197 = vmatpush2.bf16.msra.mxu0 %v14018_v7  ;;  %v16030_v7 = vld [vmem:[#allocation17 + $0x224] ss:$16 sps:$4 sm:$0xff]  }
 0xa7a   : > { %9238 = vmatpush2.bf16.msra.mxu1 %v14274_v10  ;;  %12374 = vmatprep.subr.bf16.mxu0 %v15991_v20  ;;  %v16025_v10 = vld [vmem:[#allocation17 + $0x20] ss:$16 sps:$4 sm:$0xff]  }
 0xa7b   : > { %12415 = vmatprep.subr.bf16.mxu1 %v15994_v12  ;;  %v16028_v20 = vld [vmem:[#allocation17 + $0x220] ss:$16 sps:$4 sm:$0xff]   ;;  %v16033_v12 = vld [vmem:[#allocation17 + $0x4] ss:$16 sps:$4 sm:$0xff]  }
 0xa7c   : > { %v8954_v8 = vpop.f32.mrf.mxu0  ;;  %9199 = vmatmul.mubr.bf16.vlgmr.msra.gmra.mxu0 %v17922_v27 }
 0xa7d   : > { %v8955_v32 = vadd.f32 %v8954_v8, %v5987_v24  ;;  %v8995_v34 = vpop.f32.mrf.mxu1  ;;  %9240 = vmatmul.mubr.bf16.vlgmr.msra.gmra.mxu1 %v17926_v28  ;;  %12375 = vmatpush1.bf16.msra.mxu0 %v15989_v19  ;;  %v16034_v24 = vld [vmem:[#allocation17 + $0x200] ss:$16 sps:$4 sm:$0xff]   ;;  %v16039_v19 = vld [vmem:[#allocation17 + $0x1e4] ss:$16 sps:$4 sm:$0xff]  }
 0xa7e   : > { %12406 = vmatprep.mubr.bf16.mxu0 %v17998_v31  ;;  %12416 = vmatpush1.bf16.msra.mxu1 %v15992_v42  ;;  %v8956_v37 = vpop.f32.mrf.mxu0  ;;  %v16042_v42 = vld [vmem:[#allocation17 + $0x3e4] ss:$16 sps:$4 sm:$0xff]  }
 0xa7f   : > { %v18005_v40 = vadd.f32 %v8995_v34, %v8955_v32  ;;  %12447 = vmatprep.mubr.bf16.mxu1 %v18001_v4  ;;  %v8957_v27 = vadd.f32 %v8956_v37, %v5991_v29  ;;  %v8997_v13 = vpop.f32.mrf.mxu1  ;;  %12376 = vmatprep.subr.bf16.mxu0 %v15997_v30  ;;  %v16037_v29 = vld [vmem:[#allocation17 + $0x1e0] ss:$16 sps:$4 sm:$0xff]   ;;  %v16045_v8 = vld [vmem:[#allocation17 + $0x1c4] ss:$16 sps:$4 sm:$0xff]  }
 0xa80   : > { %v8958_v50 = vpop.f32.mrf.mxu0  ;;  %12417 = vmatprep.subr.bf16.mxu1 %v16000_v62  ;;  %v16040_v30 = vld [vmem:[#allocation17 + $0x3e0] ss:$16 sps:$4 sm:$0xff]   ;;  %v16048_v62 = vld [vmem:[#allocation17 + $0x3c4] ss:$16 sps:$4 sm:$0xff]  }
 0xa81   : > { %v18008_v48 = vadd.f32 %v8997_v13, %v8957_v27  ;;  %v8999_v28 = vpop.f32.mrf.mxu1  ;;  %12377 = vmatpush1.bf16.msra.mxu0 %v15995_v36  ;;  %v16043_v32 = vld [vmem:[#allocation17 + $0x1c0] ss:$16 sps:$4 sm:$0xff]   ;;  %v16051_v36 = vld [vmem:[#allocation17 + $0x1a4] ss:$16 sps:$4 sm:$0xff]  }
 0xa82   : > { %12418 = vmatpush1.bf16.msra.mxu1 %v15998_v38  ;;  %v8959_v41 = vpop.f32.mrf.mxu0  ;;  %12378 = vmatprep.subr.bf16.mxu0 %v16003_v9  ;;  %v16046_v34 = vld [vmem:[#allocation17 + $0x3c0] ss:$16 sps:$4 sm:$0xff]   ;;  %v16054_v37 = vld [vmem:[#allocation17 + $0x3a4] ss:$16 sps:$4 sm:$0xff]  }
 0xa83   : > { %v9000_v0 = vpop.f32.mrf.mxu1  ;;  %12419 = vmatprep.subr.bf16.mxu1 %v16006_v45  ;;  %v16049_v38 = vld [vmem:[#allocation17 + $0x1a0] ss:$16 sps:$4 sm:$0xff]   ;;  %v16057_v27 = vld [vmem:[#allocation17 + $0x184] ss:$16 sps:$4 sm:$0xff]  }
 0xa84   : > { %v16052_v9 = vld [vmem:[#allocation17 + $0x3a0] ss:$16 sps:$4 sm:$0xff]   ;;  %v16060_v13 = vld [vmem:[#allocation17 + $0x384] ss:$16 sps:$4 sm:$0xff]  }
 0xa85   : > { %12379 = vmatpush1.bf16.msra.mxu0 %v16001_v46  ;;  %v16055_v45 = vld [vmem:[#allocation17 + $0x180] ss:$16 sps:$4 sm:$0xff]   ;;  %v16063_v28 = vld [vmem:[#allocation17 + $0x164] ss:$16 sps:$4 sm:$0xff]  }
 0xa86   : > { %12420 = vmatpush1.bf16.msra.mxu1 %v16004_v44  ;;  %12380 = vmatprep.subr.bf16.mxu0 %v16009_v53  ;;  %v16058_v50 = vld [vmem:[#allocation17 + $0x380] ss:$16 sps:$4 sm:$0xff]   ;;  %v16066_v46 = vld [vmem:[#allocation17 + $0x364] ss:$16 sps:$4 sm:$0xff]  }
 0xa87   : > { %12421 = vmatprep.subr.bf16.mxu1 %v16012_v56  ;;  %v16061_v41 = vld [vmem:[#allocation17 + $0x160] ss:$16 sps:$4 sm:$0xff]   ;;  %v16069_v53 = vld [vmem:[#allocation17 + $0x144] ss:$16 sps:$4 sm:$0xff]  }
 0xa88   : > { %v16064_v44 = vld [vmem:[#allocation17 + $0x360] ss:$16 sps:$4 sm:$0xff]   ;;  %v16072_v0 = vld [vmem:[#allocation17 + $0x344] ss:$16 sps:$4 sm:$0xff]  }
 0xa89   : > { %12381 = vmatpush1.bf16.msra.mxu0 %v16007_v58  ;;  %v16067_v56 = vld [vmem:[#allocation17 + $0x140] ss:$16 sps:$4 sm:$0xff]  }
 0xa8a   : > { %12422 = vmatpush1.bf16.msra.mxu1 %v16010_v35  ;;  %12382 = vmatprep.subr.bf16.mxu0 %v16015_v55  ;;  %v16070_v58 = vld [vmem:[#allocation17 + $0x340] ss:$16 sps:$4 sm:$0xff]   ;;  %v16075_v35 = vld [vmem:[#allocation17 + $0x124] ss:$16 sps:$4 sm:$0xff]  }
 0xa8b   : > { %12423 = vmatprep.subr.bf16.mxu1 %v16018_v61  ;;  %v16078_v55 = vld [vmem:[#allocation17 + $0x324] ss:$16 sps:$4 sm:$0xff]   ;;  %v16073_v61 = vld [vmem:[#allocation17 + $0x120] ss:$16 sps:$4 sm:$0xff]  }
 0xa8d   : > { %12383 = vmatpush1.bf16.msra.mxu0 %v16013_v63  ;;  %v16076_v63 = vld [vmem:[#allocation17 + $0x320] ss:$16 sps:$4 sm:$0xff]  }
 0xa8e   : > { %12424 = vmatpush1.bf16.msra.mxu1 %v16016_v15  ;;  %12384 = vmatprep.subr.bf16.mxu0 %v16021_v1  ;;  %v16081_v15 = vld [vmem:[#allocation17 + $0x104] ss:$16 sps:$4 sm:$0xff]  }
 0xa8f   : > { %12425 = vmatprep.subr.bf16.mxu1 %v16024_v2  ;;  %v16084_v1 = vld [vmem:[#allocation17 + $0x304] ss:$16 sps:$4 sm:$0xff]   ;;  %v16079_v2 = vld [vmem:[#allocation17 + $0x100] ss:$16 sps:$4 sm:$0xff]  }
 0xa91   : > { %12385 = vmatpush1.bf16.msra.mxu0 %v16019_v3  ;;  %v9248_v3 = vmax.f32 %v17951_v47, 0.0  ;;  %v16088_v47 = vld [vmem:[#allocation17 + $0x6e0] ss:$16 sps:$4 sm:$0xff]  }
 0xa92   : > { %12426 = vmatpush1.bf16.msra.mxu1 %v16022_v14  ;;  %12386 = vmatprep.subr.bf16.mxu0 %v16027_v22  ;;  %v16082_v14 = vld [vmem:[#allocation17 + $0x300] ss:$16 sps:$4 sm:$0xff]   ;;  %v16087_v22 = vld [vmem:[#allocation17 + $0x4e4] ss:$16 sps:$4 sm:$0xff]  }
 0xa93   : > { %12427 = vmatprep.subr.bf16.mxu1 %v16030_v7  ;;  %v9250_v7 = vmax.f32 %v17963_v59, 0.0  ;;  %v16093_v59 = vld [vmem:[#allocation17 + $0x4c4] ss:$16 sps:$4 sm:$0xff]  }
 0xa95   : > { %12387 = vmatpush1.bf16.msra.mxu0 %v16025_v10  ;;  %v16090_v10 = vld [vmem:[#allocation17 + $0x6e4] ss:$16 sps:$4 sm:$0xff]  }
 0xa96   : > { %12428 = vmatpush1.bf16.msra.mxu1 %v16028_v20  ;;  %12388 = vmatprep.subr.bf16.mxu0 %v16033_v12  ;;  %v9253_v20 = vmax.f32 %v17978_v39, 0.0  ;;  %v9255_v12 = vmax.f32 %v17988_v57, 0.0  ;;  %v16096_v39 = vld [vmem:[#allocation17 + $0x6c4] ss:$16 sps:$4 sm:$0xff]  }
 0xa97   : > { %12429 = vmatprep.subr.bf16.mxu1 %v16036_v17  ;;  %v5995_v17 = vrot.slane %v17990_v11, %v17619_v51 }
 0xa98   : > { %v18023_v57 = vpack.c.bf16 %v9255_v12, %v9255_v12  ;;  %v16130_v12 = vld [vmem:[#allocation17 + $0x600] ss:$16 sps:$4 sm:$0xff]  }
 0xa99   : > { %12389 = vmatpush1.bf16.msra.mxu0 %v16031_v60  ;;  %v16085_v60 = vld [vmem:[#allocation17 + $0x4e0] ss:$16 sps:$4 sm:$0xff]  }
 0xa9a   : > { %12430 = vmatpush1.bf16.msra.mxu1 %v16034_v24  ;;  %12390 = vmatprep.subr.bf16.mxu0 %v16039_v19  ;;  %v18016_v24 = vpack.c.bf16 %v9248_v3, %v9248_v3  ;;  %v18018_v19 = vpack.c.bf16 %v9250_v7, %v9250_v7  ;;  %v16126_v3 = vld [vmem:[#allocation17 + $0x624] ss:$16 sps:$4 sm:$0xff]  }
 0xa9b   : > { %12431 = vmatprep.subr.bf16.mxu1 %v16042_v42  ;;  %v18020_v42 = vpack.c.bf16 %v9253_v20, %v9253_v20  ;;  %v16129_v7 = vld [vmem:[#allocation17 + $0x404] ss:$16 sps:$4 sm:$0xff]   ;;  %v16127_v20 = vld [vmem:[#allocation17 + $0x400] ss:$16 sps:$4 sm:$0xff]  }
 0xa9d   : > { %12391 = vmatpush2.bf16.msra.mxu0 %v16037_v29 }
 0xa9e   : > { %12432 = vmatpush2.bf16.msra.mxu1 %v16040_v30  ;;  %12392 = vmatprep.subr.bf16.mxu0 %v16045_v8 }
 0xa9f   : > { %12433 = vmatprep.subr.bf16.mxu1 %v16048_v62  ;;  %v16091_v62 = vld [vmem:[#allocation17 + $0x4c0] ss:$16 sps:$4 sm:$0xff]  }
 0xaa1   : > { %12393 = vmatpush2.bf16.msra.mxu0 %v16043_v32 }
 0xaa2   : > { %12434 = vmatpush2.bf16.msra.mxu1 %v16046_v34  ;;  %12394 = vmatprep.subr.bf16.mxu0 %v16051_v36  ;;  %v16094_v34 = vld [vmem:[#allocation17 + $0x6c0] ss:$16 sps:$4 sm:$0xff]   ;;  %v16099_v36 = vld [vmem:[#allocation17 + $0x4a4] ss:$16 sps:$4 sm:$0xff]  }
 0xaa3   : > { %12435 = vmatprep.subr.bf16.mxu1 %v16054_v37 }
 0xaa5   : > { %12395 = vmatpush2.bf16.msra.mxu0 %v16049_v38 }
 0xaa6   : > { %12436 = vmatpush2.bf16.msra.mxu1 %v16052_v9  ;;  %12396 = vmatprep.subr.bf16.mxu0 %v16057_v27  ;;  %v16102_v9 = vld [vmem:[#allocation17 + $0x6a4] ss:$16 sps:$4 sm:$0xff]  }
 0xaa7   : > { %12437 = vmatprep.subr.bf16.mxu1 %v16060_v13 }
 0xaa9   : > { %12397 = vmatpush2.bf16.msra.mxu0 %v16055_v45  ;;  %v16097_v45 = vld [vmem:[#allocation17 + $0x4a0] ss:$16 sps:$4 sm:$0xff]  }
 0xaaa   : > { %12438 = vmatpush2.bf16.msra.mxu1 %v16058_v50  ;;  %12398 = vmatprep.subr.bf16.mxu0 %v16063_v28  ;;  %v16100_v28 = vld [vmem:[#allocation17 + $0x6a0] ss:$16 sps:$4 sm:$0xff]  }
 0xaab   : > { %12439 = vmatprep.subr.bf16.mxu1 %v16066_v46  ;;  %v16105_v46 = vld [vmem:[#allocation17 + $0x484] ss:$16 sps:$4 sm:$0xff]  }
 0xaad   : > { %12399 = vmatpush2.bf16.msra.mxu0 %v16061_v41 }
 0xaae   : > { %12440 = vmatpush2.bf16.msra.mxu1 %v16064_v44  ;;  %12400 = vmatprep.subr.bf16.mxu0 %v16069_v53  ;;  %v16108_v44 = vld [vmem:[#allocation17 + $0x684] ss:$16 sps:$4 sm:$0xff]   ;;  %v16103_v53 = vld [vmem:[#allocation17 + $0x480] ss:$16 sps:$4 sm:$0xff]  }
 0xaaf   : > { %12441 = vmatprep.subr.bf16.mxu1 %v16072_v0  ;;  %v16106_v0 = vld [vmem:[#allocation17 + $0x680] ss:$16 sps:$4 sm:$0xff]  }
 0xab1   : > { %12401 = vmatpush2.bf16.msra.mxu0 %v16067_v56  ;;  %v16111_v56 = vld [vmem:[#allocation17 + $0x464] ss:$16 sps:$4 sm:$0xff]  }
 0xab2   : > { %12442 = vmatpush2.bf16.msra.mxu1 %v16070_v58  ;;  %12402 = vmatprep.subr.bf16.mxu0 %v16075_v35  ;;  %v16114_v58 = vld [vmem:[#allocation17 + $0x664] ss:$16 sps:$4 sm:$0xff]   ;;  %v16109_v35 = vld [vmem:[#allocation17 + $0x460] ss:$16 sps:$4 sm:$0xff]  }
 0xab3   : > { %12443 = vmatprep.subr.bf16.mxu1 %v16078_v55  ;;  %v16112_v55 = vld [vmem:[#allocation17 + $0x660] ss:$16 sps:$4 sm:$0xff]  }
 0xab5   : > { %12403 = vmatpush2.bf16.msra.mxu0 %v16073_v61  ;;  %v16117_v61 = vld [vmem:[#allocation17 + $0x444] ss:$16 sps:$4 sm:$0xff]  }
 0xab6   : > { %12444 = vmatpush2.bf16.msra.mxu1 %v16076_v63  ;;  %12404 = vmatprep.subr.bf16.mxu0 %v16081_v15  ;;  %v16120_v63 = vld [vmem:[#allocation17 + $0x644] ss:$16 sps:$4 sm:$0xff]   ;;  %v16115_v15 = vld [vmem:[#allocation17 + $0x440] ss:$16 sps:$4 sm:$0xff]  }
 0xab7   : > { %12445 = vmatprep.subr.bf16.mxu1 %v16084_v1  ;;  %v16118_v1 = vld [vmem:[#allocation17 + $0x640] ss:$16 sps:$4 sm:$0xff]  }
 0xab9   : > { %12405 = vmatpush2.bf16.msra.mxu0 %v16079_v2  ;;  %v16123_v2 = vld [vmem:[#allocation17 + $0x424] ss:$16 sps:$4 sm:$0xff]  }
 0xaba   : > { %12446 = vmatpush2.bf16.msra.mxu1 %v16082_v14  ;;  %12456 = vmatprep.subr.bf16.mxu0 %v16087_v22  ;;  %v16121_v14 = vld [vmem:[#allocation17 + $0x420] ss:$16 sps:$4 sm:$0xff]  }
 0xabb   : > { %12497 = vmatprep.subr.bf16.mxu1 %v16090_v10  ;;  %v16124_v22 = vld [vmem:[#allocation17 + $0x620] ss:$16 sps:$4 sm:$0xff]   ;;  %v16132_v10 = vld [vmem:[#allocation17 + $0x604] ss:$16 sps:$4 sm:$0xff]  }
 0xabc   : > { %v9036_v29 = vpop.f32.mrf.mxu0  ;;  %12407 = vmatmul.mubr.bf16.vlgmr.msra.gmra.mxu0 %v18016_v24 }
 0xabd   : > { %v9037_v30 = vadd.f32 %v9036_v29, %v5995_v17  ;;  %v9077_v8 = vpop.f32.mrf.mxu1  ;;  %12448 = vmatmul.mubr.bf16.vlgmr.msra.gmra.mxu1 %v18018_v19  ;;  %12457 = vmatpush1.bf16.msra.mxu0 %v16085_v60  ;;  %v16135_v17 = vld [vmem:[#allocation17 + $0x5e4] ss:$16 sps:$4 sm:$0xff]  }
 0xabe   : > { %12488 = vmatprep.mubr.bf16.mxu0 %v18020_v42  ;;  %12498 = vmatpush1.bf16.msra.mxu1 %v16088_v47  ;;  %v18027_v32 = vpop.f32.mrf.mxu0  ;;  %v16138_v60 = vld [vmem:[#allocation17 + $0x7e4] ss:$16 sps:$4 sm:$0xff]   ;;  %v16133_v47 = vld [vmem:[#allocation17 + $0x5e0] ss:$16 sps:$4 sm:$0xff]  }
 0xabf   : > { %v18029_v37 = vadd.f32 %v9077_v8, %v9037_v30  ;;  %12529 = vmatprep.mubr.bf16.mxu1 %v18023_v57  ;;  %v18032_v38 = vpop.f32.mrf.mxu1  ;;  %12458 = vmatprep.subr.bf16.mxu0 %v16093_v59  ;;  %v16136_v59 = vld [vmem:[#allocation17 + $0x7e0] ss:$16 sps:$4 sm:$0xff]   ;;  %v16141_v29 = vld [vmem:[#allocation17 + $0x5c4] ss:$16 sps:$4 sm:$0xff]  }
 0xac0   : > { %v9040_v27 = vpop.f32.mrf.mxu0  ;;  %12499 = vmatprep.subr.bf16.mxu1 %v16096_v39  ;;  %v16144_v39 = vld [vmem:[#allocation17 + $0x7c4] ss:$16 sps:$4 sm:$0xff]   ;;  %v16139_v30 = vld [vmem:[#allocation17 + $0x5c0] ss:$16 sps:$4 sm:$0xff]  }
 0xac1   : > { %v9081_v13 = vpop.f32.mrf.mxu1  ;;  %12459 = vmatpush1.bf16.msra.mxu0 %v16091_v62  ;;  %v16142_v8 = vld [vmem:[#allocation17 + $0x7c0] ss:$16 sps:$4 sm:$0xff]   ;;  %v16147_v62 = vld [vmem:[#allocation17 + $0x5a4] ss:$16 sps:$4 sm:$0xff]  }
 0xac2   : > { %12500 = vmatpush1.bf16.msra.mxu1 %v16094_v34  ;;  %v9041_v50 = vpop.f32.mrf.mxu0  ;;  %12460 = vmatprep.subr.bf16.mxu0 %v16099_v36  ;;  %v16150_v34 = vld [vmem:[#allocation17 + $0x7a4] ss:$16 sps:$4 sm:$0xff]   ;;  %v16145_v36 = vld [vmem:[#allocation17 + $0x5a0] ss:$16 sps:$4 sm:$0xff]  }
 0xac3   : > { %v9082_v41 = vpop.f32.mrf.mxu1  ;;  %12501 = vmatprep.subr.bf16.mxu1 %v16102_v9  ;;  %v16148_v9 = vld [vmem:[#allocation17 + $0x7a0] ss:$16 sps:$4 sm:$0xff]   ;;  %v16153_v27 = vld [vmem:[#allocation17 + $0x584] ss:$16 sps:$4 sm:$0xff]  }
 0xac4   : > { %v16156_v13 = vld [vmem:[#allocation17 + $0x784] ss:$16 sps:$4 sm:$0xff]   ;;  %v16154_v50 = vld [vmem:[#allocation17 + $0x780] ss:$16 sps:$4 sm:$0xff]  }
 0xac5   : > { %12461 = vmatpush1.bf16.msra.mxu0 %v16097_v45  ;;  %v16151_v45 = vld [vmem:[#allocation17 + $0x580] ss:$16 sps:$4 sm:$0xff]  }
 0xac6   : > { %12502 = vmatpush1.bf16.msra.mxu1 %v16100_v28  ;;  %12462 = vmatprep.subr.bf16.mxu0 %v16105_v46  ;;  %v16159_v28 = vld [vmem:[#allocation17 + $0x564] ss:$16 sps:$4 sm:$0xff]   ;;  %v16157_v41 = vld [vmem:[#allocation17 + $0x560] ss:$16 sps:$4 sm:$0xff]  }
 0xac7   : > { %12503 = vmatprep.subr.bf16.mxu1 %v16108_v44  ;;  %v16162_v46 = vld [vmem:[#allocation17 + $0x764] ss:$16 sps:$4 sm:$0xff]   ;;  %v16160_v44 = vld [vmem:[#allocation17 + $0x760] ss:$16 sps:$4 sm:$0xff]  }
 0xac9   : > { %12463 = vmatpush1.bf16.msra.mxu0 %v16103_v53  ;;  %v16165_v53 = vld [vmem:[#allocation17 + $0x544] ss:$16 sps:$4 sm:$0xff]  }
 0xaca   : > { %12504 = vmatpush1.bf16.msra.mxu1 %v16106_v0  ;;  %12464 = vmatprep.subr.bf16.mxu0 %v16111_v56  ;;  %v16168_v0 = vld [vmem:[#allocation17 + $0x744] ss:$16 sps:$4 sm:$0xff]   ;;  %v5999_v56 = vrot.slane %v17990_v11, %v17622_v54 }
 0xacb   : > { %12505 = vmatprep.subr.bf16.mxu1 %v16114_v58  ;;  %v16163_v58 = vld [vmem:[#allocation17 + $0x540] ss:$16 sps:$4 sm:$0xff]  }
 0xacd   : > { %12465 = vmatpush1.bf16.msra.mxu0 %v16109_v35  ;;  %v16166_v35 = vld [vmem:[#allocation17 + $0x740] ss:$16 sps:$4 sm:$0xff]  }
 0xace   : > { %12506 = vmatpush1.bf16.msra.mxu1 %v16112_v55  ;;  %12466 = vmatprep.subr.bf16.mxu0 %v16117_v61  ;;  %v16171_v55 = vld [vmem:[#allocation17 + $0x524] ss:$16 sps:$4 sm:$0xff]  }
 0xacf   : > { %12507 = vmatprep.subr.bf16.mxu1 %v16120_v63  ;;  %v16174_v61 = vld [vmem:[#allocation17 + $0x724] ss:$16 sps:$4 sm:$0xff]   ;;  %v9039_v63 = vadd.f32 %v18027_v32, %v5999_v56  ;;  %v9254_v32 = vmax.f32 %v17985_v33, 0.0 }
 0xad1   : > { %12467 = vmatpush1.bf16.msra.mxu0 %v16115_v15  ;;  %v16169_v15 = vld [vmem:[#allocation17 + $0x520] ss:$16 sps:$4 sm:$0xff]  }
 0xad2   : > { %12508 = vmatpush1.bf16.msra.mxu1 %v16118_v1  ;;  %12468 = vmatprep.subr.bf16.mxu0 %v16123_v2  ;;  %v16172_v1 = vld [vmem:[#allocation17 + $0x720] ss:$16 sps:$4 sm:$0xff]   ;;  %v16177_v2 = vld [vmem:[#allocation17 + $0x504] ss:$16 sps:$4 sm:$0xff]  }
 0xad3   : > { %12509 = vmatprep.subr.bf16.mxu1 %v16126_v3  ;;  %v16180_v3 = vld [vmem:[#allocation17 + $0x704] ss:$16 sps:$4 sm:$0xff]  }
 0xad5   : > { %12469 = vmatpush1.bf16.msra.mxu0 %v16121_v14  ;;  %v9080_v14 = vadd.f32 %v18032_v38, %v9039_v63  ;;  %v16181_v38 = vld [vmem:[#allocation17 + $0x8e0] ss:$16 sps:$4 sm:$0xff]   ;;  %v16210_v63 = vld [vmem:[#allocation17 + $0xa64] ss:$16 sps:$4 sm:$0xff]  }
 0xad6   : > { %12510 = vmatpush1.bf16.msra.mxu1 %v16124_v22  ;;  %12470 = vmatprep.subr.bf16.mxu0 %v16129_v7  ;;  %v16175_v22 = vld [vmem:[#allocation17 + $0x500] ss:$16 sps:$4 sm:$0xff]   ;;  %v9252_v7 = vmax.f32 %v17975_v6, 0.0 }
 0xad7   : > { %12511 = vmatprep.subr.bf16.mxu1 %v16132_v10  ;;  %v16178_v10 = vld [vmem:[#allocation17 + $0x700] ss:$16 sps:$4 sm:$0xff]  }
 0xad8   : > { %v16184_v6 = vld [vmem:[#allocation17 + $0xae0] ss:$16 sps:$4 sm:$0xff]  }
 0xad9   : > { %12471 = vmatpush1.bf16.msra.mxu0 %v16127_v20  ;;  %v16183_v20 = vld [vmem:[#allocation17 + $0x8e4] ss:$16 sps:$4 sm:$0xff]  }
 0xada   : > { %12512 = vmatpush1.bf16.msra.mxu1 %v16130_v12  ;;  %12472 = vmatprep.subr.bf16.mxu0 %v16135_v17  ;;  %v16186_v12 = vld [vmem:[#allocation17 + $0xae4] ss:$16 sps:$4 sm:$0xff]   ;;  %v9257_v17 = vmax.f32 %v18008_v48, 0.0 }
 0xadb   : > { %12513 = vmatprep.subr.bf16.mxu1 %v16138_v60  ;;  %v9259_v60 = vmax.f32 %v9080_v14, 0.0  ;;  %v16192_v48 = vld [vmem:[#allocation17 + $0xac4] ss:$16 sps:$4 sm:$0xff]   ;;  %v16211_v14 = vld [vmem:[#allocation17 + $0x840] ss:$16 sps:$4 sm:$0xff]  }
 0xadc   : > { %v18047_v33 = vpack.c.bf16 %v9257_v17, %v9257_v17  ;;  %v16228_v17 = vld [vmem:[#allocation17 + $0xa04] ss:$16 sps:$4 sm:$0xff]  }
 0xadd   : > { %12473 = vmatpush2.bf16.msra.mxu0 %v16133_v47  ;;  %v6003_v47 = vrot.slane %v17990_v11, %v17637_v49 }
 0xade   : > { %12514 = vmatpush2.bf16.msra.mxu1 %v16136_v59  ;;  %12474 = vmatprep.subr.bf16.mxu0 %v16141_v29  ;;  %v18043_v59 = vpack.c.bf16 %v9252_v7, %v9252_v7  ;;  %v18045_v29 = vpack.c.bf16 %v9254_v32, %v9254_v32  ;;  %v16219_v7 = vld [vmem:[#allocation17 + $0x824] ss:$16 sps:$4 sm:$0xff]   ;;  %v16220_v32 = vld [vmem:[#allocation17 + $0xa20] ss:$16 sps:$4 sm:$0xff]  }
 0xadf   : > { %12515 = vmatprep.subr.bf16.mxu1 %v16144_v39  ;;  %v16189_v39 = vld [vmem:[#allocation17 + $0x8c4] ss:$16 sps:$4 sm:$0xff]  }
 0xae1   : > { %12475 = vmatpush2.bf16.msra.mxu0 %v16139_v30 }
 0xae2   : > { %12516 = vmatpush2.bf16.msra.mxu1 %v16142_v8  ;;  %12476 = vmatprep.subr.bf16.mxu0 %v16147_v62  ;;  %v18050_v8 = vpack.c.bf16 %v9259_v60, %v9259_v60  ;;  %v16223_v60 = vld [vmem:[#allocation17 + $0x800] ss:$16 sps:$4 sm:$0xff]  }
 0xae3   : > { %12517 = vmatprep.subr.bf16.mxu1 %v16150_v34  ;;  %v16187_v34 = vld [vmem:[#allocation17 + $0x8c0] ss:$16 sps:$4 sm:$0xff]  }
 0xae5   : > { %12477 = vmatpush2.bf16.msra.mxu0 %v16145_v36 }
 0xae6   : > { %12518 = vmatpush2.bf16.msra.mxu1 %v16148_v9  ;;  %12478 = vmatprep.subr.bf16.mxu0 %v16153_v27  ;;  %v16190_v9 = vld [vmem:[#allocation17 + $0xac0] ss:$16 sps:$4 sm:$0xff]   ;;  %v16195_v27 = vld [vmem:[#allocation17 + $0x8a4] ss:$16 sps:$4 sm:$0xff]  }
 0xae7   : > { %12519 = vmatprep.subr.bf16.mxu1 %v16156_v13 }
 0xae9   : > { %12479 = vmatpush2.bf16.msra.mxu0 %v16151_v45 }
 0xaea   : > { %12520 = vmatpush2.bf16.msra.mxu1 %v16154_v50  ;;  %12480 = vmatprep.subr.bf16.mxu0 %v16159_v28  ;;  %v16198_v50 = vld [vmem:[#allocation17 + $0xaa4] ss:$16 sps:$4 sm:$0xff]  }
 0xaeb   : > { %12521 = vmatprep.subr.bf16.mxu1 %v16162_v46 }
 0xaed   : > { %12481 = vmatpush2.bf16.msra.mxu0 %v16157_v41  ;;  %v16193_v41 = vld [vmem:[#allocation17 + $0x8a0] ss:$16 sps:$4 sm:$0xff]  }
 0xaee   : > { %12522 = vmatpush2.bf16.msra.mxu1 %v16160_v44  ;;  %12482 = vmatprep.subr.bf16.mxu0 %v16165_v53  ;;  %v16196_v53 = vld [vmem:[#allocation17 + $0xaa0] ss:$16 sps:$4 sm:$0xff]  }
 0xaef   : > { %12523 = vmatprep.subr.bf16.mxu1 %v16168_v0  ;;  %v16201_v0 = vld [vmem:[#allocation17 + $0x884] ss:$16 sps:$4 sm:$0xff]  }
 0xaf1   : > { %12483 = vmatpush2.bf16.msra.mxu0 %v16163_v58  ;;  %v16204_v58 = vld [vmem:[#allocation17 + $0xa84] ss:$16 sps:$4 sm:$0xff]  }
 0xaf2   : > { %12524 = vmatpush2.bf16.msra.mxu1 %v16166_v35  ;;  %12484 = vmatprep.subr.bf16.mxu0 %v16171_v55  ;;  %v16199_v35 = vld [vmem:[#allocation17 + $0x880] ss:$16 sps:$4 sm:$0xff]  }
 0xaf3   : > { %12525 = vmatprep.subr.bf16.mxu1 %v16174_v61  ;;  %v16202_v55 = vld [vmem:[#allocation17 + $0xa80] ss:$16 sps:$4 sm:$0xff]   ;;  %v16207_v61 = vld [vmem:[#allocation17 + $0x864] ss:$16 sps:$4 sm:$0xff]  }
 0xaf5   : > { %12485 = vmatpush2.bf16.msra.mxu0 %v16169_v15  ;;  %v16205_v15 = vld [vmem:[#allocation17 + $0x860] ss:$16 sps:$4 sm:$0xff]  }
 0xaf6   : > { %12526 = vmatpush2.bf16.msra.mxu1 %v16172_v1  ;;  %12486 = vmatprep.subr.bf16.mxu0 %v16177_v2  ;;  %v16208_v1 = vld [vmem:[#allocation17 + $0xa60] ss:$16 sps:$4 sm:$0xff]   ;;  %v16213_v2 = vld [vmem:[#allocation17 + $0x844] ss:$16 sps:$4 sm:$0xff]  }
 0xaf7   : > { %12527 = vmatprep.subr.bf16.mxu1 %v16180_v3  ;;  %v16216_v3 = vld [vmem:[#allocation17 + $0xa44] ss:$16 sps:$4 sm:$0xff]  }
 0xaf9   : > { %12487 = vmatpush2.bf16.msra.mxu0 %v16175_v22  ;;  %v16214_v22 = vld [vmem:[#allocation17 + $0xa40] ss:$16 sps:$4 sm:$0xff]  }
 0xafa   : > { %12528 = vmatpush2.bf16.msra.mxu1 %v16178_v10  ;;  %12538 = vmatprep.subr.bf16.mxu0 %v16183_v20  ;;  %v16222_v10 = vld [vmem:[#allocation17 + $0xa24] ss:$16 sps:$4 sm:$0xff]   ;;  %v16217_v20 = vld [vmem:[#allocation17 + $0x820] ss:$16 sps:$4 sm:$0xff]  }
 0xafb   : > { %12579 = vmatprep.subr.bf16.mxu1 %v16186_v12  ;;  %v16225_v12 = vld [vmem:[#allocation17 + $0x804] ss:$16 sps:$4 sm:$0xff]  }
 0xafc   : > { %v9118_v30 = vpop.f32.mrf.mxu0  ;;  %12489 = vmatmul.mubr.bf16.vlgmr.msra.gmra.mxu0 %v18043_v59 }
 0xafd   : > { %v9119_v62 = vadd.f32 %v9118_v30, %v6003_v47  ;;  %v9159_v49 = vpop.f32.mrf.mxu1  ;;  %12530 = vmatmul.mubr.bf16.vlgmr.msra.gmra.mxu1 %v18045_v29  ;;  %12539 = vmatpush1.bf16.msra.mxu0 %v16181_v38  ;;  %v16226_v47 = vld [vmem:[#allocation17 + $0xa00] ss:$16 sps:$4 sm:$0xff]   ;;  %v16231_v38 = vld [vmem:[#allocation17 + $0x9e4] ss:$16 sps:$4 sm:$0xff]  }
 0xafe   : > { %12570 = vmatprep.mubr.bf16.mxu0 %v18047_v33  ;;  %12580 = vmatpush1.bf16.msra.mxu1 %v16184_v6  ;;  %v18054_v36 = vpop.f32.mrf.mxu0  ;;  %v16234_v6 = vld [vmem:[#allocation17 + $0xbe4] ss:$16 sps:$4 sm:$0xff]   ;;  %v16232_v30 = vld [vmem:[#allocation17 + $0xbe0] ss:$16 sps:$4 sm:$0xff]  }
 0xaff   : > { %v18056_v13 = vadd.f32 %v9159_v49, %v9119_v62  ;;  %12611 = vmatprep.mubr.bf16.mxu1 %v18050_v8  ;;  %v18059_v45 = vpop.f32.mrf.mxu1  ;;  %12540 = vmatprep.subr.bf16.mxu0 %v16189_v39  ;;  %v16229_v39 = vld [vmem:[#allocation17 + $0x9e0] ss:$16 sps:$4 sm:$0xff]   ;;  %v16240_v62 = vld [vmem:[#allocation17 + $0xbc4] ss:$16 sps:$4 sm:$0xff]  }
 0xb00   : > { %v9122_v28 = vpop.f32.mrf.mxu0  ;;  %12581 = vmatprep.subr.bf16.mxu1 %v16192_v48  ;;  %v16237_v48 = vld [vmem:[#allocation17 + $0x9c4] ss:$16 sps:$4 sm:$0xff]   ;;  %v16235_v49 = vld [vmem:[#allocation17 + $0x9c0] ss:$16 sps:$4 sm:$0xff]  }
 0xb01   : > { %v9163_v46 = vpop.f32.mrf.mxu1  ;;  %12541 = vmatpush1.bf16.msra.mxu0 %v16187_v34  ;;  %v16238_v34 = vld [vmem:[#allocation17 + $0xbc0] ss:$16 sps:$4 sm:$0xff]  }
 0xb02   : > { %12582 = vmatpush1.bf16.msra.mxu1 %v16190_v9  ;;  %v9123_v44 = vpop.f32.mrf.mxu0  ;;  %12542 = vmatprep.subr.bf16.mxu0 %v16195_v27  ;;  %v16243_v9 = vld [vmem:[#allocation17 + $0x9a4] ss:$16 sps:$4 sm:$0xff]   ;;  %v16244_v28 = vld [vmem:[#allocation17 + $0xba0] ss:$16 sps:$4 sm:$0xff]  }
 0xb03   : > { %v9164_v56 = vpop.f32.mrf.mxu1  ;;  %12583 = vmatprep.subr.bf16.mxu1 %v16198_v50  ;;  %v16246_v27 = vld [vmem:[#allocation17 + $0xba4] ss:$16 sps:$4 sm:$0xff]   ;;  %v16241_v50 = vld [vmem:[#allocation17 + $0x9a0] ss:$16 sps:$4 sm:$0xff]  }
 0xb04   : > { %v16249_v46 = vld [vmem:[#allocation17 + $0x984] ss:$16 sps:$4 sm:$0xff]   ;;  %v16247_v44 = vld [vmem:[#allocation17 + $0x980] ss:$16 sps:$4 sm:$0xff]  }
 0xb05   : > { %12543 = vmatpush1.bf16.msra.mxu0 %v16193_v41  ;;  %v16252_v41 = vld [vmem:[#allocation17 + $0xb84] ss:$16 sps:$4 sm:$0xff]  }
 0xb06   : > { %12584 = vmatpush1.bf16.msra.mxu1 %v16196_v53  ;;  %12544 = vmatprep.subr.bf16.mxu0 %v16201_v0  ;;  %v16250_v53 = vld [vmem:[#allocation17 + $0xb80] ss:$16 sps:$4 sm:$0xff]   ;;  %v16255_v0 = vld [vmem:[#allocation17 + $0x964] ss:$16 sps:$4 sm:$0xff]  }
 0xb07   : > { %12585 = vmatprep.subr.bf16.mxu1 %v16204_v58  ;;  %v16258_v56 = vld [vmem:[#allocation17 + $0xb64] ss:$16 sps:$4 sm:$0xff]   ;;  %v16253_v58 = vld [vmem:[#allocation17 + $0x960] ss:$16 sps:$4 sm:$0xff]  }
 0xb09   : > { %12545 = vmatpush1.bf16.msra.mxu0 %v16199_v35  ;;  %v16256_v35 = vld [vmem:[#allocation17 + $0xb60] ss:$16 sps:$4 sm:$0xff]  }
 0xb0a   : > { %12586 = vmatpush1.bf16.msra.mxu1 %v16202_v55  ;;  %12546 = vmatprep.subr.bf16.mxu0 %v16207_v61  ;;  %v16261_v55 = vld [vmem:[#allocation17 + $0x944] ss:$16 sps:$4 sm:$0xff]  }
 0xb0b   : > { %12587 = vmatprep.subr.bf16.mxu1 %v16210_v63  ;;  %v16264_v61 = vld [vmem:[#allocation17 + $0xb44] ss:$16 sps:$4 sm:$0xff]   ;;  %v6007_v63 = vrot.slane %v17990_v11, %v17640_v16 }
 0xb0d   : > { %12547 = vmatpush1.bf16.msra.mxu0 %v16205_v15  ;;  %v16259_v15 = vld [vmem:[#allocation17 + $0x940] ss:$16 sps:$4 sm:$0xff]  }
 0xb0e   : > { %12588 = vmatpush1.bf16.msra.mxu1 %v16208_v1  ;;  %12548 = vmatprep.subr.bf16.mxu0 %v16213_v2  ;;  %v16262_v1 = vld [vmem:[#allocation17 + $0xb40] ss:$16 sps:$4 sm:$0xff]   ;;  %v16267_v2 = vld [vmem:[#allocation17 + $0x924] ss:$16 sps:$4 sm:$0xff]  }
 0xb0f   : > { %12589 = vmatprep.subr.bf16.mxu1 %v16216_v3  ;;  %v16270_v3 = vld [vmem:[#allocation17 + $0xb24] ss:$16 sps:$4 sm:$0xff]  }
 0xb11   : > { %12549 = vmatpush1.bf16.msra.mxu0 %v16211_v14  ;;  %v9121_v14 = vadd.f32 %v18054_v36, %v6007_v63  ;;  %v9258_v36 = vmax.f32 %v18029_v37, 0.0  ;;  %v16300_v63 = vld [vmem:[#allocation17 + $0xe84] ss:$16 sps:$4 sm:$0xff]  }
 0xb12   : > { %12590 = vmatpush1.bf16.msra.mxu1 %v16214_v22  ;;  %12550 = vmatprep.subr.bf16.mxu0 %v16219_v7  ;;  %v16265_v22 = vld [vmem:[#allocation17 + $0x920] ss:$16 sps:$4 sm:$0xff]  }
 0xb13   : > { %12591 = vmatprep.subr.bf16.mxu1 %v16222_v10  ;;  %v16268_v7 = vld [vmem:[#allocation17 + $0xb20] ss:$16 sps:$4 sm:$0xff]   ;;  %v16273_v10 = vld [vmem:[#allocation17 + $0x904] ss:$16 sps:$4 sm:$0xff]   ;;  %v9162_v16 = vadd.f32 %v18059_v45, %v9121_v14 }
 0xb14   : > { %v16280_v45 = vld [vmem:[#allocation17 + $0xee0] ss:$16 sps:$4 sm:$0xff]   ;;  %v16306_v14 = vld [vmem:[#allocation17 + $0xe64] ss:$16 sps:$4 sm:$0xff]  }
 0xb15   : > { %12551 = vmatpush1.bf16.msra.mxu0 %v16217_v20  ;;  %v16276_v20 = vld [vmem:[#allocation17 + $0xb04] ss:$16 sps:$4 sm:$0xff]  }
 0xb16   : > { %12592 = vmatpush1.bf16.msra.mxu1 %v16220_v32  ;;  %12552 = vmatprep.subr.bf16.mxu0 %v16225_v12  ;;  %v16271_v32 = vld [vmem:[#allocation17 + $0x900] ss:$16 sps:$4 sm:$0xff]   ;;  %v9256_v12 = vmax.f32 %v18005_v40, 0.0  ;;  %v6015_v40 = vrot.slane %v17990_v11, %v17680_v43  ;;  %v16291_v43 = vld [vmem:[#allocation17 + $0xca4] ss:$16 sps:$4 sm:$0xff]  }
 0xb17   : > { %12593 = vmatprep.subr.bf16.mxu1 %v16228_v17  ;;  %v16274_v17 = vld [vmem:[#allocation17 + $0xb00] ss:$16 sps:$4 sm:$0xff]  }
 0xb19   : > { %12553 = vmatpush1.bf16.msra.mxu0 %v16223_v60  ;;  %v16279_v60 = vld [vmem:[#allocation17 + $0xce4] ss:$16 sps:$4 sm:$0xff]  }
 0xb1a   : > { %12594 = vmatpush1.bf16.msra.mxu1 %v16226_v47  ;;  %12554 = vmatprep.subr.bf16.mxu0 %v16231_v38  ;;  %v16282_v47 = vld [vmem:[#allocation17 + $0xee4] ss:$16 sps:$4 sm:$0xff]   ;;  %v9261_v38 = vmax.f32 %v9162_v16, 0.0  ;;  %v16307_v16 = vld [vmem:[#allocation17 + $0xc40] ss:$16 sps:$4 sm:$0xff]  }
 0xb1b   : > { %12595 = vmatprep.subr.bf16.mxu1 %v16234_v6  ;;  %v16277_v6 = vld [vmem:[#allocation17 + $0xce0] ss:$16 sps:$4 sm:$0xff]  }
 0xb1d   : > { %12555 = vmatpush2.bf16.msra.mxu0 %v16229_v39  ;;  %v18067_v39 = vpack.c.bf16 %v9256_v12, %v9256_v12  ;;  %v16315_v12 = vld [vmem:[#allocation17 + $0xc24] ss:$16 sps:$4 sm:$0xff]  }
 0xb1e   : > { %12596 = vmatpush2.bf16.msra.mxu1 %v16232_v30  ;;  %12556 = vmatprep.subr.bf16.mxu0 %v16237_v48  ;;  %v18069_v30 = vpack.c.bf16 %v9258_v36, %v9258_v36  ;;  %v16285_v48 = vld [vmem:[#allocation17 + $0xcc4] ss:$16 sps:$4 sm:$0xff]   ;;  %v16316_v36 = vld [vmem:[#allocation17 + $0xe20] ss:$16 sps:$4 sm:$0xff]  }
 0xb1f   : > { %12597 = vmatprep.subr.bf16.mxu1 %v16240_v62  ;;  %v16288_v62 = vld [vmem:[#allocation17 + $0xec4] ss:$16 sps:$4 sm:$0xff]  }
 0xb21   : > { %12557 = vmatpush2.bf16.msra.mxu0 %v16235_v49  ;;  %v18073_v49 = vpack.c.bf16 %v9261_v38, %v9261_v38  ;;  %v16324_v38 = vld [vmem:[#allocation17 + $0xe04] ss:$16 sps:$4 sm:$0xff]  }
 0xb22   : > { %12598 = vmatpush2.bf16.msra.mxu1 %v16238_v34  ;;  %12558 = vmatprep.subr.bf16.mxu0 %v16243_v9  ;;  %v16283_v9 = vld [vmem:[#allocation17 + $0xcc0] ss:$16 sps:$4 sm:$0xff]  }
 0xb23   : > { %12599 = vmatprep.subr.bf16.mxu1 %v16246_v27 }
 0xb25   : > { %12559 = vmatpush2.bf16.msra.mxu0 %v16241_v50  ;;  %v16286_v50 = vld [vmem:[#allocation17 + $0xec0] ss:$16 sps:$4 sm:$0xff]  }
 0xb26   : > { %12600 = vmatpush2.bf16.msra.mxu1 %v16244_v28  ;;  %12560 = vmatprep.subr.bf16.mxu0 %v16249_v46  ;;  %v16294_v46 = vld [vmem:[#allocation17 + $0xea4] ss:$16 sps:$4 sm:$0xff]  }
 0xb27   : > { %12601 = vmatprep.subr.bf16.mxu1 %v16252_v41 }
 0xb29   : > { %12561 = vmatpush2.bf16.msra.mxu0 %v16247_v44 }
 0xb2a   : > { %12602 = vmatpush2.bf16.msra.mxu1 %v16250_v53  ;;  %12562 = vmatprep.subr.bf16.mxu0 %v16255_v0  ;;  %v16289_v0 = vld [vmem:[#allocation17 + $0xca0] ss:$16 sps:$4 sm:$0xff]  }
 0xb2b   : > { %12603 = vmatprep.subr.bf16.mxu1 %v16258_v56 }
 0xb2d   : > { %12563 = vmatpush2.bf16.msra.mxu0 %v16253_v58  ;;  %v16292_v58 = vld [vmem:[#allocation17 + $0xea0] ss:$16 sps:$4 sm:$0xff]  }
 0xb2e   : > { %12604 = vmatpush2.bf16.msra.mxu1 %v16256_v35  ;;  %12564 = vmatprep.subr.bf16.mxu0 %v16261_v55  ;;  %v16297_v35 = vld [vmem:[#allocation17 + $0xc84] ss:$16 sps:$4 sm:$0xff]  }
 0xb2f   : > { %12605 = vmatprep.subr.bf16.mxu1 %v16264_v61 }
 0xb31   : > { %12565 = vmatpush2.bf16.msra.mxu0 %v16259_v15 }
 0xb32   : > { %12606 = vmatpush2.bf16.msra.mxu1 %v16262_v1  ;;  %12566 = vmatprep.subr.bf16.mxu0 %v16267_v2  ;;  %v16295_v1 = vld [vmem:[#allocation17 + $0xc80] ss:$16 sps:$4 sm:$0xff]  }
 0xb33   : > { %12607 = vmatprep.subr.bf16.mxu1 %v16270_v3  ;;  %v16298_v2 = vld [vmem:[#allocation17 + $0xe80] ss:$16 sps:$4 sm:$0xff]   ;;  %v16303_v3 = vld [vmem:[#allocation17 + $0xc64] ss:$16 sps:$4 sm:$0xff]  }
 0xb35   : > { %12567 = vmatpush2.bf16.msra.mxu0 %v16265_v22  ;;  %v16301_v22 = vld [vmem:[#allocation17 + $0xc60] ss:$16 sps:$4 sm:$0xff]  }
 0xb36   : > { %12608 = vmatpush2.bf16.msra.mxu1 %v16268_v7  ;;  %12568 = vmatprep.subr.bf16.mxu0 %v16273_v10  ;;  %v16304_v7 = vld [vmem:[#allocation17 + $0xe60] ss:$16 sps:$4 sm:$0xff]   ;;  %v16309_v10 = vld [vmem:[#allocation17 + $0xc44] ss:$16 sps:$4 sm:$0xff]  }
 0xb37   : > { %12609 = vmatprep.subr.bf16.mxu1 %v16276_v20  ;;  %v16312_v20 = vld [vmem:[#allocation17 + $0xe44] ss:$16 sps:$4 sm:$0xff]  }
 0xb39   : > { %12569 = vmatpush2.bf16.msra.mxu0 %v16271_v32  ;;  %v16310_v32 = vld [vmem:[#allocation17 + $0xe40] ss:$16 sps:$4 sm:$0xff]  }
 0xb3a   : > { %12610 = vmatpush2.bf16.msra.mxu1 %v16274_v17  ;;  %12620 = vmatprep.subr.bf16.mxu0 %v16279_v60  ;;  %v16318_v17 = vld [vmem:[#allocation17 + $0xe24] ss:$16 sps:$4 sm:$0xff]   ;;  %v16313_v60 = vld [vmem:[#allocation17 + $0xc20] ss:$16 sps:$4 sm:$0xff]  }
 0xb3b   : > { %12661 = vmatprep.subr.bf16.mxu1 %v16282_v47  ;;  %v16321_v47 = vld [vmem:[#allocation17 + $0xc04] ss:$16 sps:$4 sm:$0xff]  }
 0xb3c   : > { %v18075_v37 = vpop.f32.mrf.mxu0  ;;  %12571 = vmatmul.mubr.bf16.vlgmr.msra.gmra.mxu0 %v18067_v39 }
 0xb3d   : > { %v18078_v34 = vpop.f32.mrf.mxu1  ;;  %12612 = vmatmul.mubr.bf16.vlgmr.msra.gmra.mxu1 %v18069_v30  ;;  %12621 = vmatpush1.bf16.msra.mxu0 %v16277_v6  ;;  %v16319_v6 = vld [vmem:[#allocation17 + $0xc00] ss:$16 sps:$4 sm:$0xff]  }
 0xb3e   : > { %12652 = vmatprep.mubr.bf16.mxu0 %v18073_v49  ;;  %12662 = vmatpush1.bf16.msra.mxu1 %v16280_v45  ;;  %v9202_v27 = vpop.f32.mrf.mxu0  ;;  %v16322_v45 = vld [vmem:[#allocation17 + $0xe00] ss:$16 sps:$4 sm:$0xff]  }
 0xb3f   : > { %v9203_v11 = vadd.f32 %v9202_v27, %v6015_v40  ;;  %v9243_v28 = vpop.f32.mrf.mxu1  ;;  %12622 = vmatprep.subr.bf16.mxu0 %v16285_v48  ;;  %12663 = vmatprep.subr.bf16.mxu1 %v16288_v62  ;;  %v16327_v40 = vld [vmem:[#allocation17 + $0xde4] ss:$16 sps:$4 sm:$0xff]   ;;  %v16325_v62 = vld [vmem:[#allocation17 + $0xde0] ss:$16 sps:$4 sm:$0xff]  }
 0xb40   : > { %v9204_v41 = vpop.f32.mrf.mxu0  ;;  %v16330_v48 = vld [vmem:[#allocation17 + $0xfe4] ss:$16 sps:$4 sm:$0xff]  }
 0xb41   : > { %v9244_v44 = vadd.f32 %v9243_v28, %v9203_v11  ;;  %v9245_v53 = vpop.f32.mrf.mxu1  ;;  %12623 = vmatpush1.bf16.msra.mxu0 %v16283_v9  ;;  %v16328_v9 = vld [vmem:[#allocation17 + $0xfe0] ss:$16 sps:$4 sm:$0xff]   ;;  %v16333_v27 = vld [vmem:[#allocation17 + $0xdc4] ss:$16 sps:$4 sm:$0xff]  }
 0xb42   : > { %12664 = vmatpush1.bf16.msra.mxu1 %v16286_v50  ;;  %v9205_v56 = vpop.f32.mrf.mxu0  ;;  %12624 = vmatprep.subr.bf16.mxu0 %v16291_v43  ;;  %v16336_v50 = vld [vmem:[#allocation17 + $0xfc4] ss:$16 sps:$4 sm:$0xff]   ;;  %v16331_v43 = vld [vmem:[#allocation17 + $0xdc0] ss:$16 sps:$4 sm:$0xff]  }
 0xb43   : > { %v9263_v55 = vmax.f32 %v9244_v44, 0.0  ;;  %v9246_v61 = vpop.f32.mrf.mxu1  ;;  %12665 = vmatprep.subr.bf16.mxu1 %v16294_v46  ;;  %v16334_v11 = vld [vmem:[#allocation17 + $0xfc0] ss:$16 sps:$4 sm:$0xff]   ;;  %v16339_v28 = vld [vmem:[#allocation17 + $0xda4] ss:$16 sps:$4 sm:$0xff]  }
 0xb44   : > { %v16342_v46 = vld [vmem:[#allocation17 + $0xfa4] ss:$16 sps:$4 sm:$0xff]   ;;  %v16337_v41 = vld [vmem:[#allocation17 + $0xda0] ss:$16 sps:$4 sm:$0xff]  }
 0xb45   : > { %v18082_v15 = vpack.c.bf16 %v9263_v55, %v9263_v55  ;;  %12625 = vmatpush1.bf16.msra.mxu0 %v16289_v0  ;;  %v16340_v44 = vld [vmem:[#allocation17 + $0xfa0] ss:$16 sps:$4 sm:$0xff]   ;;  %v16345_v53 = vld [vmem:[#allocation17 + $0xd84] ss:$16 sps:$4 sm:$0xff]  }
 0xb46   : > { %12666 = vmatpush1.bf16.msra.mxu1 %v16292_v58  ;;  %12626 = vmatprep.subr.bf16.mxu0 %v16297_v35  ;;  %v16348_v0 = vld [vmem:[#allocation17 + $0xf84] ss:$16 sps:$4 sm:$0xff]   ;;  %v16343_v56 = vld [vmem:[#allocation17 + $0xd80] ss:$16 sps:$4 sm:$0xff]  }
 0xb47   : > { %12693 = vmatprep.mubr.bf16.mxu1 %v18082_v15  ;;  %12667 = vmatprep.subr.bf16.mxu1 %v16300_v63  ;;  %v16346_v58 = vld [vmem:[#allocation17 + $0xf80] ss:$16 sps:$4 sm:$0xff]   ;;  %v16351_v35 = vld [vmem:[#allocation17 + $0xd64] ss:$16 sps:$4 sm:$0xff]  }
 0xb48   : > { %v16354_v55 = vld [vmem:[#allocation17 + $0xf64] ss:$16 sps:$4 sm:$0xff]   ;;  %v16349_v61 = vld [vmem:[#allocation17 + $0xd60] ss:$16 sps:$4 sm:$0xff]  }
 0xb49   : > { %12627 = vmatpush1.bf16.msra.mxu0 %v16295_v1  ;;  %v16352_v63 = vld [vmem:[#allocation17 + $0xf60] ss:$16 sps:$4 sm:$0xff]   ;;  %v16357_v1 = vld [vmem:[#allocation17 + $0xd44] ss:$16 sps:$4 sm:$0xff]  }
 0xb4a   : > { %12668 = vmatpush1.bf16.msra.mxu1 %v16298_v2  ;;  %12628 = vmatprep.subr.bf16.mxu0 %v16303_v3  ;;  %v16799_v2 = vld [vmem:[#allocation16 + $0x8] sm:$0xff] }
 0xb4b   : > { %12669 = vmatprep.subr.bf16.mxu1 %v16306_v14  ;;  %v6011_v3 = vrot.slane %v16799_v2, %v17677_v5  ;;  %v16360_v14 = vld [vmem:[#allocation17 + $0xf44] ss:$16 sps:$4 sm:$0xff]   ;;  %v16385_v2 = vld [vmem:[#allocation17 + $0xa8] ss:$16 sps:$4 sm:$0xff]  }
 0xb4d   : > { %12629 = vmatpush1.bf16.msra.mxu0 %v16301_v22  ;;  %v16355_v22 = vld [vmem:[#allocation17 + $0xd40] ss:$16 sps:$4 sm:$0xff]  }
 0xb4e   : > { %12670 = vmatpush1.bf16.msra.mxu1 %v16304_v7  ;;  %12630 = vmatprep.subr.bf16.mxu0 %v16309_v10  ;;  %v16358_v7 = vld [vmem:[#allocation17 + $0xf40] ss:$16 sps:$4 sm:$0xff]   ;;  %v16363_v10 = vld [vmem:[#allocation17 + $0xd24] ss:$16 sps:$4 sm:$0xff]  }
 0xb4f   : > { %12671 = vmatprep.subr.bf16.mxu1 %v16312_v20  ;;  %v9201_v20 = vadd.f32 %v18075_v37, %v6011_v3  ;;  %v9792_v37 = vld [vmem:[#allocation19] sm:$0xf]  ;;  %v16388_v3 = vld [vmem:[#allocation17 + $0x2a8] ss:$16 sps:$4 sm:$0xff]  }
 0xb51   : > { %12631 = vmatpush1.bf16.msra.mxu0 %v16307_v16  ;;  %v16366_v16 = vld [vmem:[#allocation17 + $0xf24] ss:$16 sps:$4 sm:$0xff]   ;;  %v9242_v5 = vadd.f32 %v18078_v34, %v9201_v20  ;;  %v16376_v34 = vld [vmem:[#allocation17 + $0x2e8] ss:$16 sps:$4 sm:$0xff]   ;;  %v16399_v20 = vld [vmem:[#allocation17 + $0x6c] ss:$16 sps:$4 sm:$0xff]  }
 0xb52   : > { %12672 = vmatpush1.bf16.msra.mxu1 %v16310_v32  ;;  %12632 = vmatprep.subr.bf16.mxu0 %v16315_v12  ;;  %v16361_v32 = vld [vmem:[#allocation17 + $0xd20] ss:$16 sps:$4 sm:$0xff]  }
 0xb53   : > { %12673 = vmatprep.subr.bf16.mxu1 %v16318_v17  ;;  %v16364_v12 = vld [vmem:[#allocation17 + $0xf20] ss:$16 sps:$4 sm:$0xff]   ;;  %v16369_v17 = vld [vmem:[#allocation17 + $0xd04] ss:$16 sps:$4 sm:$0xff]  }
 0xb55   : > { %12633 = vmatpush1.bf16.msra.mxu0 %v16313_v60  ;;  %v16372_v60 = vld [vmem:[#allocation17 + $0xf04] ss:$16 sps:$4 sm:$0xff]  }
 0xb56   : > { %12674 = vmatpush1.bf16.msra.mxu1 %v16316_v36  ;;  %12634 = vmatprep.subr.bf16.mxu0 %v16321_v47  ;;  %v16367_v36 = vld [vmem:[#allocation17 + $0xd00] ss:$16 sps:$4 sm:$0xff]  }
 0xb57   : > { %12675 = vmatprep.subr.bf16.mxu1 %v16324_v38  ;;  %v16370_v47 = vld [vmem:[#allocation17 + $0xf00] ss:$16 sps:$4 sm:$0xff]   ;;  %v9260_v38 = vmax.f32 %v18056_v13, 0.0  ;;  %v9801_v13 = vrot.slane %v9792_v37, %v17604_v26 }
 0xb59   : > { %12635 = vmatpush1.bf16.msra.mxu0 %v16319_v6  ;;  %v16375_v6 = vld [vmem:[#allocation17 + $0xec] ss:$16 sps:$4 sm:$0xff]  }
 0xb5a   : > { %12676 = vmatpush1.bf16.msra.mxu1 %v16322_v45  ;;  %12636 = vmatprep.subr.bf16.mxu0 %v16327_v40  ;;  %v9262_v45 = vmax.f32 %v9242_v5, 0.0  ;;  %v16378_v40 = vld [vmem:[#allocation17 + $0x2ec] ss:$16 sps:$4 sm:$0xff]  }
 0xb5b   : > { %12677 = vmatprep.subr.bf16.mxu1 %v16330_v48  ;;  %v9797_v48 = vrot.slane %v9792_v37, %v17601_v25  ;;  %v16408_v5 = vld [vmem:[#allocation17 + $0x24c] ss:$16 sps:$4 sm:$0xff]   ;;  %v16409_v37 = vld [vmem:[#allocation17 + $0x28] ss:$16 sps:$4 sm:$0xff]  }
 0xb5d   : > { %12637 = vmatpush2.bf16.msra.mxu0 %v16325_v62  ;;  %v16373_v62 = vld [vmem:[#allocation17 + $0xe8] ss:$16 sps:$4 sm:$0xff]  }
 0xb5e   : > { %12678 = vmatpush2.bf16.msra.mxu1 %v16328_v9  ;;  %12638 = vmatprep.subr.bf16.mxu0 %v16333_v27  ;;  %v18090_v9 = vpack.c.bf16 %v9260_v38, %v9260_v38  ;;  %v18092_v27 = vpack.c.bf16 %v9262_v45, %v9262_v45  ;;  %v16414_v38 = vld [vmem:[#allocation17 + $0x22c] ss:$16 sps:$4 sm:$0xff]  }
 0xb5f   : > { %12679 = vmatprep.subr.bf16.mxu1 %v16336_v50  ;;  %v16381_v50 = vld [vmem:[#allocation17 + $0xcc] ss:$16 sps:$4 sm:$0xff]  }
 0xb60   : > { %v16417_v45 = vld [vmem:[#allocation17 + $0xc] ss:$16 sps:$4 sm:$0xff]  }
 0xb61   : > { %12639 = vmatpush2.bf16.msra.mxu0 %v16331_v43 }
 0xb62   : > { %12680 = vmatpush2.bf16.msra.mxu1 %v16334_v11  ;;  %12640 = vmatprep.subr.bf16.mxu0 %v16339_v28  ;;  %v16384_v11 = vld [vmem:[#allocation17 + $0x2cc] ss:$16 sps:$4 sm:$0xff]  }
 0xb63   : > { %12681 = vmatprep.subr.bf16.mxu1 %v16342_v46 }
 0xb65   : > { %12641 = vmatpush2.bf16.msra.mxu0 %v16337_v41  ;;  %v16379_v41 = vld [vmem:[#allocation17 + $0xc8] ss:$16 sps:$4 sm:$0xff]  }
 0xb66   : > { %12682 = vmatpush2.bf16.msra.mxu1 %v16340_v44  ;;  %12642 = vmatprep.subr.bf16.mxu0 %v16345_v53  ;;  %v16382_v53 = vld [vmem:[#allocation17 + $0x2c8] ss:$16 sps:$4 sm:$0xff]  }
 0xb67   : > { %12683 = vmatprep.subr.bf16.mxu1 %v16348_v0  ;;  %v16387_v0 = vld [vmem:[#allocation17 + $0xac] ss:$16 sps:$4 sm:$0xff]  }
 0xb69   : > { %12643 = vmatpush2.bf16.msra.mxu0 %v16343_v56 }
 0xb6a   : > { %12684 = vmatpush2.bf16.msra.mxu1 %v16346_v58  ;;  %12644 = vmatprep.subr.bf16.mxu0 %v16351_v35 }
 0xb6b   : > { %12685 = vmatprep.subr.bf16.mxu1 %v16354_v55  ;;  %v16390_v55 = vld [vmem:[#allocation17 + $0x2ac] ss:$16 sps:$4 sm:$0xff]  }
 0xb6d   : > { %12645 = vmatpush2.bf16.msra.mxu0 %v16349_v61 }
 0xb6e   : > { %12686 = vmatpush2.bf16.msra.mxu1 %v16352_v63  ;;  %12646 = vmatprep.subr.bf16.mxu0 %v16357_v1 }
 0xb6f   : > { %12687 = vmatprep.subr.bf16.mxu1 %v16360_v14  ;;  %v16393_v14 = vld [vmem:[#allocation17 + $0x8c] ss:$16 sps:$4 sm:$0xff]  }
 0xb71   : > { %12647 = vmatpush2.bf16.msra.mxu0 %v16355_v22 }
 0xb72   : > { %12688 = vmatpush2.bf16.msra.mxu1 %v16358_v7  ;;  %12648 = vmatprep.subr.bf16.mxu0 %v16363_v10  ;;  %v16396_v7 = vld [vmem:[#allocation17 + $0x28c] ss:$16 sps:$4 sm:$0xff]   ;;  %v16394_v10 = vld [vmem:[#allocation17 + $0x288] ss:$16 sps:$4 sm:$0xff]  }
 0xb73   : > { %12689 = vmatprep.subr.bf16.mxu1 %v16366_v16  ;;  %v16402_v16 = vld [vmem:[#allocation17 + $0x26c] ss:$16 sps:$4 sm:$0xff]  }
 0xb75   : > { %12649 = vmatpush2.bf16.msra.mxu0 %v16361_v32  ;;  %v16397_v32 = vld [vmem:[#allocation17 + $0x68] ss:$16 sps:$4 sm:$0xff]  }
 0xb76   : > { %12690 = vmatpush2.bf16.msra.mxu1 %v16364_v12  ;;  %12650 = vmatprep.subr.bf16.mxu0 %v16369_v17  ;;  %v16400_v12 = vld [vmem:[#allocation17 + $0x268] ss:$16 sps:$4 sm:$0xff]   ;;  %v16405_v17 = vld [vmem:[#allocation17 + $0x4c] ss:$16 sps:$4 sm:$0xff]  }
 0xb77   : > { %12691 = vmatprep.subr.bf16.mxu1 %v16372_v60  ;;  %v16403_v60 = vld [vmem:[#allocation17 + $0x48] ss:$16 sps:$4 sm:$0xff]  }
 0xb79   : > { %12651 = vmatpush2.bf16.msra.mxu0 %v16367_v36  ;;  %v16406_v36 = vld [vmem:[#allocation17 + $0x248] ss:$16 sps:$4 sm:$0xff]  }
 0xb7a   : > { %12692 = vmatpush2.bf16.msra.mxu1 %v16370_v47  ;;  %12702 = vmatprep.subr.bf16.mxu0 %v16375_v6  ;;  %v16411_v47 = vld [vmem:[#allocation17 + $0x2c] ss:$16 sps:$4 sm:$0xff]   ;;  %v16412_v6 = vld [vmem:[#allocation17 + $0x228] ss:$16 sps:$4 sm:$0xff]  }
 0xb7b   : > { %12743 = vmatprep.subr.bf16.mxu1 %v16378_v40  ;;  %v16420_v40 = vld [vmem:[#allocation17 + $0x20c] ss:$16 sps:$4 sm:$0xff]  }
 0xb7c   : > { %v12408_v43 = vpop.f32.mrf.mxu0  ;;  %12653 = vmatmul.mubr.bf16.vlgmr.msra.gmra.mxu0 %v18090_v9 }
 0xb7d   : > { %v12409_v28 = vadd.f32 %v12408_v43, %v9797_v48  ;;  %v12449_v46 = vpop.f32.mrf.mxu1  ;;  %12694 = vmatmul.mubr.bf16.vlgmr.msra.gmra.mxu1 %v18092_v27  ;;  %12703 = vmatpush1.bf16.msra.mxu0 %v16373_v62  ;;  %v16415_v48 = vld [vmem:[#allocation17 + $0x8] ss:$16 sps:$4 sm:$0xff]  }
 0xb7e   : > { %12734 = vmatprep.mubr.bf16.mxu0 %v17998_v31  ;;  %12744 = vmatpush1.bf16.msra.mxu1 %v16376_v34  ;;  %v12410_v44 = vpop.f32.mrf.mxu0  ;;  %v16418_v62 = vld [vmem:[#allocation17 + $0x208] ss:$16 sps:$4 sm:$0xff]   ;;  %v16423_v34 = vld [vmem:[#allocation17 + $0x1ec] ss:$16 sps:$4 sm:$0xff]  }
 0xb7f   : > { %v18098_v56 = vadd.f32 %v12449_v46, %v12409_v28  ;;  %12775 = vmatprep.mubr.bf16.mxu1 %v18001_v4  ;;  %v12411_v58 = vadd.f32 %v12410_v44, %v9801_v13  ;;  %v12451_v35 = vpop.f32.mrf.mxu1  ;;  %12704 = vmatprep.subr.bf16.mxu0 %v16381_v50  ;;  %v16391_v4 = vld [vmem:[#allocation17 + $0x88] ss:$16 sps:$4 sm:$0xff]   ;;  %v16426_v13 = vld [vmem:[#allocation17 + $0x3ec] ss:$16 sps:$4 sm:$0xff]  }
 0xb80   : > { %v12412_v61 = vpop.f32.mrf.mxu0  ;;  %12745 = vmatprep.subr.bf16.mxu1 %v16384_v11  ;;  %v16421_v50 = vld [vmem:[#allocation17 + $0x1e8] ss:$16 sps:$4 sm:$0xff]   ;;  %v16429_v11 = vld [vmem:[#allocation17 + $0x1cc] ss:$16 sps:$4 sm:$0xff]  }
 0xb81   : > { %v18101_v63 = vadd.f32 %v12451_v35, %v12411_v58  ;;  %v12453_v1 = vpop.f32.mrf.mxu1  ;;  %12705 = vmatpush1.bf16.msra.mxu0 %v16379_v41  ;;  %v16424_v43 = vld [vmem:[#allocation17 + $0x3e8] ss:$16 sps:$4 sm:$0xff]   ;;  %v16432_v28 = vld [vmem:[#allocation17 + $0x3cc] ss:$16 sps:$4 sm:$0xff]  }
 0xb82   : > { %12746 = vmatpush1.bf16.msra.mxu1 %v16382_v53  ;;  %v12413_v31 = vpop.f32.mrf.mxu0  ;;  %12706 = vmatprep.subr.bf16.mxu0 %v16387_v0  ;;  %v16427_v46 = vld [vmem:[#allocation17 + $0x1c8] ss:$16 sps:$4 sm:$0xff]   ;;  %v16435_v44 = vld [vmem:[#allocation17 + $0x1ac] ss:$16 sps:$4 sm:$0xff]  }
 0xb83   : > { %v12454_v22 = vpop.f32.mrf.mxu1  ;;  %12747 = vmatprep.subr.bf16.mxu1 %v16390_v55  ;;  %v16430_v41 = vld [vmem:[#allocation17 + $0x3c8] ss:$16 sps:$4 sm:$0xff]   ;;  %v16438_v53 = vld [vmem:[#allocation17 + $0x3ac] ss:$16 sps:$4 sm:$0xff]  }
 0xb84   : > { %v16433_v0 = vld [vmem:[#allocation17 + $0x1a8] ss:$16 sps:$4 sm:$0xff]   ;;  %v16441_v35 = vld [vmem:[#allocation17 + $0x18c] ss:$16 sps:$4 sm:$0xff]  }
 0xb85   : > { %12707 = vmatpush1.bf16.msra.mxu0 %v16385_v2  ;;  %v16436_v58 = vld [vmem:[#allocation17 + $0x3a8] ss:$16 sps:$4 sm:$0xff]   ;;  %v16444_v55 = vld [vmem:[#allocation17 + $0x38c] ss:$16 sps:$4 sm:$0xff]  }
 0xb86   : > { %12748 = vmatpush1.bf16.msra.mxu1 %v16388_v3  ;;  %12708 = vmatprep.subr.bf16.mxu0 %v16393_v14  ;;  %v16439_v61 = vld [vmem:[#allocation17 + $0x188] ss:$16 sps:$4 sm:$0xff]   ;;  %v16447_v2 = vld [vmem:[#allocation17 + $0x16c] ss:$16 sps:$4 sm:$0xff]  }
 0xb87   : > { %12749 = vmatprep.subr.bf16.mxu1 %v16396_v7  ;;  %v16442_v1 = vld [vmem:[#allocation17 + $0x388] ss:$16 sps:$4 sm:$0xff]   ;;  %v16450_v31 = vld [vmem:[#allocation17 + $0x36c] ss:$16 sps:$4 sm:$0xff]  }
 0xb88   : > { %v16445_v3 = vld [vmem:[#allocation17 + $0x168] ss:$16 sps:$4 sm:$0xff]   ;;  %v16453_v22 = vld [vmem:[#allocation17 + $0x14c] ss:$16 sps:$4 sm:$0xff]  }
 0xb89   : > { %12709 = vmatpush1.bf16.msra.mxu0 %v16391_v4  ;;  %v16448_v14 = vld [vmem:[#allocation17 + $0x368] ss:$16 sps:$4 sm:$0xff]   ;;  %v16456_v7 = vld [vmem:[#allocation17 + $0x34c] ss:$16 sps:$4 sm:$0xff]  }
 0xb8a   : > { %12750 = vmatpush1.bf16.msra.mxu1 %v16394_v10  ;;  %12710 = vmatprep.subr.bf16.mxu0 %v16399_v20  ;;  %v16451_v4 = vld [vmem:[#allocation17 + $0x148] ss:$16 sps:$4 sm:$0xff]   ;;  %v16459_v20 = vld [vmem:[#allocation17 + $0x12c] ss:$16 sps:$4 sm:$0xff]  }
 0xb8b   : > { %12751 = vmatprep.subr.bf16.mxu1 %v16402_v16  ;;  %v16454_v10 = vld [vmem:[#allocation17 + $0x348] ss:$16 sps:$4 sm:$0xff]   ;;  %v16462_v16 = vld [vmem:[#allocation17 + $0x32c] ss:$16 sps:$4 sm:$0xff]  }
 0xb8d   : > { %12711 = vmatpush1.bf16.msra.mxu0 %v16397_v32  ;;  %v16457_v32 = vld [vmem:[#allocation17 + $0x128] ss:$16 sps:$4 sm:$0xff]  }
 0xb8e   : > { %12752 = vmatpush1.bf16.msra.mxu1 %v16400_v12  ;;  %12712 = vmatprep.subr.bf16.mxu0 %v16405_v17  ;;  %v16460_v12 = vld [vmem:[#allocation17 + $0x328] ss:$16 sps:$4 sm:$0xff]   ;;  %v16465_v17 = vld [vmem:[#allocation17 + $0x10c] ss:$16 sps:$4 sm:$0xff]  }
 0xb8f   : > { %12753 = vmatprep.subr.bf16.mxu1 %v16408_v5  ;;  %v16468_v5 = vld [vmem:[#allocation17 + $0x30c] ss:$16 sps:$4 sm:$0xff]  }
 0xb91   : > { %12713 = vmatpush1.bf16.msra.mxu0 %v16403_v60  ;;  %v16463_v60 = vld [vmem:[#allocation17 + $0x108] ss:$16 sps:$4 sm:$0xff]  }
 0xb92   : > { %12754 = vmatpush1.bf16.msra.mxu1 %v16406_v36  ;;  %12714 = vmatprep.subr.bf16.mxu0 %v16411_v47  ;;  %v16466_v36 = vld [vmem:[#allocation17 + $0x308] ss:$16 sps:$4 sm:$0xff]   ;;  %v16471_v47 = vld [vmem:[#allocation17 + $0x4ec] ss:$16 sps:$4 sm:$0xff]  }
 0xb93   : > { %12755 = vmatprep.subr.bf16.mxu1 %v16414_v38  ;;  %v16474_v38 = vld [vmem:[#allocation17 + $0x6ec] ss:$16 sps:$4 sm:$0xff]  }
 0xb95   : > { %12715 = vmatpush1.bf16.msra.mxu0 %v16409_v37  ;;  %v16469_v37 = vld [vmem:[#allocation17 + $0x4e8] ss:$16 sps:$4 sm:$0xff]  }
 0xb96   : > { %12756 = vmatpush1.bf16.msra.mxu1 %v16412_v6  ;;  %12716 = vmatprep.subr.bf16.mxu0 %v16417_v45  ;;  %v16472_v6 = vld [vmem:[#allocation17 + $0x6e8] ss:$16 sps:$4 sm:$0xff]   ;;  %v16477_v45 = vld [vmem:[#allocation17 + $0x4cc] ss:$16 sps:$4 sm:$0xff]  }
 0xb97   : > { %12757 = vmatprep.subr.bf16.mxu1 %v16420_v40 }
 0xb99   : > { %12717 = vmatpush1.bf16.msra.mxu0 %v16415_v48  ;;  %v16480_v48 = vld [vmem:[#allocation17 + $0x6cc] ss:$16 sps:$4 sm:$0xff]  }
 0xb9a   : > { %12758 = vmatpush1.bf16.msra.mxu1 %v16418_v62  ;;  %12718 = vmatprep.subr.bf16.mxu0 %v16423_v34 }
 0xb9b   : > { %12759 = vmatprep.subr.bf16.mxu1 %v16426_v13  ;;  %v16475_v13 = vld [vmem:[#allocation17 + $0x4c8] ss:$16 sps:$4 sm:$0xff]  }
 0xb9d   : > { %12719 = vmatpush2.bf16.msra.mxu0 %v16421_v50 }
 0xb9e   : > { %12760 = vmatpush2.bf16.msra.mxu1 %v16424_v43  ;;  %12720 = vmatprep.subr.bf16.mxu0 %v16429_v11  ;;  %v16478_v43 = vld [vmem:[#allocation17 + $0x6c8] ss:$16 sps:$4 sm:$0xff]   ;;  %v16483_v11 = vld [vmem:[#allocation17 + $0x4ac] ss:$16 sps:$4 sm:$0xff]  }
 0xb9f   : > { %12761 = vmatprep.subr.bf16.mxu1 %v16432_v28 }
 0xba1   : > { %12721 = vmatpush2.bf16.msra.mxu0 %v16427_v46 }
 0xba2   : > { %12762 = vmatpush2.bf16.msra.mxu1 %v16430_v41  ;;  %12722 = vmatprep.subr.bf16.mxu0 %v16435_v44 }
 0xba3   : > { %12763 = vmatprep.subr.bf16.mxu1 %v16438_v53 }
 0xba5   : > { %12723 = vmatpush2.bf16.msra.mxu0 %v16433_v0  ;;  %v16484_v0 = vld [vmem:[#allocation17 + $0x6a8] ss:$16 sps:$4 sm:$0xff]  }
 0xba6   : > { %12764 = vmatpush2.bf16.msra.mxu1 %v16436_v58  ;;  %12724 = vmatprep.subr.bf16.mxu0 %v16441_v35  ;;  %v16489_v58 = vld [vmem:[#allocation17 + $0x48c] ss:$16 sps:$4 sm:$0xff]  }
 0xba7   : > { %12765 = vmatprep.subr.bf16.mxu1 %v16444_v55  ;;  %v16490_v55 = vld [vmem:[#allocation17 + $0x688] ss:$16 sps:$4 sm:$0xff]  }
 0xba9   : > { %12725 = vmatpush2.bf16.msra.mxu0 %v16439_v61  ;;  %v16495_v61 = vld [vmem:[#allocation17 + $0x46c] ss:$16 sps:$4 sm:$0xff]  }
 0xbaa   : > { %12766 = vmatpush2.bf16.msra.mxu1 %v16442_v1  ;;  %12726 = vmatprep.subr.bf16.mxu0 %v16447_v2  ;;  %v16498_v1 = vld [vmem:[#allocation17 + $0x66c] ss:$16 sps:$4 sm:$0xff]   ;;  %v16493_v2 = vld [vmem:[#allocation17 + $0x468] ss:$16 sps:$4 sm:$0xff]  }
 0xbab   : > { %12767 = vmatprep.subr.bf16.mxu1 %v16450_v31  ;;  %v16496_v31 = vld [vmem:[#allocation17 + $0x668] ss:$16 sps:$4 sm:$0xff]  }
 0xbad   : > { %12727 = vmatpush2.bf16.msra.mxu0 %v16445_v3  ;;  %v16501_v3 = vld [vmem:[#allocation17 + $0x44c] ss:$16 sps:$4 sm:$0xff]  }
 0xbae   : > { %12768 = vmatpush2.bf16.msra.mxu1 %v16448_v14  ;;  %12728 = vmatprep.subr.bf16.mxu0 %v16453_v22  ;;  %v16504_v14 = vld [vmem:[#allocation17 + $0x64c] ss:$16 sps:$4 sm:$0xff]   ;;  %v16499_v22 = vld [vmem:[#allocation17 + $0x448] ss:$16 sps:$4 sm:$0xff]  }
 0xbaf   : > { %12769 = vmatprep.subr.bf16.mxu1 %v16456_v7  ;;  %v16502_v7 = vld [vmem:[#allocation17 + $0x648] ss:$16 sps:$4 sm:$0xff]  }
 0xbb1   : > { %12729 = vmatpush2.bf16.msra.mxu0 %v16451_v4  ;;  %v16507_v4 = vld [vmem:[#allocation17 + $0x42c] ss:$16 sps:$4 sm:$0xff]  }
 0xbb2   : > { %12770 = vmatpush2.bf16.msra.mxu1 %v16454_v10  ;;  %12730 = vmatprep.subr.bf16.mxu0 %v16459_v20  ;;  %v16510_v10 = vld [vmem:[#allocation17 + $0x62c] ss:$16 sps:$4 sm:$0xff]   ;;  %v16505_v20 = vld [vmem:[#allocation17 + $0x428] ss:$16 sps:$4 sm:$0xff]  }
 0xbb3   : > { %12771 = vmatprep.subr.bf16.mxu1 %v16462_v16  ;;  %v16508_v16 = vld [vmem:[#allocation17 + $0x628] ss:$16 sps:$4 sm:$0xff]  }
 0xbb5   : > { %12731 = vmatpush2.bf16.msra.mxu0 %v16457_v32  ;;  %v16513_v32 = vld [vmem:[#allocation17 + $0x40c] ss:$16 sps:$4 sm:$0xff]  }
 0xbb6   : > { %12772 = vmatpush2.bf16.msra.mxu1 %v16460_v12  ;;  %12732 = vmatprep.subr.bf16.mxu0 %v16465_v17  ;;  %v16516_v12 = vld [vmem:[#allocation17 + $0x60c] ss:$16 sps:$4 sm:$0xff]   ;;  %v16511_v17 = vld [vmem:[#allocation17 + $0x408] ss:$16 sps:$4 sm:$0xff]  }
 0xbb7   : > { %12773 = vmatprep.subr.bf16.mxu1 %v16468_v5  ;;  %v16514_v5 = vld [vmem:[#allocation17 + $0x608] ss:$16 sps:$4 sm:$0xff]  }
 0xbb9   : > { %12733 = vmatpush2.bf16.msra.mxu0 %v16463_v60  ;;  %v16519_v60 = vld [vmem:[#allocation17 + $0x5ec] ss:$16 sps:$4 sm:$0xff]  }
 0xbba   : > { %12774 = vmatpush2.bf16.msra.mxu1 %v16466_v36  ;;  %12784 = vmatprep.subr.bf16.mxu0 %v16471_v47  ;;  %v16522_v36 = vld [vmem:[#allocation17 + $0x7ec] ss:$16 sps:$4 sm:$0xff]   ;;  %v16517_v47 = vld [vmem:[#allocation17 + $0x5e8] ss:$16 sps:$4 sm:$0xff]  }
 0xbbb   : > { %12825 = vmatprep.subr.bf16.mxu1 %v16474_v38  ;;  %v16520_v38 = vld [vmem:[#allocation17 + $0x7e8] ss:$16 sps:$4 sm:$0xff]  }
 0xbbc   : > { %v12490_v40 = vpop.f32.mrf.mxu0  ;;  %12735 = vmatmul.mubr.bf16.vlgmr.msra.gmra.mxu0 %v18016_v24 }
 0xbbd   : > { %v12491_v62 = vadd.f32 %v12490_v40, %v18098_v56  ;;  %v12531_v34 = vpop.f32.mrf.mxu1  ;;  %12776 = vmatmul.mubr.bf16.vlgmr.msra.gmra.mxu1 %v18018_v19  ;;  %12785 = vmatpush1.bf16.msra.mxu0 %v16469_v37  ;;  %v16486_v56 = vld [vmem:[#allocation17 + $0x6ac] ss:$16 sps:$4 sm:$0xff]   ;;  %v16526_v40 = vld [vmem:[#allocation17 + $0x7c8] ss:$16 sps:$4 sm:$0xff]  }
 0xbbe   : > { %12816 = vmatprep.mubr.bf16.mxu0 %v18020_v42  ;;  %12826 = vmatpush1.bf16.msra.mxu1 %v16472_v6  ;;  %v12492_v50 = vpop.f32.mrf.mxu0  ;;  %v16481_v42 = vld [vmem:[#allocation17 + $0x4a8] ss:$16 sps:$4 sm:$0xff]   ;;  %v16525_v37 = vld [vmem:[#allocation17 + $0x5cc] ss:$16 sps:$4 sm:$0xff]  }
 0xbbf   : > { %v18107_v28 = vadd.f32 %v12531_v34, %v12491_v62  ;;  %12857 = vmatprep.mubr.bf16.mxu1 %v18023_v57  ;;  %v12493_v24 = vadd.f32 %v12492_v50, %v18101_v63  ;;  %v12533_v46 = vpop.f32.mrf.mxu1  ;;  %12786 = vmatprep.subr.bf16.mxu0 %v16477_v45  ;;  %v16492_v57 = vld [vmem:[#allocation17 + $0x68c] ss:$16 sps:$4 sm:$0xff]   ;;  %v16487_v63 = vld [vmem:[#allocation17 + $0x488] ss:$16 sps:$4 sm:$0xff]  }
 0xbc0   : > { %v12494_v41 = vpop.f32.mrf.mxu0  ;;  %12827 = vmatprep.subr.bf16.mxu1 %v16480_v48  ;;  %v16528_v6 = vld [vmem:[#allocation17 + $0x7cc] ss:$16 sps:$4 sm:$0xff]   ;;  %v16523_v45 = vld [vmem:[#allocation17 + $0x5c8] ss:$16 sps:$4 sm:$0xff]  }
 0xbc1   : > { %v18111_v19 = vadd.f32 %v12533_v46, %v12493_v24  ;;  %v12535_v44 = vpop.f32.mrf.mxu1  ;;  %12787 = vmatpush1.bf16.msra.mxu0 %v16475_v13  ;;  %v16531_v48 = vld [vmem:[#allocation17 + $0x5ac] ss:$16 sps:$4 sm:$0xff]   ;;  %v16529_v34 = vld [vmem:[#allocation17 + $0x5a8] ss:$16 sps:$4 sm:$0xff]  }
 0xbc2   : > { %12828 = vmatpush1.bf16.msra.mxu1 %v16478_v43  ;;  %v12495_v53 = vpop.f32.mrf.mxu0  ;;  %12788 = vmatprep.subr.bf16.mxu0 %v16483_v11  ;;  %v16534_v62 = vld [vmem:[#allocation17 + $0x7ac] ss:$16 sps:$4 sm:$0xff]   ;;  %v16532_v13 = vld [vmem:[#allocation17 + $0x7a8] ss:$16 sps:$4 sm:$0xff]  }
 0xbc3   : > { %v12536_v35 = vpop.f32.mrf.mxu1  ;;  %12829 = vmatprep.subr.bf16.mxu1 %v16486_v56  ;;  %v16537_v50 = vld [vmem:[#allocation17 + $0x58c] ss:$16 sps:$4 sm:$0xff]   ;;  %v16535_v11 = vld [vmem:[#allocation17 + $0x588] ss:$16 sps:$4 sm:$0xff]  }
 0xbc4   : > { %v16540_v43 = vld [vmem:[#allocation17 + $0x78c] ss:$16 sps:$4 sm:$0xff]   ;;  %v16538_v24 = vld [vmem:[#allocation17 + $0x788] ss:$16 sps:$4 sm:$0xff]  }
 0xbc5   : > { %12789 = vmatpush1.bf16.msra.mxu0 %v16481_v42  ;;  %v16543_v46 = vld [vmem:[#allocation17 + $0x56c] ss:$16 sps:$4 sm:$0xff]   ;;  %v16541_v41 = vld [vmem:[#allocation17 + $0x568] ss:$16 sps:$4 sm:$0xff]  }
 0xbc6   : > { %12830 = vmatpush1.bf16.msra.mxu1 %v16484_v0  ;;  %12790 = vmatprep.subr.bf16.mxu0 %v16489_v58  ;;  %v16546_v56 = vld [vmem:[#allocation17 + $0x76c] ss:$16 sps:$4 sm:$0xff]   ;;  %v16544_v44 = vld [vmem:[#allocation17 + $0x768] ss:$16 sps:$4 sm:$0xff]  }
 0xbc7   : > { %12831 = vmatprep.subr.bf16.mxu1 %v16492_v57  ;;  %v16549_v42 = vld [vmem:[#allocation17 + $0x54c] ss:$16 sps:$4 sm:$0xff]   ;;  %v16547_v0 = vld [vmem:[#allocation17 + $0x548] ss:$16 sps:$4 sm:$0xff]  }
 0xbc8   : > { %v16552_v53 = vld [vmem:[#allocation17 + $0x74c] ss:$16 sps:$4 sm:$0xff]   ;;  %v16550_v58 = vld [vmem:[#allocation17 + $0x748] ss:$16 sps:$4 sm:$0xff]  }
 0xbc9   : > { %12791 = vmatpush1.bf16.msra.mxu0 %v16487_v63  ;;  %v16555_v35 = vld [vmem:[#allocation17 + $0x52c] ss:$16 sps:$4 sm:$0xff]   ;;  %v16553_v63 = vld [vmem:[#allocation17 + $0x528] ss:$16 sps:$4 sm:$0xff]  }
 0xbca   : > { %12832 = vmatpush1.bf16.msra.mxu1 %v16490_v55  ;;  %12792 = vmatprep.subr.bf16.mxu0 %v16495_v61  ;;  %v16558_v57 = vld [vmem:[#allocation17 + $0x72c] ss:$16 sps:$4 sm:$0xff]   ;;  %v16556_v55 = vld [vmem:[#allocation17 + $0x728] ss:$16 sps:$4 sm:$0xff]  }
 0xbcb   : > { %12833 = vmatprep.subr.bf16.mxu1 %v16498_v1  ;;  %v16561_v61 = vld [vmem:[#allocation17 + $0x50c] ss:$16 sps:$4 sm:$0xff]  }
 0xbcc   : > { %v16564_v1 = vld [vmem:[#allocation17 + $0x70c] ss:$16 sps:$4 sm:$0xff]  }
 0xbcd   : > { %12793 = vmatpush1.bf16.msra.mxu0 %v16493_v2  ;;  %v16559_v2 = vld [vmem:[#allocation17 + $0x508] ss:$16 sps:$4 sm:$0xff]  }
 0xbce   : > { %12834 = vmatpush1.bf16.msra.mxu1 %v16496_v31  ;;  %12794 = vmatprep.subr.bf16.mxu0 %v16501_v3  ;;  %v16562_v31 = vld [vmem:[#allocation17 + $0x708] ss:$16 sps:$4 sm:$0xff]   ;;  %v16567_v3 = vld [vmem:[#allocation17 + $0x8ec] ss:$16 sps:$4 sm:$0xff]  }
 0xbcf   : > { %12835 = vmatprep.subr.bf16.mxu1 %v16504_v14  ;;  %v16570_v14 = vld [vmem:[#allocation17 + $0xaec] ss:$16 sps:$4 sm:$0xff]  }
 0xbd1   : > { %12795 = vmatpush1.bf16.msra.mxu0 %v16499_v22  ;;  %v16565_v22 = vld [vmem:[#allocation17 + $0x8e8] ss:$16 sps:$4 sm:$0xff]  }
 0xbd2   : > { %12836 = vmatpush1.bf16.msra.mxu1 %v16502_v7  ;;  %12796 = vmatprep.subr.bf16.mxu0 %v16507_v4  ;;  %v16568_v7 = vld [vmem:[#allocation17 + $0xae8] ss:$16 sps:$4 sm:$0xff]   ;;  %v16573_v4 = vld [vmem:[#allocation17 + $0x8cc] ss:$16 sps:$4 sm:$0xff]  }
 0xbd3   : > { %12837 = vmatprep.subr.bf16.mxu1 %v16510_v10 }
 0xbd5   : > { %12797 = vmatpush1.bf16.msra.mxu0 %v16505_v20  ;;  %v16576_v20 = vld [vmem:[#allocation17 + $0xacc] ss:$16 sps:$4 sm:$0xff]  }
 0xbd6   : > { %12838 = vmatpush1.bf16.msra.mxu1 %v16508_v16  ;;  %12798 = vmatprep.subr.bf16.mxu0 %v16513_v32 }
 0xbd7   : > { %12839 = vmatprep.subr.bf16.mxu1 %v16516_v12  ;;  %v16571_v12 = vld [vmem:[#allocation17 + $0x8c8] ss:$16 sps:$4 sm:$0xff]  }
 0xbd9   : > { %12799 = vmatpush1.bf16.msra.mxu0 %v16511_v17 }
 0xbda   : > { %12840 = vmatpush1.bf16.msra.mxu1 %v16514_v5  ;;  %12800 = vmatprep.subr.bf16.mxu0 %v16519_v60  ;;  %v16574_v5 = vld [vmem:[#allocation17 + $0xac8] ss:$16 sps:$4 sm:$0xff]   ;;  %v16579_v60 = vld [vmem:[#allocation17 + $0x8ac] ss:$16 sps:$4 sm:$0xff]  }
 0xbdb   : > { %12841 = vmatprep.subr.bf16.mxu1 %v16522_v36 }
 0xbdd   : > { %12801 = vmatpush2.bf16.msra.mxu0 %v16517_v47 }
 0xbde   : > { %12842 = vmatpush2.bf16.msra.mxu1 %v16520_v38  ;;  %12802 = vmatprep.subr.bf16.mxu0 %v16525_v37 }
 0xbdf   : > { %12843 = vmatprep.subr.bf16.mxu1 %v16528_v6 }
 0xbe1   : > { %12803 = vmatpush2.bf16.msra.mxu0 %v16523_v45  ;;  %v16580_v45 = vld [vmem:[#allocation17 + $0xaa8] ss:$16 sps:$4 sm:$0xff]  }
 0xbe2   : > { %12844 = vmatpush2.bf16.msra.mxu1 %v16526_v40  ;;  %12804 = vmatprep.subr.bf16.mxu0 %v16531_v48  ;;  %v16585_v40 = vld [vmem:[#allocation17 + $0x88c] ss:$16 sps:$4 sm:$0xff]  }
 0xbe3   : > { %12845 = vmatprep.subr.bf16.mxu1 %v16534_v62  ;;  %v16586_v62 = vld [vmem:[#allocation17 + $0xa88] ss:$16 sps:$4 sm:$0xff]  }
 0xbe5   : > { %12805 = vmatpush2.bf16.msra.mxu0 %v16529_v34  ;;  %v16591_v34 = vld [vmem:[#allocation17 + $0x86c] ss:$16 sps:$4 sm:$0xff]  }
 0xbe6   : > { %12846 = vmatpush2.bf16.msra.mxu1 %v16532_v13  ;;  %12806 = vmatprep.subr.bf16.mxu0 %v16537_v50  ;;  %v16594_v13 = vld [vmem:[#allocation17 + $0xa6c] ss:$16 sps:$4 sm:$0xff]   ;;  %v16589_v50 = vld [vmem:[#allocation17 + $0x868] ss:$16 sps:$4 sm:$0xff]  }
 0xbe7   : > { %12847 = vmatprep.subr.bf16.mxu1 %v16540_v43  ;;  %v16592_v43 = vld [vmem:[#allocation17 + $0xa68] ss:$16 sps:$4 sm:$0xff]  }
 0xbe9   : > { %12807 = vmatpush2.bf16.msra.mxu0 %v16535_v11  ;;  %v16597_v11 = vld [vmem:[#allocation17 + $0x84c] ss:$16 sps:$4 sm:$0xff]  }
 0xbea   : > { %12848 = vmatpush2.bf16.msra.mxu1 %v16538_v24  ;;  %12808 = vmatprep.subr.bf16.mxu0 %v16543_v46  ;;  %v16600_v24 = vld [vmem:[#allocation17 + $0xa4c] ss:$16 sps:$4 sm:$0xff]   ;;  %v16595_v46 = vld [vmem:[#allocation17 + $0x848] ss:$16 sps:$4 sm:$0xff]  }
 0xbeb   : > { %12849 = vmatprep.subr.bf16.mxu1 %v16546_v56  ;;  %v16598_v56 = vld [vmem:[#allocation17 + $0xa48] ss:$16 sps:$4 sm:$0xff]  }
 0xbed   : > { %12809 = vmatpush2.bf16.msra.mxu0 %v16541_v41  ;;  %v16603_v41 = vld [vmem:[#allocation17 + $0x82c] ss:$16 sps:$4 sm:$0xff]  }
 0xbee   : > { %12850 = vmatpush2.bf16.msra.mxu1 %v16544_v44  ;;  %12810 = vmatprep.subr.bf16.mxu0 %v16549_v42  ;;  %v16606_v44 = vld [vmem:[#allocation17 + $0xa2c] ss:$16 sps:$4 sm:$0xff]   ;;  %v16601_v42 = vld [vmem:[#allocation17 + $0x828] ss:$16 sps:$4 sm:$0xff]  }
 0xbef   : > { %12851 = vmatprep.subr.bf16.mxu1 %v16552_v53  ;;  %v16604_v53 = vld [vmem:[#allocation17 + $0xa28] ss:$16 sps:$4 sm:$0xff]  }
 0xbf1   : > { %12811 = vmatpush2.bf16.msra.mxu0 %v16547_v0  ;;  %v16609_v0 = vld [vmem:[#allocation17 + $0x80c] ss:$16 sps:$4 sm:$0xff]  }
 0xbf2   : > { %12852 = vmatpush2.bf16.msra.mxu1 %v16550_v58  ;;  %12812 = vmatprep.subr.bf16.mxu0 %v16555_v35  ;;  %v16612_v58 = vld [vmem:[#allocation17 + $0xa0c] ss:$16 sps:$4 sm:$0xff]   ;;  %v16607_v35 = vld [vmem:[#allocation17 + $0x808] ss:$16 sps:$4 sm:$0xff]  }
 0xbf3   : > { %12853 = vmatprep.subr.bf16.mxu1 %v16558_v57  ;;  %v16610_v57 = vld [vmem:[#allocation17 + $0xa08] ss:$16 sps:$4 sm:$0xff]  }
 0xbf5   : > { %12813 = vmatpush2.bf16.msra.mxu0 %v16553_v63  ;;  %v16615_v63 = vld [vmem:[#allocation17 + $0x9ec] ss:$16 sps:$4 sm:$0xff]  }
 0xbf6   : > { %12854 = vmatpush2.bf16.msra.mxu1 %v16556_v55  ;;  %12814 = vmatprep.subr.bf16.mxu0 %v16561_v61  ;;  %v16618_v55 = vld [vmem:[#allocation17 + $0xbec] ss:$16 sps:$4 sm:$0xff]   ;;  %v16613_v61 = vld [vmem:[#allocation17 + $0x9e8] ss:$16 sps:$4 sm:$0xff]  }
 0xbf7   : > { %12855 = vmatprep.subr.bf16.mxu1 %v16564_v1  ;;  %v16616_v1 = vld [vmem:[#allocation17 + $0xbe8] ss:$16 sps:$4 sm:$0xff]  }
 0xbf9   : > { %12815 = vmatpush2.bf16.msra.mxu0 %v16559_v2  ;;  %v16621_v2 = vld [vmem:[#allocation17 + $0x9cc] ss:$16 sps:$4 sm:$0xff]  }
 0xbfa   : > { %12856 = vmatpush2.bf16.msra.mxu1 %v16562_v31  ;;  %12866 = vmatprep.subr.bf16.mxu0 %v16567_v3  ;;  %v16624_v31 = vld [vmem:[#allocation17 + $0xbcc] ss:$16 sps:$4 sm:$0xff]   ;;  %v16619_v3 = vld [vmem:[#allocation17 + $0x9c8] ss:$16 sps:$4 sm:$0xff]  }
 0xbfb   : > { %12907 = vmatprep.subr.bf16.mxu1 %v16570_v14  ;;  %v16622_v14 = vld [vmem:[#allocation17 + $0xbc8] ss:$16 sps:$4 sm:$0xff]  }
 0xbfc   : > { %v12572_v10 = vpop.f32.mrf.mxu0  ;;  %12817 = vmatmul.mubr.bf16.vlgmr.msra.gmra.mxu0 %v18043_v59 }
 0xbfd   : > { %v12573_v16 = vadd.f32 %v12572_v10, %v18107_v28  ;;  %v12613_v32 = vpop.f32.mrf.mxu1  ;;  %12858 = vmatmul.mubr.bf16.vlgmr.msra.gmra.mxu1 %v18045_v29  ;;  %12867 = vmatpush1.bf16.msra.mxu0 %v16565_v22  ;;  %v16582_v28 = vld [vmem:[#allocation17 + $0xaac] ss:$16 sps:$4 sm:$0xff]   ;;  %v16628_v10 = vld [vmem:[#allocation17 + $0xba8] ss:$16 sps:$4 sm:$0xff]  }
 0xbfe   : > { %12898 = vmatprep.mubr.bf16.mxu0 %v18047_v33  ;;  %12908 = vmatpush1.bf16.msra.mxu1 %v16568_v7  ;;  %v12574_v17 = vpop.f32.mrf.mxu0  ;;  %v16577_v33 = vld [vmem:[#allocation17 + $0x8a8] ss:$16 sps:$4 sm:$0xff]   ;;  %v16627_v22 = vld [vmem:[#allocation17 + $0x9ac] ss:$16 sps:$4 sm:$0xff]  }
 0xbff   : > { %v18117_v36 = vadd.f32 %v12613_v32, %v12573_v16  ;;  %12939 = vmatprep.mubr.bf16.mxu1 %v18050_v8  ;;  %v12575_v59 = vadd.f32 %v12574_v17, %v18111_v19  ;;  %v12615_v47 = vpop.f32.mrf.mxu1  ;;  %12868 = vmatprep.subr.bf16.mxu0 %v16573_v4  ;;  %v16588_v8 = vld [vmem:[#allocation17 + $0xa8c] ss:$16 sps:$4 sm:$0xff]   ;;  %v16583_v19 = vld [vmem:[#allocation17 + $0x888] ss:$16 sps:$4 sm:$0xff]  }
 0xc00   : > { %v12576_v38 = vpop.f32.mrf.mxu0  ;;  %12909 = vmatprep.subr.bf16.mxu1 %v16576_v20  ;;  %v16630_v7 = vld [vmem:[#allocation17 + $0xbac] ss:$16 sps:$4 sm:$0xff]   ;;  %v16625_v4 = vld [vmem:[#allocation17 + $0x9a8] ss:$16 sps:$4 sm:$0xff]  }
 0xc01   : > { %v18121_v29 = vadd.f32 %v12615_v47, %v12575_v59  ;;  %v12617_v37 = vpop.f32.mrf.mxu1  ;;  %12869 = vmatpush1.bf16.msra.mxu0 %v16571_v12  ;;  %v16633_v20 = vld [vmem:[#allocation17 + $0x98c] ss:$16 sps:$4 sm:$0xff]   ;;  %v16631_v32 = vld [vmem:[#allocation17 + $0x988] ss:$16 sps:$4 sm:$0xff]  }
 0xc02   : > { %12910 = vmatpush1.bf16.msra.mxu1 %v16574_v5  ;;  %v12577_v6 = vpop.f32.mrf.mxu0  ;;  %12870 = vmatprep.subr.bf16.mxu0 %v16579_v60  ;;  %v16636_v16 = vld [vmem:[#allocation17 + $0xb8c] ss:$16 sps:$4 sm:$0xff]   ;;  %v16634_v12 = vld [vmem:[#allocation17 + $0xb88] ss:$16 sps:$4 sm:$0xff]  }
 0xc03   : > { %v12618_v48 = vpop.f32.mrf.mxu1  ;;  %12911 = vmatprep.subr.bf16.mxu1 %v16582_v28  ;;  %v16639_v17 = vld [vmem:[#allocation17 + $0x96c] ss:$16 sps:$4 sm:$0xff]   ;;  %v16637_v60 = vld [vmem:[#allocation17 + $0x968] ss:$16 sps:$4 sm:$0xff]  }
 0xc04   : > { %v16642_v5 = vld [vmem:[#allocation17 + $0xb6c] ss:$16 sps:$4 sm:$0xff]   ;;  %v16640_v59 = vld [vmem:[#allocation17 + $0xb68] ss:$16 sps:$4 sm:$0xff]  }
 0xc05   : > { %12871 = vmatpush1.bf16.msra.mxu0 %v16577_v33  ;;  %v16645_v47 = vld [vmem:[#allocation17 + $0x94c] ss:$16 sps:$4 sm:$0xff]   ;;  %v16643_v38 = vld [vmem:[#allocation17 + $0x948] ss:$16 sps:$4 sm:$0xff]  }
 0xc06   : > { %12912 = vmatpush1.bf16.msra.mxu1 %v16580_v45  ;;  %12872 = vmatprep.subr.bf16.mxu0 %v16585_v40  ;;  %v16648_v28 = vld [vmem:[#allocation17 + $0xb4c] ss:$16 sps:$4 sm:$0xff]   ;;  %v16646_v37 = vld [vmem:[#allocation17 + $0xb48] ss:$16 sps:$4 sm:$0xff]  }
 0xc07   : > { %12913 = vmatprep.subr.bf16.mxu1 %v16588_v8  ;;  %v16651_v33 = vld [vmem:[#allocation17 + $0x92c] ss:$16 sps:$4 sm:$0xff]   ;;  %v16649_v45 = vld [vmem:[#allocation17 + $0x928] ss:$16 sps:$4 sm:$0xff]  }
 0xc08   : > { %v16654_v6 = vld [vmem:[#allocation17 + $0xb2c] ss:$16 sps:$4 sm:$0xff]   ;;  %v16652_v40 = vld [vmem:[#allocation17 + $0xb28] ss:$16 sps:$4 sm:$0xff]  }
 0xc09   : > { %12873 = vmatpush1.bf16.msra.mxu0 %v16583_v19  ;;  %v16657_v48 = vld [vmem:[#allocation17 + $0x90c] ss:$16 sps:$4 sm:$0xff]   ;;  %v16655_v19 = vld [vmem:[#allocation17 + $0x908] ss:$16 sps:$4 sm:$0xff]  }
 0xc0a   : > { %12914 = vmatpush1.bf16.msra.mxu1 %v16586_v62  ;;  %12874 = vmatprep.subr.bf16.mxu0 %v16591_v34  ;;  %v16660_v8 = vld [vmem:[#allocation17 + $0xb0c] ss:$16 sps:$4 sm:$0xff]   ;;  %v16658_v62 = vld [vmem:[#allocation17 + $0xb08] ss:$16 sps:$4 sm:$0xff]  }
 0xc0b   : > { %12915 = vmatprep.subr.bf16.mxu1 %v16594_v13  ;;  %v16663_v34 = vld [vmem:[#allocation17 + $0xcec] ss:$16 sps:$4 sm:$0xff]  }
 0xc0c   : > { %v16666_v13 = vld [vmem:[#allocation17 + $0xeec] ss:$16 sps:$4 sm:$0xff]  }
 0xc0d   : > { %12875 = vmatpush1.bf16.msra.mxu0 %v16589_v50  ;;  %v16661_v50 = vld [vmem:[#allocation17 + $0xce8] ss:$16 sps:$4 sm:$0xff]  }
 0xc0e   : > { %12916 = vmatpush1.bf16.msra.mxu1 %v16592_v43  ;;  %12876 = vmatprep.subr.bf16.mxu0 %v16597_v11  ;;  %v16664_v43 = vld [vmem:[#allocation17 + $0xee8] ss:$16 sps:$4 sm:$0xff]   ;;  %v16669_v11 = vld [vmem:[#allocation17 + $0xccc] ss:$16 sps:$4 sm:$0xff]  }
 0xc0f   : > { %12917 = vmatprep.subr.bf16.mxu1 %v16600_v24 }
 0xc11   : > { %12877 = vmatpush1.bf16.msra.mxu0 %v16595_v46  ;;  %v16672_v46 = vld [vmem:[#allocation17 + $0xecc] ss:$16 sps:$4 sm:$0xff]  }
 0xc12   : > { %12918 = vmatpush1.bf16.msra.mxu1 %v16598_v56  ;;  %12878 = vmatprep.subr.bf16.mxu0 %v16603_v41 }
 0xc13   : > { %12919 = vmatprep.subr.bf16.mxu1 %v16606_v44  ;;  %v16667_v44 = vld [vmem:[#allocation17 + $0xcc8] ss:$16 sps:$4 sm:$0xff]  }
 0xc15   : > { %12879 = vmatpush1.bf16.msra.mxu0 %v16601_v42 }
 0xc16   : > { %12920 = vmatpush1.bf16.msra.mxu1 %v16604_v53  ;;  %12880 = vmatprep.subr.bf16.mxu0 %v16609_v0  ;;  %v16670_v53 = vld [vmem:[#allocation17 + $0xec8] ss:$16 sps:$4 sm:$0xff]   ;;  %v16675_v0 = vld [vmem:[#allocation17 + $0xcac] ss:$16 sps:$4 sm:$0xff]  }
 0xc17   : > { %12921 = vmatprep.subr.bf16.mxu1 %v16612_v58 }
 0xc19   : > { %12881 = vmatpush1.bf16.msra.mxu0 %v16607_v35 }
 0xc1a   : > { %12922 = vmatpush1.bf16.msra.mxu1 %v16610_v57  ;;  %12882 = vmatprep.subr.bf16.mxu0 %v16615_v63 }
 0xc1b   : > { %12923 = vmatprep.subr.bf16.mxu1 %v16618_v55 }
 0xc1d   : > { %12883 = vmatpush2.bf16.msra.mxu0 %v16613_v61  ;;  %v16676_v61 = vld [vmem:[#allocation17 + $0xea8] ss:$16 sps:$4 sm:$0xff]  }
 0xc1e   : > { %12924 = vmatpush2.bf16.msra.mxu1 %v16616_v1  ;;  %12884 = vmatprep.subr.bf16.mxu0 %v16621_v2  ;;  %v16681_v1 = vld [vmem:[#allocation17 + $0xc8c] ss:$16 sps:$4 sm:$0xff]  }
 0xc1f   : > { %12925 = vmatprep.subr.bf16.mxu1 %v16624_v31  ;;  %v16682_v31 = vld [vmem:[#allocation17 + $0xe88] ss:$16 sps:$4 sm:$0xff]  }
 0xc21   : > { %12885 = vmatpush2.bf16.msra.mxu0 %v16619_v3  ;;  %v16687_v3 = vld [vmem:[#allocation17 + $0xc6c] ss:$16 sps:$4 sm:$0xff]  }
 0xc22   : > { %12926 = vmatpush2.bf16.msra.mxu1 %v16622_v14  ;;  %12886 = vmatprep.subr.bf16.mxu0 %v16627_v22  ;;  %v16690_v14 = vld [vmem:[#allocation17 + $0xe6c] ss:$16 sps:$4 sm:$0xff]   ;;  %v16685_v22 = vld [vmem:[#allocation17 + $0xc68] ss:$16 sps:$4 sm:$0xff]  }
 0xc23   : > { %12927 = vmatprep.subr.bf16.mxu1 %v16630_v7  ;;  %v16688_v7 = vld [vmem:[#allocation17 + $0xe68] ss:$16 sps:$4 sm:$0xff]  }
 0xc25   : > { %12887 = vmatpush2.bf16.msra.mxu0 %v16625_v4  ;;  %v16693_v4 = vld [vmem:[#allocation17 + $0xc4c] ss:$16 sps:$4 sm:$0xff]  }
 0xc26   : > { %12928 = vmatpush2.bf16.msra.mxu1 %v16628_v10  ;;  %12888 = vmatprep.subr.bf16.mxu0 %v16633_v20  ;;  %v16696_v10 = vld [vmem:[#allocation17 + $0xe4c] ss:$16 sps:$4 sm:$0xff]   ;;  %v16691_v20 = vld [vmem:[#allocation17 + $0xc48] ss:$16 sps:$4 sm:$0xff]  }
 0xc27   : > { %12929 = vmatprep.subr.bf16.mxu1 %v16636_v16  ;;  %v16694_v16 = vld [vmem:[#allocation17 + $0xe48] ss:$16 sps:$4 sm:$0xff]  }
 0xc29   : > { %12889 = vmatpush2.bf16.msra.mxu0 %v16631_v32  ;;  %v16699_v32 = vld [vmem:[#allocation17 + $0xc2c] ss:$16 sps:$4 sm:$0xff]  }
 0xc2a   : > { %12930 = vmatpush2.bf16.msra.mxu1 %v16634_v12  ;;  %12890 = vmatprep.subr.bf16.mxu0 %v16639_v17  ;;  %v16702_v12 = vld [vmem:[#allocation17 + $0xe2c] ss:$16 sps:$4 sm:$0xff]   ;;  %v16697_v17 = vld [vmem:[#allocation17 + $0xc28] ss:$16 sps:$4 sm:$0xff]  }
 0xc2b   : > { %12931 = vmatprep.subr.bf16.mxu1 %v16642_v5  ;;  %v16700_v5 = vld [vmem:[#allocation17 + $0xe28] ss:$16 sps:$4 sm:$0xff]  }
 0xc2d   : > { %12891 = vmatpush2.bf16.msra.mxu0 %v16637_v60  ;;  %v16705_v60 = vld [vmem:[#allocation17 + $0xc0c] ss:$16 sps:$4 sm:$0xff]  }
 0xc2e   : > { %12932 = vmatpush2.bf16.msra.mxu1 %v16640_v59  ;;  %12892 = vmatprep.subr.bf16.mxu0 %v16645_v47  ;;  %v16708_v59 = vld [vmem:[#allocation17 + $0xe0c] ss:$16 sps:$4 sm:$0xff]   ;;  %v16703_v47 = vld [vmem:[#allocation17 + $0xc08] ss:$16 sps:$4 sm:$0xff]  }
 0xc2f   : > { %12933 = vmatprep.subr.bf16.mxu1 %v16648_v28  ;;  %v16706_v28 = vld [vmem:[#allocation17 + $0xe08] ss:$16 sps:$4 sm:$0xff]  }
 0xc31   : > { %12893 = vmatpush2.bf16.msra.mxu0 %v16643_v38  ;;  %v16711_v38 = vld [vmem:[#allocation17 + $0xdec] ss:$16 sps:$4 sm:$0xff]  }
 0xc32   : > { %12934 = vmatpush2.bf16.msra.mxu1 %v16646_v37  ;;  %12894 = vmatprep.subr.bf16.mxu0 %v16651_v33  ;;  %v16714_v37 = vld [vmem:[#allocation17 + $0xfec] ss:$16 sps:$4 sm:$0xff]   ;;  %v16709_v33 = vld [vmem:[#allocation17 + $0xde8] ss:$16 sps:$4 sm:$0xff]  }
 0xc33   : > { %12935 = vmatprep.subr.bf16.mxu1 %v16654_v6  ;;  %v16712_v6 = vld [vmem:[#allocation17 + $0xfe8] ss:$16 sps:$4 sm:$0xff]  }
 0xc35   : > { %12895 = vmatpush2.bf16.msra.mxu0 %v16649_v45  ;;  %v16717_v45 = vld [vmem:[#allocation17 + $0xdcc] ss:$16 sps:$4 sm:$0xff]  }
 0xc36   : > { %12936 = vmatpush2.bf16.msra.mxu1 %v16652_v40  ;;  %12896 = vmatprep.subr.bf16.mxu0 %v16657_v48  ;;  %v16720_v40 = vld [vmem:[#allocation17 + $0xfcc] ss:$16 sps:$4 sm:$0xff]   ;;  %v16715_v48 = vld [vmem:[#allocation17 + $0xdc8] ss:$16 sps:$4 sm:$0xff]  }
 0xc37   : > { %12937 = vmatprep.subr.bf16.mxu1 %v16660_v8  ;;  %v16718_v8 = vld [vmem:[#allocation17 + $0xfc8] ss:$16 sps:$4 sm:$0xff]  }
 0xc39   : > { %12897 = vmatpush2.bf16.msra.mxu0 %v16655_v19  ;;  %v16723_v19 = vld [vmem:[#allocation17 + $0xdac] ss:$16 sps:$4 sm:$0xff]  }
 0xc3a   : > { %12938 = vmatpush2.bf16.msra.mxu1 %v16658_v62  ;;  %12948 = vmatprep.subr.bf16.mxu0 %v16663_v34  ;;  %v16726_v62 = vld [vmem:[#allocation17 + $0xfac] ss:$16 sps:$4 sm:$0xff]   ;;  %v16721_v34 = vld [vmem:[#allocation17 + $0xda8] ss:$16 sps:$4 sm:$0xff]  }
 0xc3b   : > { %12989 = vmatprep.subr.bf16.mxu1 %v16666_v13  ;;  %v16724_v13 = vld [vmem:[#allocation17 + $0xfa8] ss:$16 sps:$4 sm:$0xff]  }
 0xc3c   : > { %v12654_v24 = vpop.f32.mrf.mxu0  ;;  %12899 = vmatmul.mubr.bf16.vlgmr.msra.gmra.mxu0 %v18067_v39 }
 0xc3d   : > { %v12655_v56 = vadd.f32 %v12654_v24, %v18117_v36  ;;  %v12695_v41 = vpop.f32.mrf.mxu1  ;;  %12940 = vmatmul.mubr.bf16.vlgmr.msra.gmra.mxu1 %v18069_v30  ;;  %12949 = vmatpush1.bf16.msra.mxu0 %v16661_v50  ;;  %v16678_v36 = vld [vmem:[#allocation17 + $0xeac] ss:$16 sps:$4 sm:$0xff]   ;;  %v16730_v24 = vld [vmem:[#allocation17 + $0xf88] ss:$16 sps:$4 sm:$0xff]  }
 0xc3e   : > { %12980 = vmatprep.mubr.bf16.mxu0 %v18073_v49  ;;  %12990 = vmatpush1.bf16.msra.mxu1 %v16664_v43  ;;  %v12656_v42 = vpop.f32.mrf.mxu0  ;;  %v16673_v49 = vld [vmem:[#allocation17 + $0xca8] ss:$16 sps:$4 sm:$0xff]   ;;  %v16729_v50 = vld [vmem:[#allocation17 + $0xd8c] ss:$16 sps:$4 sm:$0xff]  }
 0xc3f   : > { %v18127_v58 = vadd.f32 %v12695_v41, %v12655_v56  ;;  %13021 = vmatprep.mubr.bf16.mxu1 %v18082_v15  ;;  %v12657_v39 = vadd.f32 %v12656_v42, %v18121_v29  ;;  %v12697_v35 = vpop.f32.mrf.mxu1  ;;  %12950 = vmatprep.subr.bf16.mxu0 %v16669_v11  ;;  %v16684_v15 = vld [vmem:[#allocation17 + $0xe8c] ss:$16 sps:$4 sm:$0xff]   ;;  %v16679_v29 = vld [vmem:[#allocation17 + $0xc88] ss:$16 sps:$4 sm:$0xff]  }
 0xc40   : > { %v12658_v57 = vpop.f32.mrf.mxu0  ;;  %12991 = vmatprep.subr.bf16.mxu1 %v16672_v46  ;;  %v16732_v43 = vld [vmem:[#allocation17 + $0xf8c] ss:$16 sps:$4 sm:$0xff]   ;;  %v16727_v11 = vld [vmem:[#allocation17 + $0xd88] ss:$16 sps:$4 sm:$0xff]  }
 0xc41   : > { %v18131_v30 = vadd.f32 %v12697_v35, %v12657_v39  ;;  %v12699_v63 = vpop.f32.mrf.mxu1  ;;  %12951 = vmatpush1.bf16.msra.mxu0 %v16667_v44  ;;  %v16735_v46 = vld [vmem:[#allocation17 + $0xd6c] ss:$16 sps:$4 sm:$0xff]   ;;  %v16733_v41 = vld [vmem:[#allocation17 + $0xd68] ss:$16 sps:$4 sm:$0xff]  }
 0xc42   : > { %12992 = vmatpush1.bf16.msra.mxu1 %v16670_v53  ;;  %v12659_v55 = vpop.f32.mrf.mxu0  ;;  %12952 = vmatprep.subr.bf16.mxu0 %v16675_v0  ;;  %v16738_v56 = vld [vmem:[#allocation17 + $0xf6c] ss:$16 sps:$4 sm:$0xff]   ;;  %v16736_v44 = vld [vmem:[#allocation17 + $0xf68] ss:$16 sps:$4 sm:$0xff]  }
 0xc43   : > { %v12700_v2 = vpop.f32.mrf.mxu1  ;;  %12993 = vmatprep.subr.bf16.mxu1 %v16678_v36  ;;  %v16741_v42 = vld [vmem:[#allocation17 + $0xd4c] ss:$16 sps:$4 sm:$0xff]   ;;  %v16739_v0 = vld [vmem:[#allocation17 + $0xd48] ss:$16 sps:$4 sm:$0xff]  }
 0xc44   : > { %v16744_v53 = vld [vmem:[#allocation17 + $0xf4c] ss:$16 sps:$4 sm:$0xff]   ;;  %v16742_v39 = vld [vmem:[#allocation17 + $0xf48] ss:$16 sps:$4 sm:$0xff]   ;;  %v16800_v2 = vld [vmem:[#allocation19] sm:$0xf] }
 0xc45   : > { %12953 = vmatpush1.bf16.msra.mxu0 %v16673_v49  ;;  %v16747_v35 = vld [vmem:[#allocation17 + $0xd2c] ss:$16 sps:$4 sm:$0xff]   ;;  %v16745_v57 = vld [vmem:[#allocation17 + $0xd28] ss:$16 sps:$4 sm:$0xff]  }
 0xc46   : > { %12994 = vmatpush1.bf16.msra.mxu1 %v16676_v61  ;;  %12954 = vmatprep.subr.bf16.mxu0 %v16681_v1  ;;  %v16750_v36 = vld [vmem:[#allocation17 + $0xf2c] ss:$16 sps:$4 sm:$0xff]   ;;  %v16748_v63 = vld [vmem:[#allocation17 + $0xf28] ss:$16 sps:$4 sm:$0xff]  }
 0xc47   : > { %12995 = vmatprep.subr.bf16.mxu1 %v16684_v15  ;;  %v16753_v49 = vld [vmem:[#allocation17 + $0xd0c] ss:$16 sps:$4 sm:$0xff]   ;;  %v16751_v61 = vld [vmem:[#allocation17 + $0xd08] ss:$16 sps:$4 sm:$0xff]   ;;  %v9805_v15 = vrot.slane %v16800_v2, %v17619_v51 }
 0xc48   : > { %v16756_v55 = vld [vmem:[#allocation17 + $0xf0c] ss:$16 sps:$4 sm:$0xff]   ;;  %v16754_v1 = vld [vmem:[#allocation17 + $0xf08] ss:$16 sps:$4 sm:$0xff]  }
 0xc49   : > { %12955 = vmatpush1.bf16.msra.mxu0 %v16679_v29  ;;  %v9809_v29 = vrot.slane %v16800_v2, %v17622_v54 }
 0xc4a   : > { %12996 = vmatpush1.bf16.msra.mxu1 %v16682_v31  ;;  %12956 = vmatprep.subr.bf16.mxu0 %v16687_v3 }
 0xc4b   : > { %12997 = vmatprep.subr.bf16.mxu1 %v16690_v14 }
 0xc4d   : > { %12957 = vmatpush1.bf16.msra.mxu0 %v16685_v22 }
 0xc4e   : > { %12998 = vmatpush1.bf16.msra.mxu1 %v16688_v7  ;;  %12958 = vmatprep.subr.bf16.mxu0 %v16693_v4 }
 0xc4f   : > { %12999 = vmatprep.subr.bf16.mxu1 %v16696_v10 }
 0xc51   : > { %12959 = vmatpush1.bf16.msra.mxu0 %v16691_v20 }
 0xc52   : > { %13000 = vmatpush1.bf16.msra.mxu1 %v16694_v16  ;;  %12960 = vmatprep.subr.bf16.mxu0 %v16699_v32 }
 0xc53   : > { %13001 = vmatprep.subr.bf16.mxu1 %v16702_v12 }
 0xc55   : > { %12961 = vmatpush1.bf16.msra.mxu0 %v16697_v17 }
 0xc56   : > { %13002 = vmatpush1.bf16.msra.mxu1 %v16700_v5  ;;  %12962 = vmatprep.subr.bf16.mxu0 %v16705_v60 }
 0xc57   : > { %13003 = vmatprep.subr.bf16.mxu1 %v16708_v59 }
 0xc59   : > { %12963 = vmatpush1.bf16.msra.mxu0 %v16703_v47 }
 0xc5a   : > { %13004 = vmatpush1.bf16.msra.mxu1 %v16706_v28  ;;  %12964 = vmatprep.subr.bf16.mxu0 %v16711_v38 }
 0xc5b   : > { %13005 = vmatprep.subr.bf16.mxu1 %v16714_v37 }
 0xc5d   : > { %12965 = vmatpush2.bf16.msra.mxu0 %v16709_v33 }
 0xc5e   : > { %13006 = vmatpush2.bf16.msra.mxu1 %v16712_v6  ;;  %12966 = vmatprep.subr.bf16.mxu0 %v16717_v45 }
 0xc5f   : > { %13007 = vmatprep.subr.bf16.mxu1 %v16720_v40 }
 0xc61   : > { %12967 = vmatpush2.bf16.msra.mxu0 %v16715_v48 }
 0xc62   : > { %13008 = vmatpush2.bf16.msra.mxu1 %v16718_v8  ;;  %12968 = vmatprep.subr.bf16.mxu0 %v16723_v19 }
 0xc63   : > { %13009 = vmatprep.subr.bf16.mxu1 %v16726_v62 }
 0xc65   : > { %12969 = vmatpush2.bf16.msra.mxu0 %v16721_v34 }
 0xc66   : > { %13010 = vmatpush2.bf16.msra.mxu1 %v16724_v13  ;;  %12970 = vmatprep.subr.bf16.mxu0 %v16729_v50 }
 0xc67   : > { %13011 = vmatprep.subr.bf16.mxu1 %v16732_v43 }
 0xc69   : > { %12971 = vmatpush2.bf16.msra.mxu0 %v16727_v11 }
 0xc6a   : > { %13012 = vmatpush2.bf16.msra.mxu1 %v16730_v24  ;;  %12972 = vmatprep.subr.bf16.mxu0 %v16735_v46 }
 0xc6b   : > { %13013 = vmatprep.subr.bf16.mxu1 %v16738_v56  ;;  %v13031_v56 = vadd.f32 %v18131_v30, %v17904_v52 }
 0xc6d   : > { %12973 = vmatpush2.bf16.msra.mxu0 %v16733_v41 }
 0xc6e   : > { %13014 = vmatpush2.bf16.msra.mxu1 %v16736_v44  ;;  %12974 = vmatprep.subr.bf16.mxu0 %v16741_v42 }
 0xc6f   : > { %13015 = vmatprep.subr.bf16.mxu1 %v16744_v53 }
 0xc71   : > { %12975 = vmatpush2.bf16.msra.mxu0 %v16739_v0  ;;  %v13030_v0 = vadd.f32 %v18127_v58, %v17908_v21 }
 0xc72   : > { %13016 = vmatpush2.bf16.msra.mxu1 %v16742_v39  ;;  %12976 = vmatprep.subr.bf16.mxu0 %v16747_v35 }
 0xc73   : > { %13017 = vmatprep.subr.bf16.mxu1 %v16750_v36 }
 0xc75   : > { %12977 = vmatpush2.bf16.msra.mxu0 %v16745_v57 }
 0xc76   : > { %13018 = vmatpush2.bf16.msra.mxu1 %v16748_v63  ;;  %12978 = vmatprep.subr.bf16.mxu0 %v16753_v49  ;;  %v13036_v63 = vadd.f32 %v13031_v56, %v13030_v0 }
 0xc77   : > { %13019 = vmatprep.subr.bf16.mxu1 %v16756_v55 }
 0xc79   : > { %12979 = vmatpush2.bf16.msra.mxu0 %v16751_v61 }
 0xc7a   : > { %13020 = vmatpush2.bf16.msra.mxu1 %v16754_v1 }
 0xc7c   : > { %v12736_v31 = vpop.f32.mrf.mxu0  ;;  %12981 = vmatmul.mubr.bf16.vlgmr.msra.gmra.mxu0 %v18090_v9 }
 0xc7d   : > { %v12737_v3 = vadd.f32 %v12736_v31, %v9805_v15  ;;  %v12777_v14 = vpop.f32.mrf.mxu1  ;;  %13022 = vmatmul.mubr.bf16.vlgmr.msra.gmra.mxu1 %v18092_v27 }
 0xc7e   : > { %v12738_v22 = vpop.f32.mrf.mxu0 }
 0xc7f   : > { %v12778_v7 = vadd.f32 %v12777_v14, %v12737_v3  ;;  %v12739_v4 = vadd.f32 %v12738_v22, %v9809_v29  ;;  %v12779_v10 = vpop.f32.mrf.mxu1 }
 0xc80   : > { %v12740_v20 = vpop.f32.mrf.mxu0 }
 0xc81   : > { %v12780_v16 = vadd.f32 %v12779_v10, %v12739_v4  ;;  %v12781_v32 = vpop.f32.mrf.mxu1 }
 0xc82   : > { %v12741_v12 = vpop.f32.mrf.mxu0 }
 0xc83   : > { %v12782_v17 = vpop.f32.mrf.mxu1 }
 0xc84   : > { %v13034_v17 = vld [vmem:[#allocation20] sm:$0xf] }
 0xcbc   : > { %v12818_v5 = vpop.f32.mrf.mxu0 }
 0xcbd   : > { %v12819_v60 = vadd.f32 %v12818_v5, %v12778_v7  ;;  %v12859_v59 = vpop.f32.mrf.mxu1  ;;  %v13035_v5 = vld [vmem:[#allocation22] sm:$0xf] }
 0xcbe   : > { %v12820_v47 = vpop.f32.mrf.mxu0 }
 0xcbf   : > { %v12860_v28 = vadd.f32 %v12859_v59, %v12819_v60  ;;  %v12821_v38 = vadd.f32 %v12820_v47, %v12780_v16  ;;  %v12861_v9 = vpop.f32.mrf.mxu1  ;;  %v13066_v60 = vrot.slane %v13034_v17, %v17601_v25  ;;  %v13070_v59 = vrot.slane %v13034_v17, %v17604_v26 }
 0xcc0   : > { %v12822_v37 = vpop.f32.mrf.mxu0  ;;  %v13074_v47 = vrot.slane %v13034_v17, %v17619_v51 }
 0xcc1   : > { %v12862_v33 = vadd.f32 %v12861_v9, %v12821_v38  ;;  %v12863_v6 = vpop.f32.mrf.mxu1  ;;  %v13091_v9 = vrot.slane %v13035_v5, %v17601_v25  ;;  %v13095_v37 = vrot.slane %v13035_v5, %v17604_v26 }
 0xcc2   : > { %v12823_v27 = vpop.f32.mrf.mxu0  ;;  %v13103_v6 = vrot.slane %v13035_v5, %v17622_v54 }
 0xcc3   : > { %v12864_v45 = vpop.f32.mrf.mxu1 }
 0xcfc   : > { %v12900_v40 = vpop.f32.mrf.mxu0 }
 0xcfd   : > { %v12941_v48 = vpop.f32.mrf.mxu1  ;;  %v12901_v43 = vadd.f32 %v12900_v40, %v12860_v28  ;;  %v13078_v28 = vrot.slane %v13034_v17, %v17622_v54 }
 0xcfe   : > { %v12902_v8 = vpop.f32.mrf.mxu0 }
 0xcff   : > { %v12943_v19 = vpop.f32.mrf.mxu1  ;;  %v12903_v11 = vadd.f32 %v12902_v8, %v12862_v33  ;;  %v12942_v24 = vadd.f32 %v12941_v48, %v12901_v43  ;;  %v13099_v33 = vrot.slane %v13035_v5, %v17619_v51 }
 0xd00   : > { %v12904_v62 = vpop.f32.mrf.mxu0 }
 0xd01   : > { %v12945_v34 = vpop.f32.mrf.mxu1  ;;  %v12944_v41 = vadd.f32 %v12943_v19, %v12903_v11 }
 0xd02   : > { %v12905_v13 = vpop.f32.mrf.mxu0 }
 0xd03   : > { %v12946_v50 = vpop.f32.mrf.mxu1 }
 0xd3c   : > { %v12982_v46 = vpop.f32.mrf.mxu0 }
 0xd3d   : > { %v12983_v44 = vadd.f32 %v12982_v46, %v12942_v24  ;;  %v13023_v42 = vpop.f32.mrf.mxu1 }
 0xd3e   : > { %v12984_v53 = vpop.f32.mrf.mxu0 }
 0xd3f   : > { %v13024_v39 = vadd.f32 %v13023_v42, %v12983_v44  ;;  %v12985_v35 = vadd.f32 %v12984_v53, %v12944_v41  ;;  %v13025_v36 = vpop.f32.mrf.mxu1 }
 0xd40   : > { %v12986_v57 = vpop.f32.mrf.mxu0 }
 0xd41   : > { %v13032_v49 = vadd.f32 %v13024_v39, %v17910_v23  ;;  %v13026_v55 = vadd.f32 %v13025_v36, %v12985_v35  ;;  %v13027_v61 = vpop.f32.mrf.mxu1 }
 0xd42   : > { %v12987_v1 = vpop.f32.mrf.mxu0 }
 0xd43   : > { %v13033_v2 = vadd.f32 %v13026_v55, %v17906_v18  ;;  %v13028_v52 = vpop.f32.mrf.mxu1  ;;  %v13037_v30 = vadd.f32 %v13036_v63, %v13032_v49 }
 0xd45   : > { %v13038_v15 = vadd.f32 %v13037_v30, %v13033_v2 }
 0xd47   : > { %13039 = vadd.xlane.f32.xlu0 %v13038_v15 }
 0xdd0   : > { %v13040_v29 = vpop.xlane.xlu0 %13039 }
 0xdd1   : > { %v13041_v31 = vmul.f32 0.001953125, %v13040_v29 }
 0xdd3   : > { %v13042_v3 = vsub.f32 %v13030_v0, %v13041_v31  ;;  %v13043_v21 = vsub.f32 %v13031_v56, %v13041_v31  ;;  %v13044_v58 = vsub.f32 %v13032_v49, %v13041_v31  ;;  %v13045_v14 = vsub.f32 %v13033_v2, %v13041_v31 }
 0xdd5   : > { %v13046_v22 = vmul.f32 %v13042_v3, %v13042_v3  ;;  %v13047_v7 = vmul.f32 %v13043_v21, %v13043_v21  ;;  %v13048_v4 = vmul.f32 %v13044_v58, %v13044_v58  ;;  %v13049_v23 = vmul.f32 %v13045_v14, %v13045_v14 }
 0xdd7   : > { %v13050_v10 = vadd.f32 %v13047_v7, %v13046_v22 }
 0xdd9   : > { %v13051_v20 = vadd.f32 %v13050_v10, %v13048_v4 }
 0xddb   : > { %v13052_v16 = vadd.f32 %v13051_v20, %v13049_v23 }
 0xddd   : > { %13053 = vadd.xlane.f32.xlu0 %v13052_v16 }
 0xe66   : > { %v13054_v32 = vpop.xlane.xlu0 %13053 }
 0xe67   : > { %v13055_v18 = vmul.f32 0.001953125, %v13054_v32 }
 0xe69   : > { %v13056_v12 = vadd.f32 1e-05, %v13055_v18 }
 0xe6b   : > { %16791 = vrsqrt.f32 %v13056_v12 }
 0xe78   : > { %v16792_v38 = vpop.eup %16791 }
 0xe79   : > { %v13058_v27 = vmul.f32 %v16792_v38, %v13042_v3  ;;  %v13059_v45 = vmul.f32 %v16792_v38, %v13043_v21  ;;  %v13060_v40 = vmul.f32 %v16792_v38, %v13044_v58  ;;  %v13061_v48 = vmul.f32 %v16792_v38, %v13045_v14 }
 0xe7b   : > { %v13083_v8 = vmul.f32 %v13066_v60, %v13058_v27  ;;  %v13084_v19 = vmul.f32 %v13070_v59, %v13059_v45  ;;  %v13085_v62 = vmul.f32 %v13074_v47, %v13060_v40  ;;  %v13086_v25 = vmul.f32 %v13078_v28, %v13061_v48 }
 0xe7d   : > { %v13108_v34 = vadd.f32 %v13091_v9, %v13083_v8  ;;  %v13109_v26 = vadd.f32 %v13095_v37, %v13084_v19  ;;  %v13110_v13 = vadd.f32 %v13099_v33, %v13085_v62  ;;  %v13111_v51 = vadd.f32 %v13103_v6, %v13086_v25 }
 0xe7f   : > { %13112 = vst [vmem:[%s614_s4] sm:$0xff] %v13108_v34  ;;  %13113 = vst [vmem:[%s614_s4 + $0x8] sm:$0xff] %v13109_v26 }
 0xe80   : > { %13114 = vst [vmem:[%s614_s4 + $0x10] sm:$0xff] %v13110_v13  ;;  %13115 = vst [vmem:[%s614_s4 + $0x18] sm:$0xff] %v13111_v51 }
 0xe81   : > { %17154 = shalt.err (!%p17151_p4)
}
 0xe82   : > { %s17155_s13 = scalar_lea.hbm %s18157_s22, 512  ;;  %s17159_s7 = scalar_lea.hbm %s18261_s24, 1024 }
 0xe83   : > { %p17156_p10 = scmp.ne.s32.totalorder %s18157_s22, %s17155_s13  ;;  %p17160_p12 = scmp.lt.s32.totalorder %s18157_s22, %s18261_s24 }
 0xe84   : > { %p17161_p5 = scmp.lt.s32.totalorder %s17159_s7, %s17155_s13 }
 0xe85   : > { %p17157_p9 = pnand %p17156_p10, %p18262_p6 }
 0xe86   : > { %p17162_p3 = por %p17161_p5, %p17160_p12 }
 0xe87   : > { %p17158_p11 = pneg %p17157_p9 }
 0xe89   : > { %p17163_p2 = pnand %p17162_p3, %p17158_p11 }
 0xe8b   : > { %17166 = shalt.err (!%p17163_p2)
}
 0xe8c   : > { %15085 = dma.vmem_to_hbm [thread:$0]  (%p18262_p6), %s18159_s15, 512, %s18157_s22, %s13117_s14  }
 0xe8d PF: > { %s13143_s4 = sand.u32 1, %s17217_s25   ;;  %p18263_p13 = scmp.ne.s32.totalorder %s18245_s19, 0 }
 0xe8e   : > { %p18264_p0 = scmp.ge.s32.totalorder %s17229_s28, 2  ;;  %s13144_s16 = scalar_lea.sflag [#allocation4], %s13143_s4 }
 0xe90   : > { %p15129_p1 = pnand %p18264_p0, %p18263_p13 }
 0xe92   : > { %p15130_p7 = pneg %p15129_p1 }
 0xe94   : > { %17212 = dma.done.wait (%p15130_p7), %s13144_s16, 512  }
 0xe95   : > { %17214 = vsyncadd (%p15130_p7), %s13144_s16, 4294966784  ;;  %p32_p8 = scmp.ge.s32.totalorder %s17471_s18, 4   ;;  %s18265_s25 = smov %s17221_s26 }
 0xe96   : > { %s18266_s26 = smov %s17225_s27  ;;  %s18267_s27 = smov %s17482_s29 }
 0xe97   : > { %s18268_s28 = smov %s17471_s18  ;;  %34 = sbr.rel (!%p32_p8) target bundleno = 20 (0x14), region = 165 }
 0xe9c   :  { %13149 = vsyncpa [#allocation3], 1 }
 0xe9d   :  { %13151 = vsyncpa [#allocation3 + $0x1], 1 }
 0xe9e   :  { %13152 = vsyncpa [#allocation6], 1 }
 0xe9f   :  { %13153 = vsyncpa [#allocation9], 1 }
 0xea0   :  { %13154 = vsyncpa [#allocation12], 1 }
 0xea1   :  { %13155 = vsyncpa [#allocation15], 1 }
 0xea2   :  { %13156 = vsyncpa [#allocation18], 1 }
 0xea3   :  { %13157 = vsyncpa [#allocation21], 1 }
 0xea4   :  { %13158 = vsyncpa [#allocation4], 1 }
 0xea5   :  { %13160 = vsyncpa [#allocation4 + $0x1], 1 }

</bundles_post_ra>
